<compile_context>
chip_gen: v7x
topology: tpu7x:2x2x1
jax: 0.10.0
libtpu: 0.0.40
codegen_flags: <defaults>
</compile_context>

<pallas_src>
import jax
import jax.numpy as jnp
from jax import lax
from jax.experimental import pallas as pl
from jax.experimental.pallas import tpu as pltpu

T = 20                                  # in_steps (fixed by the corrcoef reshape)
NUM_HEADS = 28                          # num_heads passed to the attention layer
HEAD_DIM = 10                           # forced by Linear(10, 1) in AttentionLayer3
ATTN_DIM = NUM_HEADS * HEAD_DIM         # 280
HIDDEN_DIM = ATTN_DIM - T               # 260


# ------------------------------------------------------------- fused kernel --
def fused_kernel(x_ref, a_ref, gx_ref, ga_ref, wx_ref, wa_ref, b_ref, out_ref):
    # x_ref : (Bt, T, 260)   a_ref : (Bt, T, K)
    # gx_ref: (260, 26)  ga_ref: (20, 2)     one-hot head-grouping matrices
    # wx_ref: (26, O)    wa_ref: (2, O)      rows of output_proj.weight.T
    # b_ref : (1, O)     out_ref: (Bt, O)
    bt = x_ref.shape[0]
    scale = 1.0 / (float(HEAD_DIM) ** 0.5)

    def corr(m):
        # np.corrcoef over rows: center + rsqrt-normalize rows, then the Gram
        # matrix IS the correlation matrix (clipped to [-1, 1] like numpy).
        mc = m - jnp.mean(m, axis=-1, keepdims=True)
        inv = lax.rsqrt(jnp.sum(mc * mc, axis=-1, keepdims=True))
        mn = mc * inv
        c = lax.dot_general(mn, mn, (((2,), (2,)), ((0,), (0,))),
                            preferred_element_type=jnp.float32)   # 'btd,bsd->bts'
        return jnp.clip(c, -1.0, 1.0)

    x = x_ref[...]
    corr_diff = corr(x) - corr(a_ref[...])                         # (Bt, T, T)

    def head_part(h, g_ref):
        # h: (Bt, T, Dp) lane-dense; heads are contiguous groups of 10 columns.
        d_part, h_part = g_ref.shape
        ksum = jnp.sum(h, axis=1, keepdims=True)                   # key.T.sum(T)  (Bt,1,Dp)
        # tanh output is bounded in [-1, 1], so exp without max-subtraction is
        # numerically safe and equals torch.softmax exactly (up to rounding).
        p = jnp.exp(jnp.tanh(h * (ksum * scale)))                  # softmax numerator
        q = p * h                                                  # numerator * value
        g = jnp.broadcast_to(g_ref[...], (bt, d_part, h_part))     # (Bt,Dp,Hp)
        dims = (((2,), (1,)), ((0,), (0,)))                        # 'btd,bdh->bth'
        denom = lax.dot_general(p, g, dims, preferred_element_type=jnp.float32)
        numer = lax.dot_general(q, g, dims, preferred_element_type=jnp.float32)
        ratio = numer * pl.reciprocal(denom, approx=True)          # sum_d softmax*value
        # c_t contribution of these heads: sum over T as well.
        return jnp.sum(ratio, axis=1)                              # (Bt, Hp)

    # h = cat([x, corr_diff], dim=2): heads 0..25 come from x, heads 26..27 from
    # corr_diff (260 = 26 * 10), so the two parts can be processed without ever
    # materializing the concatenation.
    c_x = head_part(x, gx_ref)                                     # (Bt, 26)
    c_a = head_part(corr_diff, ga_ref)                             # (Bt, 2)

    # v_attn_score = softmax over a size-1 axis == 1.0, so outs == v_value and
    # c_t = [c_x | c_a];  output_proj:  c_t @ W_out.T + b.
    out_ref[...] = (jnp.dot(c_x, wx_ref[...], preferred_element_type=jnp.float32)
                    + jnp.dot(c_a, wa_ref[...], preferred_element_type=jnp.float32)
                    + b_ref[...])


# ----------------------------------------------------------------- wrapper ----
def gru_former2_forward(x, att1, params, block_b=None):
    # w_proj / b_proj (input_proj) are mathematically dead: torch.softmax over a
    # size-1 last axis is identically 1.0.  Kept in the signature for fidelity.
    _w_proj, _b_proj, w_out, b_out = params
    B, t_steps, dx = x.shape
    da = att1.shape[2]
    assert t_steps == T and dx == HIDDEN_DIM, (t_steps, dx)
    out_dim = w_out.shape[0]
    hx = dx // HEAD_DIM                                            # 26 heads from x
    ha = T // HEAD_DIM                                             # 2 heads from corr-diff

    # Batch block: 32 is safe for v5e's 16 MiB default scoped VMEM; raise to
    # ~128-256 (and set vmem_limit_bytes) on v6e/v7x for large B.
    if block_b is None:
        block_b = 32
    if block_b >= B:
        block_b = B
    else:
        block_b = max(8, (block_b // 8) * 8)     # keep out-block sublane dim 8-aligned
    grid = (pl.cdiv(B, block_b),)

    # One-hot head-grouping matrices: column g has ones on rows g*10 .. g*10+9.
    gx = (jnp.arange(dx)[:, None] // HEAD_DIM ==
          jnp.arange(hx)[None, :]).astype(jnp.float32)             # (260, 26)
    ga = (jnp.arange(T)[:, None] // HEAD_DIM ==
          jnp.arange(ha)[None, :]).astype(jnp.float32)             # (20, 2)

    wo_t = w_out.T.astype(jnp.float32)                             # (28, O)
    wx = wo_t[:hx]                                                 # rows for x-heads
    wa = wo_t[hx:]                                                 # rows for corr-heads
    bo = b_out.reshape(1, out_dim).astype(jnp.float32)

    return pl.pallas_call(
        fused_kernel,
        out_shape=jax.ShapeDtypeStruct((B, out_dim), jnp.float32),
        grid=grid,
        in_specs=[
            pl.BlockSpec((block_b, T, dx), lambda i: (i, 0, 0)),
            pl.BlockSpec((block_b, T, da), lambda i: (i, 0, 0)),
            pl.BlockSpec((dx, hx), lambda i: (0, 0)),
            pl.BlockSpec((T, ha), lambda i: (0, 0)),
            pl.BlockSpec((hx, out_dim), lambda i: (0, 0)),
            pl.BlockSpec((ha, out_dim), lambda i: (0, 0)),
            pl.BlockSpec((1, out_dim), lambda i: (0, 0)),
        ],
        out_specs=pl.BlockSpec((block_b, out_dim), lambda i: (i, 0)),
        compiler_params=pltpu.CompilerParams(
            dimension_semantics=("parallel",)),
    )(x, att1, gx, ga, wx, wa, bo)


# --------------------------------------------------------- pure-JAX reference -
def reference_forward(x, att1, params):
    """Faithful translation of the PyTorch forward (including the dead branch)."""
    w_proj, b_proj, w_out, b_out = params

    def corr(m):
        mc = m - m.mean(axis=1, keepdims=True)
        c = mc @ mc.T
        d = jnp.diag(c)
        return jnp.clip(c / jnp.sqrt(d[:, None] * d[None, :]), -1.0, 1.0)

    att0 = jax.vmap(lambda xv, av: corr(xv) - corr(av))(x, att1)
    h = jnp.concatenate([x, att0], axis=2)                          # (B, T, 280)
    B = h.shape[0]
    hh = h.reshape(B, T, NUM_HEADS, HEAD_DIM).transpose(2, 0, 1, 3)  # (28, B, T, 10)
    q = k = v = hh
    ksum = k.sum(axis=2, keepdims=True)                              # (28, B, 1, 10)
    attn = jax.nn.softmax(jnp.tanh(q * ksum / jnp.sqrt(float(HEAD_DIM))), axis=-1)
    t_out = attn * v
    v_q = t_out.sum(axis=2)                                          # (28, B, 10)
    v_val = t_out.sum(axis=3).transpose(1, 0, 2)                     # (B, 28, T)
    va = jnp.tanh(v_q * v_q @ w_proj.T + b_proj)                     # (28, B, 1)
    va = jax.nn.softmax(va, axis=-1).transpose(1, 0, 2)              # (B, 28, 1) == 1.0
    c_t = (v_val * va).sum(axis=2)                                   # (B, 28)
    return c_t @ w_out.T + b_out


# -------------------------------------------------------------------- main ----
if __name__ == "__main__":
    B = 16
    input_dim = 4                        # num_nodes; output_proj: Linear(28, input_dim*2)
    out_dim = 2 * input_dim

    key = jax.random.PRNGKey(0)
    kx, ka, k1, k2, k3, k4 = jax.random.split(key, 6)
    x = jax.random.normal(kx, (B, T, HIDDEN_DIM), jnp.float32)       # (16, 20, 260)
    att1 = jax.random.normal(ka, (B, T, T), jnp.float32)             # (16, 20, 20)

    # Deterministic synthetic parameters (shapes from the module __init__).
    w_proj = 0.1 * jax.random.normal(k1, (1, HEAD_DIM), jnp.float32)      # Linear(10, 1).weight
    b_proj = 0.1 * jax.random.normal(k2, (1,), jnp.float32)               # Linear(10, 1).bias
    w_out = 0.1 * jax.random.normal(k3, (out_dim, NUM_HEADS), jnp.float32)  # Linear(28, 2*in).weight
    b_out = 0.1 * jax.random.normal(k4, (out_dim,), jnp.float32)            # Linear(28, 2*in).bias
    params = (w_proj, b_proj, w_out, b_out)

    out = gru_former2_forward(x, att1, params, block_b=8)            # grid = (2,)
    out = jax.block_until_ready(out)

    ref = reference_forward(x, att1, params)
    assert out.shape == (B, out_dim), out.shape
    assert bool(jnp.allclose(out, ref, atol=1e-2, rtol=1e-2)), (out, ref)
    print("KERNEL_OK")
</pallas_src>

<mosaic_0001>
module attributes {stable_mosaic.version = 11 : i64} {
  func.func @fused_kernel(%arg0: i32, %arg1: memref<8x20x260xf32, #tpu.memory_space<vmem>>, %arg2: memref<8x20x20xf32, #tpu.memory_space<vmem>>, %arg3: memref<260x26xf32, #tpu.memory_space<vmem>>, %arg4: memref<20x2xf32, #tpu.memory_space<vmem>>, %arg5: memref<26x8xf32, #tpu.memory_space<vmem>>, %arg6: memref<2x8xf32, #tpu.memory_space<vmem>>, %arg7: memref<1x8xf32, #tpu.memory_space<vmem>>, %arg8: memref<8x8xf32, #tpu.memory_space<vmem>>) attributes {dimension_semantics = [#tpu.dimension_semantics<parallel>], iteration_bounds = array<i64: 2>, scalar_prefetch = 0 : i64, scratch_operands = 0 : i64, tpu.core_type = #tpu.core_type<tc>, window_params = [{transform_indices = @transform_0, window_bounds = array<i64: 8, 20, 260>}, {transform_indices = @transform_1, window_bounds = array<i64: 8, 20, 20>}, {pipeline_mode = #tpu.pipeline_mode<synchronous>, transform_indices = @transform_2, window_bounds = array<i64: 260, 26>}, {pipeline_mode = #tpu.pipeline_mode<synchronous>, transform_indices = @transform_3, window_bounds = array<i64: 20, 2>}, {pipeline_mode = #tpu.pipeline_mode<synchronous>, transform_indices = @transform_4, window_bounds = array<i64: 26, 8>}, {pipeline_mode = #tpu.pipeline_mode<synchronous>, transform_indices = @transform_5, window_bounds = array<i64: 2, 8>}, {pipeline_mode = #tpu.pipeline_mode<synchronous>, transform_indices = @transform_6, window_bounds = array<i64: 1, 8>}, {transform_indices = @transform_7, window_bounds = array<i64: 8, 8>}]} {
    %c0 = arith.constant 0 : index
    %c0_0 = arith.constant 0 : index
    %c0_1 = arith.constant 0 : index
    %0 = vector.load %arg1[%c0, %c0_0, %c0_1] : memref<8x20x260xf32, #tpu.memory_space<vmem>>, vector<8x20x260xf32>
    %cst = arith.constant dense<0.000000e+00> : vector<8x20xf32>
    %1 = vector.multi_reduction <add>, %0, %cst [2] : vector<8x20x260xf32> to vector<8x20xf32>
    %2 = vector.shape_cast %1 : vector<8x20xf32> to vector<8x20x1xf32>
    %cst_2 = arith.constant 2.600000e+02 : f32
    %3 = vector.broadcast %cst_2 : f32 to vector<8x20x1xf32>
    %4 = arith.divf %2, %3 : vector<8x20x1xf32>
    %5 = vector.broadcast %4 : vector<8x20x1xf32> to vector<8x20x260xf32>
    %6 = arith.subf %0, %5 : vector<8x20x260xf32>
    %7 = arith.mulf %6, %6 : vector<8x20x260xf32>
    %cst_3 = arith.constant dense<0.000000e+00> : vector<8x20xf32>
    %8 = vector.multi_reduction <add>, %7, %cst_3 [2] : vector<8x20x260xf32> to vector<8x20xf32>
    %9 = vector.shape_cast %8 : vector<8x20xf32> to vector<8x20x1xf32>
    %10 = math.rsqrt %9 : vector<8x20x1xf32>
    %11 = vector.broadcast %10 : vector<8x20x1xf32> to vector<8x20x260xf32>
    %12 = arith.mulf %6, %11 : vector<8x20x260xf32>
    %cst_4 = arith.constant dense<0.000000e+00> : vector<8x20x20xf32>
    %13 = tpu.matmul %12, %12, %cst_4 {dimension_numbers = #tpu.dot_dimension_numbers<[2], [2], [1], [1], [0, 0, 0, 1, 1, 1], [0], [0]>} : vector<8x20x260xf32>, vector<8x20x260xf32>, vector<8x20x20xf32> -> vector<8x20x20xf32>
    %cst_5 = arith.constant -1.000000e+00 : f32
    %cst_6 = arith.constant 1.000000e+00 : f32
    %14 = vector.broadcast %cst_5 : f32 to vector<8x20x20xf32>
    %15 = arith.maximumf %14, %13 : vector<8x20x20xf32>
    %16 = vector.broadcast %cst_6 : f32 to vector<8x20x20xf32>
    %17 = arith.minimumf %16, %15 : vector<8x20x20xf32>
    %c0_7 = arith.constant 0 : index
    %c0_8 = arith.constant 0 : index
    %c0_9 = arith.constant 0 : index
    %18 = vector.load %arg2[%c0_7, %c0_8, %c0_9] : memref<8x20x20xf32, #tpu.memory_space<vmem>>, vector<8x20x20xf32>
    %cst_10 = arith.constant dense<0.000000e+00> : vector<8x20xf32>
    %19 = vector.multi_reduction <add>, %18, %cst_10 [2] : vector<8x20x20xf32> to vector<8x20xf32>
    %20 = vector.shape_cast %19 : vector<8x20xf32> to vector<8x20x1xf32>
    %cst_11 = arith.constant 2.000000e+01 : f32
    %21 = vector.broadcast %cst_11 : f32 to vector<8x20x1xf32>
    %22 = arith.divf %20, %21 : vector<8x20x1xf32>
    %23 = vector.broadcast %22 : vector<8x20x1xf32> to vector<8x20x20xf32>
    %24 = arith.subf %18, %23 : vector<8x20x20xf32>
    %25 = arith.mulf %24, %24 : vector<8x20x20xf32>
    %cst_12 = arith.constant dense<0.000000e+00> : vector<8x20xf32>
    %26 = vector.multi_reduction <add>, %25, %cst_12 [2] : vector<8x20x20xf32> to vector<8x20xf32>
    %27 = vector.shape_cast %26 : vector<8x20xf32> to vector<8x20x1xf32>
    %28 = math.rsqrt %27 : vector<8x20x1xf32>
    %29 = vector.broadcast %28 : vector<8x20x1xf32> to vector<8x20x20xf32>
    %30 = arith.mulf %24, %29 : vector<8x20x20xf32>
    %cst_13 = arith.constant dense<0.000000e+00> : vector<8x20x20xf32>
    %31 = tpu.matmul %30, %30, %cst_13 {dimension_numbers = #tpu.dot_dimension_numbers<[2], [2], [1], [1], [0, 0, 0, 1, 1, 1], [0], [0]>} : vector<8x20x20xf32>, vector<8x20x20xf32>, vector<8x20x20xf32> -> vector<8x20x20xf32>
    %cst_14 = arith.constant -1.000000e+00 : f32
    %cst_15 = arith.constant 1.000000e+00 : f32
    %32 = vector.broadcast %cst_14 : f32 to vector<8x20x20xf32>
    %33 = arith.maximumf %32, %31 : vector<8x20x20xf32>
    %34 = vector.broadcast %cst_15 : f32 to vector<8x20x20xf32>
    %35 = arith.minimumf %34, %33 : vector<8x20x20xf32>
    %36 = arith.subf %17, %35 : vector<8x20x20xf32>
    %cst_16 = arith.constant dense<0.000000e+00> : vector<8x260xf32>
    %37 = vector.multi_reduction <add>, %0, %cst_16 [1] : vector<8x20x260xf32> to vector<8x260xf32>
    %38 = vector.shape_cast %37 : vector<8x260xf32> to vector<8x1x260xf32>
    %cst_17 = arith.constant 0.316227764 : f32
    %39 = vector.broadcast %cst_17 : f32 to vector<8x1x260xf32>
    %40 = arith.mulf %38, %39 : vector<8x1x260xf32>
    %41 = vector.broadcast %40 : vector<8x1x260xf32> to vector<8x20x260xf32>
    %42 = arith.mulf %0, %41 : vector<8x20x260xf32>
    %43 = math.tanh %42 : vector<8x20x260xf32>
    %44 = math.exp %43 : vector<8x20x260xf32>
    %45 = arith.mulf %44, %0 : vector<8x20x260xf32>
    %c0_18 = arith.constant 0 : index
    %c0_19 = arith.constant 0 : index
    %46 = vector.load %arg3[%c0_18, %c0_19] : memref<260x26xf32, #tpu.memory_space<vmem>>, vector<260x26xf32>
    %47 = vector.shape_cast %46 : vector<260x26xf32> to vector<1x260x26xf32>
    %48 = vector.broadcast %47 : vector<1x260x26xf32> to vector<8x260x26xf32>
    %cst_20 = arith.constant dense<0.000000e+00> : vector<8x20x26xf32>
    %49 = tpu.matmul %44, %48, %cst_20 {dimension_numbers = #tpu.dot_dimension_numbers<[2], [1], [1], [2], [0, 0, 0, 1, 1, 2], [0], [0]>} : vector<8x20x260xf32>, vector<8x260x26xf32>, vector<8x20x26xf32> -> vector<8x20x26xf32>
    %cst_21 = arith.constant dense<0.000000e+00> : vector<8x20x26xf32>
    %50 = tpu.matmul %45, %48, %cst_21 {dimension_numbers = #tpu.dot_dimension_numbers<[2], [1], [1], [2], [0, 0, 0, 1, 1, 2], [0], [0]>} : vector<8x20x260xf32>, vector<8x260x26xf32>, vector<8x20x26xf32> -> vector<8x20x26xf32>
    %51 = tpu.reciprocal %49 {approx = true} : vector<8x20x26xf32> -> vector<8x20x26xf32>
    %52 = arith.mulf %50, %51 : vector<8x20x26xf32>
    %cst_22 = arith.constant dense<0.000000e+00> : vector<8x26xf32>
    %53 = vector.multi_reduction <add>, %52, %cst_22 [1] : vector<8x20x26xf32> to vector<8x26xf32>
    %cst_23 = arith.constant dense<0.000000e+00> : vector<8x20xf32>
    %54 = vector.multi_reduction <add>, %36, %cst_23 [1] : vector<8x20x20xf32> to vector<8x20xf32>
    %55 = vector.shape_cast %54 : vector<8x20xf32> to vector<8x1x20xf32>
    %cst_24 = arith.constant 0.316227764 : f32
    %56 = vector.broadcast %cst_24 : f32 to vector<8x1x20xf32>
    %57 = arith.mulf %55, %56 : vector<8x1x20xf32>
    %58 = vector.broadcast %57 : vector<8x1x20xf32> to vector<8x20x20xf32>
    %59 = arith.mulf %36, %58 : vector<8x20x20xf32>
    %60 = math.tanh %59 : vector<8x20x20xf32>
    %61 = math.exp %60 : vector<8x20x20xf32>
    %62 = arith.mulf %61, %36 : vector<8x20x20xf32>
    %c0_25 = arith.constant 0 : index
    %c0_26 = arith.constant 0 : index
    %63 = vector.load %arg4[%c0_25, %c0_26] : memref<20x2xf32, #tpu.memory_space<vmem>>, vector<20x2xf32>
    %64 = vector.shape_cast %63 : vector<20x2xf32> to vector<1x20x2xf32>
    %65 = vector.broadcast %64 : vector<1x20x2xf32> to vector<8x20x2xf32>
    %cst_27 = arith.constant dense<0.000000e+00> : vector<8x20x2xf32>
    %66 = tpu.matmul %61, %65, %cst_27 {dimension_numbers = #tpu.dot_dimension_numbers<[2], [1], [1], [2], [0, 0, 0, 1, 1, 2], [0], [0]>} : vector<8x20x20xf32>, vector<8x20x2xf32>, vector<8x20x2xf32> -> vector<8x20x2xf32>
    %cst_28 = arith.constant dense<0.000000e+00> : vector<8x20x2xf32>
    %67 = tpu.matmul %62, %65, %cst_28 {dimension_numbers = #tpu.dot_dimension_numbers<[2], [1], [1], [2], [0, 0, 0, 1, 1, 2], [0], [0]>} : vector<8x20x20xf32>, vector<8x20x2xf32>, vector<8x20x2xf32> -> vector<8x20x2xf32>
    %68 = tpu.reciprocal %66 {approx = true} : vector<8x20x2xf32> -> vector<8x20x2xf32>
    %69 = arith.mulf %67, %68 : vector<8x20x2xf32>
    %cst_29 = arith.constant dense<0.000000e+00> : vector<8x2xf32>
    %70 = vector.multi_reduction <add>, %69, %cst_29 [1] : vector<8x20x2xf32> to vector<8x2xf32>
    %c0_30 = arith.constant 0 : index
    %c0_31 = arith.constant 0 : index
    %71 = vector.load %arg5[%c0_30, %c0_31] : memref<26x8xf32, #tpu.memory_space<vmem>>, vector<26x8xf32>
    %cst_32 = arith.constant dense<0.000000e+00> : vector<8x8xf32>
    %72 = tpu.matmul %53, %71, %cst_32 {dimension_numbers = #tpu.dot_dimension_numbers<[1], [0], [0], [1], [0, 0, 1, 1], [], []>} : vector<8x26xf32>, vector<26x8xf32>, vector<8x8xf32> -> vector<8x8xf32>
    %c0_33 = arith.constant 0 : index
    %c0_34 = arith.constant 0 : index
    %73 = vector.load %arg6[%c0_33, %c0_34] : memref<2x8xf32, #tpu.memory_space<vmem>>, vector<2x8xf32>
    %cst_35 = arith.constant dense<0.000000e+00> : vector<8x8xf32>
    %74 = tpu.matmul %70, %73, %cst_35 {dimension_numbers = #tpu.dot_dimension_numbers<[1], [0], [0], [1], [0, 0, 1, 1], [], []>} : vector<8x2xf32>, vector<2x8xf32>, vector<8x8xf32> -> vector<8x8xf32>
    %75 = arith.addf %72, %74 : vector<8x8xf32>
    %c0_36 = arith.constant 0 : index
    %c0_37 = arith.constant 0 : index
    %76 = vector.load %arg7[%c0_36, %c0_37] : memref<1x8xf32, #tpu.memory_space<vmem>>, vector<1x8xf32>
    %77 = vector.broadcast %76 : vector<1x8xf32> to vector<8x8xf32>
    %78 = arith.addf %75, %77 : vector<8x8xf32>
    %c0_38 = arith.constant 0 : index
    %c0_39 = arith.constant 0 : index
    %79 = vector.load %arg8[%c0_38, %c0_39] : memref<8x8xf32, #tpu.memory_space<vmem>>, vector<8x8xf32>
    tpu.vector_store %arg8[%c0_38, %c0_39], %78 {strides = array<i32>} : memref<8x8xf32, #tpu.memory_space<vmem>>, vector<8x8xf32>,
    return
  }
  func.func @transform_0(%arg0: i32) -> (i32, i32, i32) {
    %c0_i32 = arith.constant 0 : i32
    %c0_i32_0 = arith.constant 0 : i32
    %c0_i32_1 = arith.constant 0 : i32
    return %arg0, %c0_i32, %c0_i32_0 : i32, i32, i32
  }
  func.func @transform_1(%arg0: i32) -> (i32, i32, i32) {
    %c0_i32 = arith.constant 0 : i32
    %c0_i32_0 = arith.constant 0 : i32
    %c0_i32_1 = arith.constant 0 : i32
    return %arg0, %c0_i32, %c0_i32_0 : i32, i32, i32
  }
  func.func @transform_2(%arg0: i32) -> (i32, i32) {
    %c0_i32 = arith.constant 0 : i32
    %c0_i32_0 = arith.constant 0 : i32
    %c0_i32_1 = arith.constant 0 : i32
    return %c0_i32, %c0_i32_0 : i32, i32
  }
  func.func @transform_3(%arg0: i32) -> (i32, i32) {
    %c0_i32 = arith.constant 0 : i32
    %c0_i32_0 = arith.constant 0 : i32
    %c0_i32_1 = arith.constant 0 : i32
    return %c0_i32, %c0_i32_0 : i32, i32
  }
  func.func @transform_4(%arg0: i32) -> (i32, i32) {
    %c0_i32 = arith.constant 0 : i32
    %c0_i32_0 = arith.constant 0 : i32
    %c0_i32_1 = arith.constant 0 : i32
    return %c0_i32, %c0_i32_0 : i32, i32
  }
  func.func @transform_5(%arg0: i32) -> (i32, i32) {
    %c0_i32 = arith.constant 0 : i32
    %c0_i32_0 = arith.constant 0 : i32
    %c0_i32_1 = arith.constant 0 : i32
    return %c0_i32, %c0_i32_0 : i32, i32
  }
  func.func @transform_6(%arg0: i32) -> (i32, i32) {
    %c0_i32 = arith.constant 0 : i32
    %c0_i32_0 = arith.constant 0 : i32
    %c0_i32_1 = arith.constant 0 : i32
    return %c0_i32, %c0_i32_0 : i32, i32
  }
  func.func @transform_7(%arg0: i32) -> (i32, i32) {
    %c0_i32 = arith.constant 0 : i32
    %c0_i32_0 = arith.constant 0 : i32
    return %arg0, %c0_i32 : i32, i32
  }
}

</mosaic_0001>

<bundles_post_ra>
// kernel: tpu_custom_call.1
= control target key start
LH: loop header
LB: loop body
LE: loop exit
PB: predicated region body
PF: predicated region fallthrough
CT: control target
= control target key end

     0   :  { %s12279_s24 = smov 0   ;;  %s16160_s0 = inlined_call_operand.vmem [shape: f32[16,20,260], index: 0, kind: input, shape index: {}]   ;;  %s16161_s1 = inlined_call_operand.vmem [shape: f32[16,20,20], index: 1, kind: input, shape index: {}]   ;;  %s16162_s2 = inlined_call_operand.vmem [shape: f32[260,26], index: 2, kind: input, shape index: {}]   ;;  %s16163_s3 = inlined_call_operand.vmem [shape: f32[20,2], index: 3, kind: input, shape index: {}]   ;;  %s16164_s4 = inlined_call_operand.vmem [shape: f32[26,8], index: 4, kind: input, shape index: {}]   ;;  %s16165_s5 = inlined_call_operand.vmem [shape: f32[2,8], index: 5, kind: input, shape index: {}]   ;;  %s16166_s6 = inlined_call_operand.vmem [shape: f32[1,8], index: 6, kind: input, shape index: {}]   ;;  %s16167_s7 = inlined_call_operand.vmem [shape: f32[16,8], index: 7, kind: output, shape index: {}]  }
   0x1 LB: > { %s12285_s25 = sadd.s32 4294967295, %s12233_s24   ;;  %p8904_p0 = scmp.ge.s32.totalorder %s12233_s24, 1  ;;  %s12233_s24 = sphi %s12279_s24, %s17_s24  }
   0x2   : > { %p251_p1 = scmp.lt.s32.totalorder %s12233_s24, 3 }
   0x4   : > { %p252_p2 = pnand %p8904_p0, %p251_p1 }
   0x6   : > { %255 = sbr.rel (%p252_p2) target bundleno = 1468 (0x5bc), region = 48 }
   0xd   : > { %s8905_s26 = sshll.u32 %s12285_s25, 3  ;;  %vm380_vm0 = vcmask 31744   ;;  %vm390_vm1 = vcmask 1043456   ;;  %vm394_vm2 = vcmask 27648   ;;  %vm2343_vm3 = vcmask 162816   ;;  %p303_p4 = scmp.lt.s32.totalorder %s12285_s25, 1 }
   0xe   : > { %p290_p3 = scmp.lt.s32.totalorder %s8905_s26, 15  ;;  %vm2350_vm4 = vcmask 158720   ;;  %vm13362_vm5 = vmpackc.low %vm380_vm0, %vm380_vm0  ;;  %vm12237_vm6 = vmmov 0   ;;  %vm6758_vm8 = vcmask 211968   ;;  %vm6762_vm9 = vcmask 207872  }
   0xf   : > { %vm13784_vm7 = vmpackc.low %vm2343_vm3, %vm2343_vm3  ;;  %vm8645_vm10 = vcmask 1041409   ;;  %vm8661_vm11 = vcmask 1041408   ;;  %vm12238_vm12 = vmmov 1   ;;  %vm8647_vm14 = vcmask 1042434   ;;  %s16811_s25 = smov (!%p303_p4, %s12285_s25), 1 }
  0x10   : > { %s16809_s26 = smov (!%p290_p3, %s8905_s26), 15  ;;  %vm11441_vm13 = vmpackc.low %vm8661_vm11, %vm12238_vm12  ;;  %vm8649_vm15 = vcmask 1043459   ;;  %s8909_s17 = sshll.u32 %s16811_s25, 3 }
  0x11   : > { %s11491_s27 = smul.u32 72, %s16809_s26  ;;  %s306_s22 = scalar_lea.vmem %s16167_s7, %s8909_s17 }
  0x12   : > { %s11492_s8 = smul.u32 24, %s16809_s26 }
  0x13   : > { %s12296_s30 = scalar_lea.vmem %s16160_s0, %s11491_s27 }
  0x14   : > { %v12299_v0 = vld [vmem:[%s12296_s30 + $0x48] sm:$0xff]  ;;  %v12302_v1 = vld [vmem:[%s12296_s30 + $0x50] sm:$0xff]  ;;  %v12305_v2 = vld [vmem:[%s12296_s30 + $0x58] sm:$0xff]  ;;  %s12694_s11 = scalar_lea.vmem %s16161_s1, %s11492_s8 }
  0x15   : > { %v12308_v3 = vld [vmem:[%s12296_s30 + $0x70] sm:$0xff]  ;;  %v399_v4 = vadd.f32 %v12302_v1, %v12299_v0  ;;  %v400_v5 = vsel %vm380_vm0, %v12305_v2, 0.0  ;;  %v12315_v6 = vld [vmem:[%s12296_s30] sm:$0xff]  ;;  %v12318_v7 = vld [vmem:[%s12296_s30 + $0x8] sm:$0xff] }
  0x16   : > { %v405_v8 = vsel %vm380_vm0, %v12308_v3, 0.0  ;;  %v12323_v9 = vld [vmem:[%s12296_s30 + $0x10] sm:$0xff]  ;;  %v12326_v10 = vld [vmem:[%s12296_s30 + $0x28] sm:$0xff]  ;;  %v379_v11 = vadd.f32 %v12318_v7, %v12315_v6  ;;  %v12331_v12 = vld [vmem:[%s12296_s30 + $0x60] sm:$0xff] }
  0x17   : > { %v401_v13 = vadd.f32 %v400_v5, %v399_v4  ;;  %v3434_v14 = vadd.f32 %v405_v8, %v400_v5  ;;  %v381_v15 = vsel %vm380_vm0, %v12323_v9, 0.0  ;;  %v386_v16 = vsel %vm380_vm0, %v12326_v10, 0.0  ;;  %v12338_v17 = vld [vmem:[%s12296_s30 + $0x68] sm:$0xff]  ;;  %v12341_v18 = vld [vmem:[%s12296_s30 + $0x18] sm:$0xff]  ;;  %v12344_v19 = vld [vmem:[%s12296_s30 + $0x20] sm:$0xff] }
  0x18   : > { %v382_v20 = vadd.f32 %v381_v15, %v379_v11  ;;  %v3410_v21 = vadd.f32 %v386_v16, %v381_v15  ;;  %v404_v22 = vadd.f32 %v12338_v17, %v12331_v12  ;;  %v385_v23 = vadd.f32 %v12344_v19, %v12341_v18  ;;  %v12351_v24 = vld [vmem:[%s12296_s30 + $0x78] sm:$0xf]  ;;  %v12354_v25 = vld [vmem:[%s12296_s30 + $0x80] sm:$0xf]  ;;  %v12357_v26 = vld [vmem:[%s12296_s30 + $0x88] sm:$0xf] }
  0x19   : > { %402 = vadd.xlane.f32.xlu1 %v401_v13  ;;  %v12361_v27 = vsel %vm390_vm1, %v12351_v24, 0.0  ;;  %v12365_v28 = vsel %vm390_vm1, %v12354_v25, 0.0  ;;  %v12368_v29 = vld [vmem:[%s12296_s30 + $0x30] sm:$0xf]  ;;  %v412_v33 = vsel %vm394_vm2, %v12357_v26, 0.0  ;;  %v12391_v39 = vld [vmem:[%s12296_s30 + $0xa8] sm:$0xff] }
  0x1a   : > { %16357 = vst [vmem:[#allocation2_spill] sm:$0xff] %v12361_v27  ;;  %16358 = vst [vmem:[#allocation3_spill] sm:$0xff] %v12365_v28  ;;  %383 = vadd.xlane.f32.xlu0 %v382_v20  ;;  %v406_v30 = vadd.f32 %v405_v8, %v404_v22  ;;  %v387_v31 = vadd.f32 %v386_v16, %v385_v23  ;;  %v411_v32 = vadd.f32 %v12365_v28, %v12361_v27  ;;  %v12375_v34 = vld [vmem:[%s12296_s30 + $0x38] sm:$0xf]  ;;  %v12378_v35 = vld [vmem:[%s12296_s30 + $0x40] sm:$0xf] }
  0x1b   : > { %v12380_v36 = vadd.f32 %v3434_v14, %v412_v33  ;;  %v12384_v37 = vsel %vm390_vm1, %v12368_v29, 0.0  ;;  %v12388_v38 = vsel %vm390_vm1, %v12375_v34, 0.0  ;;  %v12394_v40 = vld [vmem:[%s12296_s30 + $0xb0] sm:$0xff]  ;;  %v395_v42 = vsel %vm394_vm2, %v12378_v35, 0.0  ;;  %v12401_v44 = vld [vmem:[%s12296_s30 + $0xb8] sm:$0xff]  ;;  %v12414_v50 = vld [vmem:[%s12296_s30 + $0xa0] sm:$0xff] }
  0x1c   : > { %16360 = vst [vmem:[#allocation5_spill] sm:$0xff] %v12384_v37  ;;  %16361 = vst [vmem:[#allocation6_spill] sm:$0xff] %v12388_v38  ;;  %v393_v41 = vadd.f32 %v12388_v38, %v12384_v37  ;;  %v413_v43 = vadd.f32 %v412_v33, %v411_v32  ;;  %v12404_v45 = vld [vmem:[%s12296_s30 + $0x90] sm:$0xff]  ;;  %v12407_v46 = vld [vmem:[%s12296_s30 + $0x98] sm:$0xff]  ;;  %v12409_v48 = vadd.f32 %v3410_v21, %v395_v42  ;;  %v422_v51 = vsel %vm380_vm0, %v12401_v44, 0.0 }
  0x1d   : > { %16359 = vst [vmem:[#allocation4_spill] sm:$0xff] %v12380_v36  ;;  %407 = vadd.xlane.f32.xlu1 %v406_v30  ;;  %v421_v49 = vadd.f32 %v12394_v40, %v12391_v39  ;;  %v416_v52 = vadd.f32 %v12407_v46, %v12404_v45  ;;  %v417_v54 = vsel %vm380_vm0, %v12414_v50, 0.0  ;;  %v12423_v55 = vld [vmem:[%s12296_s30 + $0xf0] sm:$0xff]  ;;  %v12426_v56 = vld [vmem:[%s12296_s30 + $0xf8] sm:$0xff]  ;;  %v12429_v57 = vld [vmem:[%s12296_s30 + $0x100] sm:$0xff] }
  0x1e   : > { %388 = vadd.xlane.f32.xlu0 %v387_v31  ;;  %v396_v47 = vadd.f32 %v395_v42, %v393_v41  ;;  %16362 = vst [vmem:[#allocation7_spill] sm:$0xff] %v12409_v48  ;;  %v3458_v59 = vadd.f32 %v422_v51, %v417_v54  ;;  %v438_v60 = vadd.f32 %v12426_v56, %v12423_v55  ;;  %v439_v61 = vsel %vm380_vm0, %v12429_v57, 0.0  ;;  %v12436_v62 = vld [vmem:[%s12296_s30 + $0xd8] sm:$0xff]  ;;  %v12439_v63 = vld [vmem:[%s12296_s30 + $0xe0] sm:$0xff]  ;;  %v12442_v5 = vld [vmem:[%s12296_s30 + $0xe8] sm:$0xff] }
  0x1f   : > { %v423_v53 = vadd.f32 %v422_v51, %v421_v49  ;;  %v418_v58 = vadd.f32 %v417_v54, %v416_v52  ;;  %v433_v8 = vadd.f32 %v12439_v63, %v12436_v62  ;;  %v434_v11 = vsel %vm380_vm0, %v12442_v5, 0.0  ;;  %v12449_v13 = vld [vmem:[%s12296_s30 + $0x108] sm:$0xf]  ;;  %v12452_v14 = vld [vmem:[%s12296_s30 + $0x110] sm:$0xf]  ;;  %v12496_v54 = vld [vmem:[%s12296_s30 + $0x140] sm:$0xff] }
  0x20   : > { %v440_v4 = vadd.f32 %v439_v61, %v438_v60  ;;  %v3482_v16 = vadd.f32 %v439_v61, %v434_v11  ;;  %v12455_v20 = vld [vmem:[%s12296_s30 + $0x118] sm:$0xf]  ;;  %v12459_v21 = vsel %vm390_vm1, %v12449_v13, 0.0  ;;  %v12463_v22 = vsel %vm390_vm1, %v12452_v14, 0.0  ;;  %v12466_v23 = vld [vmem:[%s12296_s30 + $0xc0] sm:$0xf] }
  0x21   : > { %414 = vadd.xlane.f32.xlu1 %v413_v43  ;;  %v435_v15 = vadd.f32 %v434_v11, %v433_v8  ;;  %16363 = vst [vmem:[#allocation8_spill] sm:$0xff] %v12459_v21  ;;  %16364 = vst [vmem:[#allocation9_spill] sm:$0xff] %v12463_v22  ;;  %v12469_v30 = vld [vmem:[%s12296_s30 + $0xc8] sm:$0xf]  ;;  %v445_v31 = vadd.f32 %v12463_v22, %v12459_v21  ;;  %v446_v32 = vsel %vm394_vm2, %v12455_v20, 0.0  ;;  %v12482_v42 = vsel %vm390_vm1, %v12466_v23, 0.0 }
  0x22   : > { %397 = vadd.xlane.f32.xlu0 %v396_v47  ;;  %v12475_v33 = vadd.f32 %v3482_v16, %v446_v32  ;;  %v12478_v41 = vld [vmem:[%s12296_s30 + $0xd0] sm:$0xf]  ;;  %16366 = vst [vmem:[#allocation11_spill] sm:$0xff] %v12482_v42  ;;  %v12486_v47 = vsel %vm390_vm1, %v12469_v30, 0.0  ;;  %v12502_v60 = vld [vmem:[%s12296_s30 + $0x120] sm:$0xff]  ;;  %v12505_v61 = vld [vmem:[%s12296_s30 + $0x128] sm:$0xff] }
  0x23   : > { %v447_v43 = vadd.f32 %v446_v32, %v445_v31  ;;  %16367 = vst [vmem:[#allocation12_spill] sm:$0xff] %v12486_v47  ;;  %v428_v49 = vadd.f32 %v12486_v47, %v12482_v42  ;;  %v429_v51 = vsel %vm394_vm2, %v12478_v41, 0.0  ;;  %v12512_v11 = vld [vmem:[%s12296_s30 + $0x130] sm:$0xff]  ;;  %v450_v16 = vadd.f32 %v12505_v61, %v12502_v60  ;;  %v12519_v32 = vld [vmem:[%s12296_s30 + $0x180] sm:$0xff]  ;;  %v12540_v22 = vld [vmem:[%s12296_s30 + $0x178] sm:$0xff] }
  0x24   : > { %16365 = vst [vmem:[#allocation10_spill] sm:$0xff] %v12475_v33  ;;  %v12532_v33 = vld [vmem:[%s12296_s30 + $0x168] sm:$0xff]  ;;  %v12535_v21 = vld [vmem:[%s12296_s30 + $0x170] sm:$0xff]  ;;  %16369 = vst [vmem:[#allocation14_spill] sm:$0xff] %v12540_v22 }
  0x25   : > { %424 = vadd.xlane.f32.xlu1 %v423_v53  ;;  %v430_v52 = vadd.f32 %v429_v51, %v428_v49  ;;  %v12493_v53 = vld [vmem:[%s12296_s30 + $0x138] sm:$0xff]  ;;  %v12551_v47 = vld [vmem:[%s12296_s30 + $0x160] sm:$0xf] }
  0x26   : > { %419 = vadd.xlane.f32.xlu0 %v418_v58  ;;  %v12499_v58 = vld [vmem:[%s12296_s30 + $0x148] sm:$0xff]  ;;  %v455_v8 = vadd.f32 %v12496_v54, %v12493_v53  ;;  %16372 = vst [vmem:[#allocation17_spill] sm:$0xff] %v12551_v47  ;;  %v12568_v48 = vld [vmem:[%s12296_s30 + $0x198] sm:$0xf]  ;;  %v12571_v38 = vld [vmem:[%s12296_s30 + $0x1a0] sm:$0xf] }
  0x27   : > { %16375 = vst [vmem:[#allocation20_spill] sm:$0xff] %v12568_v48  ;;  %16376 = vst [vmem:[#allocation21_spill] sm:$0xff] %v12571_v38 }
  0x29   : > { %441 = vadd.xlane.f32.xlu1 %v440_v4  ;;  %v12507_v4 = vadd.f32 %v3458_v59, %v429_v51  ;;  %v451_v59 = vsel %vm380_vm0, %v12512_v11, 0.0  ;;  %v12527_v51 = vld [vmem:[%s12296_s30 + $0x190] sm:$0xff] }
  0x2a   : > { %436 = vadd.xlane.f32.xlu0 %v435_v15  ;;  %v456_v15 = vsel %vm380_vm0, %v12499_v58, 0.0  ;;  %v452_v49 = vadd.f32 %v451_v59, %v450_v16  ;;  %v473_v42 = vsel %vm380_vm0, %v12527_v51, 0.0  ;;  %v12546_v16 = vld [vmem:[%s12296_s30 + $0x158] sm:$0xf] }
  0x2b   : > { %16368 = vst [vmem:[#allocation13_spill] sm:$0xff] %v12507_v4  ;;  %v457_v31 = vadd.f32 %v456_v15, %v455_v8  ;;  %v3506_v8 = vadd.f32 %v456_v15, %v451_v59  ;;  %v12543_v4 = vld [vmem:[%s12296_s30 + $0x150] sm:$0xf]  ;;  %16371 = vst [vmem:[#allocation16_spill] sm:$0xff] %v12546_v16  ;;  %v468_v15 = vsel %vm380_vm0, %v12540_v22, 0.0  ;;  %v12561_v36 = vsel %vm390_vm1, %v12546_v16, 0.0 }
  0x2c   : > { %16370 = vst [vmem:[#allocation15_spill] sm:$0xff] %v12543_v4  ;;  %v12557_v59 = vsel %vm390_vm1, %v12543_v4, 0.0  ;;  %16374 = vst [vmem:[#allocation19_spill] sm:$0xff] %v12561_v36  ;;  %v12645_v22 = vld [vmem:[%s12296_s30 + $0x228] sm:$0xf] }
  0x2d   : > { %448 = vadd.xlane.f32.xlu1 %v447_v43  ;;  %v12522_v43 = vld [vmem:[%s12296_s30 + $0x188] sm:$0xff]  ;;  %16373 = vst [vmem:[#allocation18_spill] sm:$0xff] %v12557_v59  ;;  %v462_v37 = vadd.f32 %v12561_v36, %v12557_v59  ;;  %v12599_v36 = vld [vmem:[%s12296_s30 + $0x1d8] sm:$0xff]  ;;  %16392 = vst [vmem:[#allocation37_spill] sm:$0xff] %v12645_v22 }
  0x2e   : > { %431 = vadd.xlane.f32.xlu0 %v430_v52  ;;  %v472_v52 = vadd.f32 %v12522_v43, %v12519_v32  ;;  %16384 = vst [vmem:[#allocation29_spill] sm:$0xff] %v12599_v36 }
  0x31   : > { %458 = vadd.xlane.f32.xlu1 %v457_v31  ;;  %v474_v31 = vadd.f32 %v473_v42, %v472_v52  ;;  %v3530_v52 = vadd.f32 %v473_v42, %v468_v15 }
  0x32   : > { %453 = vadd.xlane.f32.xlu0 %v452_v49  ;;  %v467_v49 = vadd.f32 %v12535_v21, %v12532_v33 }
  0x34   : > { %v469_v27 = vadd.f32 %v468_v15, %v467_v49  ;;  %v12574_v49 = vld [vmem:[%s12296_s30 + $0x1a8] sm:$0xf]  ;;  %v12580_v15 = vsel %vm390_vm1, %v12568_v48, 0.0 }
  0x35   : > { %475 = vadd.xlane.f32.xlu1 %v474_v31  ;;  %v463_v31 = vsel %vm394_vm2, %v12551_v47, 0.0  ;;  %16377 = vst [vmem:[#allocation22_spill] sm:$0xff] %v12574_v49  ;;  %16379 = vst [vmem:[#allocation24_spill] sm:$0xff] %v12580_v15  ;;  %v480_v59 = vsel %vm394_vm2, %v12574_v49, 0.0  ;;  %v12619_v49 = vld [vmem:[%s12296_s30 + $0x210] sm:$0xff] }
  0x36   : > { %470 = vadd.xlane.f32.xlu0 %v469_v27  ;;  %v464_v28 = vadd.f32 %v463_v31, %v462_v37  ;;  %v12576_v42 = vadd.f32 %v3506_v8, %v463_v31  ;;  %v12584_v27 = vsel %vm390_vm1, %v12571_v38, 0.0  ;;  %v12590_v8 = vadd.f32 %v3530_v52, %v480_v59  ;;  %v12593_v31 = vld [vmem:[%s12296_s30 + $0x1c8] sm:$0xff]  ;;  %v12628_v38 = vld [vmem:[%s12296_s30 + $0x1f8] sm:$0xff] }
  0x37   : > { %16380 = vst [vmem:[#allocation25_spill] sm:$0xff] %v12584_v27  ;;  %v479_v37 = vadd.f32 %v12584_v27, %v12580_v15  ;;  %16382 = vst [vmem:[#allocation27_spill] sm:$0xff] %v12593_v31  ;;  %v12604_v27 = vld [vmem:[%s12296_s30 + $0x1b0] sm:$0xff] }
  0x38   : > { %16378 = vst [vmem:[#allocation23_spill] sm:$0xff] %v12576_v42  ;;  %16381 = vst [vmem:[#allocation26_spill] sm:$0xff] %v12590_v8  ;;  %v12596_v42 = vld [vmem:[%s12296_s30 + $0x1d0] sm:$0xff] }
  0x39   : > { %16383 = vst [vmem:[#allocation28_spill] sm:$0xff] %v12596_v42  ;;  %v489_v15 = vadd.f32 %v12596_v42, %v12593_v31  ;;  %16385 = vst [vmem:[#allocation30_spill] sm:$0xff] %v12604_v27  ;;  %v12622_v42 = vld [vmem:[%s12296_s30 + $0x218] sm:$0xff]  ;;  %v12625_v31 = vld [vmem:[%s12296_s30 + $0x220] sm:$0xff] }
  0x3a   : > { %465 = vadd.xlane.f32.xlu0 %v464_v28  ;;  %v481_v28 = vadd.f32 %v480_v59, %v479_v37  ;;  %v12607_v37 = vld [vmem:[%s12296_s30 + $0x1b8] sm:$0xff]  ;;  %v490_v59 = vsel %vm380_vm0, %v12599_v36, 0.0  ;;  %16388 = vst [vmem:[#allocation33_spill] sm:$0xff] %v12625_v31  ;;  %16389 = vst [vmem:[#allocation34_spill] sm:$0xff] %v12628_v38  ;;  %v12634_v36 = vld [vmem:[%s12296_s30 + $0x208] sm:$0xff] }
  0x3b   : > { %16386 = vst [vmem:[#allocation31_spill] sm:$0xff] %v12607_v37  ;;  %v491_v52 = vadd.f32 %v490_v59, %v489_v15  ;;  %v484_v8 = vadd.f32 %v12607_v37, %v12604_v27  ;;  %v12631_v15 = vld [vmem:[%s12296_s30 + $0x200] sm:$0xff]  ;;  %16391 = vst [vmem:[#allocation36_spill] sm:$0xff] %v12634_v36  ;;  %v507_v27 = vsel %vm380_vm0, %v12625_v31, 0.0  ;;  %v502_v16 = vsel %vm380_vm0, %v12634_v36, 0.0 }
  0x3c   : > { %482 = vadd.xlane.f32.xlu1 %v481_v28  ;;  %v12612_v28 = vld [vmem:[%s12296_s30 + $0x1c0] sm:$0xff]  ;;  %16390 = vst [vmem:[#allocation35_spill] sm:$0xff] %v12631_v15  ;;  %v501_v48 = vadd.f32 %v12631_v15, %v12628_v38  ;;  %v12655_v31 = vsel %vm390_vm1, %v12645_v22, 0.0  ;;  %v12665_v36 = vld [vmem:[%s12296_s30 + $0x1e8] sm:$0xf] }
  0x3d   : > { %16387 = vst [vmem:[#allocation32_spill] sm:$0xff] %v12612_v28  ;;  %v485_v47 = vsel %vm380_vm0, %v12612_v28, 0.0  ;;  %v506_v28 = vadd.f32 %v12622_v42, %v12619_v49  ;;  %16395 = vst [vmem:[#allocation40_spill] sm:$0xff] %v12655_v31  ;;  %v12658_v15 = vld [vmem:[%s12296_s30 + $0x1e0] sm:$0xf] }
  0x3e   : > { %v486_v37 = vadd.f32 %v485_v47, %v484_v8  ;;  %v503_v8 = vadd.f32 %v502_v16, %v501_v48  ;;  %16396 = vst [vmem:[#allocation41_spill] sm:$0xff] %v12658_v15  ;;  %16398 = vst [vmem:[#allocation43_spill] sm:$0xff] %v12665_v36 }
  0x3f   : > { %v508_v4 = vadd.f32 %v507_v27, %v506_v28 }
  0x40   : > { %492 = vadd.xlane.f32.xlu1 %v491_v52  ;;  %v3554_v52 = vadd.f32 %v490_v59, %v485_v47  ;;  %487 = vadd.xlane.f32.xlu0 %v486_v37  ;;  %v3578_v47 = vadd.f32 %v507_v27, %v502_v16  ;;  %v12648_v59 = vld [vmem:[%s12296_s30 + $0x230] sm:$0xf]  ;;  %v12651_v37 = vld [vmem:[%s12296_s30 + $0x238] sm:$0xf] }
  0x41   : > { %16393 = vst [vmem:[#allocation38_spill] sm:$0xff] %v12648_v59  ;;  %16394 = vst [vmem:[#allocation39_spill] sm:$0xff] %v12651_v37  ;;  %v12662_v28 = vsel %vm390_vm1, %v12648_v59, 0.0  ;;  %v12674_v27 = vld [vmem:[%s12296_s30 + $0x1f0] sm:$0xf]  ;;  %v12682_v59 = vsel %vm390_vm1, %v12665_v36, 0.0 }
  0x42   : > { %16397 = vst [vmem:[#allocation42_spill] sm:$0xff] %v12662_v28  ;;  %v513_v48 = vadd.f32 %v12662_v28, %v12655_v31  ;;  %16400 = vst [vmem:[#allocation45_spill] sm:$0xff] %v12674_v27  ;;  %v497_v28 = vsel %vm394_vm2, %v12674_v27, 0.0  ;;  %v12720_v31 = vld [vmem:[%s12694_s11 + $0x10] sm:$0xf] }
  0x43   : > { %16402 = vst [vmem:[#allocation47_spill] sm:$0xff] %v12682_v59  ;;  %16409 = vst [vmem:[#allocation54_spill] sm:$0xff] %v12720_v31 }
  0x44   : > { %509 = vadd.xlane.f32.xlu1 %v508_v4  ;;  %504 = vadd.xlane.f32.xlu0 %v503_v8  ;;  %v514_v4 = vsel %vm394_vm2, %v12651_v37, 0.0  ;;  %v12678_v8 = vsel %vm390_vm1, %v12658_v15, 0.0 }
  0x45   : > { %v12671_v16 = vadd.f32 %v3578_v47, %v514_v4  ;;  %16401 = vst [vmem:[#allocation46_spill] sm:$0xff] %v12678_v8  ;;  %v515_v22 = vadd.f32 %v514_v4, %v513_v48  ;;  %v496_v38 = vadd.f32 %v12682_v59, %v12678_v8  ;;  %v12700_v48 = vld [vmem:[%s12694_s11] sm:$0xff] }
  0x46   : > { %16405 = vst [vmem:[#allocation50_spill] sm:$0xff] %v12700_v48  ;;  %v2344_v4 = vsel %vm2343_vm3, %v12700_v48, 0.0 }
  0x47   : > { %16399 = vst [vmem:[#allocation44_spill] sm:$0xff] %v12671_v16  ;;  %v498_v47 = vadd.f32 %v497_v28, %v496_v38  ;;  %v12688_v16 = vadd.f32 %v3554_v52, %v497_v28  ;;  %v12703_v38 = vld [vmem:[%s12694_s11 + $0x20] sm:$0xff]  ;;  %v12708_v28 = vld [vmem:[%s12694_s11 + $0x18] sm:$0xff] }
  0x48   : > { %516 = vadd.xlane.f32.xlu1 %v515_v22  ;;  %v12697_v22 = vld [vmem:[%s12694_s11 + $0x8] sm:$0xff]  ;;  %16406 = vst [vmem:[#allocation51_spill] sm:$0xff] %v12703_v38  ;;  %16407 = vst [vmem:[#allocation52_spill] sm:$0xff] %v12708_v28  ;;  %v2354_v8 = vsel %vm2343_vm3, %v12708_v28, 0.0 }
  0x49   : > { %499 = vadd.xlane.f32.xlu0 %v498_v47  ;;  %16403 = vst [vmem:[#allocation48_spill] sm:$0xff] %v12688_v16  ;;  %16404 = vst [vmem:[#allocation49_spill] sm:$0xff] %v12697_v22  ;;  %v2347_v52 = vsel %vm2343_vm3, %v12697_v22, 0.0  ;;  %v2357_v47 = vsel %vm2343_vm3, %v12703_v38, 0.0  ;;  %v12717_v16 = vld [vmem:[%s12694_s11 + $0x28] sm:$0xf] }
  0x4a   : > { %16408 = vst [vmem:[#allocation53_spill] sm:$0xff] %v12717_v16 }
  0x4c   : > { %2348 = vadd.xlane.f32.xlu1 %v2347_v52  ;;  %v2360_v52 = vsel %vm2350_vm4, %v12717_v16, 0.0 }
  0x4d   : > { %2345 = vadd.xlane.f32.xlu0 %v2344_v4  ;;  %v2351_v4 = vsel %vm2350_vm4, %v12720_v31, 0.0 }
  0x50   : > { %2358 = vadd.xlane.f32.xlu1 %v2357_v47 }
  0x51   : > { %2355 = vadd.xlane.f32.xlu0 %v2354_v8 }
  0x54   : > { %2361 = vadd.xlane.f32.xlu1 %v2360_v52 }
  0x55   : > { %2352 = vadd.xlane.f32.xlu0 %v2351_v4 }
  0xa6   : > { %v403_v59 = vpop.xlane.xlu1 %402 }
  0xa7   : > { %v384_v38 = vpop.xlane.xlu0 %383 }
  0xa8   : > { %v519_v48 = vmul.f32 0.0038461538, %v384_v38 }
  0xaa   : > { %v12727_v28 = vsub.f32 %v12315_v6, %v519_v48  ;;  %v408_v47 = vpop.xlane.xlu1 %407  ;;  %v12730_v8 = vsub.f32 %v12318_v7, %v519_v48  ;;  %v12733_v22 = vsub.f32 %v12323_v9, %v519_v48  ;;  %v522_v9 = vmul.f32 0.0038461538, %v403_v59 }
  0xab   : > { %v389_v27 = vpop.xlane.xlu0 %388  ;;  %v523_v16 = vmul.f32 0.0038461538, %v408_v47 }
  0xac   : > { %16410 = vst [vmem:[#allocation55_spill] sm:$0xff] %v12727_v28  ;;  %16411 = vst [vmem:[#allocation56_spill] sm:$0xff] %v12730_v8  ;;  %v615_v52 = vmul.f32 %v12727_v28, %v12727_v28  ;;  %v616_v4 = vmul.f32 %v12730_v8, %v12730_v8  ;;  %v617_v6 = vmul.f32 %v12733_v22, %v12733_v22  ;;  %v520_v38 = vmul.f32 0.0038461538, %v389_v27 }
  0xad   : > { %16412 = vst [vmem:[#allocation57_spill] sm:$0xff] %v12733_v22  ;;  %v12742_v7 = vsub.f32 %v12331_v12, %v523_v16  ;;  %v12745_v48 = vsub.f32 %v12338_v17, %v523_v16  ;;  %v12748_v47 = vsub.f32 %v12308_v3, %v523_v16  ;;  %v12763_v3 = vsub.f32 %v12299_v0, %v522_v9 }
  0xae   : > { %v415_v31 = vpop.xlane.xlu1 %414  ;;  %v687_v15 = vadd.f32 %v616_v4, %v615_v52  ;;  %v688_v28 = vsel %vm380_vm0, %v617_v6, 0.0  ;;  %v12752_v37 = vsub.f32 %v12341_v18, %v520_v38  ;;  %v12757_v12 = vsub.f32 %v12344_v19, %v520_v38 }
  0xaf   : > { %v398_v36 = vpop.xlane.xlu0 %397  ;;  %16413 = vst [vmem:[#allocation58_spill] sm:$0xff] %v12748_v47  ;;  %v524_v22 = vmul.f32 0.0038461538, %v415_v31  ;;  %v627_v27 = vmul.f32 %v12742_v7, %v12742_v7  ;;  %v12760_v59 = vsub.f32 %v12326_v10, %v520_v38  ;;  %v12766_v16 = vsub.f32 %v12302_v1, %v522_v9 }
  0xb0   : > { %v689_v17 = vadd.f32 %v688_v28, %v687_v15  ;;  %v628_v18 = vmul.f32 %v12745_v48, %v12745_v48  ;;  %v629_v31 = vmul.f32 %v12748_v47, %v12748_v47  ;;  %v12773_v19 = vsub.f32 %v12305_v2, %v522_v9 }
  0xb1   : > { %v521_v4 = vmul.f32 0.0038461538, %v398_v36  ;;  %v618_v15 = vmul.f32 %v12752_v37, %v12752_v37  ;;  %v12778_v28 = vsub.f32 %v12351_v24, %v524_v22  ;;  %v12781_v1 = vsub.f32 %v12354_v25, %v524_v22 }
  0xb2   : > { %v425_v8 = vpop.xlane.xlu1 %424  ;;  %690 = vadd.xlane.f32.xlu1 %v689_v17  ;;  %v709_v38 = vadd.f32 %v628_v18, %v627_v27  ;;  %v12784_v47 = vsub.f32 %v12357_v26, %v524_v22  ;;  %v710_v2 = vsel %vm380_vm0, %v629_v31, 0.0  ;;  %v619_v36 = vmul.f32 %v12757_v12, %v12757_v12 }
  0xb3   : > { %v420_v52 = vpop.xlane.xlu0 %419  ;;  %v526_v10 = vmul.f32 0.0038461538, %v425_v8  ;;  %v620_v8 = vmul.f32 %v12760_v59, %v12760_v59  ;;  %v624_v24 = vmul.f32 %v12763_v3, %v12763_v3  ;;  %v625_v25 = vmul.f32 %v12766_v16, %v12766_v16 }
  0xb4   : > { %v525_v6 = vmul.f32 0.0038461538, %v420_v52  ;;  %v711_v9 = vadd.f32 %v710_v2, %v709_v38  ;;  %v692_v22 = vadd.f32 %v619_v36, %v618_v15  ;;  %v12803_v18 = vsub.f32 %v12368_v29, %v521_v4 }
  0xb5   : > { %v12796_v27 = vsub.f32 %v12391_v39, %v526_v10  ;;  %v12799_v26 = vsub.f32 %v12394_v40, %v526_v10  ;;  %v693_v52 = vsel %vm380_vm0, %v620_v8, 0.0  ;;  %v12806_v31 = vsub.f32 %v12375_v34, %v521_v4 }
  0xb6   : > { %v442_v0 = vpop.xlane.xlu1 %441  ;;  %v12812_v38 = vsub.f32 %v12404_v45, %v525_v6  ;;  %712 = vadd.xlane.f32.xlu1 %v711_v9  ;;  %v12815_v39 = vsub.f32 %v12407_v46, %v525_v6  ;;  %v12818_v40 = vsub.f32 %v12414_v50, %v525_v6  ;;  %v694_v15 = vadd.f32 %v693_v52, %v692_v22 }
  0xb7   : > { %v529_v17 = vmul.f32 0.0038461538, %v442_v0  ;;  %v12809_v0 = vsub.f32 %v12401_v44, %v526_v10  ;;  %v437_v2 = vpop.xlane.xlu0 %436  ;;  %v626_v29 = vmul.f32 %v12773_v19, %v12773_v19  ;;  %v704_v10 = vadd.f32 %v625_v25, %v624_v24 }
  0xb8   : > { %16415 = vst [vmem:[#allocation60_spill] sm:$0xff] %v12818_v40  ;;  %v528_v45 = vmul.f32 0.0038461538, %v437_v2  ;;  %695 = vadd.xlane.f32.xlu0 %v694_v15  ;;  %v636_v6 = vmul.f32 %v12796_v27, %v12796_v27  ;;  %v637_v36 = vmul.f32 %v12799_v26, %v12799_v26  ;;  %v633_v25 = vmul.f32 %v12812_v38, %v12812_v38 }
  0xb9   : > { %16414 = vst [vmem:[#allocation59_spill] sm:$0xff] %v12809_v0  ;;  %v12823_v34 = vsub.f32 %v12423_v55, %v529_v17  ;;  %v12826_v44 = vsub.f32 %v12426_v56, %v529_v17  ;;  %v12829_v46 = vsub.f32 %v12429_v57, %v529_v17  ;;  %v705_v50 = vsel %vm380_vm0, %v626_v29, 0.0 }
  0xba   : > { %v12837_v55 = vsub.f32 %v12378_v35, %v521_v4  ;;  %v12840_v56 = vsub.f32 %v12436_v62, %v528_v45  ;;  %v12843_v8 = vsub.f32 %v12439_v63, %v528_v45  ;;  %v12846_v57 = vsub.f32 %v12442_v5, %v528_v45 }
  0xbb   : > { %16416 = vst [vmem:[#allocation61_spill] sm:$0xff] %v12829_v46  ;;  %v706_v9 = vadd.f32 %v705_v50, %v704_v10  ;;  %v638_v17 = vmul.f32 %v12809_v0, %v12809_v0  ;;  %v726_v24 = vadd.f32 %v637_v36, %v636_v6  ;;  %v634_v35 = vmul.f32 %v12815_v39, %v12815_v39 }
  0xbc   : > { %16417 = vst [vmem:[#allocation62_spill] sm:$0xff] %v12846_v57  ;;  %v635_v62 = vmul.f32 %v12818_v40, %v12818_v40  ;;  %v645_v63 = vmul.f32 %v12823_v34, %v12823_v34  ;;  %v646_v5 = vmul.f32 %v12826_v44, %v12826_v44  ;;  %v647_v22 = vmul.f32 %v12829_v46, %v12829_v46 }
  0xbd   : > { %707 = vadd.xlane.f32.xlu0 %v706_v9  ;;  %v727_v4 = vsel %vm380_vm0, %v638_v17, 0.0  ;;  %v642_v52 = vmul.f32 %v12840_v56, %v12840_v56  ;;  %v643_v15 = vmul.f32 %v12843_v8, %v12843_v8  ;;  %v721_v29 = vadd.f32 %v634_v35, %v633_v25 }
  0xbe   : > { %v728_v2 = vadd.f32 %v727_v4, %v726_v24  ;;  %v722_v45 = vsel %vm380_vm0, %v635_v62, 0.0  ;;  %v743_v10 = vadd.f32 %v646_v5, %v645_v63  ;;  %v744_v50 = vsel %vm380_vm0, %v647_v22, 0.0 }
  0xbf   : > { %v644_v6 = vmul.f32 %v12846_v57, %v12846_v57  ;;  %v738_v36 = vadd.f32 %v643_v15, %v642_v52  ;;  %v630_v9 = vmul.f32 %v12778_v28, %v12778_v28  ;;  %v723_v17 = vadd.f32 %v722_v45, %v721_v29 }
  0xc0   : > { %729 = vadd.xlane.f32.xlu1 %v728_v2  ;;  %v745_v46 = vadd.f32 %v744_v50, %v743_v10  ;;  %v631_v40 = vmul.f32 %v12781_v1, %v12781_v1  ;;  %v632_v24 = vmul.f32 %v12784_v47, %v12784_v47  ;;  %v621_v62 = vmul.f32 %v12803_v18, %v12803_v18  ;;  %v12890_v50 = vld [vmem:[%s12694_s11 + $0x38] sm:$0xff] }
  0xc1   : > { %v739_v25 = vsel %vm380_vm0, %v644_v6, 0.0  ;;  %v714_v35 = vsel %vm390_vm1, %v630_v9, 0.0  ;;  %v622_v63 = vmul.f32 %v12806_v31, %v12806_v31  ;;  %724 = vadd.xlane.f32.xlu0 %v723_v17  ;;  %v623_v52 = vmul.f32 %v12837_v55, %v12837_v55  ;;  %v449_v9 = vpop.xlane.xlu1 %448  ;;  %v432_v17 = vpop.xlane.xlu0 %431 }
  0xc2   : > { %v740_v5 = vadd.f32 %v739_v25, %v738_v36  ;;  %v715_v4 = vsel %vm390_vm1, %v631_v40, 0.0  ;;  %v697_v15 = vsel %vm390_vm1, %v621_v62, 0.0  ;;  %v717_v45 = vsel %vm394_vm2, %v632_v24, 0.0  ;;  %v12894_v36 = vld [vmem:[%s12694_s11 + $0x30] sm:$0xff] }
  0xc3   : > { %v716_v22 = vadd.f32 %v715_v4, %v714_v35  ;;  %v698_v2 = vsel %vm390_vm1, %v622_v63, 0.0  ;;  %v700_v40 = vsel %vm394_vm2, %v623_v52, 0.0  ;;  %v12899_v25 = vld [vmem:[%s12694_s11 + $0x50] sm:$0xff]  ;;  %v2363_v24 = vsel %vm2343_vm3, %v12894_v36, 0.0  ;;  %v12904_v35 = vld [vmem:[%s12694_s11 + $0x48] sm:$0xff] }
  0xc4   : > { %746 = vadd.xlane.f32.xlu1 %v745_v46  ;;  %v699_v29 = vadd.f32 %v698_v2, %v697_v15  ;;  %v2366_v46 = vsel %vm2343_vm3, %v12890_v50, 0.0  ;;  %v530_v62 = vmul.f32 0.0038461538, %v449_v9  ;;  %v527_v63 = vmul.f32 0.0038461538, %v432_v17 }
  0xc5   : > { %741 = vadd.xlane.f32.xlu0 %v740_v5  ;;  %v718_v10 = vadd.f32 %v717_v45, %v716_v22  ;;  %v2375_v5 = vsel %vm2343_vm3, %v12899_v25, 0.0  ;;  %v2372_v4 = vsel %vm2343_vm3, %v12904_v35, 0.0  ;;  %v12911_v22 = vld [vmem:[%s12694_s11 + $0x58] sm:$0xf]  ;;  %v12926_v45 = vld [vmem:[%s12694_s11 + $0x40] sm:$0xf] }
  0xc6   : > { %v701_v6 = vadd.f32 %v700_v40, %v699_v29  ;;  %v12914_v52 = vsub.f32 %v12449_v13, %v530_v62  ;;  %v12917_v15 = vsub.f32 %v12452_v14, %v530_v62  ;;  %v12920_v2 = vsub.f32 %v12466_v23, %v527_v63  ;;  %v12939_v23 = vld [vmem:[%s12694_s11 + $0x68] sm:$0xff] }
  0xc7   : > { %v12923_v29 = vsub.f32 %v12469_v30, %v527_v63  ;;  %v12932_v40 = vsub.f32 %v12478_v41, %v527_v63  ;;  %v2378_v13 = vsel %vm2350_vm4, %v12911_v22, 0.0  ;;  %v2369_v14 = vsel %vm2350_vm4, %v12926_v45, 0.0  ;;  %v12942_v30 = vld [vmem:[%s12694_s11 + $0x60] sm:$0xff]  ;;  %v454_v63 = vpop.xlane.xlu0 %453 }
  0xc8   : > { %719 = vadd.xlane.f32.xlu1 %v718_v10  ;;  %16418 = vst [vmem:[#allocation63_spill] sm:$0xff] %v12914_v52  ;;  %16419 = vst [vmem:[#allocation64_spill] sm:$0xff] %v12917_v15  ;;  %v12929_v10 = vsub.f32 %v12455_v20, %v530_v62  ;;  %v648_v9 = vmul.f32 %v12914_v52, %v12914_v52  ;;  %v649_v20 = vmul.f32 %v12917_v15, %v12917_v15  ;;  %v12970_v52 = vld [vmem:[%s12694_s11 + $0x80] sm:$0xff] }
  0xc9   : > { %702 = vadd.xlane.f32.xlu0 %v701_v6  ;;  %16420 = vst [vmem:[#allocation65_spill] sm:$0xff] %v12920_v2  ;;  %16421 = vst [vmem:[#allocation66_spill] sm:$0xff] %v12923_v29  ;;  %v459_v6 = vpop.xlane.xlu1 %458  ;;  %v639_v41 = vmul.f32 %v12920_v2, %v12920_v2  ;;  %v640_v17 = vmul.f32 %v12923_v29, %v12923_v29  ;;  %v2381_v62 = vsel %vm2343_vm3, %v12942_v30, 0.0  ;;  %v531_v0 = vmul.f32 0.0038461538, %v454_v63  ;;  %v12973_v2 = vld [vmem:[%s12694_s11 + $0x78] sm:$0xff] }
  0xca   : > { %16422 = vst [vmem:[#allocation67_spill] sm:$0xff] %v12929_v10  ;;  %16423 = vst [vmem:[#allocation68_spill] sm:$0xff] %v12932_v40  ;;  %v749_v29 = vsel %vm390_vm1, %v649_v20, 0.0  ;;  %v2390_v20 = vsel %vm2343_vm3, %v12973_v2, 0.0 }
  0xcc   : > { %2367 = vadd.xlane.f32.xlu1 %v2366_v46  ;;  %v532_v46 = vmul.f32 0.0038461538, %v459_v6 }
  0xcd   : > { %2364 = vadd.xlane.f32.xlu0 %v2363_v24  ;;  %v2384_v24 = vsel %vm2343_vm3, %v12939_v23, 0.0 }
  0xce   : > { %v12961_v57 = vsub.f32 %v12493_v53, %v532_v46  ;;  %v12967_v6 = vsub.f32 %v12499_v58, %v532_v46  ;;  %v732_v53 = vsel %vm390_vm1, %v640_v17, 0.0  ;;  %v12983_v58 = vsub.f32 %v12505_v61, %v531_v0  ;;  %v476_v61 = vpop.xlane.xlu1 %475 }
  0xd0   : > { %2376 = vadd.xlane.f32.xlu1 %v2375_v5  ;;  %v650_v5 = vmul.f32 %v12929_v10, %v12929_v10  ;;  %16424 = vst [vmem:[#allocation69_spill] sm:$0xff] %v12961_v57  ;;  %16426 = vst [vmem:[#allocation71_spill] sm:$0xff] %v12967_v6  ;;  %v748_v10 = vsel %vm390_vm1, %v648_v9, 0.0  ;;  %v654_v63 = vmul.f32 %v12961_v57, %v12961_v57  ;;  %v2393_v9 = vsel %vm2343_vm3, %v12970_v52, 0.0 }
  0xd1   : > { %2373 = vadd.xlane.f32.xlu0 %v2372_v4  ;;  %v641_v4 = vmul.f32 %v12932_v40, %v12932_v40  ;;  %v750_v17 = vadd.f32 %v749_v29, %v748_v10  ;;  %v535_v57 = vmul.f32 0.0038461538, %v476_v61 }
  0xd2   : > { %v751_v40 = vsel %vm394_vm2, %v650_v5, 0.0 }
  0xd3   : > { %v734_v15 = vsel %vm394_vm2, %v641_v4, 0.0  ;;  %v13010_v29 = vsub.f32 %v12522_v43, %v535_v57  ;;  %v13013_v10 = vsub.f32 %v12527_v51, %v535_v57  ;;  %v752_v4 = vadd.f32 %v751_v40, %v750_v17  ;;  %v16431_v40 = vld [vmem:[#allocation14_spill] sm:$0xff] }
  0xd4   : > { %2379 = vadd.xlane.f32.xlu1 %v2378_v13  ;;  %v12964_v13 = vsub.f32 %v12496_v54, %v532_v46  ;;  %v12980_v54 = vsub.f32 %v12502_v60, %v531_v0  ;;  %v12986_v46 = vsub.f32 %v12512_v11, %v531_v0  ;;  %v656_v60 = vmul.f32 %v12967_v6, %v12967_v6 }
  0xd5   : > { %2370 = vadd.xlane.f32.xlu0 %v2369_v14  ;;  %v731_v14 = vsel %vm390_vm1, %v639_v41, 0.0  ;;  %16430 = vst [vmem:[#allocation75_spill] sm:$0xff] %v13013_v10  ;;  %v664_v43 = vmul.f32 %v13010_v29, %v13010_v29  ;;  %v665_v51 = vmul.f32 %v13013_v10, %v13013_v10  ;;  %v13096_v10 = vld [vmem:[%s12694_s11 + $0xa8] sm:$0xff] }
  0xd6   : > { %16425 = vst [vmem:[#allocation70_spill] sm:$0xff] %v12964_v13  ;;  %16427 = vst [vmem:[#allocation72_spill] sm:$0xff] %v12980_v54  ;;  %v655_v41 = vmul.f32 %v12964_v13, %v12964_v13  ;;  %v733_v11 = vadd.f32 %v732_v53, %v731_v14  ;;  %v651_v0 = vmul.f32 %v12980_v54, %v12980_v54  ;;  %v471_v14 = vpop.xlane.xlu0 %470  ;;  %v761_v53 = vsel %vm380_vm0, %v656_v60, 0.0 }
  0xd7   : > { %16428 = vst [vmem:[#allocation73_spill] sm:$0xff] %v12986_v46  ;;  %v653_v13 = vmul.f32 %v12986_v46, %v12986_v46  ;;  %v534_v5 = vmul.f32 0.0038461538, %v471_v14 }
  0xd8   : > { %2385 = vadd.xlane.f32.xlu1 %v2384_v24  ;;  %v652_v24 = vmul.f32 %v12983_v58, %v12983_v58  ;;  %v760_v6 = vadd.f32 %v655_v41, %v654_v63  ;;  %v735_v61 = vadd.f32 %v734_v15, %v733_v11  ;;  %v778_v41 = vsel %vm380_vm0, %v665_v51, 0.0 }
  0xd9   : > { %2382 = vadd.xlane.f32.xlu0 %v2381_v62  ;;  %v13007_v62 = vsub.f32 %v12519_v32, %v535_v57  ;;  %v13024_v57 = vsub.f32 %v12532_v33, %v534_v5  ;;  %v13027_v63 = vsub.f32 %v12535_v21, %v534_v5  ;;  %v13030_v15 = vsub.f32 %v16431_v40, %v534_v5  ;;  %v13041_v5 = vld [vmem:[%s12694_s11 + $0x88] sm:$0xf] }
  0xda   : > { %v755_v54 = vadd.f32 %v652_v24, %v651_v0  ;;  %v466_v60 = vpop.xlane.xlu0 %465  ;;  %v2396_v40 = vsel %vm2350_vm4, %v13041_v5, 0.0 }
  0xdb   : > { %16429 = vst [vmem:[#allocation74_spill] sm:$0xff] %v13007_v62  ;;  %v663_v32 = vmul.f32 %v13007_v62, %v13007_v62  ;;  %16432 = vst [vmem:[#allocation14_spill] sm:$0xff] %v13030_v15  ;;  %v660_v33 = vmul.f32 %v13024_v57, %v13024_v57  ;;  %v661_v21 = vmul.f32 %v13027_v63, %v13027_v63  ;;  %v533_v14 = vmul.f32 0.0038461538, %v466_v60  ;;  %v16439_v60 = vld [vmem:[#allocation21_spill] sm:$0xff] }
  0xdc   : > { %2394 = vadd.xlane.f32.xlu1 %v2393_v9  ;;  %v756_v9 = vsel %vm380_vm0, %v653_v13, 0.0  ;;  %v762_v13 = vadd.f32 %v761_v53, %v760_v6  ;;  %v662_v11 = vmul.f32 %v13030_v15, %v13030_v15 }
  0xdd   : > { %2391 = vadd.xlane.f32.xlu0 %v2390_v20  ;;  %v777_v20 = vadd.f32 %v664_v43, %v663_v32  ;;  %v757_v17 = vadd.f32 %v756_v9, %v755_v54  ;;  %v772_v0 = vadd.f32 %v661_v21, %v660_v33  ;;  %v16433_v54 = vld [vmem:[#allocation15_spill] sm:$0xff]  ;;  %v13047_v9 = vld [vmem:[%s12694_s11 + $0x70] sm:$0xf]  ;;  %v16441_v33 = vld [vmem:[#allocation22_spill] sm:$0xff] }
  0xde   : > { %v773_v24 = vsel %vm380_vm0, %v662_v11, 0.0  ;;  %v16435_v32 = vld [vmem:[#allocation16_spill] sm:$0xff]  ;;  %v2387_v11 = vsel %vm2350_vm4, %v13047_v9, 0.0 }
  0xdf   : > { %v779_v6 = vadd.f32 %v778_v41, %v777_v20  ;;  %v774_v53 = vadd.f32 %v773_v24, %v772_v0  ;;  %v13050_v43 = vsub.f32 %v16435_v32, %v533_v14  ;;  %v16437_v20 = vld [vmem:[#allocation20_spill] sm:$0xff] }
  0xe0   : > { %753 = vadd.xlane.f32.xlu1 %v752_v4  ;;  %v13044_v4 = vsub.f32 %v16433_v54, %v533_v14 }
  0xe1   : > { %736 = vadd.xlane.f32.xlu0 %v735_v61  ;;  %v483_v61 = vpop.xlane.xlu1 %482  ;;  %16436 = vst [vmem:[#allocation16_spill] sm:$0xff] %v13050_v43 }
  0xe2   : > { %16434 = vst [vmem:[#allocation15_spill] sm:$0xff] %v13044_v4  ;;  %v536_v51 = vmul.f32 0.0038461538, %v483_v61  ;;  %v657_v54 = vmul.f32 %v13044_v4, %v13044_v4  ;;  %v13079_v61 = vld [vmem:[%s12694_s11 + $0xb0] sm:$0xff] }
  0xe4   : > { %763 = vadd.xlane.f32.xlu1 %v762_v13  ;;  %v13055_v13 = vld [vmem:[%s12694_s11 + $0x98] sm:$0xff]  ;;  %v13058_v41 = vsub.f32 %v16437_v20, %v536_v51  ;;  %v13064_v21 = vsub.f32 %v16441_v33, %v536_v51  ;;  %v765_v46 = vsel %vm390_vm1, %v657_v54, 0.0 }
  0xe5   : > { %758 = vadd.xlane.f32.xlu0 %v757_v17  ;;  %v13061_v17 = vsub.f32 %v16439_v60, %v536_v51  ;;  %v2402_v24 = vsel %vm2343_vm3, %v13055_v13, 0.0 }
  0xe6   : > { %16438 = vst [vmem:[#allocation20_spill] sm:$0xff] %v13058_v41  ;;  %16442 = vst [vmem:[#allocation22_spill] sm:$0xff] %v13064_v21  ;;  %v666_v32 = vmul.f32 %v13058_v41, %v13058_v41 }
  0xe7   : > { %16440 = vst [vmem:[#allocation21_spill] sm:$0xff] %v13061_v17  ;;  %v667_v51 = vmul.f32 %v13061_v17, %v13061_v17 }
  0xe8   : > { %780 = vadd.xlane.f32.xlu1 %v779_v6  ;;  %v16443_v6 = vld [vmem:[#allocation17_spill] sm:$0xff]  ;;  %v782_v60 = vsel %vm390_vm1, %v666_v32, 0.0 }
  0xe9   : > { %775 = vadd.xlane.f32.xlu0 %v774_v53  ;;  %v13069_v0 = vsub.f32 %v16443_v6, %v533_v14  ;;  %v13074_v53 = vld [vmem:[%s12694_s11 + $0x90] sm:$0xff]  ;;  %v668_v14 = vmul.f32 %v13064_v21, %v13064_v21  ;;  %v783_v33 = vsel %vm390_vm1, %v667_v51, 0.0  ;;  %v2411_v6 = vsel %vm2343_vm3, %v13079_v61, 0.0 }
  0xea   : > { %v2399_v20 = vsel %vm2343_vm3, %v13074_v53, 0.0  ;;  %v784_v21 = vadd.f32 %v783_v33, %v782_v60  ;;  %v13107_v60 = vld [vmem:[%s12694_s11 + $0xb8] sm:$0xf]  ;;  %v13110_v33 = vld [vmem:[%s12694_s11 + $0xa0] sm:$0xf] }
  0xeb   : > { %16444 = vst [vmem:[#allocation17_spill] sm:$0xff] %v13069_v0  ;;  %v785_v15 = vsel %vm394_vm2, %v668_v14, 0.0  ;;  %16445 = vst [vmem:[#allocation76_spill] sm:$0xff] %v13107_v60  ;;  %v2414_v54 = vsel %vm2350_vm4, %v13107_v60, 0.0 }
  0xec   : > { %2397 = vadd.xlane.f32.xlu1 %v2396_v40  ;;  %v658_v40 = vmul.f32 %v13050_v43, %v13050_v43  ;;  %v786_v51 = vadd.f32 %v785_v15, %v784_v21  ;;  %16446 = vst [vmem:[#allocation77_spill] sm:$0xff] %v13110_v33  ;;  %v16449_v21 = vld [vmem:[#allocation28_spill] sm:$0xff] }
  0xed   : > { %2388 = vadd.xlane.f32.xlu0 %v2387_v11  ;;  %v659_v11 = vmul.f32 %v13069_v0, %v13069_v0 }
  0xee   : > { %v766_v32 = vsel %vm390_vm1, %v658_v40, 0.0  ;;  %v493_v40 = vpop.xlane.xlu1 %492 }
  0xef   : > { %v767_v41 = vadd.f32 %v766_v32, %v765_v46  ;;  %v768_v4 = vsel %vm394_vm2, %v659_v11, 0.0  ;;  %v16447_v46 = vld [vmem:[#allocation27_spill] sm:$0xff]  ;;  %v16451_v32 = vld [vmem:[#allocation29_spill] sm:$0xff] }
  0xf0   : > { %2403 = vadd.xlane.f32.xlu1 %v2402_v24  ;;  %v2408_v24 = vsel %vm2343_vm3, %v13096_v10, 0.0 }
  0xf1   : > { %2400 = vadd.xlane.f32.xlu0 %v2399_v20  ;;  %v769_v14 = vadd.f32 %v768_v4, %v767_v41  ;;  %v538_v20 = vmul.f32 0.0038461538, %v493_v40  ;;  %v488_v41 = vpop.xlane.xlu0 %487 }
  0xf3   : > { %v13117_v15 = vsub.f32 %v16447_v46, %v538_v20  ;;  %v13120_v11 = vsub.f32 %v16449_v21, %v538_v20  ;;  %v13123_v4 = vsub.f32 %v16451_v32, %v538_v20  ;;  %v16453_v21 = vld [vmem:[#allocation30_spill] sm:$0xff]  ;;  %v16455_v20 = vld [vmem:[#allocation31_spill] sm:$0xff] }
  0xf4   : > { %2412 = vadd.xlane.f32.xlu1 %v2411_v6  ;;  %v2405_v6 = vsel %vm2350_vm4, %v13110_v33, 0.0 }
  0xf5   : > { %2409 = vadd.xlane.f32.xlu0 %v2408_v24  ;;  %16448 = vst [vmem:[#allocation27_spill] sm:$0xff] %v13117_v15  ;;  %16450 = vst [vmem:[#allocation28_spill] sm:$0xff] %v13120_v11  ;;  %v672_v24 = vmul.f32 %v13117_v15, %v13117_v15  ;;  %v510_v15 = vpop.xlane.xlu1 %509  ;;  %v505_v33 = vpop.xlane.xlu0 %504 }
  0xf6   : > { %16452 = vst [vmem:[#allocation29_spill] sm:$0xff] %v13123_v4  ;;  %v541_v17 = vmul.f32 0.0038461538, %v510_v15  ;;  %v540_v60 = vmul.f32 0.0038461538, %v505_v33  ;;  %v16463_v33 = vld [vmem:[#allocation34_spill] sm:$0xff] }
  0xf8   : > { %787 = vadd.xlane.f32.xlu1 %v786_v51  ;;  %v673_v51 = vmul.f32 %v13120_v11, %v13120_v11 }
  0xf9   : > { %770 = vadd.xlane.f32.xlu0 %v769_v14  ;;  %v674_v14 = vmul.f32 %v13123_v4, %v13123_v4 }
  0xfa   : > { %v794_v40 = vadd.f32 %v673_v51, %v672_v24 }
  0xfb   : > { %v795_v46 = vsel %vm380_vm0, %v674_v14, 0.0  ;;  %v13148_v14 = vsub.f32 %v12619_v49, %v541_v17 }
  0xfc   : > { %2415 = vadd.xlane.f32.xlu1 %v2414_v54  ;;  %v537_v54 = vmul.f32 0.0038461538, %v488_v41  ;;  %v796_v11 = vadd.f32 %v795_v46, %v794_v40  ;;  %v13157_v40 = vsub.f32 %v16463_v33, %v540_v60  ;;  %v16465_v46 = vld [vmem:[#allocation35_spill] sm:$0xff] }
  0xfd   : > { %2406 = vadd.xlane.f32.xlu0 %v2405_v6  ;;  %v16457_v6 = vld [vmem:[#allocation32_spill] sm:$0xff]  ;;  %16459 = vst [vmem:[#allocation78_spill] sm:$0xff] %v13148_v14 }
  0xfe   : > { %v13133_v0 = vsub.f32 %v16453_v21, %v537_v54  ;;  %v13136_v32 = vsub.f32 %v16455_v20, %v537_v54  ;;  %v13139_v43 = vsub.f32 %v16457_v6, %v537_v54  ;;  %v13151_v54 = vsub.f32 %v12622_v42, %v541_v17  ;;  %v16461_v21 = vld [vmem:[#allocation33_spill] sm:$0xff]  ;;  %16464 = vst [vmem:[#allocation34_spill] sm:$0xff] %v13157_v40  ;;  %v16467_v6 = vld [vmem:[#allocation36_spill] sm:$0xff] }
  0xff   : > { %v13154_v15 = vsub.f32 %v16461_v21, %v541_v17  ;;  %v13160_v20 = vsub.f32 %v16465_v46, %v540_v60  ;;  %v13163_v4 = vsub.f32 %v16467_v6, %v540_v60  ;;  %v681_v42 = vmul.f32 %v13148_v14, %v13148_v14  ;;  %v517_v46 = vpop.xlane.xlu1 %516 }
 0x100   : > { %16454 = vst [vmem:[#allocation30_spill] sm:$0xff] %v13133_v0  ;;  %16456 = vst [vmem:[#allocation31_spill] sm:$0xff] %v13136_v32  ;;  %v669_v41 = vmul.f32 %v13133_v0, %v13133_v0  ;;  %v670_v24 = vmul.f32 %v13136_v32, %v13136_v32  ;;  %v671_v51 = vmul.f32 %v13139_v43, %v13139_v43  ;;  %797 = vadd.xlane.f32.xlu1 %v796_v11 }
 0x101   : > { %16458 = vst [vmem:[#allocation32_spill] sm:$0xff] %v13139_v43  ;;  %16460 = vst [vmem:[#allocation79_spill] sm:$0xff] %v13151_v54  ;;  %v682_v17 = vmul.f32 %v13151_v54, %v13151_v54  ;;  %v683_v11 = vmul.f32 %v13154_v15, %v13154_v15  ;;  %v678_v33 = vmul.f32 %v13157_v40, %v13157_v40  ;;  %v542_v54 = vmul.f32 0.0038461538, %v517_v46  ;;  %v16469_v40 = vld [vmem:[#allocation38_spill] sm:$0xff] }
 0x102   : > { %16462 = vst [vmem:[#allocation33_spill] sm:$0xff] %v13154_v15  ;;  %16466 = vst [vmem:[#allocation35_spill] sm:$0xff] %v13160_v20  ;;  %v789_v43 = vadd.f32 %v670_v24, %v669_v41  ;;  %v790_v49 = vsel %vm380_vm0, %v671_v51, 0.0  ;;  %v679_v60 = vmul.f32 %v13160_v20, %v13160_v20  ;;  %v680_v41 = vmul.f32 %v13163_v4, %v13163_v4  ;;  %v16470_v20 = vld [vmem:[#allocation39_spill] sm:$0xff] }
 0x103   : > { %v811_v24 = vadd.f32 %v682_v17, %v681_v42  ;;  %v812_v51 = vsel %vm380_vm0, %v683_v11, 0.0  ;;  %v13184_v32 = vsub.f32 %v16469_v40, %v542_v54  ;;  %v13187_v62 = vsub.f32 %v16470_v20, %v542_v54  ;;  %v500_v42 = vpop.xlane.xlu0 %499  ;;  %v16474_v40 = vld [vmem:[#allocation43_spill] sm:$0xff] }
 0x104   : > { %v791_v21 = vadd.f32 %v790_v49, %v789_v43  ;;  %v806_v6 = vadd.f32 %v679_v60, %v678_v33  ;;  %v807_v14 = vsel %vm380_vm0, %v680_v41, 0.0  ;;  %v16468_v49 = vld [vmem:[#allocation37_spill] sm:$0xff]  ;;  %v539_v17 = vmul.f32 0.0038461538, %v500_v42 }
 0x105   : > { %v813_v15 = vadd.f32 %v812_v51, %v811_v24  ;;  %v13181_v0 = vsub.f32 %v16468_v49, %v542_v54  ;;  %16471 = vst [vmem:[#allocation36_spill] sm:$0xff] %v13187_v62  ;;  %v16472_v33 = vld [vmem:[#allocation41_spill] sm:$0xff] }
 0x106   : > { %792 = vadd.xlane.f32.xlu0 %v791_v21  ;;  %v808_v43 = vadd.f32 %v807_v14, %v806_v6  ;;  %v685_v21 = vmul.f32 %v13184_v32, %v13184_v32  ;;  %v686_v14 = vmul.f32 %v13187_v62, %v13187_v62  ;;  %v13196_v60 = vsub.f32 %v16472_v33, %v539_v17  ;;  %v16476_v54 = vld [vmem:[#allocation45_spill] sm:$0xff] }
 0x107   : > { %814 = vadd.xlane.f32.xlu1 %v813_v15  ;;  %v684_v11 = vmul.f32 %v13181_v0, %v13181_v0  ;;  %v13199_v41 = vsub.f32 %v16474_v40, %v539_v17  ;;  %v13202_v15 = vsub.f32 %v16476_v54, %v539_v17  ;;  %v2349_v40 = vpop.xlane.xlu1 %2348  ;;  %v16478_v62 = vld [vmem:[#allocation49_spill] sm:$0xff] }
 0x108   : > { %16473 = vst [vmem:[#allocation37_spill] sm:$0xff] %v13196_v60  ;;  %v817_v24 = vsel %vm390_vm1, %v685_v21, 0.0  ;;  %v819_v51 = vsel %vm394_vm2, %v686_v14, 0.0  ;;  %v675_v6 = vmul.f32 %v13196_v60, %v13196_v60  ;;  %v2419_v54 = vmul.f32 0.05, %v2349_v40 }
 0x109   : > { %16475 = vst [vmem:[#allocation38_spill] sm:$0xff] %v13199_v41  ;;  %16477 = vst [vmem:[#allocation39_spill] sm:$0xff] %v13202_v15  ;;  %v816_v20 = vsel %vm390_vm1, %v684_v11, 0.0  ;;  %v677_v49 = vmul.f32 %v13202_v15, %v13202_v15 }
 0x10a   : > { %809 = vadd.xlane.f32.xlu0 %v808_v43  ;;  %v818_v46 = vadd.f32 %v817_v24, %v816_v20  ;;  %v676_v43 = vmul.f32 %v13199_v41, %v13199_v41  ;;  %v799_v17 = vsel %vm390_vm1, %v675_v6, 0.0  ;;  %v2346_v20 = vpop.xlane.xlu0 %2345  ;;  %v13217_v60 = vsub.f32 %v16478_v62, %v2419_v54  ;;  %v16480_v41 = vld [vmem:[#allocation50_spill] sm:$0xff]  ;;  %v16484_v62 = vld [vmem:[#allocation52_spill] sm:$0xff] }
 0x10b   : > { %v802_v11 = vsel %vm394_vm2, %v677_v49, 0.0  ;;  %v2418_v24 = vmul.f32 0.05, %v2346_v20  ;;  %vm8655_vm2 = vcmask 1046534  }
 0x10c   : > { %v820_v42 = vadd.f32 %v819_v51, %v818_v46  ;;  %v800_v33 = vsel %vm390_vm1, %v676_v43, 0.0  ;;  %16479 = vst [vmem:[#allocation41_spill] sm:$0xff] %v13217_v60  ;;  %v2359_v51 = vpop.xlane.xlu1 %2358  ;;  %v2467_v43 = vmul.f32 %v13217_v60, %v13217_v60 }
 0x10d   : > { %v801_v21 = vadd.f32 %v800_v33, %v799_v17  ;;  %v13220_v15 = vsub.f32 %v16480_v41, %v2418_v24  ;;  %v2422_v46 = vmul.f32 0.05, %v2359_v51  ;;  %v16482_v17 = vld [vmem:[#allocation51_spill] sm:$0xff] }
 0x10e   : > { %821 = vadd.xlane.f32.xlu1 %v820_v42  ;;  %v2356_v6 = vpop.xlane.xlu0 %2355 }
 0x10f   : > { %v803_v14 = vadd.f32 %v802_v11, %v801_v21  ;;  %16481 = vst [vmem:[#allocation43_spill] sm:$0xff] %v13220_v15  ;;  %v2421_v49 = vmul.f32 0.05, %v2356_v6  ;;  %v2466_v42 = vmul.f32 %v13220_v15, %v13220_v15  ;;  %v13227_v33 = vsub.f32 %v16482_v17, %v2422_v46  ;;  %v16486_v46 = vld [vmem:[#allocation53_spill] sm:$0xff] }
 0x110   : > { %v2493_v11 = vsel %vm2343_vm3, %v2467_v43, 0.0  ;;  %v2362_v41 = vpop.xlane.xlu1 %2361 }
 0x111   : > { %804 = vadd.xlane.f32.xlu0 %v803_v14  ;;  %16483 = vst [vmem:[#allocation45_spill] sm:$0xff] %v13227_v33  ;;  %v13231_v21 = vsub.f32 %v16484_v62, %v2421_v49  ;;  %v2490_v14 = vsel %vm2343_vm3, %v2466_v42, 0.0  ;;  %v2423_v40 = vmul.f32 0.05, %v2362_v41  ;;  %v2470_v20 = vmul.f32 %v13227_v33, %v13227_v33  ;;  %v16488_v49 = vld [vmem:[#allocation54_spill] sm:$0xff] }
 0x112   : > { %2494 = vadd.xlane.f32.xlu1 %v2493_v11  ;;  %v2353_v54 = vpop.xlane.xlu0 %2352 }
 0x113   : > { %16485 = vst [vmem:[#allocation49_spill] sm:$0xff] %v13231_v21  ;;  %v2420_v24 = vmul.f32 0.05, %v2353_v54  ;;  %v2469_v51 = vmul.f32 %v13231_v21, %v13231_v21  ;;  %v13239_v6 = vsub.f32 %v16486_v46, %v2423_v40  ;;  %v2502_v43 = vsel %vm2343_vm3, %v2470_v20, 0.0  ;;  %v16490_v46 = vld [vmem:[#allocation56_spill] sm:$0xff] }
 0x115   : > { %2491 = vadd.xlane.f32.xlu0 %v2490_v14  ;;  %16487 = vst [vmem:[#allocation50_spill] sm:$0xff] %v13239_v6  ;;  %v13243_v17 = vsub.f32 %v16488_v49, %v2420_v24  ;;  %v2499_v42 = vsel %vm2343_vm3, %v2469_v51, 0.0  ;;  %v2471_v11 = vmul.f32 %v13239_v6, %v13239_v6 }
 0x116   : > { %2503 = vadd.xlane.f32.xlu1 %v2502_v43 }
 0x117   : > { %16489 = vst [vmem:[#allocation51_spill] sm:$0xff] %v13243_v17  ;;  %v2468_v62 = vmul.f32 %v13243_v17, %v13243_v17  ;;  %v2505_v41 = vsel %vm2350_vm4, %v2471_v11, 0.0 }
 0x119   : > { %2500 = vadd.xlane.f32.xlu0 %v2499_v42  ;;  %v2496_v14 = vsel %vm2350_vm4, %v2468_v62, 0.0 }
 0x11a   : > { %2506 = vadd.xlane.f32.xlu1 %v2505_v41 }
 0x11d   : > { %2497 = vadd.xlane.f32.xlu0 %v2496_v14 }
 0x13f   : > { %v691_v40 = vpop.xlane.xlu1 %690 }
 0x140   : > { %11505 = vrsqrt.f32 %v691_v40  ;;  %v16491_v40 = vld [vmem:[#allocation55_spill] sm:$0xff] }
 0x143   : > { %v713_v54 = vpop.xlane.xlu1 %712 }
 0x145   : > { %v696_v20 = vpop.xlane.xlu0 %695 }
 0x146   : > { %11507 = vrsqrt.f32 %v696_v20 }
 0x147   : > { %11509 = vrsqrt.f32 %v713_v54 }
 0x14a   : > { %v13252_v24 = vpop.eup %11505  ;;  %v708_v51 = vpop.xlane.xlu0 %707 }
 0x14b   : > { %v848_v43 = vmul.f32 %v13252_v24, %v16490_v46  ;;  %11511 = vrsqrt.f32 %v708_v51  ;;  %v13263_v54 = vmul.f32 %v13252_v24, %v16491_v40 }
 0x14d   : > { %992 = vmatprep.mubr.f32.mxu0 %v848_v43  ;;  %v730_v49 = vpop.xlane.xlu1 %729 }
 0x14e   : > { %v725_v42 = vpop.xlane.xlu0 %724 }
 0x150   : > { %v11508_v11 = vpop.eup %11507 }
 0x151   : > { %v747_v41 = vpop.xlane.xlu1 %746  ;;  %v13256_v62 = vpop.eup %11509  ;;  %v13259_v14 = vmul.f32 %v11508_v11, %v12757_v12  ;;  %v13266_v20 = vmul.f32 %v11508_v11, %v12752_v37 }
 0x152   : > { %v742_v17 = vpop.xlane.xlu0 %741  ;;  %v13273_v33 = vmul.f32 %v13256_v62, %v12745_v48  ;;  %v13281_v37 = vmul.f32 %v13256_v62, %v12742_v7 }
 0x153   : > { %v10780_v51 = vpack.c.bf16 %v13259_v14, %v848_v43  ;;  %v10782_v46 = vpack.c.bf16 %v13266_v20, %v13263_v54 }
 0x155   : > { %v11512_v6 = vpop.eup %11511  ;;  %v720_v21 = vpop.xlane.xlu1 %719  ;;  %10781 = vmatprep.subr.bf16.mxu0 %v10780_v51 }
 0x156   : > { %11513 = vrsqrt.f32 %v720_v21  ;;  %v857_v12 = vmul.f32 %v11512_v6, %v12766_v16  ;;  %v13277_v40 = vmul.f32 %v11512_v6, %v12763_v3  ;;  %v703_v43 = vpop.xlane.xlu0 %702  ;;  %10783 = vmatpush1.bf16.xpose.msra.mxu0 %v10782_v46 }
 0x157   : > { %11515 = vrsqrt.f32 %v703_v43 }
 0x158   : > { %1161 = vmatprep.mubr.f32.mxu1 %v857_v12  ;;  %v10788_v15 = vpack.c.bf16 %v13273_v33, %v857_v12  ;;  %v10790_v48 = vpack.c.bf16 %v13281_v37, %v13277_v40  ;;  %11517 = vrsqrt.f32 %v730_v49 }
 0x159   : > { %v2368_v21 = vpop.xlane.xlu1 %2367  ;;  %11519 = vrsqrt.f32 %v725_v42 }
 0x15a   : > { %v2425_v51 = vmul.f32 0.05, %v2368_v21  ;;  %10789 = vmatprep.subr.bf16.mxu1 %v10788_v15  ;;  %v2365_v16 = vpop.xlane.xlu0 %2364  ;;  %11521 = vrsqrt.f32 %v747_v41 }
 0x15b   : > { %10791 = vmatpush1.bf16.xpose.msra.mxu1 %v10790_v48  ;;  %v2424_v7 = vmul.f32 0.05, %v2365_v16  ;;  %11523 = vrsqrt.f32 %v742_v17 }
 0x15c   : > { %v13287_v3 = vsub.f32 %v12890_v50, %v2425_v51 }
 0x15d   : > { %v2377_v60 = vpop.xlane.xlu1 %2376  ;;  %v13290_v46 = vsub.f32 %v12894_v36, %v2424_v7 }
 0x15e   : > { %v2428_v12 = vmul.f32 0.05, %v2377_v60  ;;  %v2473_v43 = vmul.f32 %v13287_v3, %v13287_v3  ;;  %v2374_v21 = vpop.xlane.xlu0 %2373 }
 0x15f   : > { %v2427_v50 = vmul.f32 0.05, %v2374_v21  ;;  %v2472_v42 = vmul.f32 %v13290_v46, %v13290_v46 }
 0x160   : > { %v13294_v15 = vpop.eup %11513  ;;  %v13297_v49 = vsub.f32 %v12899_v25, %v2428_v12  ;;  %v2511_v48 = vsel %vm2343_vm3, %v2473_v43, 0.0 }
 0x161   : > { %2512 = vadd.xlane.f32.xlu1 %v2511_v48  ;;  %v2380_v36 = vpop.xlane.xlu1 %2379  ;;  %v13304_v60 = vmul.f32 %v13294_v15, %v12781_v1  ;;  %v13308_v17 = vmul.f32 %v13294_v15, %v12778_v28  ;;  %v13310_v41 = vpop.eup %11515  ;;  %v13313_v25 = vsub.f32 %v12904_v35, %v2427_v50  ;;  %v2508_v16 = vsel %vm2343_vm3, %v2472_v42, 0.0 }
 0x162   : > { %v2429_v51 = vmul.f32 0.05, %v2380_v36  ;;  %v2476_v7 = vmul.f32 %v13297_v49, %v13297_v49  ;;  %2509 = vadd.xlane.f32.xlu0 %v2508_v16  ;;  %v2371_v12 = vpop.xlane.xlu0 %2370  ;;  %v13320_v1 = vmul.f32 %v13310_v41, %v12806_v31  ;;  %v13325_v28 = vmul.f32 %v13310_v41, %v12803_v18  ;;  %v16492_v18 = vld [vmem:[#allocation57_spill] sm:$0xff] }
 0x163   : > { %1101 = vmatprep.subr.mxu1 %v13304_v60  ;;  %v13328_v35 = vmul.f32 %v11508_v11, %v12760_v59  ;;  %v2426_v21 = vmul.f32 0.05, %v2371_v12  ;;  %v2475_v31 = vmul.f32 %v13313_v25, %v13313_v25  ;;  %v13340_v42 = vmul.f32 %v13252_v24, %v16492_v18  ;;  %v16495_v12 = vld [vmem:[#allocation58_spill] sm:$0xff] }
 0x164   : > { %v13331_v43 = vsub.f32 %v12911_v22, %v2429_v51  ;;  %1102 = vmatpush1.xpose.msra.mxu1 %v13308_v17  ;;  %v2520_v50 = vsel %vm2343_vm3, %v2476_v7, 0.0  ;;  %932 = vmatprep.subr.mxu0 %v13320_v1  ;;  %v13343_v59 = vmul.f32 %v11512_v6, %v12773_v19  ;;  %v13345_v22 = vpop.eup %11517  ;;  %v16272_v16 = vmov 0.0|0.0  }
 0x165   : > { %2521 = vadd.xlane.f32.xlu1 %v2520_v50  ;;  %v2386_v48 = vpop.xlane.xlu1 %2385  ;;  %v13348_v11 = vsub.f32 %v12926_v45, %v2426_v21  ;;  %933 = vmatpush1.xpose.msra.mxu0 %v13325_v28  ;;  %v2517_v51 = vsel %vm2343_vm3, %v2475_v31, 0.0  ;;  %v13355_v7 = vpop.eup %11519  ;;  %v10785_v45 = vpack.c.bf16 %v13328_v35, %v13340_v42  ;;  %v13368_v21 = vmul.f32 %v13256_v62, %v16495_v12 }
 0x166   : > { %v2431_v36 = vmul.f32 0.05, %v2386_v48  ;;  %10792 = vmatprep.subr.bf16.mxu1 %v16272_v16  ;;  %v2477_v24 = vmul.f32 %v13331_v43, %v13331_v43  ;;  %2518 = vadd.xlane.f32.xlu0 %v2517_v51  ;;  %v2383_v19 = vpop.xlane.xlu0 %2382  ;;  %v13370_v50 = vpop.eup %11521 }
 0x167   : > { %10784 = vmatprep.subr.bf16.mxu0 %v16272_v16  ;;  %v2430_v48 = vmul.f32 0.05, %v2383_v19  ;;  %1162 = vmatmul.mubr.f32.vlgmr.msra.gmra.mrb[0].mxu1 %v13277_v40  ;;  %v2474_v51 = vmul.f32 %v13348_v11, %v13348_v11  ;;  %v13379_v16 = vpop.eup %11523  ;;  %v10793_v62 = vpack.c.bf16 %v13368_v21, %v13343_v59 }
 0x168   : > { %v13373_v31 = vsub.f32 %v12939_v23, %v2431_v36  ;;  %v2523_v18 = vsel %vm2350_vm4, %v2477_v24, 0.0  ;;  %993 = vmatmul.mubr.f32.vlgmr.msra.gmra.mrb[0].mxu0 %v13263_v54  ;;  %1166 = vmatprep.mubr.f32.mxu1 %v13273_v33 }
 0x169   : > { %v2395_v12 = vpop.xlane.xlu1 %2394  ;;  %v13386_v23 = vsub.f32 %v12942_v30, %v2430_v48  ;;  %997 = vmatprep.mubr.f32.mxu0 %v13259_v14  ;;  %10787 = vmatpush3.bf16.xpose.msk.msra.mxu0 %vm13362_vm5, %v10785_v45  ;;  %v2514_v36 = vsel %vm2350_vm4, %v2474_v51, 0.0  ;;  %v13398_v30 = vmul.f32 %v13345_v22, %v12799_v26  ;;  %v13411_v26 = vmul.f32 %v13355_v7, %v12815_v39 }
 0x16a   : > { %v2434_v40 = vmul.f32 0.05, %v2395_v12  ;;  %v2479_v54 = vmul.f32 %v13373_v31, %v13373_v31  ;;  %10795 = vmatpush3.bf16.xpose.msk.msra.mxu1 %vm13362_vm5, %v10793_v62  ;;  %2524 = vadd.xlane.f32.xlu1 %v2523_v18  ;;  %v2392_v33 = vpop.xlane.xlu0 %2391 }
 0x16b   : > { %2515 = vadd.xlane.f32.xlu0 %v2514_v36  ;;  %v2433_v24 = vmul.f32 0.05, %v2392_v33  ;;  %1167 = vmatmul.mubr.f32.gmra.mrb[2].mxu1 %v13281_v37  ;;  %v2478_v45 = vmul.f32 %v13386_v23, %v13386_v23  ;;  %v13419_v37 = vmul.f32 %v13370_v50, %v12826_v44  ;;  %v13432_v44 = vmul.f32 %v13355_v7, %v12812_v38 }
 0x16c   : > { %v13401_v14 = vsub.f32 %v12970_v52, %v2434_v40  ;;  %v2529_v19 = vsel %vm2343_vm3, %v2479_v54, 0.0  ;;  %998 = vmatmul.mubr.f32.gmra.mrb[2].mxu0 %v13266_v20  ;;  %1171 = vmatprep.mubr.f32.mxu1 %v13304_v60  ;;  %v13415_v52 = vmul.f32 %v13379_v16, %v12843_v8  ;;  %v16274_v60 = vmov 0.0   ;;  %v16496_v54 = vld [vmem:[#allocation64_spill] sm:$0xff] }
 0x16d   : > { %v754_v48 = vpop.xlane.xlu1 %753  ;;  %v13422_v18 = vsub.f32 %v12973_v2, %v2433_v24  ;;  %1002 = vmatprep.mubr.f32.mxu0 %v13320_v1  ;;  %v2526_v20 = vsel %vm2343_vm3, %v2478_v45, 0.0  ;;  %10112 = vmatprep.subr.mxu0 %v16274_v60  ;;  %v13436_v2 = vmul.f32 %v13345_v22, %v12796_v27  ;;  %v855_v1 = vmul.f32 %v13310_v41, %v12837_v55 }
 0x16e   : > { %11525 = vrsqrt.f32 %v754_v48  ;;  %v2482_v39 = vmul.f32 %v13401_v14, %v13401_v14  ;;  %2530 = vadd.xlane.f32.xlu1 %v2529_v19  ;;  %v737_v8 = vpop.xlane.xlu0 %736  ;;  %10127 = vmatprep.subr.mxu1 %v16274_v60  ;;  %v864_v38 = vmul.f32 %v13294_v15, %v12784_v47  ;;  %v13451_v27 = vmul.f32 %v13379_v16, %v12840_v56  ;;  %v16498_v48 = vld [vmem:[#allocation65_spill] sm:$0xff] }
 0x16f   : > { %2527 = vadd.xlane.f32.xlu0 %v2526_v20  ;;  %11527 = vrsqrt.f32 %v737_v8  ;;  %1172 = vmatmul.mubr.f32.gmra.mrb[4].mxu1 %v13308_v17  ;;  %v2481_v62 = vmul.f32 %v13422_v18, %v13422_v18  ;;  %v13455_v55 = vmul.f32 %v13370_v50, %v12823_v34  ;;  %v10796_v17 = vpack.c.bf16 %v13398_v30, %v13411_v26 }
 0x170   : > { %v2538_v51 = vsel %vm2343_vm3, %v2482_v39, 0.0  ;;  %1003 = vmatmul.mubr.f32.gmra.mrb[4].mxu0 %v13325_v28  ;;  %10129 = vmatprep.mubr.msk.f32.mxu1 %vm12237_vm6, %v16274_v60  ;;  %v10804_v47 = vpack.c.bf16 %v13419_v37, %v13415_v52  ;;  %v10798_v34 = vpack.c.bf16 %v13436_v2, %v13432_v44  ;;  %v16499_v39 = vld [vmem:[#allocation63_spill] sm:$0xff] }
 0x171   : > { %v764_v12 = vpop.xlane.xlu1 %763  ;;  %10113 = vmatpush3.xpose.msk.msra.mxu0 %vm380_vm0, %v855_v1  ;;  %v2535_v15 = vsel %vm2343_vm3, %v2481_v62, 0.0  ;;  %10114 = vmatprep.mubr.msk.f32.mxu0 %vm12237_vm6, %v16274_v60  ;;  %v10806_v41 = vpack.c.bf16 %v13455_v55, %v13451_v27  ;;  %v16500_v62 = vld [vmem:[#allocation59_spill] sm:$0xff] }
 0x172   : > { %10128 = vmatpush3.xpose.msk.msra.mxu1 %vm380_vm0, %v864_v38  ;;  %2539 = vadd.xlane.f32.xlu1 %v2538_v51  ;;  %v759_v56 = vpop.xlane.xlu0 %758  ;;  %11529 = vrsqrt.f32 %v764_v12  ;;  %v13510_v12 = vmul.f32 %v13345_v22, %v16500_v62 }
 0x173   : > { %10797 = vmatprep.subr.bf16.mxu0 %v10796_v17  ;;  %10805 = vmatprep.subr.bf16.mxu1 %v10804_v47  ;;  %11531 = vrsqrt.f32 %v759_v56  ;;  %v16501_v47 = vld [vmem:[#allocation60_spill] sm:$0xff]  ;;  %v16502_v56 = vld [vmem:[#allocation62_spill] sm:$0xff] }
 0x174   : > { %2536 = vadd.xlane.f32.xlu0 %v2535_v15  ;;  %10115 = vmatmul.mubr.msk.f32.vlgmr.msra.gmra.mrb[0].mxu0 %vm380_vm0, %v13340_v42  ;;  %v13515_v15 = vmul.f32 %v13355_v7, %v16501_v47 }
 0x175   : > { %v781_v28 = vpop.xlane.xlu1 %780  ;;  %10130 = vmatmul.mubr.msk.f32.vlgmr.msra.gmra.mrb[0].mxu1 %vm380_vm0, %v13343_v59  ;;  %10799 = vmatpush1.bf16.xpose.msra.mxu0 %v10798_v34  ;;  %v13519_v34 = vmul.f32 %v13379_v16, %v16502_v56 }
 0x176   : > { %10807 = vmatpush1.bf16.xpose.msra.mxu1 %v10806_v41  ;;  %v776_v40 = vpop.xlane.xlu0 %775  ;;  %10117 = vmatprep.mubr.msk.f32.mxu0 %vm12237_vm6, %v16274_v60  ;;  %11533 = vrsqrt.f32 %v781_v28  ;;  %v16503_v41 = vld [vmem:[#allocation61_spill] sm:$0xff] }
 0x177   : > { %10132 = vmatprep.mubr.msk.f32.mxu1 %vm12237_vm6, %v16274_v60  ;;  %11535 = vrsqrt.f32 %v776_v40 }
 0x178   : > { %v13476_v36 = vpop.eup %11525  ;;  %10118 = vmatmul.mubr.msk.f32.gmra.mrb[2].mxu0 %vm380_vm0, %v13328_v35  ;;  %v16497_v35 = vld [vmem:[#allocation66_spill] sm:$0xff] }
 0x179   : > { %v2398_v42 = vpop.xlane.xlu1 %2397  ;;  %v13484_v59 = vmul.f32 %v13476_v36, %v16496_v54  ;;  %v13486_v33 = vpop.eup %11527  ;;  %10133 = vmatmul.mubr.msk.f32.gmra.mrb[2].mxu1 %vm380_vm0, %v13368_v21  ;;  %10120 = vmatprep.mubr.msk.f32.mxu0 %vm12237_vm6, %v16274_v60  ;;  %v13503_v21 = vmul.f32 %v13476_v36, %v16499_v39 }
 0x17a   : > { %v2435_v24 = vmul.f32 0.05, %v2398_v42  ;;  %v2389_v19 = vpop.xlane.xlu0 %2388  ;;  %10135 = vmatprep.mubr.msk.f32.mxu1 %vm12237_vm6, %v16274_v60  ;;  %v872_v45 = vmul.f32 %v13486_v33, %v16497_v35  ;;  %v13499_v20 = vmul.f32 %v13486_v33, %v16498_v48 }
 0x17b   : > { %1439 = vmatprep.subr.mxu1 %v13484_v59  ;;  %v2432_v51 = vmul.f32 0.05, %v2389_v19 }
 0x17c   : > { %v13506_v8 = vsub.f32 %v13041_v5, %v2435_v24  ;;  %10121 = vmatmul.mubr.msk.f32.gmra.mrb[4].mxu0 %vm380_vm0, %v855_v1  ;;  %1270 = vmatprep.subr.mxu0 %v872_v45  ;;  %v13523_v5 = vmul.f32 %v13370_v50, %v16503_v41  ;;  %v16504_v1 = vmov 0.0|0.0   ;;  %v13541_v40 = vpop.eup %11529 }
 0x17d   : > { %v2404_v17 = vpop.xlane.xlu1 %2403  ;;  %v13526_v28 = vsub.f32 %v13047_v9, %v2432_v51  ;;  %10136 = vmatmul.mubr.msk.f32.gmra.mrb[4].mxu1 %vm380_vm0, %v864_v38  ;;  %1271 = vmatpush1.xpose.msra.mxu0 %v13499_v20  ;;  %v13550_v54 = vpop.eup %11531 }
 0x17e   : > { %v2437_v22 = vmul.f32 0.05, %v2404_v17  ;;  %v2483_v7 = vmul.f32 %v13506_v8, %v13506_v8  ;;  %1330 = vmatprep.mubr.f32.mxu0 %v13411_v26  ;;  %1440 = vmatpush1.xpose.msra.mxu1 %v13503_v21  ;;  %v2401_v16 = vpop.xlane.xlu0 %2400  ;;  %v10801_v26 = vpack.c.bf16 %v13510_v12, %v13515_v15  ;;  %v16505_v17 = vld [vmem:[#allocation70_spill] sm:$0xff] }
 0x17f   : > { %1499 = vmatprep.mubr.f32.mxu1 %v13415_v52  ;;  %v2436_v9 = vmul.f32 0.05, %v2401_v16  ;;  %10800 = vmatprep.subr.bf16.mxu0 %v16504_v1  ;;  %v2480_v38 = vmul.f32 %v13526_v28, %v13526_v28  ;;  %v10809_v52 = vpack.c.bf16 %v13523_v5, %v13519_v34  ;;  %v13578_v47 = vmul.f32 %v13541_v40, %v16505_v17  ;;  %v16507_v16 = vld [vmem:[#allocation72_spill] sm:$0xff] }
 0x180   : > { %v13536_v50 = vsub.f32 %v13055_v13, %v2437_v22  ;;  %1331 = vmatmul.mubr.f32.vlgmr.msra.gmra.mrb[6].mxu0 %v13432_v44  ;;  %10808 = vmatprep.subr.bf16.mxu1 %v16504_v1  ;;  %v2541_v13 = vsel %vm2350_vm4, %v2483_v7, 0.0  ;;  %v13560_v48 = vpop.eup %11533  ;;  %v13591_v22 = vmul.f32 %v13550_v54, %v12983_v58  ;;  %v16506_v58 = vld [vmem:[#allocation68_spill] sm:$0xff] }
 0x181   : > { %v2413_v42 = vpop.xlane.xlu1 %2412  ;;  %v13553_v24 = vsub.f32 %v13074_v53, %v2436_v9  ;;  %1500 = vmatmul.mubr.f32.vlgmr.msra.gmra.mrb[6].mxu1 %v13451_v27  ;;  %1335 = vmatprep.mubr.f32.mxu0 %v13398_v30  ;;  %v2532_v19 = vsel %vm2350_vm4, %v2480_v38, 0.0  ;;  %v13565_v53 = vpop.eup %11535  ;;  %v16508_v9 = vld [vmem:[#allocation69_spill] sm:$0xff] }
 0x182   : > { %v2440_v44 = vmul.f32 0.05, %v2413_v42  ;;  %v2485_v35 = vmul.f32 %v13536_v50, %v13536_v50  ;;  %10803 = vmatpush3.bf16.xpose.msk.msra.mxu0 %vm13362_vm5, %v10801_v26  ;;  %1504 = vmatprep.mubr.f32.mxu1 %v13419_v37  ;;  %v2410_v39 = vpop.xlane.xlu0 %2409  ;;  %v13614_v38 = vmul.f32 %v13541_v40, %v16508_v9  ;;  %v16509_v26 = vld [vmem:[#allocation67_spill] sm:$0xff] }
 0x183   : > { %10811 = vmatpush3.bf16.xpose.msk.msra.mxu1 %vm13362_vm5, %v10809_v52  ;;  %2542 = vadd.xlane.f32.xlu1 %v2541_v13  ;;  %v2439_v27 = vmul.f32 0.05, %v2410_v39  ;;  %v2484_v51 = vmul.f32 %v13553_v24, %v13553_v24  ;;  %v882_v52 = vmul.f32 %v13476_v36, %v16509_v26  ;;  %v16510_v13 = vld [vmem:[#allocation74_spill] sm:$0xff]  ;;  %v16515_v9 = vld [vmem:[#allocation15_spill] sm:$0xff] }
 0x184   : > { %v13570_v30 = vsub.f32 %v13079_v61, %v2440_v44  ;;  %2533 = vadd.xlane.f32.xlu0 %v2532_v19  ;;  %1336 = vmatmul.mubr.f32.gmra.mrb[8].mxu0 %v13436_v2  ;;  %v2547_v62 = vsel %vm2343_vm3, %v2485_v35, 0.0  ;;  %v13625_v42 = vmul.f32 %v13560_v48, %v16510_v13  ;;  %v10812_v44 = vpack.c.bf16 %v13578_v47, %v13591_v22 }
 0x185   : > { %v788_v37 = vpop.xlane.xlu1 %787  ;;  %v13581_v56 = vsub.f32 %v13096_v10, %v2439_v27  ;;  %1505 = vmatmul.mubr.f32.gmra.mrb[8].mxu1 %v13455_v55  ;;  %1340 = vmatprep.mubr.f32.mxu0 %v872_v45  ;;  %v2544_v61 = vsel %vm2343_vm3, %v2484_v51, 0.0  ;;  %v13595_v10 = vmul.f32 %v13565_v53, %v13027_v63  ;;  %v13599_v55 = vmul.f32 %v13560_v48, %v13010_v29  ;;  %v16512_v51 = vld [vmem:[#allocation77_spill] sm:$0xff] }
 0x186   : > { %11537 = vrsqrt.f32 %v788_v37  ;;  %v2488_v41 = vmul.f32 %v13570_v30, %v13570_v30  ;;  %1509 = vmatprep.mubr.f32.mxu1 %v13484_v59  ;;  %v771_v2 = vpop.xlane.xlu0 %770  ;;  %10142 = vmatprep.subr.mxu0 %v16274_v60  ;;  %v873_v45 = vmul.f32 %v13486_v33, %v16506_v58  ;;  %v13610_v29 = vmul.f32 %v13550_v54, %v16507_v16 }
 0x187   : > { %2548 = vadd.xlane.f32.xlu1 %v2547_v62  ;;  %11539 = vrsqrt.f32 %v771_v2  ;;  %10157 = vmatprep.subr.mxu1 %v16274_v60  ;;  %v2487_v59 = vmul.f32 %v13581_v56, %v13581_v56  ;;  %v892_v33 = vmul.f32 %v13565_v53, %v13024_v57  ;;  %v16511_v57 = vld [vmem:[#allocation76_spill] sm:$0xff] }
 0x188   : > { %2545 = vadd.xlane.f32.xlu0 %v2544_v61  ;;  %1341 = vmatmul.mubr.f32.gmra.mrb[10].mxu0 %v13499_v20  ;;  %v2556_v63 = vsel %vm2343_vm3, %v2488_v41, 0.0  ;;  %v10814_v27 = vpack.c.bf16 %v13614_v38, %v13610_v29 }
 0x189   : > { %v2416_v7 = vpop.xlane.xlu1 %2415  ;;  %1510 = vmatmul.mubr.f32.gmra.mrb[10].mxu1 %v13503_v21  ;;  %10144 = vmatprep.mubr.msk.f32.mxu0 %vm12237_vm6, %v16274_v60  ;;  %v10820_v21 = vpack.c.bf16 %v13599_v55, %v13595_v10  ;;  %v2553_v36 = vsel %vm2343_vm3, %v2487_v59, 0.0  ;;  %v10822_v37 = vpack.c.bf16 %v13625_v42, %v892_v33 }
 0x18a   : > { %v2441_v20 = vmul.f32 0.05, %v2416_v7  ;;  %10143 = vmatpush3.xpose.msk.msra.mxu0 %vm380_vm0, %v873_v45  ;;  %v2407_v19 = vpop.xlane.xlu0 %2406  ;;  %10159 = vmatprep.mubr.msk.f32.mxu1 %vm12237_vm6, %v16274_v60  ;;  %v16514_v7 = vld [vmem:[#allocation16_spill] sm:$0xff] }
 0x18b   : > { %10158 = vmatpush3.xpose.msk.msra.mxu1 %vm380_vm0, %v882_v52  ;;  %2557 = vadd.xlane.f32.xlu1 %v2556_v63  ;;  %v2438_v39 = vmul.f32 0.05, %v2407_v19  ;;  %v16519_v19 = vld [vmem:[#allocation14_spill] sm:$0xff] }
 0x18c   : > { %v13637_v35 = vsub.f32 %v16511_v57, %v2441_v20  ;;  %10813 = vmatprep.subr.bf16.mxu0 %v10812_v44  ;;  %10821 = vmatprep.subr.bf16.mxu1 %v10820_v21  ;;  %v16516_v20 = vld [vmem:[#allocation20_spill] sm:$0xff]  ;;  %v16518_v44 = vld [vmem:[#allocation71_spill] sm:$0xff]  ;;  %v894_v57 = vmul.f32 %v13565_v53, %v16519_v19 }
 0x18d   : > { %2554 = vadd.xlane.f32.xlu0 %v2553_v36  ;;  %v13642_v62 = vsub.f32 %v16512_v51, %v2438_v39  ;;  %10145 = vmatmul.mubr.msk.f32.vlgmr.msra.gmra.mrb[6].mxu0 %vm380_vm0, %v13515_v15  ;;  %v16513_v15 = vld [vmem:[#allocation21_spill] sm:$0xff]  ;;  %v798_v63 = vpop.xlane.xlu1 %797  ;;  %v13676_v21 = vmul.f32 %v13541_v40, %v16518_v44  ;;  %v16520_v39 = vld [vmem:[#allocation75_spill] sm:$0xff] }
 0x18e   : > { %v2489_v17 = vmul.f32 %v13637_v35, %v13637_v35  ;;  %10160 = vmatmul.mubr.msk.f32.vlgmr.msra.gmra.mrb[6].mxu1 %vm380_vm0, %v13519_v34  ;;  %10815 = vmatpush1.bf16.xpose.msra.mxu0 %v10814_v27  ;;  %11541 = vrsqrt.f32 %v798_v63  ;;  %v13683_v27 = vmul.f32 %v13560_v48, %v16520_v39 }
 0x18f   : > { %10823 = vmatpush1.bf16.xpose.msra.mxu1 %v10822_v37  ;;  %10147 = vmatprep.mubr.msk.f32.mxu0 %vm12237_vm6, %v16274_v60  ;;  %v2486_v2 = vmul.f32 %v13642_v62, %v13642_v62  ;;  %v16525_v37 = vld [vmem:[#allocation31_spill] sm:$0xff] }
 0x190   : > { %v11538_v61 = vpop.eup %11537  ;;  %v2559_v41 = vsel %vm2350_vm4, %v2489_v17, 0.0  ;;  %10162 = vmatprep.mubr.msk.f32.mxu1 %vm12237_vm6, %v16274_v60  ;;  %v10825_v48 = vpack.c.bf16 %v13683_v27, %v894_v57 }
 0x191   : > { %2560 = vadd.xlane.f32.xlu1 %v2559_v41  ;;  %v899_v59 = vmul.f32 %v11538_v61, %v16513_v15  ;;  %v11540_v58 = vpop.eup %11539  ;;  %10148 = vmatmul.mubr.msk.f32.gmra.mrb[8].mxu0 %vm380_vm0, %v13510_v12  ;;  %v2550_v34 = vsel %vm2350_vm4, %v2486_v2, 0.0  ;;  %v898_v13 = vmul.f32 %v11538_v61, %v16516_v20  ;;  %v16517_v12 = vld [vmem:[#allocation73_spill] sm:$0xff] }
 0x192   : > { %10163 = vmatmul.mubr.msk.f32.gmra.mrb[8].mxu1 %vm380_vm0, %v13523_v5  ;;  %2551 = vadd.xlane.f32.xlu0 %v2550_v34  ;;  %v890_v16 = vmul.f32 %v11540_v58, %v16514_v7  ;;  %v889_v26 = vmul.f32 %v11540_v58, %v16515_v9  ;;  %v885_v5 = vmul.f32 %v13550_v54, %v16517_v12  ;;  %v16528_v7 = vld [vmem:[#allocation78_spill] sm:$0xff] }
 0x193   : > { %10150 = vmatprep.mubr.msk.f32.mxu0 %vm12237_vm6, %v16274_v60  ;;  %10165 = vmatprep.mubr.msk.f32.mxu1 %vm12237_vm6, %v16274_v60  ;;  %v793_v36 = vpop.xlane.xlu0 %792 }
 0x194   : > { %1608 = vmatprep.subr.mxu0 %v890_v16  ;;  %1777 = vmatprep.subr.mxu1 %v899_v59  ;;  %11543 = vrsqrt.f32 %v793_v36  ;;  %v815_v40 = vpop.xlane.xlu1 %814  ;;  %v10817_v54 = vpack.c.bf16 %v13676_v21, %v885_v5 }
 0x195   : > { %10151 = vmatmul.mubr.msk.f32.gmra.mrb[10].mxu0 %vm380_vm0, %v873_v45  ;;  %11545 = vrsqrt.f32 %v815_v40  ;;  %v16522_v45 = vld [vmem:[#allocation17_spill] sm:$0xff] }
 0x196   : > { %10166 = vmatmul.mubr.msk.f32.gmra.mrb[10].mxu1 %vm380_vm0, %v882_v52  ;;  %1609 = vmatpush1.xpose.msra.mxu0 %v889_v26  ;;  %v16523_v52 = vld [vmem:[#allocation27_spill] sm:$0xff] }
 0x197   : > { %1668 = vmatprep.mubr.f32.mxu0 %v13591_v22  ;;  %1778 = vmatpush1.xpose.msra.mxu1 %v898_v13  ;;  %v810_v53 = vpop.xlane.xlu0 %809 }
 0x198   : > { %1837 = vmatprep.mubr.f32.mxu1 %v13595_v10  ;;  %10816 = vmatprep.subr.bf16.mxu0 %v16504_v1  ;;  %11547 = vrsqrt.f32 %v810_v53  ;;  %v13699_v22 = vpop.eup %11541 }
 0x199   : > { %1669 = vmatmul.mubr.f32.vlgmr.msra.gmra.mrb[12].mxu0 %v13610_v29  ;;  %10824 = vmatprep.subr.bf16.mxu1 %v16504_v1  ;;  %v891_v29 = vmul.f32 %v11540_v58, %v16522_v45  ;;  %v16527_v58 = vld [vmem:[#allocation79_spill] sm:$0xff]  ;;  %v16533_v45 = vld [vmem:[#allocation37_spill] sm:$0xff] }
 0x19a   : > { %1838 = vmatmul.mubr.f32.vlgmr.msra.gmra.mrb[12].mxu1 %v892_v33  ;;  %1673 = vmatprep.mubr.f32.mxu0 %v13578_v47  ;;  %v16521_v47 = vld [vmem:[#allocation28_spill] sm:$0xff]  ;;  %v13711_v33 = vmul.f32 %v13699_v22, %v16523_v52 }
 0x19b   : > { %10819 = vmatpush3.bf16.xpose.msk.msra.mxu0 %vm13362_vm5, %v10817_v54  ;;  %1842 = vmatprep.mubr.f32.mxu1 %v13599_v55  ;;  %v13706_v10 = vmul.f32 %v13699_v22, %v16521_v47  ;;  %v822_v2 = vpop.xlane.xlu1 %821  ;;  %v16531_v54 = vld [vmem:[#allocation33_spill] sm:$0xff] }
 0x19c   : > { %10827 = vmatpush3.bf16.xpose.msk.msra.mxu1 %vm13362_vm5, %v10825_v48  ;;  %10172 = vmatprep.subr.mxu0 %v16274_v60  ;;  %11549 = vrsqrt.f32 %v822_v2  ;;  %v16532_v48 = vld [vmem:[#allocation38_spill] sm:$0xff] }
 0x19d   : > { %1674 = vmatmul.mubr.f32.gmra.mrb[14].mxu0 %v13614_v38  ;;  %10187 = vmatprep.subr.mxu1 %v16274_v60  ;;  %v16524_v38 = vld [vmem:[#allocation22_spill] sm:$0xff] }
 0x19e   : > { %1843 = vmatmul.mubr.f32.gmra.mrb[14].mxu1 %v13625_v42  ;;  %1678 = vmatprep.mubr.f32.mxu0 %v890_v16  ;;  %v11544_v55 = vpop.eup %11543  ;;  %v900_v51 = vmul.f32 %v11538_v61, %v16524_v38  ;;  %v16526_v42 = vld [vmem:[#allocation30_spill] sm:$0xff]  ;;  %v805_v9 = vpop.xlane.xlu0 %804  ;;  %v16535_v38 = vld [vmem:[#allocation29_spill] sm:$0xff] }
 0x19f   : > { %1847 = vmatprep.mubr.f32.mxu1 %v899_v59  ;;  %v902_v17 = vmul.f32 %v11544_v55, %v16525_v37  ;;  %v13718_v41 = vmul.f32 %v11544_v55, %v16526_v42  ;;  %v11546_v15 = vpop.eup %11545  ;;  %11551 = vrsqrt.f32 %v805_v9  ;;  %v16541_v9 = vld [vmem:[#allocation49_spill] sm:$0xff] }
 0x1a0   : > { %v914_v63 = vmul.f32 %v11546_v15, %v16527_v58  ;;  %v913_v16 = vmul.f32 %v11546_v15, %v16528_v7  ;;  %v915_v53 = vmul.f32 %v11546_v15, %v16531_v54 }
 0x1a1   : > { %1679 = vmatmul.mubr.f32.gmra.mrb[16].mxu0 %v889_v26  ;;  %v10828_v61 = vpack.c.bf16 %v13706_v10, %v902_v17  ;;  %v10830_v34 = vpack.c.bf16 %v13711_v33, %v13718_v41  ;;  %v16529_v26 = vld [vmem:[#allocation35_spill] sm:$0xff] }
 0x1a2   : > { %1848 = vmatmul.mubr.f32.gmra.mrb[16].mxu1 %v898_v13  ;;  %10174 = vmatprep.mubr.msk.f32.mxu0 %vm12237_vm6, %v16274_v60  ;;  %v11548_v59 = vpop.eup %11547  ;;  %v16530_v13 = vld [vmem:[#allocation34_spill] sm:$0xff]  ;;  %v2492_v39 = vpop.xlane.xlu0 %2491 }
 0x1a3   : > { %10173 = vmatpush3.xpose.msk.msra.mxu0 %vm380_vm0, %v891_v29  ;;  %10189 = vmatprep.mubr.msk.f32.mxu1 %vm12237_vm6, %v16274_v60  ;;  %v911_v20 = vmul.f32 %v11548_v59, %v16529_v26  ;;  %v910_v12 = vmul.f32 %v11548_v59, %v16530_v13 }
 0x1a4   : > { %10188 = vmatpush3.xpose.msk.msra.mxu1 %vm380_vm0, %v900_v51  ;;  %10829 = vmatprep.subr.bf16.mxu0 %v10828_v61  ;;  %v16537_v61 = vld [vmem:[#allocation41_spill] sm:$0xff] }
 0x1a5   : > { %v10836_v44 = vpack.c.bf16 %v914_v63, %v911_v20  ;;  %v10838_v36 = vpack.c.bf16 %v913_v16, %v910_v12 }
 0x1a6   : > { %10175 = vmatmul.mubr.msk.f32.vlgmr.msra.gmra.mrb[12].mxu0 %vm380_vm0, %v885_v5  ;;  %v11550_v5 = vpop.eup %11549 }
 0x1a7   : > { %10190 = vmatmul.mubr.msk.f32.vlgmr.msra.gmra.mrb[12].mxu1 %vm380_vm0, %v894_v57  ;;  %10831 = vmatpush1.bf16.xpose.msra.mxu0 %v10830_v34  ;;  %v917_v19 = vmul.f32 %v11550_v5, %v13184_v32  ;;  %v2495_v57 = vpop.xlane.xlu1 %2494  ;;  %v916_v40 = vmul.f32 %v11550_v5, %v13181_v0  ;;  %v2501_v0 = vpop.xlane.xlu0 %2500 }
 0x1a8   : > { %10177 = vmatprep.mubr.msk.f32.mxu0 %vm12237_vm6, %v16274_v60  ;;  %10192 = vmatprep.mubr.msk.f32.mxu1 %vm12237_vm6, %v16274_v60  ;;  %11553 = vrsqrt.f32 %v2495_v57  ;;  %v16545_v57 = vld [vmem:[#allocation51_spill] sm:$0xff] }
 0x1a9   : > { %10837 = vmatprep.subr.bf16.mxu1 %v10836_v44  ;;  %11555 = vrsqrt.f32 %v2492_v39 }
 0x1aa   : > { %10178 = vmatmul.mubr.msk.f32.gmra.mrb[14].mxu0 %vm380_vm0, %v13676_v21  ;;  %10839 = vmatpush1.bf16.xpose.msra.mxu1 %v10838_v36  ;;  %v11552_v21 = vpop.eup %11551 }
 0x1ab   : > { %10180 = vmatprep.mubr.msk.f32.mxu0 %vm12237_vm6, %v16274_v60  ;;  %10193 = vmatmul.mubr.msk.f32.gmra.mrb[14].mxu1 %vm380_vm0, %v13683_v27  ;;  %v912_v27 = vmul.f32 %v11548_v59, %v13163_v4  ;;  %v908_v47 = vmul.f32 %v11552_v21, %v16532_v48  ;;  %v907_v32 = vmul.f32 %v11552_v21, %v16533_v45  ;;  %v2504_v37 = vpop.xlane.xlu1 %2503  ;;  %v2498_v42 = vpop.xlane.xlu0 %2497  ;;  %v16538_v59 = vld [vmem:[#allocation43_spill] sm:$0xff]  ;;  %v13839_v48 = vld [vmem:[%s12296_s30 + $0x20] sm:$0xff] }
 0x1ac   : > { %10195 = vmatprep.mubr.msk.f32.mxu1 %vm12237_vm6, %v16274_v60  ;;  %2115 = vmatprep.subr.mxu1 %v917_v19  ;;  %11557 = vrsqrt.f32 %v2504_v37 }
 0x1ad   : > { %1946 = vmatprep.subr.mxu0 %v908_v47  ;;  %v10841_v4 = vpack.c.bf16 %v915_v53, %v912_v27  ;;  %11559 = vrsqrt.f32 %v2501_v0 }
 0x1ae   : > { %10181 = vmatmul.mubr.msk.f32.gmra.mrb[16].mxu0 %vm380_vm0, %v891_v29  ;;  %v16534_v29 = vld [vmem:[#allocation32_spill] sm:$0xff] }
 0x1af   : > { %2006 = vmatprep.mubr.f32.mxu0 %v902_v17  ;;  %10196 = vmatmul.mubr.msk.f32.gmra.mrb[16].mxu1 %vm380_vm0, %v900_v51  ;;  %v903_v52 = vmul.f32 %v11544_v55, %v16534_v29  ;;  %v906_v51 = vmul.f32 %v13699_v22, %v16535_v38  ;;  %v2507_v22 = vpop.xlane.xlu1 %2506 }
 0x1b0   : > { %2175 = vmatprep.mubr.f32.mxu1 %v911_v20  ;;  %1947 = vmatpush1.xpose.msra.mxu0 %v907_v32  ;;  %11561 = vrsqrt.f32 %v2507_v22  ;;  %v3988_v20 = vld [vmem:[%s16162_s2 + $0x90] sm:$0xff] }
 0x1b1   : > { %10832 = vmatprep.subr.bf16.mxu0 %v16504_v1  ;;  %v10833_v17 = vpack.c.bf16 %v906_v51, %v903_v52  ;;  %11563 = vrsqrt.f32 %v2498_v42 }
 0x1b2   : > { %2116 = vmatpush1.xpose.msra.mxu1 %v916_v40  ;;  %v11554_v55 = vpop.eup %11553 }
 0x1b3   : > { %10840 = vmatprep.subr.bf16.mxu1 %v16504_v1  ;;  %2007 = vmatmul.mubr.f32.vlgmr.msra.gmra.mrb[18].mxu0 %v13718_v41  ;;  %v11556_v2 = vpop.eup %11555  ;;  %v16536_v41 = vld [vmem:[#allocation36_spill] sm:$0xff]  ;;  %v2587_v6 = vmul.f32 %v11554_v55, %v16537_v61 }
 0x1b4   : > { %2011 = vmatprep.mubr.f32.mxu0 %v13706_v10  ;;  %10835 = vmatpush3.bf16.xpose.msk.msra.mxu0 %vm13362_vm5, %v10833_v17  ;;  %v918_v15 = vmul.f32 %v11550_v5, %v16536_v41  ;;  %v2586_v58 = vmul.f32 %v11556_v2, %v16538_v59  ;;  %v16544_v5 = vld [vmem:[#allocation50_spill] sm:$0xff] }
 0x1b5   : > { %2176 = vmatmul.mubr.f32.vlgmr.msra.gmra.mrb[18].mxu1 %v910_v12  ;;  %10202 = vmatprep.subr.mxu0 %v16274_v60 }
 0x1b6   : > { %2180 = vmatprep.mubr.f32.mxu1 %v914_v63  ;;  %10843 = vmatpush3.bf16.xpose.msk.msra.mxu1 %vm13362_vm5, %v10841_v4  ;;  %v11558_v10 = vpop.eup %11557  ;;  %v16539_v63 = vld [vmem:[#allocation39_spill] sm:$0xff]  ;;  %v10845_v13 = vpack.c.bf16 %v2587_v6, %v2586_v58  ;;  %vm8546_vm5 = vcmask 11264  }
 0x1b7   : > { %10217 = vmatprep.subr.mxu1 %v16274_v60  ;;  %2012 = vmatmul.mubr.f32.gmra.mrb[20].mxu0 %v13711_v33  ;;  %v909_v34 = vmul.f32 %v11552_v21, %v16539_v63  ;;  %v11560_v7 = vpop.eup %11559  ;;  %v16540_v33 = vld [vmem:[#allocation45_spill] sm:$0xff]  ;;  %v13862_v63 = vld [vmem:[%s12296_s30 + $0x68] sm:$0xff] }
 0x1b8   : > { %2016 = vmatprep.mubr.f32.mxu0 %v908_v47  ;;  %v2589_v26 = vmul.f32 %v11560_v7, %v16541_v9 }
 0x1b9   : > { %2181 = vmatmul.mubr.f32.gmra.mrb[20].mxu1 %v913_v16  ;;  %v2590_v16 = vmul.f32 %v11558_v10, %v16540_v33 }
 0x1ba   : > { %2185 = vmatprep.mubr.f32.mxu1 %v917_v19  ;;  %v11562_v44 = vpop.eup %11561 }
 0x1bb   : > { %2017 = vmatmul.mubr.f32.gmra.mrb[22].mxu0 %v907_v32  ;;  %v10849_v12 = vpack.c.bf16 %v2590_v16, %v2589_v26  ;;  %v11564_v36 = vpop.eup %11563  ;;  %v2591_v19 = vmul.f32 %v11562_v44, %v16544_v5  ;;  %v16548_v44 = vld [vmem:[#allocation3_spill] sm:$0xff] }
 0x1bc   : > { %10203 = vmatpush3.xpose.msk.msra.mxu0 %vm380_vm0, %v909_v34  ;;  %10204 = vmatprep.mubr.msk.f32.mxu0 %vm12237_vm6, %v16274_v60  ;;  %v2588_v21 = vmul.f32 %v11564_v36, %v16545_v57  ;;  %v13879_v57 = vld [vmem:[%s12296_s30] sm:$0xff] }
 0x1bd   : > { %2186 = vmatmul.mubr.f32.gmra.mrb[22].mxu1 %v916_v40  ;;  %10844 = vmatprep.subr.bf16.mxu0 %v16504_v1 }
 0x1be   : > { %10218 = vmatpush3.xpose.msk.msra.mxu1 %vm380_vm0, %v918_v15  ;;  %10219 = vmatprep.mubr.msk.f32.mxu1 %vm12237_vm6, %v16274_v60 }
 0x1bf   : > { %10848 = vmatprep.subr.bf16.mxu1 %v16504_v1  ;;  %10205 = vmatmul.mubr.msk.f32.vlgmr.msra.gmra.mrb[18].mxu0 %vm380_vm0, %v903_v52  ;;  %v16546_v52 = vld [vmem:[#allocation6_spill] sm:$0xff] }
 0x1c0   : > { %10847 = vmatpush3.bf16.xpose.msk.msra.mxu0 %vm13784_vm7, %v10845_v13  ;;  %10207 = vmatprep.mubr.msk.f32.mxu0 %vm12237_vm6, %v16274_v60 }
 0x1c1   : > { %10220 = vmatmul.mubr.msk.f32.vlgmr.msra.gmra.mrb[18].mxu1 %vm380_vm0, %v912_v27  ;;  %10232 = vmatprep.subr.mxu0 %v16274_v60 }
 0x1c2   : > { %10222 = vmatprep.mubr.msk.f32.mxu1 %vm12237_vm6, %v16274_v60  ;;  %10851 = vmatpush3.bf16.xpose.msk.msra.mxu1 %vm13784_vm7, %v10849_v12 }
 0x1c3   : > { %10208 = vmatmul.mubr.msk.f32.gmra.mrb[20].mxu0 %vm380_vm0, %v906_v51  ;;  %10247 = vmatprep.subr.mxu1 %v16274_v60 }
 0x1c4   : > { %10210 = vmatprep.mubr.msk.f32.mxu0 %vm12237_vm6, %v16274_v60 }
 0x1c5   : > { %10223 = vmatmul.mubr.msk.f32.gmra.mrb[20].mxu1 %vm380_vm0, %v915_v53  ;;  %v13836_v53 = vld [vmem:[%s12296_s30 + $0x8] sm:$0xff] }
 0x1c6   : > { %10225 = vmatprep.mubr.msk.f32.mxu1 %vm12237_vm6, %v16274_v60  ;;  %v3402_v47 = vadd.f32 %v13839_v48, %v13836_v53 }
 0x1c7   : > { %10211 = vmatmul.mubr.msk.f32.gmra.mrb[22].mxu0 %vm380_vm0, %v909_v34 }
 0x1c8   : > { %10233 = vmatpush3.xpose.msk.msra.mxu0 %vm2343_vm3, %v2588_v21  ;;  %10234 = vmatprep.mubr.msk.f32.mxu0 %vm12237_vm6, %v16274_v60  ;;  %v3403_v38 = vadd.f32 %v3402_v47, %v16546_v52 }
 0x1c9   : > { %10226 = vmatmul.mubr.msk.f32.gmra.mrb[22].mxu1 %vm380_vm0, %v918_v15  ;;  %10852 = vmatprep.subr.bf16.mxu0 %v16504_v1 }
 0x1ca   : > { %10249 = vmatprep.mubr.msk.f32.mxu1 %vm12237_vm6, %v16274_v60  ;;  %10248 = vmatpush3.xpose.msk.msra.mxu1 %vm2343_vm3, %v2591_v19  ;;  %v3404_v55 = vrot.slane %v3403_v38, 4 }
 0x1cb   : > { %10856 = vmatprep.subr.bf16.mxu1 %v16504_v1  ;;  %10235 = vmatmul.mubr.msk.f32.vlgmr.msra.gmra.mrb[24].mxu0 %vm2343_vm3, %v2586_v58  ;;  %v13859_v58 = vld [vmem:[%s12296_s30 + $0x50] sm:$0xff] }
 0x1cc   : > { %10237 = vmatprep.mubr.msk.f32.mxu0 %vm12237_vm6, %v16274_v60  ;;  %v3426_v34 = vadd.f32 %v13862_v63, %v13859_v58 }
 0x1cd   : > { %10250 = vmatmul.mubr.msk.f32.vlgmr.msra.gmra.mrb[24].mxu1 %vm2343_vm3, %v2589_v26 }
 0x1ce   : > { %10252 = vmatprep.mubr.msk.f32.mxu1 %vm12237_vm6, %v16274_v60  ;;  %v3427_v36 = vadd.f32 %v3426_v34, %v16548_v44 }
 0x1cf   : > { %10238 = vmatmul.mubr.msk.f32.gmra.mrb[26].mxu0 %vm2343_vm3, %v2587_v6 }
 0x1d0   : > { %10240 = vmatprep.mubr.msk.f32.mxu0 %vm12237_vm6, %v16274_v60 }
 0x1d1   : > { %10253 = vmatmul.mubr.msk.f32.gmra.mrb[26].mxu1 %vm2343_vm3, %v2590_v16 }
 0x1d2   : > { %10255 = vmatprep.mubr.msk.f32.mxu1 %vm12237_vm6, %v16274_v60 }
 0x1d3   : > { %10241 = vmatmul.mubr.msk.f32.gmra.mrb[28].mxu0 %vm2343_vm3, %v2588_v21  ;;  %v13882_v21 = vld [vmem:[%s12296_s30 + $0x18] sm:$0xff] }
 0x1d4   : > { %10264 = vmatprep.mubr.msk.f32.mxu0 %vm12237_vm6, %v16274_v60 }
 0x1d5   : > { %10256 = vmatmul.mubr.msk.f32.gmra.mrb[28].mxu1 %vm2343_vm3, %v2591_v19 }
 0x1d6   : > { %10279 = vmatprep.mubr.msk.f32.mxu1 %vm12237_vm6, %v16274_v60 }
 0x1ee   : > { %v2513_v39 = vpop.xlane.xlu1 %2512 }
 0x1ef   : > { %11565 = vrsqrt.f32 %v2513_v39  ;;  %v2510_v40 = vpop.xlane.xlu0 %2509 }
 0x1f0   : > { %11567 = vrsqrt.f32 %v2510_v40 }
 0x1f2   : > { %v2522_v27 = vpop.xlane.xlu1 %2521 }
 0x1f3   : > { %11569 = vrsqrt.f32 %v2522_v27  ;;  %v2519_v54 = vpop.xlane.xlu0 %2518  ;;  %v3428_v27 = vrot.slane %v3427_v36, 4 }
 0x1f4   : > { %11571 = vrsqrt.f32 %v2519_v54 }
 0x1f5   : > { %v3429_v52 = vadd.f32 %v3428_v27, %v3427_v36 }
 0x1f7   : > { %v2525_v45 = vpop.xlane.xlu1 %2524 }
 0x1f8   : > { %v2516_v29 = vpop.xlane.xlu0 %2515 }
 0x1f9   : > { %v11566_v32 = vpop.eup %11565  ;;  %11573 = vrsqrt.f32 %v2516_v29 }
 0x1fa   : > { %v2593_v51 = vmul.f32 %v11566_v32, %v13287_v3  ;;  %v11568_v37 = vpop.eup %11567  ;;  %11575 = vrsqrt.f32 %v2525_v45 }
 0x1fb   : > { %v2592_v0 = vmul.f32 %v11568_v37, %v13290_v46  ;;  %v2531_v4 = vpop.xlane.xlu1 %2530  ;;  %v3405_v46 = vadd.f32 %v3404_v55, %v3403_v38 }
 0x1fc   : > { %11577 = vrsqrt.f32 %v2531_v4  ;;  %v2528_v22 = vpop.xlane.xlu0 %2527 }
 0x1fd   : > { %v11570_v17 = vpop.eup %11569  ;;  %11579 = vrsqrt.f32 %v2528_v22  ;;  %v10853_v2 = vpack.c.bf16 %v2593_v51, %v2592_v0  ;;  %v3406_v7 = vrot.slane %v3405_v46, 2 }
 0x1fe   : > { %v13847_v42 = vmul.f32 %v11570_v17, %v13297_v49  ;;  %v11572_v41 = vpop.eup %11571  ;;  %v16547_v49 = vld [vmem:[#allocation7_spill] sm:$0xff]  ;;  %v3430_v17 = vrot.slane %v3429_v52, 2 }
 0x1ff   : > { %v2595_v3 = vmul.f32 %v11572_v41, %v13313_v25  ;;  %v2540_v15 = vpop.xlane.xlu1 %2539  ;;  %10855 = vmatpush3.bf16.xpose.msk.msra.mxu0 %vm13784_vm7, %v10853_v2  ;;  %v3412_v6 = vrot.slane %v16547_v49, 4  ;;  %v3407_v5 = vadd.f32 %v3406_v7, %v3405_v46  ;;  %v13924_v2 = vld [vmem:[%s12296_s30 + $0x48] sm:$0xff]  ;;  %v13927_v41 = vld [vmem:[%s12296_s30 + $0x60] sm:$0xff] }
 0x200   : > { %11581 = vrsqrt.f32 %v2540_v15  ;;  %10262 = vmatprep.subr.mxu0 %v16274_v60 }
 0x201   : > { %v2537_v10 = vpop.xlane.xlu0 %2536  ;;  %v10857_v61 = vpack.c.bf16 %v13847_v42, %v2595_v3  ;;  %v3413_v9 = vadd.f32 %v3412_v6, %v16547_v49  ;;  %v3408_v54 = vrot.slane %v3407_v5, 1  ;;  %v16550_v49 = vld [vmem:[#allocation2_spill] sm:$0xff] }
 0x202   : > { %11583 = vrsqrt.f32 %v2537_v10  ;;  %v3431_v10 = vadd.f32 %v3430_v17, %v3429_v52  ;;  %v12092_v52 = vld [vmem:[%s12296_s30 + $0x28] sm:$0xff] }
 0x203   : > { %v11574_v59 = vpop.eup %11573  ;;  %10859 = vmatpush3.bf16.xpose.msk.msra.mxu1 %vm13784_vm7, %v10857_v61  ;;  %v3414_v39 = vrot.slane %v3413_v9, 2  ;;  %v3409_v38 = vadd.f32 %v3408_v54, %v3407_v5  ;;  %v13953_v54 = vld [vmem:[%s12296_s30 + $0xb0] sm:$0xff] }
 0x204   : > { %10277 = vmatprep.subr.mxu1 %v16274_v60  ;;  %v11576_v25 = vpop.eup %11575  ;;  %v2594_v33 = vmul.f32 %v11574_v59, %v13348_v11 }
 0x205   : > { %v2597_v19 = vmul.f32 %v11576_v25, %v13331_v43  ;;  %v3415_v32 = vadd.f32 %v3414_v39, %v3413_v9  ;;  %v13921_v22 = vmul.f32 0.31622776, %v3409_v38  ;;  %v3432_v9 = vrot.slane %v3431_v10, 1 }
 0x206   : > { %v11578_v16 = vpop.eup %11577 }
 0x207   : > { %v11580_v26 = vpop.eup %11579  ;;  %v13869_v13 = vmul.f32 %v11578_v16, %v13373_v31  ;;  %10263 = vmatpush3.xpose.msk.msra.mxu0 %vm2343_vm3, %v2594_v33  ;;  %v3394_v31 = vadd.f32 %v13882_v21, %v13879_v57  ;;  %v3611_v61 = vmul.f32 %v13836_v53, %v13921_v22 }
 0x208   : > { %v13873_v12 = vmul.f32 %v11580_v26, %v13386_v23  ;;  %10860 = vmatprep.subr.bf16.mxu0 %v16504_v1  ;;  %v16551_v26 = vld [vmem:[#allocation4_spill] sm:$0xff] }
 0x209   : > { %v3436_v44 = vrot.slane %v16551_v26, 4 }
 0x20a   : > { %v11582_v11 = vpop.eup %11581  ;;  %10265 = vmatmul.mubr.msk.f32.vlgmr.msra.gmra.mrb[30].mxu0 %vm2343_vm3, %v2592_v0  ;;  %v10861_v23 = vpack.c.bf16 %v13869_v13, %v13873_v12  ;;  %v3416_v0 = vrot.slane %v3415_v32, 1 }
 0x20b   : > { %v13890_v40 = vmul.f32 %v11582_v11, %v13401_v14  ;;  %10278 = vmatpush3.xpose.msk.msra.mxu1 %vm2343_vm3, %v2597_v19  ;;  %10267 = vmatprep.mubr.msk.f32.mxu0 %vm12237_vm6, %v16274_v60  ;;  %v16549_v14 = vld [vmem:[#allocation5_spill] sm:$0xff]  ;;  %v3437_v27 = vadd.f32 %v3436_v44, %v16551_v26 }
 0x20c   : > { %v11584_v43 = vpop.eup %11583  ;;  %10863 = vmatpush3.bf16.xpose.msk.msra.mxu0 %vm13784_vm7, %v10861_v23  ;;  %10864 = vmatprep.subr.bf16.mxu1 %v16504_v1  ;;  %v3395_v45 = vadd.f32 %v3394_v31, %v16549_v14  ;;  %v3417_v15 = vadd.f32 %v3416_v0, %v3415_v32  ;;  %v13956_v14 = vld [vmem:[%s12296_s30 + $0x98] sm:$0xff]  ;;  %v16552_v0 = vld [vmem:[#allocation12_spill] sm:$0xff] }
 0x20d   : > { %v13899_v47 = vmul.f32 %v11584_v43, %v13422_v18  ;;  %10292 = vmatprep.subr.mxu0 %v16274_v60  ;;  %v3433_v43 = vadd.f32 %v3432_v9, %v3431_v10 }
 0x20e   : > { %10268 = vmatmul.mubr.msk.f32.gmra.mrb[32].mxu0 %vm2343_vm3, %v2593_v51  ;;  %10280 = vmatmul.mubr.msk.f32.vlgmr.msra.gmra.mrb[30].mxu1 %vm2343_vm3, %v2595_v3  ;;  %v3396_v37 = vrot.slane %v3395_v45, 4  ;;  %v3588_v25 = vmul.f32 0.31622776, %v3417_v15 }
 0x20f   : > { %v10865_v29 = vpack.c.bf16 %v13890_v40, %v13899_v47  ;;  %10270 = vmatprep.mubr.msk.f32.mxu0 %vm12237_vm6, %v16274_v60  ;;  %10282 = vmatprep.mubr.msk.f32.mxu1 %vm12237_vm6, %v16274_v60 }
 0x210   : > { %v2543_v18 = vpop.xlane.xlu1 %2542  ;;  %v3397_v3 = vadd.f32 %v3396_v37, %v3395_v45  ;;  %v3450_v45 = vadd.f32 %v13956_v14, %v13953_v54  ;;  %v3615_v38 = vmul.f32 %v12092_v52, %v3588_v25  ;;  %v3438_v37 = vrot.slane %v3437_v27, 2 }
 0x211   : > { %11585 = vrsqrt.f32 %v2543_v18  ;;  %10867 = vmatpush3.bf16.xpose.msk.msra.mxu1 %vm13784_vm7, %v10865_v29  ;;  %v2534_v51 = vpop.xlane.xlu0 %2533 }
 0x212   : > { %11587 = vrsqrt.f32 %v2534_v51  ;;  %10271 = vmatmul.mubr.msk.f32.gmra.mrb[34].mxu0 %vm2343_vm3, %v2594_v33  ;;  %10283 = vmatmul.mubr.msk.f32.gmra.mrb[32].mxu1 %vm2343_vm3, %v13847_v42  ;;  %v3418_v42 = vadd.f32 %v13927_v41, %v13924_v2  ;;  %v3398_v59 = vrot.slane %v3397_v3, 2 }
 0x213   : > { %10285 = vmatprep.mubr.msk.f32.mxu1 %vm12237_vm6, %v16274_v60  ;;  %10307 = vmatprep.subr.mxu1 %v16274_v60 }
 0x214   : > { %v2549_v4 = vpop.xlane.xlu1 %2548  ;;  %10294 = vmatprep.mubr.msk.f32.mxu0 %vm12237_vm6, %v16274_v60  ;;  %v3419_v6 = vadd.f32 %v3418_v42, %v16550_v49  ;;  %v3399_v5 = vadd.f32 %v3398_v59, %v3397_v3  ;;  %v12093_v3 = vld [vmem:[%s12296_s30 + $0x40] sm:$0xf] }
 0x215   : > { %11589 = vrsqrt.f32 %v2549_v4  ;;  %v2546_v55 = vpop.xlane.xlu0 %2545  ;;  %v3451_v4 = vadd.f32 %v3450_v45, %v16552_v0  ;;  %v3618_v15 = vmul.f32 %v12093_v3, %v3588_v25  ;;  %v3991_v45 = vld [vmem:[%s16162_s2 + $0xa8] sm:$0xff]  ;;  %v12096_v0 = vld [vmem:[%s12296_s30 + $0x38] sm:$0xf] }
 0x216   : > { %11591 = vrsqrt.f32 %v2546_v55  ;;  %10286 = vmatmul.mubr.msk.f32.gmra.mrb[34].mxu1 %vm2343_vm3, %v2597_v19  ;;  %v3420_v53 = vrot.slane %v3419_v6, 4  ;;  %v12089_v19 = vld [vmem:[%s12296_s30 + $0x10] sm:$0xff]  ;;  %v3400_v29 = vrot.slane %v3399_v5, 1 }
 0x217   : > { %10309 = vmatprep.mubr.msk.f32.mxu1 %vm12237_vm6, %v16274_v60  ;;  %v3612_v11 = vmul.f32 %v12089_v19, %v3588_v25 }
 0x218   : > { %v2558_v46 = vpop.xlane.xlu1 %2557  ;;  %v3401_v55 = vadd.f32 %v3400_v29, %v3399_v5  ;;  %v14064_v29 = vld [vmem:[%s12296_s30 + $0xf8] sm:$0xff] }
 0x219   : > { %11593 = vrsqrt.f32 %v2558_v46  ;;  %v3439_v46 = vadd.f32 %v3438_v37, %v3437_v27  ;;  %v3990_v27 = vld [vmem:[%s16162_s2 + $0xa0] sm:$0xff]  ;;  %v3975_v37 = vld [vmem:[%s16162_s2 + $0x28] sm:$0xff] }
 0x21a   : > { %v2555_v34 = vpop.xlane.xlu0 %2554  ;;  %v14006_v59 = vmul.f32 0.31622776, %v3401_v55  ;;  %v14096_v55 = vpack.c.bf16 %v3991_v45, %v3990_v27  ;;  %v16556_v45 = vld [vmem:[#allocation11_spill] sm:$0xff] }
 0x21b   : > { %v11586_v7 = vpop.eup %11585  ;;  %11595 = vrsqrt.f32 %v2555_v34 }
 0x21c   : > { %v11588_v33 = vpop.eup %11587  ;;  %v2603_v16 = vmul.f32 %v11586_v7, %v13506_v8  ;;  %11597 = vtanh.f32 %v3611_v61  ;;  %v3452_v61 = vrot.slane %v3451_v4, 4  ;;  %v3971_v7 = vld [vmem:[%s16162_s2 + $0x8] sm:$0xff]  ;;  %v3610_v5 = vmul.f32 %v13879_v57, %v14006_v59 }
 0x21d   : > { %v13940_v36 = vmul.f32 %v11588_v33, %v13526_v28 }
 0x21e   : > { %10308 = vmatpush3.xpose.msk.msra.mxu1 %vm2343_vm3, %v2603_v16  ;;  %v2561_v28 = vpop.xlane.xlu1 %2560  ;;  %v3453_v44 = vadd.f32 %v3452_v61, %v3451_v4  ;;  %v3617_v4 = vmul.f32 %v12096_v0, %v13921_v22  ;;  %v12097_v61 = vld [vmem:[%s12296_s30 + $0x30] sm:$0xf] }
 0x21f   : > { %v11590_v31 = vpop.eup %11589  ;;  %10293 = vmatpush3.xpose.msk.msra.mxu0 %vm2343_vm3, %v13940_v36  ;;  %v2552_v8 = vpop.xlane.xlu0 %2551  ;;  %10872 = vmatprep.subr.bf16.mxu1 %v16504_v1  ;;  %v12103_v0 = vld [vmem:[%s12296_s30 + $0x70] sm:$0xff] }
 0x220   : > { %v11592_v39 = vpop.eup %11591  ;;  %v13948_v23 = vmul.f32 %v11590_v31, %v13536_v50  ;;  %11599 = vrsqrt.f32 %v2552_v8  ;;  %10868 = vmatprep.subr.bf16.mxu0 %v16504_v1  ;;  %v3421_v50 = vadd.f32 %v3420_v53, %v3419_v6  ;;  %v3973_v31 = vld [vmem:[%s16162_s2 + $0x18] sm:$0xff]  ;;  %v3614_v8 = vmul.f32 %v13839_v48, %v13921_v22 }
 0x221   : > { %v13961_v32 = vmul.f32 %v11592_v39, %v13553_v24  ;;  %10310 = vmatmul.mubr.msk.f32.vlgmr.msra.gmra.mrb[36].mxu1 %vm2343_vm3, %v13899_v47  ;;  %11601 = vtanh.f32 %v3612_v11  ;;  %v3972_v11 = vld [vmem:[%s16162_s2 + $0x10] sm:$0xff]  ;;  %v16553_v39 = vld [vmem:[#allocation13_spill] sm:$0xff]  ;;  %v3454_v52 = vrot.slane %v3453_v44, 2 }
 0x222   : > { %10295 = vmatmul.mubr.msk.f32.vlgmr.msra.gmra.mrb[36].mxu0 %vm2343_vm3, %v13873_v12  ;;  %10312 = vmatprep.mubr.msk.f32.mxu1 %vm12237_vm6, %v16274_v60  ;;  %11603 = vrsqrt.f32 %v2561_v28  ;;  %v13977_v12 = vmul.f32 0.31622776, %v3433_v43  ;;  %v3422_v17 = vrot.slane %v3421_v50, 2  ;;  %v3460_v28 = vrot.slane %v16553_v39, 4  ;;  %v3993_v22 = vld [vmem:[%s16162_s2 + $0xb8] sm:$0xff] }
 0x223   : > { %v11594_v18 = vpop.eup %11593  ;;  %10297 = vmatprep.mubr.msk.f32.mxu0 %vm12237_vm6, %v16274_v60  ;;  %v10869_v24 = vpack.c.bf16 %v13948_v23, %v13961_v32  ;;  %11605 = vtanh.f32 %v3615_v38 }
 0x224   : > { %v13975_v47 = vmul.f32 %v11594_v18, %v13570_v30  ;;  %v3620_v10 = vmul.f32 %v13859_v58, %v13977_v12  ;;  %v3423_v6 = vadd.f32 %v3422_v17, %v3421_v50  ;;  %v3970_v58 = vld [vmem:[%s16162_s2] sm:$0xff]  ;;  %11607 = vtanh.f32 %v3618_v15 }
 0x225   : > { %v11596_v51 = vpop.eup %11595  ;;  %10871 = vmatpush3.bf16.xpose.msk.msra.mxu0 %vm13784_vm7, %v10869_v24  ;;  %10313 = vmatmul.mubr.msk.f32.gmra.mrb[38].mxu1 %vm2343_vm3, %v13890_v40  ;;  %v14067_v18 = vld [vmem:[%s12296_s30 + $0xe0] sm:$0xff]  ;;  %v3613_v24 = vmul.f32 %v13882_v21, %v14006_v59  ;;  %v3461_v21 = vadd.f32 %v3460_v28, %v16553_v39 }
 0x226   : > { %v13985_v42 = vmul.f32 %v11596_v51, %v13581_v56  ;;  %10298 = vmatmul.mubr.msk.f32.gmra.mrb[38].mxu0 %vm2343_vm3, %v13869_v13  ;;  %10315 = vmatprep.mubr.msk.f32.mxu1 %vm12237_vm6, %v16274_v60  ;;  %v11598_v30 = vpop.eup %11597  ;;  %v3986_v56 = vld [vmem:[%s16162_s2 + $0x80] sm:$0xff]  ;;  %v3987_v13 = vld [vmem:[%s16162_s2 + $0x88] sm:$0xff]  ;;  %11609 = vtanh.f32 %v3620_v10  ;;  %v3424_v53 = vrot.slane %v3423_v6, 1 }
 0x227   : > { %10300 = vmatprep.mubr.msk.f32.mxu0 %vm12237_vm6, %v16274_v60  ;;  %10322 = vmatprep.subr.mxu0 %v16274_v60  ;;  %v3756_v25 = vmul.f32 1.442695, %v11598_v30  ;;  %v14012_v34 = vpack.c.bf16 %v3987_v13, %v3986_v56  ;;  %v3974_v51 = vld [vmem:[%s16162_s2 + $0x20] sm:$0xff]  ;;  %v3992_v30 = vld [vmem:[%s16162_s2 + $0xb0] sm:$0xff]  ;;  %v16554_v13 = vld [vmem:[#allocation9_spill] sm:$0xff] }
 0x228   : > { %v10873_v40 = vpack.c.bf16 %v13975_v47, %v13985_v42  ;;  %v3425_v38 = vadd.f32 %v3424_v53, %v3423_v6  ;;  %v14094_v17 = vld [vmem:[%s16162_s2 + $0x100] sm:$0xf]  ;;  %v14112_v10 = vpack.c.bf16 %v3975_v37, %v3974_v51  ;;  %v14117_v6 = vld [vmem:[%s12296_s30 + $0xa8] sm:$0xff]  ;;  %v14150_v53 = vld [vmem:[%s12296_s30 + $0xf0] sm:$0xff] }
 0x229   : > { %10316 = vmatmul.mubr.msk.f32.gmra.mrb[40].mxu1 %vm2343_vm3, %v2603_v16  ;;  %v3989_v16 = vld [vmem:[%s16162_s2 + $0x98] sm:$0xff]  ;;  %11611 = vpow2.f32 %v3756_v25 }
 0x22a   : > { %v11600_v49 = vpop.eup %11599  ;;  %10875 = vmatpush3.bf16.xpose.msk.msra.mxu1 %vm13784_vm7, %v10873_v40  ;;  %10301 = vmatmul.mubr.msk.f32.gmra.mrb[40].mxu0 %vm2343_vm3, %v13940_v36  ;;  %v14036_v36 = vpack.c.bf16 %v3971_v7, %v3970_v58  ;;  %v14041_v19 = vpack.c.bf16 %v3989_v16, %v3988_v20  ;;  %11613 = vtanh.f32 %v3610_v5  ;;  %v3977_v58 = vld [vmem:[%s16162_s2 + $0x38] sm:$0xff]  ;;  %v14136_v20 = vmul.f32 0.31622776, %v3425_v38  ;;  %v3996_v38 = vld [vmem:[%s16162_s2 + $0xd0] sm:$0xff] }
 0x22b   : > { %v14021_v33 = vmul.f32 %v11600_v49, %v13642_v62  ;;  %10337 = vmatprep.subr.mxu1 %v16274_v60  ;;  %10324 = vmatprep.mubr.msk.f32.mxu0 %vm12237_vm6, %v16274_v60  ;;  %v11602_v9 = vpop.eup %11601  ;;  %v3440_v62 = vrot.slane %v3439_v46, 1  ;;  %11615 = vtanh.f32 %v3614_v8  ;;  %v3616_v49 = vmul.f32 %v12097_v61, %v14006_v59  ;;  %v3976_v59 = vld [vmem:[%s16162_s2 + $0x30] sm:$0xff]  ;;  %v14153_v5 = vld [vmem:[%s12296_s30 + $0xd8] sm:$0xff] }
 0x22c   : > { %10339 = vmatprep.mubr.msk.f32.mxu1 %vm12237_vm6, %v16274_v60  ;;  %v11604_v26 = vpop.eup %11603  ;;  %v3758_v57 = vmul.f32 1.442695, %v11602_v9  ;;  %v3462_v16 = vrot.slane %v3461_v21, 2  ;;  %v3994_v9 = vld [vmem:[%s16162_s2 + $0xc0] sm:$0xff]  ;;  %v3622_v37 = vmul.f32 %v13927_v41, %v14136_v20  ;;  %v3623_v41 = vmul.f32 %v13862_v63, %v13977_v12 }
 0x22d   : > { %10323 = vmatpush3.xpose.msk.msra.mxu0 %vm2343_vm3, %v14021_v33  ;;  %v14053_v43 = vmul.f32 %v11604_v26, %v13637_v35  ;;  %v11606_v50 = vpop.eup %11605  ;;  %v3441_v48 = vadd.f32 %v3440_v62, %v3439_v46  ;;  %v3474_v35 = vadd.f32 %v14067_v18, %v14064_v29  ;;  %v3455_v46 = vadd.f32 %v3454_v52, %v3453_v44  ;;  %v3995_v26 = vld [vmem:[%s16162_s2 + $0xc8] sm:$0xff] }
 0x22e   : > { %10877 = vmatprep.subr.bf16.mxu0 %v14012_v34  ;;  %11617 = vpow2.f32 %v3758_v57  ;;  %v3764_v3 = vmul.f32 1.442695, %v11606_v50  ;;  %v11608_v15 = vpop.eup %11607  ;;  %v14165_v57 = vpack.c.bf16 %v3977_v58, %v3976_v59  ;;  %v3463_v52 = vadd.f32 %v3462_v16, %v3461_v21  ;;  %v3999_v59 = vld [vmem:[%s16162_s2 + $0xe8] sm:$0xff] }
 0x22f   : > { %v14106_v56 = vmul.f32 0.31622776, %v3441_v48  ;;  %v3475_v40 = vadd.f32 %v3474_v35, %v16554_v13  ;;  %11619 = vtanh.f32 %v3613_v24  ;;  %v3770_v44 = vmul.f32 1.442695, %v11608_v15  ;;  %v3979_v48 = vld [vmem:[%s16162_s2 + $0x48] sm:$0xff]  ;;  %v3997_v24 = vld [vmem:[%s16162_s2 + $0xd8] sm:$0xff] }
 0x230   : > { %10325 = vmatmul.mubr.msk.f32.vlgmr.msra.gmra.mrb[42].mxu0 %vm2343_vm3, %v13961_v32  ;;  %v14074_v32 = vpack.c.bf16 %v3973_v31, %v3972_v11  ;;  %v11610_v7 = vpop.eup %11609  ;;  %11621 = vtanh.f32 %v3617_v4  ;;  %v3466_v11 = vadd.f32 %v14153_v5, %v14150_v53  ;;  %v12102_v31 = vld [vmem:[%s12296_s30 + $0x58] sm:$0xff]  ;;  %v3456_v28 = vrot.slane %v3455_v46, 1 }
 0x231   : > { %10879 = vmatpush3.bf16.msra.mxu0 %v14036_v36  ;;  %10327 = vmatprep.mubr.msk.f32.mxu0 %vm12237_vm6, %v16274_v60  ;;  %11623 = vpow2.f32 %v3764_v3  ;;  %v3621_v8 = vmul.f32 %v12102_v31, %v14106_v56  ;;  %v3476_v39 = vrot.slane %v3475_v40, 4  ;;  %v3774_v27 = vmul.f32 1.442695, %v11610_v7  ;;  %v12104_v7 = vld [vmem:[%s12296_s30 + $0x88] sm:$0xf] }
 0x232   : > { %10338 = vmatpush3.xpose.msk.msra.mxu1 %vm2343_vm3, %v14053_v43  ;;  %10881 = vmatprep.subr.bf16.mxu0 %v14041_v19  ;;  %11625 = vtanh.f32 %v3616_v49  ;;  %v3619_v35 = vmul.f32 %v13924_v2, %v14136_v20  ;;  %v3624_v4 = vmul.f32 %v12103_v0, %v14106_v56  ;;  %v16557_v2 = vld [vmem:[#allocation8_spill] sm:$0xff]  ;;  %v3457_v3 = vadd.f32 %v3456_v28, %v3455_v46  ;;  %v3981_v46 = vld [vmem:[%s16162_s2 + $0x58] sm:$0xff]  ;;  %v12105_v28 = vld [vmem:[%s12296_s30 + $0x80] sm:$0xf] }
 0x233   : > { %10348 = vmatprep.subr.mxu1 %v16274_v60  ;;  %v14147_v62 = vpop.eup %11611  ;;  %11627 = vpow2.f32 %v3770_v44  ;;  %v3467_v21 = vadd.f32 %v3466_v11, %v16557_v2  ;;  %v3464_v63 = vrot.slane %v3463_v52, 1  ;;  %v3627_v16 = vmul.f32 %v12104_v7, %v14106_v56  ;;  %v16560_v0 = vld [vmem:[#allocation10_spill] sm:$0xff] }
 0x234   : > { %10328 = vmatmul.mubr.msk.f32.gmra.mrb[44].mxu0 %vm2343_vm3, %v13948_v23  ;;  %v14120_v23 = vld [vmem:[%s12296_s30 + $0x90] sm:$0xff]  ;;  %16555 = vst [vmem:[#allocation52_spill] sm:$0xff] %v14147_v62  ;;  %v11614_v51 = vpop.eup %11613  ;;  %11629 = vtanh.f32 %v3621_v8  ;;  %v14221_v31 = vmul.f32 0.31622776, %v3457_v3  ;;  %v3626_v56 = vmul.f32 %v12105_v28, %v13977_v12 }
 0x235   : > { %10340 = vmatmul.mubr.msk.f32.vlgmr.msra.gmra.mrb[42].mxu1 %vm2343_vm3, %v13985_v42  ;;  %10883 = vmatpush3.bf16.msra.mxu0 %v14074_v32  ;;  %v3442_v25 = vadd.f32 %v14120_v23, %v14117_v6  ;;  %v14128_v42 = vpack.c.bf16 %v3993_v22, %v3992_v30  ;;  %v11616_v30 = vpop.eup %11615  ;;  %v3477_v22 = vadd.f32 %v3476_v39, %v3475_v40  ;;  %11631 = vpow2.f32 %v3774_v27  ;;  %v4000_v12 = vld [vmem:[%s16162_s2 + $0xf0] sm:$0xff] }
 0x236   : > { %10342 = vmatprep.mubr.msk.f32.mxu1 %vm12237_vm6, %v16274_v60  ;;  %10349 = vmatpush3.msk.msra.mxu1 %vm390_vm1, %v14094_v17  ;;  %v14205_v40 = vpack.c.bf16 %v3997_v24, %v3996_v38  ;;  %11633 = vtanh.f32 %v3619_v35  ;;  %v3754_v49 = vmul.f32 1.442695, %v11614_v51  ;;  %v3465_v38 = vadd.f32 %v3464_v63, %v3463_v52 }
 0x237   : > { %10330 = vmatprep.mubr.msk.f32.mxu0 %vm12237_vm6, %v16274_v60  ;;  %10885 = vmatprep.subr.bf16.mxu0 %v14096_v55  ;;  %v3443_v50 = vadd.f32 %v3442_v25, %v16556_v45  ;;  %v3998_v25 = vld [vmem:[%s16162_s2 + $0xe0] sm:$0xff]  ;;  %11635 = vtanh.f32 %v3622_v37  ;;  %v3478_v11 = vrot.slane %v3477_v22, 2  ;;  %v3484_v52 = vrot.slane %v16560_v0, 4 }
 0x238   : > { %10331 = vmatmul.mubr.msk.f32.gmra.mrb[46].mxu0 %vm2343_vm3, %v14021_v33  ;;  %10909 = vmatprep.subr.bf16.mxu1 %v14012_v34  ;;  %v14171_v33 = vpack.c.bf16 %v3995_v26, %v3994_v9  ;;  %v14198_v13 = vpop.eup %11617  ;;  %v3762_v9 = vmul.f32 1.442695, %v11616_v30  ;;  %v3468_v26 = vrot.slane %v3467_v21, 4  ;;  %11637 = vtanh.f32 %v3624_v4 }
 0x239   : > { %10343 = vmatmul.mubr.msk.f32.gmra.mrb[44].mxu1 %vm2343_vm3, %v13975_v47  ;;  %10887 = vmatpush3.bf16.msra.mxu0 %v14112_v10  ;;  %v3978_v47 = vld [vmem:[%s16162_s2 + $0x40] sm:$0xff]  ;;  %16558 = vst [vmem:[#allocation53_spill] sm:$0xff] %v14198_v13  ;;  %v3444_v61 = vrot.slane %v3443_v50, 4  ;;  %v11620_v58 = vpop.eup %11619  ;;  %11639 = vtanh.f32 %v3623_v41  ;;  %v14234_v45 = vpack.c.bf16 %v3999_v59, %v3998_v25  ;;  %v3479_v4 = vadd.f32 %v3478_v11, %v3477_v22  ;;  %v12106_v41 = vld [vmem:[%s12296_s30 + $0x78] sm:$0xf] }
 0x23a   : > { %10345 = vmatprep.mubr.msk.f32.mxu1 %vm12237_vm6, %v16274_v60  ;;  %10889 = vmatprep.subr.bf16.mxu0 %v14128_v42  ;;  %v14196_v15 = vpack.c.bf16 %v3979_v48, %v3978_v47  ;;  %v11622_v44 = vpop.eup %11621  ;;  %v3982_v47 = vld [vmem:[%s16162_s2 + $0x60] sm:$0xff]  ;;  %v3983_v48 = vld [vmem:[%s16162_s2 + $0x68] sm:$0xff]  ;;  %11641 = vpow2.f32 %v3754_v49  ;;  %v3760_v35 = vmul.f32 1.442695, %v11620_v58  ;;  %v3469_v37 = vadd.f32 %v3468_v26, %v3467_v21 }
 0x23b   : > { %4079 = vmatprep.mubr.f32.mxu0 %v14147_v62  ;;  %v14228_v39 = vpop.eup %11623  ;;  %v3445_v27 = vadd.f32 %v3444_v61, %v3443_v50  ;;  %v4001_v50 = vld [vmem:[%s16162_s2 + $0xf8] sm:$0xff]  ;;  %11643 = vpow2.f32 %v3762_v9  ;;  %v3768_v51 = vmul.f32 1.442695, %v11622_v44  ;;  %v3629_v2 = vmul.f32 %v13956_v14, %v14221_v31  ;;  %v3984_v14 = vld [vmem:[%s16162_s2 + $0x70] sm:$0xff] }
 0x23c   : > { %16559 = vst [vmem:[#allocation54_spill] sm:$0xff] %v14228_v39  ;;  %v11626_v24 = vpop.eup %11625  ;;  %11645 = vtanh.f32 %v3627_v16  ;;  %v14255_v30 = vpack.c.bf16 %v3983_v48, %v3982_v47  ;;  %v3625_v61 = vmul.f32 %v12106_v41, %v14136_v20  ;;  %v14265_v22 = vpack.c.bf16 %v4001_v50, %v4000_v12 }
 0x23d   : > { %10346 = vmatmul.mubr.msk.f32.gmra.mrb[46].mxu1 %vm2343_vm3, %v14053_v43  ;;  %10891 = vmatpush3.bf16.msra.mxu0 %v14165_v57  ;;  %v3980_v43 = vld [vmem:[%s16162_s2 + $0x50] sm:$0xff]  ;;  %v14259_v3 = vpop.eup %11627  ;;  %11647 = vtanh.f32 %v3626_v56  ;;  %v3446_v21 = vrot.slane %v3445_v27, 2  ;;  %v3766_v49 = vmul.f32 1.442695, %v11626_v24  ;;  %v14273_v20 = vmul.f32 0.31622776, %v3465_v38 }
 0x23e   : > { %10350 = vmatprep.mubr.msk.f32.mxu1 %vm12237_vm6, %v16274_v60  ;;  %10893 = vmatprep.subr.bf16.mxu0 %v14171_v33  ;;  %v14226_v8 = vpack.c.bf16 %v3981_v46, %v3980_v43  ;;  %16561 = vst [vmem:[#allocation56_spill] sm:$0xff] %v14259_v3  ;;  %v3985_v43 = vld [vmem:[%s16162_s2 + $0x78] sm:$0xff]  ;;  %v11630_v46 = vpop.eup %11629  ;;  %11649 = vpow2.f32 %v3760_v35  ;;  %v3485_v59 = vadd.f32 %v3484_v52, %v16560_v0  ;;  %v3470_v9 = vrot.slane %v3469_v37, 2  ;;  %v12107_v35 = vld [vmem:[%s12296_s30 + $0xa0] sm:$0xff] }
 0x23f   : > { %v14280_v25 = vpop.eup %11631  ;;  %11651 = vpow2.f32 %v3768_v51  ;;  %v3480_v26 = vrot.slane %v3479_v4, 1  ;;  %v14286_v11 = vpack.c.bf16 %v3985_v43, %v3984_v14  ;;  %v3776_v56 = vmul.f32 1.442695, %v11630_v46 }
 0x240   : > { %16562 = vst [vmem:[#allocation55_spill] sm:$0xff] %v14280_v25  ;;  %v11634_v16 = vpop.eup %11633  ;;  %11653 = vtanh.f32 %v3629_v2  ;;  %v3447_v47 = vadd.f32 %v3446_v21, %v3445_v27  ;;  %v3630_v38 = vmul.f32 %v12107_v35, %v14273_v20  ;;  %v3486_v27 = vrot.slane %v3485_v59, 2  ;;  %v14306_v21 = vld [vmem:[%s12296_s30 + $0x128] sm:$0xff] }
 0x241   : > { %10351 = vmatmul.mubr.msk.f32.vlgmr.msra.gmra.mrb[48].mxu1 %vm380_vm0, %v14198_v13  ;;  %10895 = vmatpush3.bf16.msra.mxu0 %v14196_v15  ;;  %v11636_v28 = vpop.eup %11635  ;;  %11655 = vtanh.f32 %v3625_v61  ;;  %v3772_v24 = vmul.f32 1.442695, %v11634_v16  ;;  %v3471_v2 = vadd.f32 %v3470_v9, %v3469_v37  ;;  %v3481_v41 = vadd.f32 %v3480_v26, %v3479_v4  ;;  %v14303_v61 = vld [vmem:[%s12296_s30 + $0x140] sm:$0xff]  ;;  %v12110_v4 = vld [vmem:[%s12296_s30 + $0xb8] sm:$0xff] }
 0x242   : > { %10911 = vmatpush3.bf16.msra.mxu1 %v14036_v36  ;;  %10897 = vmatprep.subr.bf16.mxu0 %v14205_v40  ;;  %v11638_v48 = vpop.eup %11637  ;;  %11657 = vpow2.f32 %v3766_v49  ;;  %v3498_v14 = vadd.f32 %v14306_v21, %v14303_v61  ;;  %v3633_v16 = vmul.f32 %v12110_v4, %v14273_v20  ;;  %v3487_v35 = vadd.f32 %v3486_v27, %v3485_v59  ;;  %v12111_v27 = vld [vmem:[%s12296_s30 + $0xd0] sm:$0xf]  ;;  %v12123_v13 = vld [vmem:[%s12296_s30 + $0x118] sm:$0xf] }
 0x243   : > { %10913 = vmatprep.subr.bf16.mxu1 %v14041_v19  ;;  %10353 = vmatprep.mubr.msk.f32.mxu1 %vm12237_vm6, %v16274_v60  ;;  %v11640_v50 = vpop.eup %11639  ;;  %11659 = vpow2.f32 %v3776_v56  ;;  %v3782_v49 = vmul.f32 1.442695, %v11638_v48  ;;  %v14325_v4 = vmul.f32 0.31622776, %v3481_v41  ;;  %v3636_v41 = vmul.f32 %v12111_v27, %v14273_v20 }
 0x244   : > { %v14300_v52 = vpop.eup %11641  ;;  %11661 = vtanh.f32 %v3630_v38  ;;  %v16566_v38 = vld [vmem:[#allocation19_spill] sm:$0xff] }
 0x245   : > { %10899 = vmatpush3.bf16.msra.mxu0 %v14226_v8  ;;  %10354 = vmatmul.mubr.msk.f32.gmra.mrb[50].mxu1 %vm380_vm0, %v14228_v39  ;;  %16563 = vst [vmem:[#allocation57_spill] sm:$0xff] %v14300_v52  ;;  %v14311_v46 = vpop.eup %11643  ;;  %11663 = vpow2.f32 %v3772_v24  ;;  %v3499_v1 = vadd.f32 %v3498_v14, %v16566_v38  ;;  %v14357_v38 = vld [vmem:[%s12296_s30 + $0x120] sm:$0xff] }
 0x246   : > { %10915 = vmatpush3.bf16.msra.mxu1 %v14074_v32  ;;  %10901 = vmatprep.subr.bf16.mxu0 %v14234_v45  ;;  %16564 = vst [vmem:[#allocation58_spill] sm:$0xff] %v14311_v46  ;;  %v11646_v37 = vpop.eup %11645  ;;  %11665 = vpow2.f32 %v3782_v49 }
 0x247   : > { %10917 = vmatprep.subr.bf16.mxu1 %v14096_v55  ;;  %v14276_v63 = vpop.f32.mrb[0].mxu0  ;;  %10356 = vmatprep.mubr.msk.f32.mxu1 %vm12237_vm6, %v16274_v60  ;;  %v11648_v26 = vpop.eup %11647  ;;  %11667 = vtanh.f32 %v3633_v16 }
 0x248   : > { %v14283_v58 = vpop.f32.mrb[0].mxu1  ;;  %v10116_v7 = vpop.f32.mrb[1].mxu0  ;;  %v3786_v14 = vmul.f32 1.442695, %v11648_v26 }
 0x249   : > { %v10131_v44 = vpop.f32.mrb[1].mxu1  ;;  %10903 = vmatpush3.bf16.msra.mxu0 %v14255_v30  ;;  %10357 = vmatmul.mubr.msk.f32.gmra.mrb[52].mxu1 %vm380_vm0, %v14259_v3  ;;  %v3448_v7 = vrot.slane %v3447_v47, 1 }
 0x24a   : > { %10919 = vmatpush3.bf16.msra.mxu1 %v14112_v10  ;;  %10905 = vmatprep.subr.bf16.mxu0 %v14265_v22  ;;  %v3778_v44 = vmul.f32 1.442695, %v11636_v28  ;;  %v3788_v28 = vmul.f32 1.442695, %v11646_v37  ;;  %v3500_v37 = vrot.slane %v3499_v1, 4 }
 0x24b   : > { %10921 = vmatprep.subr.bf16.mxu1 %v14128_v42  ;;  %v14295_v12 = vpop.f32.mrb[2].mxu0  ;;  %4248 = vmatprep.mubr.f32.mxu1 %v14280_v25  ;;  %v3449_v24 = vadd.f32 %v3448_v7, %v3447_v47  ;;  %v3638_v7 = vmul.f32 %v14067_v18, %v14325_v4 }
 0x24c   : > { %v14298_v51 = vpop.f32.mrb[2].mxu1  ;;  %v10119_v0 = vpop.f32.mrb[3].mxu0  ;;  %11669 = vpow2.f32 %v3778_v44 }
 0x24d   : > { %v10134_v43 = vpop.f32.mrb[3].mxu1  ;;  %10907 = vmatpush3.bf16.msra.mxu0 %v14286_v11  ;;  %v14323_v0 = vpop.eup %11649  ;;  %v14344_v20 = vmul.f32 0.31622776, %v3449_v24  ;;  %v3501_v24 = vadd.f32 %v3500_v37, %v3499_v1  ;;  %v16574_v37 = vld [vmem:[#allocation18_spill] sm:$0xff] }
 0x24e   : > { %10923 = vmatpush3.bf16.msra.mxu1 %v14165_v57  ;;  %10359 = vmatprep.subr.mxu0 %v16274_v60  ;;  %16565 = vst [vmem:[#allocation64_spill] sm:$0xff] %v14323_v0  ;;  %v3780_v43 = vmul.f32 1.442695, %v11640_v50  ;;  %v3472_v60 = vrot.slane %v3471_v2, 1  ;;  %v14331_v59 = vpop.eup %11651 }
 0x24f   : > { %10925 = vmatprep.subr.bf16.mxu1 %v14171_v33  ;;  %v14318_v9 = vpop.f32.mrb[4].mxu0  ;;  %16567 = vst [vmem:[#allocation66_spill] sm:$0xff] %v14331_v59  ;;  %v11654_v50 = vpop.eup %11653 }
 0x250   : > { %v14320_v56 = vpop.f32.mrb[4].mxu1  ;;  %v10122_v48 = vpop.f32.mrb[5].mxu0  ;;  %4080 = vmatmul.mubr.f32.vlgmr.msra.gmra.mrb[48].mxu0 %v14300_v52  ;;  %11671 = vpow2.f32 %v3780_v43  ;;  %v3473_v47 = vadd.f32 %v3472_v60, %v3471_v2  ;;  %v3792_v16 = vmul.f32 1.442695, %v11654_v50  ;;  %v14354_v43 = vld [vmem:[%s12296_s30 + $0x138] sm:$0xff]  ;;  %v16570_v50 = vmov 0.0  }
 0x251   : > { %v10137_v25 = vpop.f32.mrb[5].mxu1  ;;  %4084 = vmatprep.mubr.f32.mxu0 %v14311_v46  ;;  %10360 = vmatpush3.msk.msra.mxu0 %vm390_vm1, %v14094_v17  ;;  %v3488_v48 = vrot.slane %v3487_v35, 1  ;;  %11673 = vpow2.f32 %v3788_v28  ;;  %v3490_v28 = vadd.f32 %v14357_v38, %v14354_v43  ;;  %v12117_v46 = vld [vmem:[%s12296_s30 + $0xe8] sm:$0xff] }
 0x252   : > { %10927 = vmatpush3.bf16.msra.mxu1 %v14196_v15  ;;  %10941 = vmatprep.subr.bf16.mxu0 %v14012_v34  ;;  %v11656_v25 = vpop.eup %11655  ;;  %11675 = vtanh.f32 %v3636_v41  ;;  %v14351_v44 = vmul.f32 0.31622776, %v3473_v47  ;;  %v3632_v41 = vmul.f32 %v13953_v54, %v14221_v31 }
 0x253   : > { %10929 = vmatprep.subr.bf16.mxu1 %v14205_v40  ;;  %v14339_v49 = vpop.eup %11657  ;;  %v3784_v60 = vmul.f32 1.442695, %v11656_v25  ;;  %11677 = vpow2.f32 %v3786_v14  ;;  %v3489_v2 = vadd.f32 %v3488_v48, %v3487_v35  ;;  %v3628_v35 = vmul.f32 %v14120_v23, %v14344_v20  ;;  %v16572_v25 = vld [vmem:[#allocation23_spill] sm:$0xff] }
 0x254   : > { %4085 = vmatmul.mubr.f32.gmra.mrb[50].mxu0 %v14323_v0  ;;  %16568 = vst [vmem:[#allocation65_spill] sm:$0xff] %v14339_v49  ;;  %v14348_v26 = vpop.eup %11659  ;;  %11679 = vtanh.f32 %v3638_v7  ;;  %v3508_v14 = vrot.slane %v16572_v25, 4  ;;  %v3637_v7 = vmul.f32 %v14153_v5, %v14351_v44  ;;  %v3491_v54 = vadd.f32 %v3490_v28, %v16574_v37  ;;  %v12116_v28 = vld [vmem:[%s12296_s30 + $0xc8] sm:$0xf] }
 0x255   : > { %4089 = vmatprep.mubr.f32.mxu0 %v14331_v59  ;;  %16569 = vst [vmem:[#allocation63_spill] sm:$0xff] %v14348_v26  ;;  %v11662_v18 = vpop.eup %11661  ;;  %11681 = vpow2.f32 %v3792_v16  ;;  %v14374_v48 = vmul.f32 0.31622776, %v3489_v2  ;;  %v3502_v16 = vrot.slane %v3501_v24, 2  ;;  %v14385_v59 = vld [vmem:[%s12296_s30 + $0x170] sm:$0xff]  ;;  %v3631_v5 = vmul.f32 %v14117_v6, %v14344_v20 }
 0x256   : > { %10931 = vmatpush3.bf16.msra.mxu1 %v14226_v8  ;;  %v14363_v27 = vpop.eup %11663  ;;  %11683 = vpow2.f32 %v3784_v60  ;;  %v3794_v47 = vmul.f32 1.442695, %v11662_v18  ;;  %v3635_v37 = vmul.f32 %v12116_v28, %v14221_v31  ;;  %v3492_v31 = vrot.slane %v3491_v54, 4 }
 0x257   : > { %10933 = vmatprep.subr.bf16.mxu1 %v14234_v45  ;;  %16571 = vst [vmem:[#allocation59_spill] sm:$0xff] %v14363_v27  ;;  %v14372_v1 = vpop.eup %11665  ;;  %11685 = vtanh.f32 %v3628_v35  ;;  %v3639_v6 = vmul.f32 %v12117_v46, %v14374_v48 }
 0x258   : > { %4090 = vmatmul.mubr.f32.gmra.mrb[52].mxu0 %v14339_v49  ;;  %16573 = vst [vmem:[#allocation60_spill] sm:$0xff] %v14372_v1  ;;  %v11668_v23 = vpop.eup %11667  ;;  %v14382_v49 = vld [vmem:[%s12296_s30 + $0x188] sm:$0xff]  ;;  %11687 = vtanh.f32 %v3632_v41  ;;  %v3503_v41 = vadd.f32 %v3502_v16, %v3501_v24 }
 0x259   : > { %10361 = vmatprep.mubr.msk.f32.mxu0 %vm12237_vm6, %v16570_v50  ;;  %v3522_v60 = vadd.f32 %v14385_v59, %v14382_v49  ;;  %v14392_v2 = vpop.eup %11669  ;;  %11689 = vpow2.f32 %v3794_v47  ;;  %v3800_v35 = vmul.f32 1.442695, %v11668_v23  ;;  %v12118_v47 = vld [vmem:[%s12296_s30 + $0xc0] sm:$0xf] }
 0x25a   : > { %10935 = vmatpush3.bf16.msra.mxu1 %v14255_v30  ;;  %16575 = vst [vmem:[#allocation62_spill] sm:$0xff] %v14392_v2  ;;  %v14398_v18 = vpop.eup %11671  ;;  %11691 = vtanh.f32 %v3637_v7  ;;  %v3634_v23 = vmul.f32 %v12118_v47, %v14344_v20  ;;  %v3640_v7 = vmul.f32 %v14150_v53, %v14351_v44  ;;  %v3641_v20 = vmul.f32 %v14064_v29, %v14325_v4 }
 0x25b   : > { %10937 = vmatprep.subr.bf16.mxu1 %v14265_v22  ;;  %16576 = vst [vmem:[#allocation61_spill] sm:$0xff] %v14398_v18  ;;  %v14404_v0 = vpop.eup %11673  ;;  %11693 = vtanh.f32 %v3631_v5  ;;  %v3493_v53 = vadd.f32 %v3492_v31, %v3491_v54  ;;  %v3504_v5 = vrot.slane %v3503_v41, 1  ;;  %v12119_v54 = vld [vmem:[%s12296_s30 + $0x100] sm:$0xff] }
 0x25c   : > { %10362 = vmatmul.mubr.msk.f32.vlgmr.msra.gmra.mrb[54].mxu0 %vm380_vm0, %v14348_v26  ;;  %v3509_v26 = vadd.f32 %v3508_v14, %v16572_v25  ;;  %16577 = vst [vmem:[#allocation70_spill] sm:$0xff] %v14404_v0  ;;  %v11676_v3 = vpop.eup %11675  ;;  %v16579_v25 = vld [vmem:[#allocation25_spill] sm:$0xff]  ;;  %11695 = vtanh.f32 %v3635_v37 }
 0x25d   : > { %10943 = vmatpush3.bf16.msra.mxu0 %v14036_v36  ;;  %10364 = vmatprep.mubr.msk.f32.mxu0 %vm12237_vm6, %v16570_v50  ;;  %v3523_v14 = vadd.f32 %v3522_v60, %v16579_v25  ;;  %v14417_v46 = vpop.eup %11677  ;;  %11697 = vpow2.f32 %v3800_v35 }
 0x25e   : > { %10939 = vmatpush3.bf16.msra.mxu1 %v14286_v11  ;;  %10945 = vmatprep.subr.bf16.mxu0 %v14041_v19  ;;  %16581 = vst [vmem:[#allocation69_spill] sm:$0xff] %v14417_v46  ;;  %v11680_v24 = vpop.eup %11679  ;;  %11699 = vtanh.f32 %v3639_v6  ;;  %v3642_v6 = vmul.f32 %v12119_v54, %v14374_v48 }
 0x25f   : > { %10370 = vmatprep.subr.mxu1 %v16570_v50  ;;  %v14429_v16 = vpop.eup %11681  ;;  %v3524_v37 = vrot.slane %v3523_v14, 4  ;;  %v3810_v35 = vmul.f32 1.442695, %v11680_v24  ;;  %11701 = vtanh.f32 %v3634_v23  ;;  %v12122_v24 = vld [vmem:[%s12296_s30 + $0x110] sm:$0xf] }
 0x260   : > { %v14408_v52 = vpop.f32.mrb[6].mxu0  ;;  %10365 = vmatmul.mubr.msk.f32.gmra.mrb[56].mxu0 %vm380_vm0, %v14372_v1  ;;  %16582 = vst [vmem:[#allocation67_spill] sm:$0xff] %v14429_v16  ;;  %11703 = vtanh.f32 %v3640_v7  ;;  %v3505_v7 = vadd.f32 %v3504_v5, %v3503_v41 }
 0x261   : > { %16578 = vst [vmem:[#allocation68_spill] sm:$0xff] %v14408_v52  ;;  %4249 = vmatmul.mubr.f32.vlgmr.msra.gmra.mrb[54].mxu1 %v14363_v27  ;;  %v14414_v28 = vpop.f32.mrb[6].mxu1  ;;  %v10146_v39 = vpop.f32.mrb[7].mxu0  ;;  %10947 = vmatpush3.bf16.msra.mxu0 %v14074_v32 }
 0x262   : > { %16580 = vst [vmem:[#allocation72_spill] sm:$0xff] %v14414_v28  ;;  %v10161_v1 = vpop.f32.mrb[7].mxu1  ;;  %4253 = vmatprep.mubr.f32.mxu1 %v14398_v18  ;;  %10371 = vmatpush3.msk.msra.mxu1 %vm390_vm1, %v14094_v17  ;;  %v3510_v39 = vrot.slane %v3509_v26, 2 }
 0x263   : > { %10949 = vmatprep.subr.bf16.mxu0 %v14096_v55  ;;  %10367 = vmatprep.mubr.msk.f32.mxu0 %vm12237_vm6, %v16570_v50  ;;  %v3806_v1 = vmul.f32 1.442695, %v11676_v3  ;;  %v14442_v3 = vpop.eup %11683 }
 0x264   : > { %v14433_v60 = vpop.f32.mrb[8].mxu0  ;;  %10973 = vmatprep.subr.bf16.mxu1 %v14012_v34  ;;  %10368 = vmatmul.mubr.msk.f32.gmra.mrb[58].mxu0 %vm380_vm0, %v14404_v0  ;;  %16585 = vst [vmem:[#allocation77_spill] sm:$0xff] %v14442_v3  ;;  %v3511_v31 = vadd.f32 %v3510_v39, %v3509_v26  ;;  %v14449_v0 = vld [vmem:[%s12296_s30 + $0x180] sm:$0xff]  ;;  %v11686_v23 = vpop.eup %11685  ;;  %v3494_v26 = vrot.slane %v3493_v53, 2  ;;  %v3525_v39 = vadd.f32 %v3524_v37, %v3523_v14 }
 0x265   : > { %16583 = vst [vmem:[#allocation74_spill] sm:$0xff] %v14433_v60  ;;  %4254 = vmatmul.mubr.f32.gmra.mrb[56].mxu1 %v14392_v2  ;;  %v14439_v25 = vpop.f32.mrb[8].mxu1  ;;  %v10149_v29 = vpop.f32.mrb[9].mxu0  ;;  %10951 = vmatpush3.bf16.msra.mxu0 %v14112_v10  ;;  %11705 = vpow2.f32 %v3806_v1  ;;  %v3790_v14 = vmul.f32 1.442695, %v11686_v23 }
 0x266   : > { %16584 = vst [vmem:[#allocation76_spill] sm:$0xff] %v14439_v25  ;;  %v10164_v47 = vpop.f32.mrb[9].mxu1  ;;  %4258 = vmatprep.mubr.f32.mxu1 %v14417_v46  ;;  %10953 = vmatprep.subr.bf16.mxu0 %v14128_v42  ;;  %v14452_v29 = vld [vmem:[%s12296_s30 + $0x168] sm:$0xff]  ;;  %v11688_v54 = vpop.eup %11687  ;;  %11707 = vtanh.f32 %v3641_v20  ;;  %v3512_v20 = vrot.slane %v3511_v31, 1 }
 0x267   : > { %v3514_v2 = vadd.f32 %v14452_v29, %v14449_v0  ;;  %4417 = vmatprep.mubr.f32.mxu0 %v14429_v16  ;;  %v3644_v47 = vmul.f32 %v12122_v24, %v14325_v4  ;;  %v14465_v16 = vpop.eup %11689  ;;  %v3645_v4 = vmul.f32 %v12123_v13, %v14374_v48  ;;  %11709 = vpow2.f32 %v3810_v35 }
 0x268   : > { %v14459_v46 = vpop.f32.mrb[10].mxu0  ;;  %16588 = vst [vmem:[#allocation15_spill] sm:$0xff] %v14465_v16  ;;  %v11692_v41 = vpop.eup %11691  ;;  %11711 = vtanh.f32 %v3642_v6  ;;  %v3798_v24 = vmul.f32 1.442695, %v11688_v54  ;;  %v14473_v13 = vmul.f32 0.31622776, %v3505_v7 }
 0x269   : > { %16586 = vst [vmem:[#allocation21_spill] sm:$0xff] %v14459_v46  ;;  %4259 = vmatmul.mubr.f32.gmra.mrb[58].mxu1 %v14442_v3  ;;  %v14462_v18 = vpop.f32.mrb[10].mxu1  ;;  %v10152_v27 = vpop.f32.mrb[11].mxu0  ;;  %10955 = vmatpush3.bf16.msra.mxu0 %v14165_v57  ;;  %11713 = vtanh.f32 %v3644_v47  ;;  %v3526_v48 = vrot.slane %v3525_v39, 2  ;;  %v12124_v6 = vld [vmem:[%s12296_s30 + $0x108] sm:$0xf]  ;;  %v3513_v47 = vadd.f32 %v3512_v20, %v3511_v31 }
 0x26a   : > { %16587 = vst [vmem:[#allocation16_spill] sm:$0xff] %v14462_v18  ;;  %v10167_v1 = vpop.f32.mrb[11].mxu1  ;;  %10372 = vmatprep.mubr.msk.f32.mxu1 %vm12237_vm6, %v16570_v50  ;;  %10957 = vmatprep.subr.bf16.mxu0 %v14171_v33  ;;  %v16589_v27 = vld [vmem:[#allocation24_spill] sm:$0xff]  ;;  %v11694_v37 = vpop.eup %11693  ;;  %v3495_v18 = vadd.f32 %v3494_v26, %v3493_v53  ;;  %v3643_v23 = vmul.f32 %v12124_v6, %v14351_v44  ;;  %11715 = vtanh.f32 %v3645_v4 }
 0x26b   : > { %v3515_v5 = vadd.f32 %v3514_v2, %v16589_v27  ;;  %v11696_v3 = vpop.eup %11695  ;;  %11717 = vpow2.f32 %v3790_v14  ;;  %v3796_v53 = vmul.f32 1.442695, %v11694_v37  ;;  %v16591_v1 = vld [vmem:[#allocation26_spill] sm:$0xff]  ;;  %v3647_v6 = vmul.f32 %v14306_v21, %v14473_v13 }
 0x26c   : > { %v14478_v35 = vpop.eup %11697  ;;  %11719 = vpow2.f32 %v3798_v24  ;;  %v3804_v7 = vmul.f32 1.442695, %v11696_v3  ;;  %v3532_v44 = vrot.slane %v16591_v1, 4  ;;  %v3496_v27 = vrot.slane %v3495_v18, 1 }
 0x26d   : > { %10373 = vmatmul.mubr.msk.f32.vlgmr.msra.gmra.mrb[60].mxu1 %vm380_vm0, %v14465_v16  ;;  %10959 = vmatpush3.bf16.msra.mxu0 %v14196_v15  ;;  %16590 = vst [vmem:[#allocation20_spill] sm:$0xff] %v14478_v35  ;;  %v11700_v2 = vpop.eup %11699  ;;  %v3516_v54 = vrot.slane %v3515_v5, 4  ;;  %v3527_v16 = vadd.f32 %v3526_v48, %v3525_v39  ;;  %11721 = vtanh.f32 %v3643_v23  ;;  %v3808_v14 = vmul.f32 1.442695, %v11692_v41 }
 0x26e   : > { %10975 = vmatpush3.bf16.msra.mxu1 %v14036_v36  ;;  %10961 = vmatprep.subr.bf16.mxu0 %v14205_v40  ;;  %v11702_v26 = vpop.eup %11701  ;;  %11723 = vpow2.f32 %v3796_v53  ;;  %v14497_v37 = vmul.f32 0.31622776, %v3513_v47  ;;  %v3812_v24 = vmul.f32 1.442695, %v11700_v2  ;;  %v3533_v41 = vadd.f32 %v3532_v44, %v16591_v1  ;;  %v12125_v47 = vld [vmem:[%s12296_s30 + $0x130] sm:$0xff] }
 0x26f   : > { %10977 = vmatprep.subr.bf16.mxu1 %v14041_v19  ;;  %10375 = vmatprep.mubr.msk.f32.mxu1 %vm12237_vm6, %v16570_v50  ;;  %v11704_v4 = vpop.eup %11703  ;;  %v3802_v20 = vmul.f32 1.442695, %v11702_v26  ;;  %v3517_v21 = vadd.f32 %v3516_v54, %v3515_v5  ;;  %11725 = vpow2.f32 %v3804_v7  ;;  %v3528_v53 = vrot.slane %v3527_v16, 1 }
 0x270   : > { %v14493_v31 = vpop.eup %11705  ;;  %v3814_v23 = vmul.f32 1.442695, %v11704_v4  ;;  %11727 = vtanh.f32 %v3647_v6  ;;  %v3534_v1 = vrot.slane %v3533_v41, 2  ;;  %v14519_v6 = vld [vmem:[%s12296_s30 + $0x1d0] sm:$0xff] }
 0x271   : > { %10963 = vmatpush3.bf16.msra.mxu0 %v14226_v8  ;;  %10376 = vmatmul.mubr.msk.f32.gmra.mrb[62].mxu1 %vm380_vm0, %v14478_v35  ;;  %16592 = vst [vmem:[#allocation73_spill] sm:$0xff] %v14493_v31  ;;  %v11708_v3 = vpop.eup %11707  ;;  %v3497_v35 = vadd.f32 %v3496_v27, %v3495_v18  ;;  %11729 = vpow2.f32 %v3808_v14  ;;  %v3648_v18 = vmul.f32 %v12125_v47, %v14497_v37  ;;  %v3518_v54 = vrot.slane %v3517_v21, 2  ;;  %v14522_v14 = vld [vmem:[%s12296_s30 + $0x1b8] sm:$0xff] }
 0x272   : > { %10979 = vmatpush3.bf16.msra.mxu1 %v14074_v32  ;;  %10965 = vmatprep.subr.bf16.mxu0 %v14234_v45  ;;  %v14502_v39 = vpop.eup %11709  ;;  %v3816_v5 = vmul.f32 1.442695, %v11708_v3  ;;  %11731 = vpow2.f32 %v3802_v20  ;;  %v3529_v27 = vadd.f32 %v3528_v53, %v3527_v16  ;;  %v3546_v3 = vadd.f32 %v14522_v14, %v14519_v6 }
 0x273   : > { %10981 = vmatprep.subr.bf16.mxu1 %v14096_v55  ;;  %10378 = vmatprep.mubr.msk.f32.mxu1 %vm12237_vm6, %v16570_v50  ;;  %16593 = vst [vmem:[#allocation71_spill] sm:$0xff] %v14502_v39  ;;  %v11712_v48 = vpop.eup %11711  ;;  %11733 = vpow2.f32 %v3812_v24  ;;  %v14516_v4 = vmul.f32 0.31622776, %v3497_v35  ;;  %v3519_v47 = vadd.f32 %v3518_v54, %v3517_v21  ;;  %v14549_v21 = vld [vmem:[%s12296_s30 + $0x1f8] sm:$0xff]  ;;  %v16599_v54 = vld [vmem:[#allocation47_spill] sm:$0xff] }
 0x274   : > { %v11714_v2 = vpop.eup %11713  ;;  %v3818_v7 = vmul.f32 1.442695, %v11712_v48  ;;  %11735 = vpow2.f32 %v3814_v23  ;;  %v12128_v23 = vld [vmem:[%s12296_s30 + $0x148] sm:$0xff] }
 0x275   : > { %10967 = vmatpush3.bf16.msra.mxu0 %v14255_v30  ;;  %10379 = vmatmul.mubr.msk.f32.gmra.mrb[64].mxu1 %vm380_vm0, %v14493_v31  ;;  %v11716_v26 = vpop.eup %11715  ;;  %11737 = vpow2.f32 %v3816_v5  ;;  %v3822_v48 = vmul.f32 1.442695, %v11714_v2  ;;  %v3651_v53 = vmul.f32 %v12128_v23, %v14497_v37  ;;  %v3535_v2 = vadd.f32 %v3534_v1, %v3533_v41  ;;  %v14564_v1 = vld [vmem:[%s12296_s30 + $0x218] sm:$0xff] }
 0x276   : > { %10983 = vmatpush3.bf16.msra.mxu1 %v14112_v10  ;;  %10969 = vmatprep.subr.bf16.mxu0 %v14265_v22  ;;  %v14514_v44 = vpop.eup %11717  ;;  %11739 = vtanh.f32 %v3648_v18  ;;  %v3824_v5 = vmul.f32 1.442695, %v11716_v26  ;;  %v14546_v18 = vld [vmem:[%s12296_s30 + $0x210] sm:$0xff]  ;;  %v3547_v41 = vadd.f32 %v3546_v3, %v16599_v54 }
 0x277   : > { %10985 = vmatprep.subr.bf16.mxu1 %v14128_v42  ;;  %4586 = vmatprep.mubr.f32.mxu1 %v14502_v39  ;;  %16594 = vst [vmem:[#allocation14_spill] sm:$0xff] %v14514_v44  ;;  %v14529_v24 = vpop.eup %11719  ;;  %11741 = vpow2.f32 %v3818_v7  ;;  %v3649_v7 = vmul.f32 %v14354_v43, %v14516_v4  ;;  %v3536_v62 = vrot.slane %v3535_v2, 1 }
 0x278   : > { %16596 = vst [vmem:[#allocation28_spill] sm:$0xff] %v14529_v24  ;;  %v11722_v31 = vpop.eup %11721  ;;  %11743 = vpow2.f32 %v3822_v48  ;;  %v3520_v48 = vrot.slane %v3519_v47, 1 }
 0x279   : > { %v14526_v20 = vpop.f32.mrb[12].mxu0  ;;  %10971 = vmatpush3.bf16.msra.mxu0 %v14286_v11  ;;  %11745 = vtanh.f32 %v3651_v53  ;;  %v16605_v53 = vld [vmem:[#allocation40_spill] sm:$0xff] }
 0x27a   : > { %16595 = vst [vmem:[#allocation75_spill] sm:$0xff] %v14526_v20  ;;  %10987 = vmatpush3.bf16.msra.mxu1 %v14165_v57  ;;  %v14532_v35 = vpop.f32.mrb[12].mxu1  ;;  %v10176_v16 = vpop.f32.mrb[13].mxu0  ;;  %10381 = vmatprep.subr.mxu0 %v16570_v50  ;;  %v3646_v20 = vmul.f32 %v14357_v38, %v14516_v4  ;;  %11747 = vpow2.f32 %v3824_v5 }
 0x27b   : > { %16597 = vst [vmem:[#allocation17_spill] sm:$0xff] %v14532_v35  ;;  %v10191_v39 = vpop.f32.mrb[13].mxu1  ;;  %10989 = vmatprep.subr.bf16.mxu1 %v14171_v33  ;;  %v14539_v16 = vpop.eup %11723  ;;  %v14543_v35 = vmul.f32 0.31622776, %v3529_v27  ;;  %v14567_v27 = vld [vmem:[%s12296_s30 + $0x200] sm:$0xff] }
 0x27c   : > { %4418 = vmatmul.mubr.f32.vlgmr.msra.gmra.mrb[60].mxu0 %v14514_v44  ;;  %16598 = vst [vmem:[#allocation27_spill] sm:$0xff] %v14539_v16  ;;  %v3562_v39 = vadd.f32 %v14549_v21, %v14546_v18  ;;  %v14559_v38 = vpop.eup %11725  ;;  %v3570_v3 = vadd.f32 %v14567_v27, %v14564_v1  ;;  %11749 = vtanh.f32 %v3646_v20 }
 0x27d   : > { %v14554_v26 = vpop.f32.mrb[14].mxu0  ;;  %4422 = vmatprep.mubr.f32.mxu0 %v14529_v24  ;;  %10382 = vmatpush3.msk.msra.mxu0 %vm390_vm1, %v14094_v17  ;;  %16601 = vst [vmem:[#allocation31_spill] sm:$0xff] %v14559_v38  ;;  %v11728_v54 = vpop.eup %11727  ;;  %v12133_v17 = vld [vmem:[%s12296_s30 + $0x160] sm:$0xf]  ;;  %11751 = vtanh.f32 %v3649_v7  ;;  %v3537_v7 = vadd.f32 %v3536_v62, %v3535_v2  ;;  %v12134_v62 = vld [vmem:[%s12296_s30 + $0x150] sm:$0xf] }
 0x27e   : > { %16600 = vst [vmem:[#allocation22_spill] sm:$0xff] %v14554_v26  ;;  %10991 = vmatpush3.bf16.msra.mxu1 %v14196_v15  ;;  %v10179_v23 = vpop.f32.mrb[15].mxu0  ;;  %11005 = vmatprep.subr.bf16.mxu0 %v14012_v34  ;;  %v3654_v24 = vmul.f32 %v12133_v17, %v14497_v37  ;;  %v14575_v44 = vpop.f32.mrb[14].mxu1  ;;  %v3650_v26 = vmul.f32 %v14303_v61, %v14473_v13  ;;  %v3828_v61 = vmul.f32 1.442695, %v11728_v54 }
 0x27f   : > { %16602 = vst [vmem:[#allocation30_spill] sm:$0xff] %v14575_v44  ;;  %10993 = vmatprep.subr.bf16.mxu1 %v14205_v40  ;;  %v14578_v43 = vpop.eup %11729  ;;  %v10194_v23 = vpop.f32.mrb[15].mxu1  ;;  %v3656_v37 = vmul.f32 %v14385_v59, %v14543_v35  ;;  %v3563_v17 = vadd.f32 %v3562_v39, %v16605_v53  ;;  %v3548_v44 = vrot.slane %v3547_v41, 4  ;;  %v3521_v59 = vadd.f32 %v3520_v48, %v3519_v47 }
 0x280   : > { %16603 = vst [vmem:[#allocation79_spill] sm:$0xff] %v14578_v43  ;;  %4423 = vmatmul.mubr.f32.gmra.mrb[62].mxu0 %v14539_v16  ;;  %v14583_v46 = vpop.eup %11731  ;;  %v16608_v23 = vld [vmem:[#allocation42_spill] sm:$0xff]  ;;  %11753 = vtanh.f32 %v3654_v24  ;;  %v3820_v53 = vmul.f32 1.442695, %v11722_v31  ;;  %v3652_v31 = vmul.f32 %v12134_v62, %v14516_v4  ;;  %v14626_v62 = vld [vmem:[%s12296_s30 + $0x1b0] sm:$0xff] }
 0x281   : > { %16604 = vst [vmem:[#allocation78_spill] sm:$0xff] %v14583_v46  ;;  %v14588_v25 = vpop.f32.mrb[16].mxu0  ;;  %4427 = vmatprep.mubr.f32.mxu0 %v14559_v38  ;;  %v14591_v5 = vpop.eup %11733  ;;  %v3571_v60 = vadd.f32 %v3570_v3, %v16608_v23  ;;  %11755 = vtanh.f32 %v3650_v26  ;;  %v3549_v23 = vadd.f32 %v3548_v44, %v3547_v41  ;;  %v14610_v2 = vmul.f32 0.31622776, %v3521_v59  ;;  %v16613_v26 = vld [vmem:[#allocation48_spill] sm:$0xff]  ;;  %v14623_v59 = vld [vmem:[%s12296_s30 + $0x1c8] sm:$0xff] }
 0x282   : > { %16606 = vst [vmem:[#allocation35_spill] sm:$0xff] %v14588_v25  ;;  %16607 = vst [vmem:[#allocation34_spill] sm:$0xff] %v14591_v5  ;;  %10995 = vmatpush3.bf16.msra.mxu1 %v14226_v8  ;;  %v10182_v16 = vpop.f32.mrb[17].mxu0  ;;  %v14595_v20 = vpop.eup %11735  ;;  %11757 = vtanh.f32 %v3656_v37  ;;  %v3556_v48 = vrot.slane %v16613_v26, 4  ;;  %v14616_v37 = vmul.f32 0.31622776, %v3537_v7  ;;  %v3538_v38 = vadd.f32 %v14626_v62, %v14623_v59 }
 0x283   : > { %16609 = vst [vmem:[#allocation33_spill] sm:$0xff] %v14595_v20  ;;  %v14597_v28 = vpop.f32.mrb[16].mxu1  ;;  %10997 = vmatprep.subr.bf16.mxu1 %v14234_v45  ;;  %v14600_v39 = vpop.eup %11737  ;;  %v3564_v16 = vrot.slane %v3563_v17, 4  ;;  %11759 = vpow2.f32 %v3828_v61  ;;  %v3572_v47 = vrot.slane %v3571_v60, 4  ;;  %16615 = vst [vmem:[#allocation36_spill] sm:$0xff] %v14623_v59 }
 0x284   : > { %16610 = vst [vmem:[#allocation38_spill] sm:$0xff] %v14597_v28  ;;  %16611 = vst [vmem:[#allocation37_spill] sm:$0xff] %v14600_v39  ;;  %v10197_v54 = vpop.f32.mrb[17].mxu1  ;;  %4428 = vmatmul.mubr.f32.gmra.mrb[64].mxu0 %v14583_v46  ;;  %v11740_v3 = vpop.eup %11739  ;;  %11761 = vpow2.f32 %v3820_v53  ;;  %v3550_v53 = vrot.slane %v3549_v23, 2  ;;  %v12138_v28 = vld [vmem:[%s12296_s30 + $0x178] sm:$0xff] }
 0x285   : > { %10383 = vmatprep.mubr.msk.f32.mxu0 %vm12237_vm6, %v16570_v50  ;;  %v14605_v24 = vpop.eup %11741  ;;  %v3830_v41 = vmul.f32 1.442695, %v11740_v3  ;;  %v12135_v54 = vld [vmem:[%s12296_s30 + $0x158] sm:$0xf]  ;;  %v3565_v4 = vadd.f32 %v3564_v16, %v3563_v17  ;;  %v3573_v3 = vadd.f32 %v3572_v47, %v3571_v60  ;;  %11763 = vtanh.f32 %v3652_v31  ;;  %v16617_v31 = vld [vmem:[#allocation46_spill] sm:$0xff] }
 0x286   : > { %16612 = vst [vmem:[#allocation32_spill] sm:$0xff] %v14605_v24  ;;  %10999 = vmatpush3.bf16.msra.mxu1 %v14255_v30  ;;  %v14614_v44 = vpop.eup %11743  ;;  %v3653_v46 = vmul.f32 %v12135_v54, %v14473_v13  ;;  %v3655_v17 = vmul.f32 %v14452_v29, %v14610_v2  ;;  %v3557_v16 = vadd.f32 %v3556_v48, %v16613_v26 }
 0x287   : > { %11001 = vmatprep.subr.bf16.mxu1 %v14265_v22  ;;  %16614 = vst [vmem:[#allocation29_spill] sm:$0xff] %v14614_v44  ;;  %v11746_v61 = vpop.eup %11745  ;;  %11765 = vpow2.f32 %v3830_v41  ;;  %v3657_v25 = vmul.f32 %v12138_v28, %v14616_v37  ;;  %v3566_v47 = vrot.slane %v3565_v4, 2  ;;  %v3539_v52 = vadd.f32 %v3538_v38, %v16617_v31  ;;  %v14654_v28 = vld [vmem:[%s16162_s2 + $0x100] sm:$0xf] }
 0x288   : > { %10384 = vmatmul.mubr.msk.f32.vlgmr.msra.gmra.mrb[66].mxu0 %vm380_vm0, %v14591_v5  ;;  %v14633_v7 = vpop.eup %11747  ;;  %v3836_v5 = vmul.f32 1.442695, %v11746_v61  ;;  %11767 = vtanh.f32 %v3653_v46  ;;  %v3551_v59 = vadd.f32 %v3550_v53, %v3549_v23  ;;  %v3658_v26 = vmul.f32 %v14449_v0, %v14610_v2  ;;  %v16618_v23 = vld [vmem:[#allocation44_spill] sm:$0xff] }
 0x289   : > { %11007 = vmatpush3.bf16.msra.mxu0 %v14036_v36  ;;  %10386 = vmatprep.mubr.msk.f32.mxu0 %vm12237_vm6, %v16570_v50  ;;  %16616 = vst [vmem:[#allocation41_spill] sm:$0xff] %v14633_v7  ;;  %v11750_v13 = vpop.eup %11749  ;;  %v3574_v48 = vrot.slane %v3573_v3, 2  ;;  %11769 = vtanh.f32 %v3655_v17  ;;  %v3580_v41 = vrot.slane %v16618_v23, 4  ;;  %v3558_v61 = vrot.slane %v3557_v16, 2 }
 0x28a   : > { %11003 = vmatpush3.bf16.msra.mxu1 %v14286_v11  ;;  %11009 = vmatprep.subr.bf16.mxu0 %v14041_v19  ;;  %v11752_v54 = vpop.eup %11751  ;;  %v3826_v38 = vmul.f32 1.442695, %v11750_v13  ;;  %11771 = vpow2.f32 %v3836_v5  ;;  %v3567_v13 = vadd.f32 %v3566_v47, %v3565_v4  ;;  %v3540_v17 = vrot.slane %v3539_v52, 4  ;;  %v12140_v47 = vld [vmem:[%s12296_s30 + $0x190] sm:$0xff] }
 0x28b   : > { %10392 = vmatprep.subr.mxu1 %v16570_v50  ;;  %v11754_v60 = vpop.eup %11753  ;;  %v3832_v53 = vmul.f32 1.442695, %v11752_v54  ;;  %11773 = vtanh.f32 %v3657_v25  ;;  %v3575_v5 = vadd.f32 %v3574_v48, %v3573_v3  ;;  %v3581_v25 = vadd.f32 %v3580_v41, %v16618_v23 }
 0x28c   : > { %10387 = vmatmul.mubr.msk.f32.gmra.mrb[68].mxu0 %vm380_vm0, %v14605_v24  ;;  %v11756_v29 = vpop.eup %11755  ;;  %v3842_v31 = vmul.f32 1.442695, %v11754_v60  ;;  %11775 = vtanh.f32 %v3658_v26  ;;  %v3559_v4 = vadd.f32 %v3558_v61, %v3557_v16  ;;  %v3568_v26 = vrot.slane %v3567_v13, 1 }
 0x28d   : > { %4587 = vmatmul.mubr.f32.vlgmr.msra.gmra.mrb[66].mxu1 %v14578_v43  ;;  %11011 = vmatpush3.bf16.msra.mxu0 %v14074_v32  ;;  %v11758_v46 = vpop.eup %11757  ;;  %11777 = vpow2.f32 %v3826_v38  ;;  %v3834_v60 = vmul.f32 1.442695, %v11756_v29  ;;  %v3541_v3 = vadd.f32 %v3540_v17, %v3539_v52  ;;  %v3659_v29 = vmul.f32 %v14382_v49, %v14543_v35 }
 0x28e   : > { %4591 = vmatprep.mubr.f32.mxu1 %v14600_v39  ;;  %10393 = vmatpush3.msk.msra.mxu1 %vm390_vm1, %v14654_v28  ;;  %v14662_v0 = vpop.eup %11759  ;;  %v3552_v39 = vrot.slane %v3551_v59, 1  ;;  %v3846_v54 = vmul.f32 1.442695, %v11758_v46  ;;  %11779 = vpow2.f32 %v3842_v31  ;;  %v3576_v38 = vrot.slane %v3575_v5, 1  ;;  %v12142_v31 = vld [vmem:[%s12296_s30 + $0x1a8] sm:$0xf] }
 0x28f   : > { %11013 = vmatprep.subr.bf16.mxu0 %v14096_v55  ;;  %10389 = vmatprep.mubr.msk.f32.mxu0 %vm12237_vm6, %v16570_v50  ;;  %16619 = vst [vmem:[#allocation43_spill] sm:$0xff] %v14662_v0  ;;  %v14669_v24 = vpop.eup %11761  ;;  %11781 = vpow2.f32 %v3832_v53  ;;  %v3582_v41 = vrot.slane %v3581_v25, 2  ;;  %v3560_v61 = vrot.slane %v3559_v4, 1  ;;  %v3663_v49 = vmul.f32 %v12142_v31, %v14616_v37 }
 0x290   : > { %11037 = vmatprep.subr.bf16.mxu1 %v14012_v34  ;;  %10390 = vmatmul.mubr.msk.f32.gmra.mrb[70].mxu0 %vm380_vm0, %v14633_v7  ;;  %16620 = vst [vmem:[#allocation39_spill] sm:$0xff] %v14669_v24  ;;  %v3660_v7 = vmul.f32 %v12140_v47, %v14616_v37  ;;  %v3553_v48 = vadd.f32 %v3552_v39, %v3551_v59  ;;  %11783 = vpow2.f32 %v3846_v54  ;;  %v12141_v39 = vld [vmem:[%s12296_s30 + $0x1a0] sm:$0xf] }
 0x291   : > { %4592 = vmatmul.mubr.f32.gmra.mrb[68].mxu1 %v14595_v20  ;;  %11015 = vmatpush3.bf16.msra.mxu0 %v14112_v10  ;;  %v11764_v20 = vpop.eup %11763  ;;  %11785 = vpow2.f32 %v3834_v60  ;;  %v3662_v59 = vmul.f32 %v12141_v39, %v14543_v35  ;;  %v3577_v37 = vadd.f32 %v3576_v38, %v3575_v5  ;;  %v3561_v31 = vadd.f32 %v3560_v61, %v3559_v4 }
 0x292   : > { %4596 = vmatprep.mubr.f32.mxu1 %v14614_v44  ;;  %11017 = vmatprep.subr.bf16.mxu0 %v14128_v42  ;;  %v14681_v16 = vpop.eup %11765  ;;  %v14690_v53 = vpop.f32.mrb[18].mxu0  ;;  %11787 = vtanh.f32 %v3660_v7  ;;  %v3838_v47 = vmul.f32 1.442695, %v11764_v20  ;;  %v12145_v44 = vld [vmem:[%s12296_s30 + $0x1d8] sm:$0xff] }
 0x293   : > { %4755 = vmatprep.mubr.f32.mxu0 %v14662_v0  ;;  %16621 = vst [vmem:[#allocation45_spill] sm:$0xff] %v14681_v16  ;;  %v11768_v52 = vpop.eup %11767  ;;  %v10206_v17 = vpop.f32.mrb[19].mxu0  ;;  %v14694_v0 = vmul.f32 0.31622776, %v3553_v48  ;;  %11789 = vtanh.f32 %v3659_v29  ;;  %v3583_v48 = vadd.f32 %v3582_v41, %v3581_v25  ;;  %v14725_v61 = vmul.f32 0.31622776, %v3577_v37 }
 0x294   : > { %v14677_v46 = vpop.f32.mrb[18].mxu1  ;;  %v11770_v54 = vpop.eup %11769  ;;  %v3840_v39 = vmul.f32 1.442695, %v11768_v52  ;;  %11791 = vtanh.f32 %v3662_v59 }
 0x295   : > { %4597 = vmatmul.mubr.f32.gmra.mrb[70].mxu1 %v14669_v24  ;;  %11019 = vmatpush3.bf16.msra.mxu0 %v14165_v57  ;;  %v10221_v23 = vpop.f32.mrb[19].mxu1  ;;  %v3542_v24 = vrot.slane %v3541_v3, 2  ;;  %v14701_v35 = vpop.eup %11771  ;;  %11793 = vtanh.f32 %v3663_v49  ;;  %v3844_v29 = vmul.f32 1.442695, %v11770_v54  ;;  %v3665_v25 = vmul.f32 %v14522_v14, %v14694_v0 }
 0x296   : > { %10394 = vmatprep.mubr.msk.f32.mxu1 %vm12237_vm6, %v16570_v50  ;;  %11021 = vmatprep.subr.bf16.mxu0 %v14171_v33  ;;  %v3569_v23 = vadd.f32 %v3568_v26, %v3567_v13  ;;  %16622 = vst [vmem:[#allocation49_spill] sm:$0xff] %v14701_v35  ;;  %v11774_v20 = vpop.eup %11773  ;;  %v12143_v13 = vld [vmem:[%s12296_s30 + $0x198] sm:$0xf]  ;;  %v14707_v17 = vpop.f32.mrb[20].mxu0  ;;  %11795 = vpow2.f32 %v3838_v47  ;;  %v14731_v54 = vmul.f32 0.31622776, %v3561_v31  ;;  %v3674_v31 = vmul.f32 %v14567_v27, %v14725_v61 }
 0x297   : > { %v3661_v26 = vmul.f32 %v12143_v13, %v14610_v2  ;;  %v11776_v5 = vpop.eup %11775  ;;  %v10209_v38 = vpop.f32.mrb[21].mxu0  ;;  %v3543_v2 = vadd.f32 %v3542_v24, %v3541_v3  ;;  %11797 = vpow2.f32 %v3840_v39  ;;  %v3848_v41 = vmul.f32 1.442695, %v11774_v20 }
 0x298   : > { %v14696_v60 = vpop.f32.mrb[20].mxu1  ;;  %v14712_v52 = vpop.eup %11777  ;;  %v3850_v14 = vmul.f32 1.442695, %v11776_v5  ;;  %v3584_v3 = vrot.slane %v3583_v48, 1  ;;  %v8961_v27 = vclamps-f32 %v14283_v58, 1.0 }
 0x299   : > { %10395 = vmatmul.mubr.msk.f32.vlgmr.msra.gmra.mrb[72].mxu1 %vm380_vm0, %v14681_v16  ;;  %11023 = vmatpush3.bf16.msra.mxu0 %v14196_v15  ;;  %v10224_v7 = vpop.f32.mrb[21].mxu1  ;;  %16623 = vst [vmem:[#allocation50_spill] sm:$0xff] %v14712_v52  ;;  %v14723_v59 = vpop.eup %11779  ;;  %11799 = vtanh.f32 %v3661_v26  ;;  %v3544_v13 = vrot.slane %v3543_v2, 1 }
 0x29a   : > { %11039 = vmatpush3.bf16.msra.mxu1 %v14036_v36  ;;  %11025 = vmatprep.subr.bf16.mxu0 %v14205_v40  ;;  %v14714_v7 = vmul.f32 0.31622776, %v3569_v23  ;;  %16625 = vst [vmem:[#allocation6_spill] sm:$0xff] %v14723_v59  ;;  %v14729_v24 = vpop.eup %11781  ;;  %v14733_v47 = vpop.f32.mrb[22].mxu0  ;;  %11801 = vpow2.f32 %v3844_v29  ;;  %v3585_v5 = vadd.f32 %v3584_v3, %v3583_v48  ;;  %v12144_v29 = vld [vmem:[%s12296_s30 + $0x1c0] sm:$0xff] }
 0x29b   : > { %11041 = vmatprep.subr.bf16.mxu1 %v14041_v19  ;;  %10397 = vmatprep.mubr.msk.f32.mxu1 %vm12237_vm6, %v16570_v50  ;;  %16626 = vst [vmem:[#allocation7_spill] sm:$0xff] %v14729_v24  ;;  %16627 = vst [vmem:[#allocation3_spill] sm:$0xff] %v14733_v47  ;;  %v14738_v23 = vpop.eup %11783  ;;  %v10212_v39 = vpop.f32.mrb[23].mxu0  ;;  %11803 = vtanh.f32 %v3665_v25 }
 0x29c   : > { %v14718_v4 = vpop.f32.mrb[22].mxu1  ;;  %16628 = vst [vmem:[#allocation5_spill] sm:$0xff] %v14738_v23  ;;  %v14740_v37 = vpop.eup %11785  ;;  %v3673_v20 = vmul.f32 %v14549_v21, %v14714_v7  ;;  %11805 = vpow2.f32 %v3848_v41  ;;  %v3666_v21 = vmul.f32 %v12144_v29, %v14731_v54  ;;  %v3545_v29 = vadd.f32 %v3544_v13, %v3543_v2 }
 0x29d   : > { %16624 = vst [vmem:[#allocation51_spill] sm:$0xff] %v14718_v4  ;;  %11027 = vmatpush3.bf16.msra.mxu0 %v14226_v8  ;;  %10398 = vmatmul.mubr.msk.f32.gmra.mrb[74].mxu1 %vm380_vm0, %v14701_v35  ;;  %v10227_v49 = vpop.f32.mrb[23].mxu1  ;;  %16629 = vst [vmem:[#allocation2_spill] sm:$0xff] %v14740_v37  ;;  %v11788_v26 = vpop.eup %11787  ;;  %11807 = vpow2.f32 %v3850_v14 }
 0x29e   : > { %11043 = vmatpush3.bf16.msra.mxu1 %v14074_v32  ;;  %11029 = vmatprep.subr.bf16.mxu0 %v14234_v45  ;;  %v2685_v38 = vpop.f32.mrb[24].mxu0  ;;  %v11790_v41 = vpop.eup %11789  ;;  %v8958_v49 = vclamps-f32 %v14276_v63, 1.0  ;;  %v3854_v3 = vmul.f32 1.442695, %v11788_v26  ;;  %11809 = vtanh.f32 %v3673_v20  ;;  %v14768_v20 = vmul.f32 0.31622776, %v3585_v5 }
 0x29f   : > { %11045 = vmatprep.subr.bf16.mxu1 %v14096_v55  ;;  %10400 = vmatprep.mubr.msk.f32.mxu1 %vm12237_vm6, %v16570_v50  ;;  %v9030_v39 = vclamps-f32 %v2685_v38, 1.0  ;;  %v10236_v35 = vpop.f32.mrb[25].mxu0  ;;  %v11792_v48 = vpop.eup %11791  ;;  %11811 = vtanh.f32 %v3674_v31 }
 0x2a0   : > { %v2774_v25 = vpop.f32.mrb[24].mxu1  ;;  %v11794_v16 = vpop.eup %11793  ;;  %v3852_v35 = vmul.f32 1.442695, %v11790_v41  ;;  %11813 = vtanh.f32 %v3666_v21  ;;  %v3858_v21 = vmul.f32 1.442695, %v11792_v48  ;;  %v8960_v48 = vclamps-f32 %v14318_v9, 1.0 }
 0x2a1   : > { %11031 = vmatpush3.bf16.msra.mxu0 %v14255_v30  ;;  %10401 = vmatmul.mubr.msk.f32.gmra.mrb[76].mxu1 %vm380_vm0, %v14723_v59  ;;  %v9033_v59 = vclamps-f32 %v2774_v25, 1.0  ;;  %v10251_v14 = vpop.f32.mrb[25].mxu1  ;;  %v14760_v43 = vsub.f32 %v8958_v49, %v9030_v39  ;;  %v14766_v58 = vpop.eup %11795  ;;  %11815 = vpow2.f32 %v3854_v3  ;;  %v3860_v41 = vmul.f32 1.442695, %v11794_v16 }
 0x2a2   : > { %11047 = vmatpush3.bf16.msra.mxu1 %v14112_v10  ;;  %11033 = vmatprep.subr.bf16.mxu0 %v14265_v22  ;;  %16630 = vst [vmem:[#allocation4_spill] sm:$0xff] %v14766_v58  ;;  %v2690_v2 = vpop.f32.mrb[26].mxu0  ;;  %v14771_v26 = vpop.eup %11797  ;;  %v8963_v3 = vclamps-f32 %v14320_v56, 1.0 }
 0x2a3   : > { %11049 = vmatprep.subr.bf16.mxu1 %v14128_v42  ;;  %4924 = vmatprep.mubr.f32.mxu1 %v14738_v23  ;;  %v3669_v23 = vmul.f32 %v12145_v44, %v14731_v54  ;;  %v14762_v63 = vsub.f32 %v8961_v27, %v9033_v59  ;;  %16631 = vst [vmem:[#allocation12_spill] sm:$0xff] %v14771_v26  ;;  %v8959_v44 = vclamps-f32 %v14295_v12, 1.0  ;;  %v8962_v59 = vclamps-f32 %v14298_v51, 1.0  ;;  %v10239_v25 = vpop.f32.mrb[27].mxu0  ;;  %v11800_v5 = vpop.eup %11799  ;;  %v12146_v51 = vld [vmem:[%s12296_s30 + $0x1f0] sm:$0xf] }
 0x2a4   : > { %v2779_v13 = vpop.f32.mrb[26].mxu1  ;;  %v9031_v31 = vclamps-f32 %v2690_v2, 1.0  ;;  %v14776_v27 = vmul.f32 0.31622776, %v3545_v29  ;;  %v14781_v12 = vpop.eup %11801  ;;  %v3672_v39 = vmul.f32 %v12146_v51, %v14731_v54  ;;  %v6848_v29 = vsel %vm2343_vm3, %v14760_v43, 0.0 }
 0x2a5   : > { %11035 = vmatpush3.bf16.msra.mxu0 %v14286_v11  ;;  %v9034_v38 = vclamps-f32 %v2779_v13, 1.0  ;;  %v10254_v49 = vpop.f32.mrb[27].mxu1  ;;  %16632 = vst [vmem:[#allocation13_spill] sm:$0xff] %v14781_v12  ;;  %11817 = vtanh.f32 %v3669_v23  ;;  %v11804_v16 = vpop.eup %11803  ;;  %v6859_v54 = vsel %vm2343_vm3, %v14762_v63, 0.0 }
 0x2a6   : > { %11051 = vmatpush3.bf16.msra.mxu1 %v14165_v57  ;;  %10403 = vmatprep.subr.mxu0 %v16570_v50  ;;  %v14785_v14 = vsub.f32 %v8959_v44, %v9031_v31  ;;  %v2695_v23 = vpop.f32.mrb[28].mxu0  ;;  %v14798_v44 = vpop.eup %11805  ;;  %11819 = vpow2.f32 %v3852_v35  ;;  %v3664_v51 = vmul.f32 %v14626_v62, %v14776_v27  ;;  %v3864_v47 = vmul.f32 1.442695, %v11804_v16 }
 0x2a7   : > { %11053 = vmatprep.subr.bf16.mxu1 %v14171_v33  ;;  %v14787_v2 = vsub.f32 %v8962_v59, %v9034_v38  ;;  %16633 = vst [vmem:[#allocation9_spill] sm:$0xff] %v14798_v44  ;;  %v9032_v31 = vclamps-f32 %v2695_v23, 1.0  ;;  %v10242_v38 = vpop.f32.mrb[29].mxu0  ;;  %v14805_v49 = vpop.eup %11807  ;;  %11821 = vpow2.f32 %v3860_v41 }
 0x2a8   : > { %4756 = vmatmul.mubr.f32.vlgmr.msra.gmra.mrb[72].mxu0 %v14712_v52  ;;  %v2784_v13 = vpop.f32.mrb[28].mxu1  ;;  %v6849_v59 = vsel %vm2343_vm3, %v14785_v14, 0.0  ;;  %16634 = vst [vmem:[#allocation11_spill] sm:$0xff] %v14805_v49  ;;  %v12147_v38 = vld [vmem:[%s12296_s30 + $0x208] sm:$0xff]  ;;  %11823 = vtanh.f32 %v3672_v39 }
 0x2a9   : > { %4760 = vmatprep.mubr.f32.mxu0 %v14740_v37  ;;  %10404 = vmatpush3.msk.msra.mxu0 %vm390_vm1, %v14654_v28  ;;  %v6860_v9 = vsel %vm2343_vm3, %v14787_v2, 0.0  ;;  %v9035_v56 = vclamps-f32 %v2784_v13, 1.0  ;;  %v10257_v25 = vpop.f32.mrb[29].mxu1  ;;  %v6850_v37 = vadd.f32 %v6849_v59, %v6848_v29  ;;  %v14810_v4 = vsub.f32 %v8960_v48, %v9032_v31  ;;  %v14815_v13 = vpop.eup %11809 }
 0x2aa   : > { %11055 = vmatpush3.bf16.msra.mxu1 %v14196_v15  ;;  %11069 = vmatprep.subr.bf16.mxu0 %v14012_v34  ;;  %v6861_v52 = vadd.f32 %v6860_v9, %v6859_v54  ;;  %v3675_v35 = vmul.f32 %v12147_v38, %v14768_v20  ;;  %v11812_v62 = vpop.eup %11811  ;;  %v3856_v29 = vmul.f32 1.442695, %v11800_v5  ;;  %11825 = vpow2.f32 %v3858_v21  ;;  %v12149_v38 = vld [vmem:[%s12296_s30 + $0x1e8] sm:$0xf] }
 0x2ab   : > { %11057 = vmatprep.subr.bf16.mxu1 %v14205_v40  ;;  %v14812_v23 = vsub.f32 %v8963_v3, %v9035_v56  ;;  %v6851_v41 = vsel %vm2350_vm4, %v14810_v4, 0.0  ;;  %v11814_v48 = vpop.eup %11813  ;;  %v3676_v3 = vmul.f32 %v14546_v18, %v14714_v7  ;;  %11827 = vtanh.f32 %v3664_v51 }
 0x2ac   : > { %4761 = vmatmul.mubr.f32.gmra.mrb[74].mxu0 %v14729_v24  ;;  %v6852_v54 = vadd.f32 %v6851_v41, %v6850_v37  ;;  %v3677_v5 = vmul.f32 %v14564_v1, %v14725_v61  ;;  %11829 = vpow2.f32 %v3864_v47  ;;  %v14832_v21 = vpop.eup %11815  ;;  %v3668_v59 = vmul.f32 %v14519_v6, %v14694_v0  ;;  %v12148_v1 = vld [vmem:[%s12296_s30 + $0x220] sm:$0xff]  ;;  %v16636_v6 = vld [vmem:[#allocation36_spill] sm:$0xff] }
 0x2ad   : > { %4765 = vmatprep.mubr.f32.mxu0 %v14771_v26  ;;  %v6862_v16 = vsel %vm2350_vm4, %v14812_v23, 0.0  ;;  %16635 = vst [vmem:[#allocation8_spill] sm:$0xff] %v14832_v21  ;;  %11831 = vtanh.f32 %v3675_v35  ;;  %v3866_v37 = vmul.f32 1.442695, %v11814_v48  ;;  %v3678_v47 = vmul.f32 %v12148_v1, %v14768_v20 }
 0x2ae   : > { %11059 = vmatpush3.bf16.msra.mxu1 %v14226_v8  ;;  %v6863_v39 = vadd.f32 %v6862_v16, %v6861_v52  ;;  %v6853_v18 = vrot.slane %v6852_v54, 4  ;;  %11833 = vpow2.f32 %v3856_v29  ;;  %v3667_v25 = vmul.f32 %v16636_v6, %v14776_v27 }
 0x2af   : > { %11061 = vmatprep.subr.bf16.mxu1 %v14234_v45  ;;  %v11818_v52 = vpop.eup %11817  ;;  %11835 = vtanh.f32 %v3676_v3  ;;  %v3671_v35 = vmul.f32 %v12149_v38, %v14694_v0 }
 0x2b0   : > { %4766 = vmatmul.mubr.f32.gmra.mrb[76].mxu0 %v14766_v58  ;;  %v6864_v9 = vrot.slane %v6863_v39, 4  ;;  %v6854_v31 = vadd.f32 %v6853_v18, %v6852_v54  ;;  %11837 = vtanh.f32 %v3677_v5  ;;  %v14848_v51 = vpop.eup %11819  ;;  %v3872_v48 = vmul.f32 1.442695, %v11818_v52  ;;  %v12150_v54 = vld [vmem:[%s12296_s30 + $0x228] sm:$0xf] }
 0x2b1   : > { %10405 = vmatprep.mubr.msk.f32.mxu0 %vm12237_vm6, %v16570_v50  ;;  %16637 = vst [vmem:[#allocation10_spill] sm:$0xff] %v14848_v51  ;;  %11839 = vtanh.f32 %v3668_v59  ;;  %v14853_v16 = vpop.eup %11821  ;;  %v12151_v18 = vld [vmem:[%s12296_s30 + $0x1e0] sm:$0xf] }
 0x2b2   : > { %11063 = vmatpush3.bf16.msra.mxu1 %v14255_v30  ;;  %v6865_v56 = vadd.f32 %v6864_v9, %v6863_v39  ;;  %v6855_v29 = vrot.slane %v6854_v31, 2  ;;  %16638 = vst [vmem:[#allocation19_spill] sm:$0xff] %v14853_v16  ;;  %11841 = vpow2.f32 %v3866_v37  ;;  %v11824_v3 = vpop.eup %11823  ;;  %v3679_v39 = vmul.f32 %v12150_v54, %v14714_v7 }
 0x2b3   : > { %11065 = vmatprep.subr.bf16.mxu1 %v14265_v22  ;;  %11843 = vtanh.f32 %v3678_v47  ;;  %v3670_v9 = vmul.f32 %v12151_v18, %v14776_v27  ;;  %v3882_v7 = vmul.f32 1.442695, %v11812_v62  ;;  %v3878_v27 = vmul.f32 1.442695, %v11824_v3 }
 0x2b4   : > { %10406 = vmatmul.mubr.msk.f32.vlgmr.msra.gmra.mrb[78].mxu0 %vm380_vm0, %v14798_v44  ;;  %v6866_v41 = vrot.slane %v6865_v56, 2  ;;  %v6856_v5 = vadd.f32 %v6855_v29, %v6854_v31  ;;  %v14861_v59 = vpop.eup %11825  ;;  %11845 = vtanh.f32 %v3667_v25 }
 0x2b5   : > { %11071 = vmatpush3.bf16.msra.mxu0 %v14036_v36  ;;  %10408 = vmatprep.mubr.msk.f32.mxu0 %vm12237_vm6, %v16570_v50  ;;  %16639 = vst [vmem:[#allocation23_spill] sm:$0xff] %v14861_v59  ;;  %v11828_v52 = vpop.eup %11827  ;;  %11847 = vtanh.f32 %v3671_v35 }
 0x2b6   : > { %11067 = vmatpush3.bf16.msra.mxu1 %v14286_v11  ;;  %11073 = vmatprep.subr.bf16.mxu0 %v14041_v19  ;;  %v6867_v0 = vadd.f32 %v6866_v41, %v6865_v56  ;;  %v6857_v37 = vrot.slane %v6856_v5, 1  ;;  %v14871_v47 = vpop.eup %11829  ;;  %11849 = vpow2.f32 %v3872_v48  ;;  %v3862_v25 = vmul.f32 1.442695, %v11828_v52 }
 0x2b7   : > { %10414 = vmatprep.subr.mxu1 %v16570_v50  ;;  %16640 = vst [vmem:[#allocation18_spill] sm:$0xff] %v14871_v47  ;;  %v11832_v31 = vpop.eup %11831  ;;  %11851 = vtanh.f32 %v3679_v39 }
 0x2b8   : > { %10409 = vmatmul.mubr.msk.f32.gmra.mrb[80].mxu0 %vm380_vm0, %v14832_v21  ;;  %v6868_v1 = vrot.slane %v6867_v0, 1  ;;  %v6858_v62 = vadd.f32 %v6857_v37, %v6856_v5  ;;  %v14878_v6 = vpop.eup %11833  ;;  %11853 = vtanh.f32 %v3670_v9 }
 0x2b9   : > { %4925 = vmatmul.mubr.f32.vlgmr.msra.gmra.mrb[78].mxu1 %v14781_v12  ;;  %11075 = vmatpush3.bf16.msra.mxu0 %v14074_v32  ;;  %16641 = vst [vmem:[#allocation25_spill] sm:$0xff] %v14878_v6  ;;  %v14882_v38 = vpop.eup %11835  ;;  %11855 = vpow2.f32 %v3882_v7 }
 0x2ba   : > { %4929 = vmatprep.mubr.f32.mxu1 %v14848_v51  ;;  %10415 = vmatpush3.msk.msra.mxu1 %vm390_vm1, %v14654_v28  ;;  %v6869_v56 = vadd.f32 %v6868_v1, %v6867_v0  ;;  %v6936_v35 = vmul.f32 0.31622776, %v6858_v62  ;;  %v14885_v41 = vpop.eup %11837  ;;  %11857 = vpow2.f32 %v3878_v27  ;;  %v12152_v62 = vld [vmem:[%s12296_s30 + $0x230] sm:$0xf]  ;;  %v12167_v51 = vld [vmem:[%s12296_s30 + $0x68] sm:$0xff] }
 0x2bb   : > { %11077 = vmatprep.subr.bf16.mxu0 %v14096_v55  ;;  %10411 = vmatprep.mubr.msk.f32.mxu0 %vm12237_vm6, %v16570_v50  ;;  %v11840_v48 = vpop.eup %11839  ;;  %11859 = vpow2.f32 %v3862_v25 }
 0x2bc   : > { %11101 = vmatprep.subr.bf16.mxu1 %v14012_v34  ;;  %10412 = vmatmul.mubr.msk.f32.gmra.mrb[82].mxu0 %vm380_vm0, %v14853_v16  ;;  %v6937_v29 = vmul.f32 0.31622776, %v6869_v56  ;;  %v6944_v3 = vmul.f32 %v6936_v35, %v14760_v43  ;;  %v6945_v54 = vmul.f32 %v6936_v35, %v14785_v14  ;;  %v6946_v39 = vmul.f32 %v6936_v35, %v14810_v4  ;;  %v14892_v0 = vpop.eup %11841  ;;  %v12153_v35 = vld [vmem:[%s12296_s30 + $0x238] sm:$0xf] }
 0x2bd   : > { %4930 = vmatmul.mubr.f32.gmra.mrb[80].mxu1 %v14805_v49  ;;  %11079 = vmatpush3.bf16.msra.mxu0 %v14112_v10  ;;  %16642 = vst [vmem:[#allocation24_spill] sm:$0xff] %v14892_v0  ;;  %v14899_v52 = vpop.eup %11843  ;;  %v3870_v1 = vmul.f32 1.442695, %v11840_v48  ;;  %v3680_v56 = vmul.f32 %v12152_v62, %v14725_v61 }
 0x2be   : > { %4934 = vmatprep.mubr.f32.mxu1 %v14861_v59  ;;  %11081 = vmatprep.subr.bf16.mxu0 %v14128_v42  ;;  %v6947_v5 = vmul.f32 %v6937_v29, %v14762_v63  ;;  %v6948_v18 = vmul.f32 %v6937_v29, %v14787_v2  ;;  %v6949_v9 = vmul.f32 %v6937_v29, %v14812_v23  ;;  %11861 = vtanh.f32 %v6944_v3  ;;  %v11846_v7 = vpop.eup %11845 }
 0x2bf   : > { %5093 = vmatprep.mubr.f32.mxu0 %v14871_v47  ;;  %11863 = vtanh.f32 %v6945_v54  ;;  %v11848_v37 = vpop.eup %11847  ;;  %v3681_v29 = vmul.f32 %v12153_v35, %v14768_v20  ;;  %v3868_v3 = vmul.f32 1.442695, %v11846_v7  ;;  %v3884_v20 = vmul.f32 1.442695, %v11832_v31 }
 0x2c0   : > { %11865 = vtanh.f32 %v6946_v39  ;;  %v14904_v27 = vpop.eup %11849  ;;  %v3876_v54 = vmul.f32 1.442695, %v11848_v37 }
 0x2c1   : > { %4935 = vmatmul.mubr.f32.gmra.mrb[82].mxu1 %v14878_v6  ;;  %11083 = vmatpush3.bf16.msra.mxu0 %v14165_v57  ;;  %16643 = vst [vmem:[#allocation26_spill] sm:$0xff] %v14904_v27  ;;  %11867 = vtanh.f32 %v6947_v5  ;;  %v14910_v25 = vpop.eup %11851 }
 0x2c2   : > { %10416 = vmatprep.mubr.msk.f32.mxu1 %vm12237_vm6, %v16570_v50  ;;  %11085 = vmatprep.subr.bf16.mxu0 %v14171_v33  ;;  %11869 = vtanh.f32 %v6948_v18  ;;  %v11854_v48 = vpop.eup %11853 }
 0x2c3   : > { %11871 = vtanh.f32 %v6949_v9  ;;  %v14918_v61 = vpop.eup %11855  ;;  %v3874_v5 = vmul.f32 1.442695, %v11854_v48 }
 0x2c4   : > { %16644 = vst [vmem:[#allocation47_spill] sm:$0xff] %v14918_v61  ;;  %11873 = vpow2.f32 %v3870_v1  ;;  %v14922_v39 = vpop.eup %11857 }
 0x2c5   : > { %10417 = vmatmul.mubr.msk.f32.vlgmr.msra.gmra.mrb[84].mxu1 %vm380_vm0, %v14892_v0  ;;  %11087 = vmatpush3.bf16.msra.mxu0 %v14196_v15  ;;  %16645 = vst [vmem:[#allocation40_spill] sm:$0xff] %v14922_v39  ;;  %11875 = vtanh.f32 %v3680_v56  ;;  %v14928_v18 = vpop.eup %11859 }
 0x2c6   : > { %11103 = vmatpush3.bf16.msra.mxu1 %v14036_v36  ;;  %11089 = vmatprep.subr.bf16.mxu0 %v14205_v40  ;;  %11877 = vtanh.f32 %v3681_v29  ;;  %16646 = vst [vmem:[#allocation42_spill] sm:$0xff] %v14928_v18 }
 0x2c7   : > { %11105 = vmatprep.subr.bf16.mxu1 %v14041_v19  ;;  %10419 = vmatprep.mubr.msk.f32.mxu1 %vm12237_vm6, %v16570_v50  ;;  %11879 = vpow2.f32 %v3868_v3 }
 0x2c8   : > { %v11862_v9 = vpop.eup %11861  ;;  %11881 = vpow2.f32 %v3876_v54 }
 0x2c9   : > { %10420 = vmatmul.mubr.msk.f32.gmra.mrb[86].mxu1 %vm380_vm0, %v14904_v27  ;;  %11091 = vmatpush3.bf16.msra.mxu0 %v14226_v8  ;;  %v11864_v31 = vpop.eup %11863  ;;  %11883 = vpow2.f32 %v3884_v20  ;;  %v6992_v7 = vmul.f32 1.442695, %v11862_v9  ;;  %v3880_v20 = vmul.f32 1.442695, %v14815_v13 }
 0x2ca   : > { %11107 = vmatpush3.bf16.msra.mxu1 %v14074_v32  ;;  %11093 = vmatprep.subr.bf16.mxu0 %v14234_v45  ;;  %v11866_v37 = vpop.eup %11865  ;;  %11885 = vpow2.f32 %v3874_v5  ;;  %v6994_v1 = vmul.f32 1.442695, %v11864_v31  ;;  %v3890_v31 = vmul.f32 1.442695, %v14899_v52 }
 0x2cb   : > { %11109 = vmatprep.subr.bf16.mxu1 %v14096_v55  ;;  %10422 = vmatprep.mubr.msk.f32.mxu1 %vm12237_vm6, %v16570_v50  ;;  %v11868_v62 = vpop.eup %11867  ;;  %11887 = vpow2.f32 %v6992_v7  ;;  %v6996_v56 = vmul.f32 1.442695, %v11866_v37  ;;  %v3888_v37 = vmul.f32 1.442695, %v14885_v41 }
 0x2cc   : > { %v11870_v35 = vpop.eup %11869  ;;  %11889 = vpow2.f32 %v6994_v1  ;;  %v6998_v29 = vmul.f32 1.442695, %v11868_v62  ;;  %v3886_v62 = vmul.f32 1.442695, %v14882_v38 }
 0x2cd   : > { %10423 = vmatmul.mubr.msk.f32.gmra.mrb[88].mxu1 %vm380_vm0, %v14922_v39  ;;  %11095 = vmatpush3.bf16.msra.mxu0 %v14255_v30  ;;  %v11872_v48 = vpop.eup %11871  ;;  %11891 = vpow2.f32 %v6996_v56  ;;  %v7000_v3 = vmul.f32 1.442695, %v11870_v35 }
 0x2ce   : > { %11111 = vmatpush3.bf16.msra.mxu1 %v14112_v10  ;;  %11097 = vmatprep.subr.bf16.mxu0 %v14265_v22  ;;  %v14941_v54 = vpop.eup %11873  ;;  %11893 = vpow2.f32 %v6998_v29  ;;  %v7002_v5 = vmul.f32 1.442695, %v11872_v48 }
 0x2cf   : > { %11113 = vmatprep.subr.bf16.mxu1 %v14128_v42  ;;  %5262 = vmatprep.mubr.f32.mxu1 %v14918_v61  ;;  %16647 = vst [vmem:[#allocation48_spill] sm:$0xff] %v14941_v54  ;;  %v11876_v9 = vpop.eup %11875  ;;  %11895 = vpow2.f32 %v7000_v3 }
 0x2d0   : > { %v11878_v7 = vpop.eup %11877  ;;  %11897 = vpow2.f32 %v7002_v5  ;;  %v3894_v35 = vmul.f32 1.442695, %v11876_v9 }
 0x2d1   : > { %11099 = vmatpush3.bf16.msra.mxu0 %v14286_v11  ;;  %v14949_v1 = vpop.eup %11879  ;;  %11899 = vpow2.f32 %v3880_v20  ;;  %v3896_v52 = vmul.f32 1.442695, %v11878_v7  ;;  %v3892_v20 = vmul.f32 1.442695, %v14910_v25 }
 0x2d2   : > { %11115 = vmatpush3.bf16.msra.mxu1 %v14165_v57  ;;  %10425 = vmatprep.subr.mxu0 %v16570_v50  ;;  %16648 = vst [vmem:[#allocation46_spill] sm:$0xff] %v14949_v1  ;;  %v14953_v13 = vpop.eup %11881  ;;  %11901 = vpow2.f32 %v3890_v31 }
 0x2d3   : > { %11117 = vmatprep.subr.bf16.mxu1 %v14171_v33  ;;  %16649 = vst [vmem:[#allocation44_spill] sm:$0xff] %v14953_v13  ;;  %v14959_v41 = vpop.eup %11883  ;;  %11903 = vpow2.f32 %v3888_v37  ;;  %v16660_v37 = vld [vmem:[#allocation68_spill] sm:$0xff] }
 0x2d4   : > { %5094 = vmatmul.mubr.f32.vlgmr.msra.gmra.mrb[84].mxu0 %v14928_v18  ;;  %16650 = vst [vmem:[#allocation36_spill] sm:$0xff] %v14959_v41  ;;  %v14962_v56 = vpop.eup %11885  ;;  %11905 = vpow2.f32 %v3886_v62  ;;  %v8964_v62 = vclamps-f32 %v16660_v37, 1.0 }
 0x2d5   : > { %5098 = vmatprep.mubr.f32.mxu0 %v14941_v54  ;;  %10426 = vmatpush3.msk.msra.mxu0 %vm390_vm1, %v14654_v28  ;;  %16651 = vst [vmem:[#allocation80_spill] sm:$0xff] %v14962_v56  ;;  %v14965_v29 = vpop.eup %11887  ;;  %11907 = vpow2.f32 %v3896_v52 }
 0x2d6   : > { %11119 = vmatpush3.bf16.msra.mxu1 %v14196_v15  ;;  %11133 = vmatprep.subr.bf16.mxu0 %v14012_v34  ;;  %16652 = vst [vmem:[#allocation81_spill] sm:$0xff] %v14965_v29  ;;  %v14969_v38 = vpop.eup %11889  ;;  %v14974_v48 = vmul.f32 %v14965_v29, %v14760_v43  ;;  %11909 = vpow2.f32 %v3894_v35 }
 0x2d7   : > { %11121 = vmatprep.subr.bf16.mxu1 %v14205_v40  ;;  %16653 = vst [vmem:[#allocation82_spill] sm:$0xff] %v14969_v38  ;;  %v14976_v3 = vpop.eup %11891  ;;  %v14981_v5 = vmul.f32 %v14969_v38, %v14785_v14  ;;  %11911 = vpow2.f32 %v3892_v20 }
 0x2d8   : > { %5099 = vmatmul.mubr.f32.gmra.mrb[86].mxu0 %v14949_v1  ;;  %16654 = vst [vmem:[#allocation83_spill] sm:$0xff] %v14974_v48  ;;  %16655 = vst [vmem:[#allocation84_spill] sm:$0xff] %v14976_v3  ;;  %v14983_v9 = vpop.eup %11893  ;;  %v14987_v31 = vmul.f32 %v14976_v3, %v14810_v4 }
 0x2d9   : > { %5103 = vmatprep.mubr.f32.mxu0 %v14953_v13  ;;  %16656 = vst [vmem:[#allocation85_spill] sm:$0xff] %v14981_v5  ;;  %16657 = vst [vmem:[#allocation86_spill] sm:$0xff] %v14983_v9  ;;  %v14990_v7 = vpop.eup %11895  ;;  %v15001_v4 = vmul.f32 %v14983_v9, %v14762_v63 }
 0x2da   : > { %11123 = vmatpush3.bf16.msra.mxu1 %v14226_v8  ;;  %16658 = vst [vmem:[#allocation87_spill] sm:$0xff] %v14987_v31  ;;  %16659 = vst [vmem:[#allocation88_spill] sm:$0xff] %v14990_v7  ;;  %v14996_v52 = vpop.eup %11897  ;;  %v15005_v35 = vmul.f32 %v14990_v7, %v14787_v2  ;;  %v16668_v2 = vld [vmem:[#allocation74_spill] sm:$0xff] }
 0x2db   : > { %11125 = vmatprep.subr.bf16.mxu1 %v14234_v45  ;;  %16661 = vst [vmem:[#allocation68_spill] sm:$0xff] %v14996_v52  ;;  %16662 = vst [vmem:[#allocation89_spill] sm:$0xff] %v15001_v4  ;;  %v15009_v37 = vmul.f32 %v14996_v52, %v14812_v23  ;;  %v16667_v4 = vld [vmem:[#allocation72_spill] sm:$0xff] }
 0x2dc   : > { %5104 = vmatmul.mubr.f32.gmra.mrb[88].mxu0 %v14962_v56  ;;  %16663 = vst [vmem:[#allocation90_spill] sm:$0xff] %v15005_v35  ;;  %v8967_v48 = vclamps-f32 %v16667_v4, 1.0  ;;  %v8965_v35 = vclamps-f32 %v16668_v2, 1.0  ;;  %v16671_v2 = vld [vmem:[#allocation76_spill] sm:$0xff] }
 0x2dd   : > { %v2863_v43 = vpop.f32.mrb[30].mxu0  ;;  %10427 = vmatprep.mubr.msk.f32.mxu0 %vm12237_vm6, %v16570_v50  ;;  %16664 = vst [vmem:[#allocation91_spill] sm:$0xff] %v15009_v37 }
 0x2de   : > { %11127 = vmatpush3.bf16.msra.mxu1 %v14255_v30  ;;  %v9036_v14 = vclamps-f32 %v2863_v43, 1.0  ;;  %v10266_v25 = vpop.f32.mrb[31].mxu0  ;;  %v15013_v43 = vpop.eup %11899 }
 0x2df   : > { %11129 = vmatprep.subr.bf16.mxu1 %v14265_v22  ;;  %16665 = vst [vmem:[#allocation92_spill] sm:$0xff] %v15013_v43  ;;  %v15017_v63 = vpop.eup %11901 }
 0x2e0   : > { %v15011_v31 = vsub.f32 %v8964_v62, %v9036_v14  ;;  %10428 = vmatmul.mubr.msk.f32.vlgmr.msra.gmra.mrb[90].mxu0 %vm380_vm0, %v14959_v41  ;;  %16666 = vst [vmem:[#allocation93_spill] sm:$0xff] %v15017_v63  ;;  %v15023_v37 = vpop.eup %11903 }
 0x2e1   : > { %v2868_v25 = vpop.f32.mrb[32].mxu0  ;;  %v2952_v5 = vpop.f32.mrb[30].mxu1  ;;  %11135 = vmatpush3.bf16.msra.mxu0 %v14036_v36  ;;  %16669 = vst [vmem:[#allocation72_spill] sm:$0xff] %v15023_v37  ;;  %10430 = vmatprep.mubr.msk.f32.mxu0 %vm12237_vm6, %v16570_v50 }
 0x2e2   : > { %11131 = vmatpush3.bf16.msra.mxu1 %v14286_v11  ;;  %v9037_v23 = vclamps-f32 %v2868_v25, 1.0  ;;  %v9039_v20 = vclamps-f32 %v2952_v5, 1.0  ;;  %v10269_v62 = vpop.f32.mrb[33].mxu0  ;;  %v10281_v14 = vpop.f32.mrb[31].mxu1  ;;  %11137 = vmatprep.subr.bf16.mxu0 %v14041_v19  ;;  %v8968_v25 = vclamps-f32 %v16671_v2, 1.0  ;;  %v16672_v5 = vld [vmem:[#allocation21_spill] sm:$0xff] }
 0x2e3   : > { %10436 = vmatprep.subr.mxu1 %v16570_v50  ;;  %v15033_v4 = vpop.eup %11905  ;;  %v8966_v62 = vclamps-f32 %v16672_v5, 1.0 }
 0x2e4   : > { %v15027_v52 = vsub.f32 %v8965_v35, %v9037_v23  ;;  %v15029_v3 = vsub.f32 %v8967_v48, %v9039_v20  ;;  %16670 = vst [vmem:[#allocation74_spill] sm:$0xff] %v15033_v4  ;;  %10431 = vmatmul.mubr.msk.f32.gmra.mrb[92].mxu0 %vm380_vm0, %v15017_v63  ;;  %v15040_v35 = vpop.eup %11907  ;;  %v6870_v48 = vsel %vm2343_vm3, %v15011_v31, 0.0  ;;  %v12154_v63 = vld [vmem:[%s12296_s30 + $0x8] sm:$0xff] }
 0x2e5   : > { %5263 = vmatmul.mubr.f32.vlgmr.msra.gmra.mrb[90].mxu1 %v15013_v43  ;;  %v2873_v14 = vpop.f32.mrb[34].mxu0  ;;  %v2957_v7 = vpop.f32.mrb[32].mxu1  ;;  %16673 = vst [vmem:[#allocation76_spill] sm:$0xff] %v15040_v35  ;;  %11139 = vmatpush3.bf16.msra.mxu0 %v14074_v32  ;;  %v16675_v43 = vld [vmem:[#allocation52_spill] sm:$0xff] }
 0x2e6   : > { %v6871_v23 = vsel %vm2343_vm3, %v15027_v52, 0.0  ;;  %5267 = vmatprep.mubr.f32.mxu1 %v15023_v37  ;;  %v9038_v20 = vclamps-f32 %v2873_v14, 1.0  ;;  %v9040_v2 = vclamps-f32 %v2957_v7, 1.0  ;;  %v10272_v5 = vpop.f32.mrb[35].mxu0  ;;  %v10284_v38 = vpop.f32.mrb[33].mxu1  ;;  %10437 = vmatpush3.msk.msra.mxu1 %vm390_vm1, %v14654_v28  ;;  %v3899_v41 = vmul.f32 %v12154_v63, %v16675_v43 }
 0x2e7   : > { %v15048_v9 = vpop.eup %11909  ;;  %v6872_v29 = vadd.f32 %v6871_v23, %v6870_v48  ;;  %11141 = vmatprep.subr.bf16.mxu0 %v14096_v55  ;;  %10433 = vmatprep.mubr.msk.f32.mxu0 %vm12237_vm6, %v16570_v50  ;;  %v16676_v38 = vld [vmem:[#allocation16_spill] sm:$0xff]  ;;  %v6881_v43 = vsel %vm2343_vm3, %v15029_v3, 0.0 }
 0x2e8   : > { %16674 = vst [vmem:[#allocation21_spill] sm:$0xff] %v15048_v9  ;;  %v15055_v56 = vsub.f32 %v8966_v62, %v9038_v20  ;;  %v15057_v37 = vsub.f32 %v8968_v25, %v9040_v2  ;;  %11165 = vmatprep.subr.bf16.mxu1 %v14012_v34  ;;  %v8969_v7 = vclamps-f32 %v16676_v38, 1.0  ;;  %10434 = vmatmul.mubr.msk.f32.gmra.mrb[94].mxu0 %vm380_vm0, %v15040_v35  ;;  %v15066_v28 = vpop.eup %11911  ;;  %v12155_v38 = vld [vmem:[%s12296_s30 + $0x10] sm:$0xff]  ;;  %v16678_v35 = vld [vmem:[#allocation53_spill] sm:$0xff] }
 0x2e9   : > { %5268 = vmatmul.mubr.f32.gmra.mrb[92].mxu1 %v15033_v4  ;;  %v2962_v14 = vpop.f32.mrb[34].mxu1  ;;  %16677 = vst [vmem:[#allocation52_spill] sm:$0xff] %v15066_v28  ;;  %11143 = vmatpush3.bf16.msra.mxu0 %v14112_v10  ;;  %v3900_v4 = vmul.f32 %v12155_v38, %v16678_v35 }
 0x2ea   : > { %v6873_v63 = vsel %vm2350_vm4, %v15055_v56, 0.0  ;;  %v6882_v25 = vsel %vm2343_vm3, %v15057_v37, 0.0  ;;  %5272 = vmatprep.mubr.f32.mxu1 %v15048_v9  ;;  %v9041_v62 = vclamps-f32 %v2962_v14, 1.0  ;;  %v10287_v48 = vpop.f32.mrb[35].mxu1  ;;  %11145 = vmatprep.subr.bf16.mxu0 %v14128_v42 }
 0x2eb   : > { %v6874_v23 = vadd.f32 %v6873_v63, %v6872_v29  ;;  %v6883_v20 = vadd.f32 %v6882_v25, %v6881_v43  ;;  %5431 = vmatprep.mubr.f32.mxu0 %v3899_v41  ;;  %v12156_v43 = vld [vmem:[%s12296_s30 + $0x28] sm:$0xff]  ;;  %v16679_v63 = vld [vmem:[#allocation54_spill] sm:$0xff] }
 0x2ec   : > { %v15077_v2 = vsub.f32 %v8969_v7, %v9041_v62  ;;  %v3903_v25 = vmul.f32 %v12156_v43, %v16679_v63  ;;  %v12157_v63 = vld [vmem:[%s12296_s30 + $0x40] sm:$0xf] }
 0x2ed   : > { %v6875_v5 = vrot.slane %v6874_v23, 4  ;;  %5273 = vmatmul.mubr.f32.gmra.mrb[94].mxu1 %v15066_v28  ;;  %11147 = vmatpush3.bf16.msra.mxu0 %v14165_v57 }
 0x2ee   : > { %v6884_v9 = vsel %vm2350_vm4, %v15077_v2, 0.0  ;;  %10438 = vmatprep.mubr.msk.f32.mxu1 %vm12237_vm6, %v16570_v50  ;;  %11149 = vmatprep.subr.bf16.mxu0 %v14171_v33 }
 0x2ef   : > { %v6876_v29 = vadd.f32 %v6875_v5, %v6874_v23  ;;  %v6885_v14 = vadd.f32 %v6884_v9, %v6883_v20  ;;  %v16680_v9 = vld [vmem:[#allocation17_spill] sm:$0xff] }
 0x2f0   : > { %v8973_v48 = vclamps-f32 %v16680_v9, 1.0 }
 0x2f1   : > { %v6877_v41 = vrot.slane %v6876_v29, 2  ;;  %v6886_v7 = vrot.slane %v6885_v14, 4  ;;  %10439 = vmatmul.mubr.msk.f32.vlgmr.msra.gmra.mrb[96].mxu1 %vm380_vm0, %v3900_v4  ;;  %11151 = vmatpush3.bf16.msra.mxu0 %v14196_v15 }
 0x2f2   : > { %11167 = vmatpush3.bf16.msra.mxu1 %v14036_v36  ;;  %11153 = vmatprep.subr.bf16.mxu0 %v14205_v40 }
 0x2f3   : > { %v6878_v35 = vadd.f32 %v6877_v41, %v6876_v29  ;;  %v6887_v62 = vadd.f32 %v6886_v7, %v6885_v14  ;;  %11169 = vmatprep.subr.bf16.mxu1 %v14041_v19  ;;  %10441 = vmatprep.mubr.msk.f32.mxu1 %vm12237_vm6, %v16570_v50  ;;  %v16681_v29 = vld [vmem:[#allocation56_spill] sm:$0xff]  ;;  %v16682_v41 = vld [vmem:[#allocation75_spill] sm:$0xff] }
 0x2f4   : > { %v3130_v23 = vpop.f32.mrb[36].mxu1  ;;  %v3906_v14 = vmul.f32 %v12157_v63, %v16681_v29  ;;  %v8970_v7 = vclamps-f32 %v16682_v41, 1.0  ;;  %v12158_v29 = vld [vmem:[%s12296_s30 + $0x50] sm:$0xff]  ;;  %v16686_v41 = vld [vmem:[#allocation35_spill] sm:$0xff] }
 0x2f5   : > { %v6879_v4 = vrot.slane %v6878_v35, 1  ;;  %v6888_v20 = vrot.slane %v6887_v62, 2  ;;  %v3041_v5 = vpop.f32.mrb[36].mxu0  ;;  %v9045_v38 = vclamps-f32 %v3130_v23, 1.0  ;;  %v10311_v43 = vpop.f32.mrb[37].mxu1  ;;  %10442 = vmatmul.mubr.msk.f32.gmra.mrb[98].mxu1 %vm380_vm0, %v3903_v25  ;;  %11155 = vmatpush3.bf16.msra.mxu0 %v14226_v8  ;;  %v16683_v25 = vld [vmem:[#allocation22_spill] sm:$0xff] }
 0x2f6   : > { %11171 = vmatpush3.bf16.msra.mxu1 %v14074_v32  ;;  %v9042_v9 = vclamps-f32 %v3041_v5, 1.0  ;;  %v10296_v28 = vpop.f32.mrb[37].mxu0  ;;  %11157 = vmatprep.subr.bf16.mxu0 %v14234_v45  ;;  %v8971_v43 = vclamps-f32 %v16683_v25, 1.0  ;;  %v16684_v5 = vld [vmem:[#allocation55_spill] sm:$0xff]  ;;  %v8972_v25 = vclamps-f32 %v16686_v41, 1.0 }
 0x2f7   : > { %v6880_v13 = vadd.f32 %v6879_v4, %v6878_v35  ;;  %v6889_v1 = vadd.f32 %v6888_v20, %v6887_v62  ;;  %11173 = vmatprep.subr.bf16.mxu1 %v14096_v55  ;;  %v15105_v23 = vsub.f32 %v8973_v48, %v9045_v38  ;;  %10444 = vmatprep.mubr.msk.f32.mxu1 %vm12237_vm6, %v16570_v50  ;;  %v16685_v35 = vld [vmem:[#allocation30_spill] sm:$0xff] }
 0x2f8   : > { %v15109_v54 = vsub.f32 %v8970_v7, %v9042_v9  ;;  %v3135_v63 = vpop.f32.mrb[38].mxu1  ;;  %v3908_v28 = vmul.f32 %v12158_v29, %v16684_v5  ;;  %v8974_v62 = vclamps-f32 %v16685_v35, 1.0  ;;  %v16687_v7 = vld [vmem:[#allocation38_spill] sm:$0xff]  ;;  %v16688_v35 = vld [vmem:[#allocation57_spill] sm:$0xff] }
 0x2f9   : > { %v6938_v4 = vmul.f32 0.31622776, %v6880_v13  ;;  %v6890_v20 = vrot.slane %v6889_v1, 1  ;;  %v3046_v48 = vpop.f32.mrb[38].mxu0  ;;  %v9046_v38 = vclamps-f32 %v3135_v63, 1.0  ;;  %10445 = vmatmul.mubr.msk.f32.gmra.mrb[100].mxu1 %vm380_vm0, %v3906_v14  ;;  %v8975_v9 = vclamps-f32 %v16687_v7, 1.0  ;;  %11159 = vmatpush3.bf16.msra.mxu0 %v14255_v30 }
 0x2fa   : > { %11175 = vmatpush3.bf16.msra.mxu1 %v14112_v10  ;;  %v9043_v18 = vclamps-f32 %v3046_v48, 1.0  ;;  %v10299_v61 = vpop.f32.mrb[39].mxu0  ;;  %v10314_v29 = vpop.f32.mrb[39].mxu1  ;;  %v12159_v5 = vld [vmem:[%s12296_s30] sm:$0xff]  ;;  %v6903_v7 = vsel %vm2343_vm3, %v15105_v23, 0.0  ;;  %11161 = vmatprep.subr.bf16.mxu0 %v14265_v22 }
 0x2fb   : > { %v3898_v13 = vmul.f32 %v12159_v5, %v16688_v35  ;;  %v6950_v39 = vmul.f32 %v6938_v4, %v15011_v31  ;;  %v6951_v63 = vmul.f32 %v6938_v4, %v15027_v52  ;;  %v6952_v14 = vmul.f32 %v6938_v4, %v15055_v56  ;;  %11177 = vmatprep.subr.bf16.mxu1 %v14128_v42  ;;  %v12160_v29 = vld [vmem:[%s12296_s30 + $0x20] sm:$0xff] }
 0x2fc   : > { %v6891_v41 = vadd.f32 %v6890_v20, %v6889_v1  ;;  %v15129_v27 = vsub.f32 %v8971_v43, %v9043_v18  ;;  %v15131_v48 = vsub.f32 %v8974_v62, %v9046_v38  ;;  %v3140_v61 = vpop.f32.mrb[40].mxu1  ;;  %v16689_v5 = vld [vmem:[#allocation58_spill] sm:$0xff]  ;;  %5600 = vmatprep.mubr.f32.mxu1 %v3908_v28  ;;  %v6892_v1 = vsel %vm2343_vm3, %v15109_v54, 0.0 }
 0x2fd   : > { %v3902_v35 = vmul.f32 %v12160_v29, %v16689_v5  ;;  %11913 = vtanh.f32 %v6950_v39  ;;  %v3051_v4 = vpop.f32.mrb[40].mxu0  ;;  %v9047_v20 = vclamps-f32 %v3140_v61, 1.0  ;;  %v10317_v6 = vpop.f32.mrb[41].mxu1  ;;  %11163 = vmatpush3.bf16.msra.mxu0 %v14286_v11  ;;  %v16690_v5 = vld [vmem:[#allocation64_spill] sm:$0xff] }
 0x2fe   : > { %v6939_v0 = vmul.f32 0.31622776, %v6891_v41  ;;  %11915 = vtanh.f32 %v6951_v63  ;;  %11179 = vmatpush3.bf16.msra.mxu1 %v14165_v57  ;;  %v6893_v18 = vsel %vm2343_vm3, %v15129_v27, 0.0  ;;  %v6904_v43 = vsel %vm2343_vm3, %v15131_v48, 0.0  ;;  %v10302_v28 = vpop.f32.mrb[41].mxu0  ;;  %10447 = vmatprep.subr.mxu0 %v16570_v50 }
 0x2ff   : > { %v9044_v39 = vclamps-f32 %v3051_v4, 1.0  ;;  %11917 = vtanh.f32 %v6952_v14  ;;  %11181 = vmatprep.subr.bf16.mxu1 %v14171_v33  ;;  %v6894_v63 = vadd.f32 %v6893_v18, %v6892_v1  ;;  %v6905_v41 = vadd.f32 %v6904_v43, %v6903_v7  ;;  %v12161_v14 = vld [vmem:[%s12296_s30 + $0x18] sm:$0xff] }
 0x300   : > { %v6953_v62 = vmul.f32 %v6939_v0, %v15029_v3  ;;  %v6954_v38 = vmul.f32 %v6939_v0, %v15057_v37  ;;  %v6955_v6 = vmul.f32 %v6939_v0, %v15077_v2  ;;  %v15151_v29 = vsub.f32 %v8975_v9, %v9047_v20  ;;  %5432 = vmatmul.mubr.f32.vlgmr.msra.gmra.mrb[96].mxu0 %v3898_v13  ;;  %v12162_v7 = vld [vmem:[%s12296_s30 + $0x38] sm:$0xf]  ;;  %v15166_v20 = vld [vmem:[%s16162_s2 + $0x100] sm:$0xf] }
 0x301   : > { %v15149_v61 = vsub.f32 %v8972_v25, %v9044_v39  ;;  %v3901_v4 = vmul.f32 %v12161_v14, %v16690_v5  ;;  %5436 = vmatprep.mubr.f32.mxu0 %v3902_v35  ;;  %v16691_v25 = vld [vmem:[#allocation66_spill] sm:$0xff]  ;;  %10448 = vmatpush3.msk.msra.mxu0 %vm390_vm1, %v15166_v20  ;;  %v8976_v35 = vclamps-f32 %v14690_v53, 1.0  ;;  %v8979_v43 = vclamps-f32 %v14677_v46, 1.0  ;;  %v16692_v14 = vld [vmem:[#allocation65_spill] sm:$0xff] }
 0x302   : > { %11919 = vtanh.f32 %v6953_v62  ;;  %11183 = vmatpush3.bf16.msra.mxu1 %v14196_v15  ;;  %v6906_v28 = vsel %vm2350_vm4, %v15151_v29, 0.0  ;;  %v3905_v1 = vmul.f32 %v12162_v7, %v16691_v25  ;;  %11197 = vmatprep.subr.bf16.mxu0 %v14012_v34  ;;  %v12165_v7 = vld [vmem:[%s12296_s30 + $0x58] sm:$0xff]  ;;  %v16694_v25 = vld [vmem:[#allocation63_spill] sm:$0xff] }
 0x303   : > { %11921 = vtanh.f32 %v6954_v38  ;;  %v6895_v0 = vsel %vm2350_vm4, %v15149_v61, 0.0  ;;  %v6907_v13 = vadd.f32 %v6906_v28, %v6905_v41  ;;  %11185 = vmatprep.subr.bf16.mxu1 %v14205_v40  ;;  %v3219_v18 = vpop.f32.mrb[42].mxu0  ;;  %v12164_v41 = vld [vmem:[%s12296_s30 + $0x30] sm:$0xf]  ;;  %v16693_v28 = vld [vmem:[#allocation51_spill] sm:$0xff] }
 0x304   : > { %11923 = vtanh.f32 %v6955_v6  ;;  %v6896_v9 = vadd.f32 %v6895_v0, %v6894_v63  ;;  %v9048_v39 = vclamps-f32 %v3219_v18, 1.0  ;;  %v10326_v62 = vpop.f32.mrb[43].mxu0  ;;  %5437 = vmatmul.mubr.f32.gmra.mrb[98].mxu0 %v3901_v4  ;;  %v3904_v5 = vmul.f32 %v12164_v41, %v16692_v14  ;;  %v16695_v4 = vld [vmem:[#allocation3_spill] sm:$0xff] }
 0x305   : > { %v6908_v63 = vrot.slane %v6907_v13, 4  ;;  %v8977_v0 = vclamps-f32 %v14707_v17, 1.0  ;;  %5441 = vmatprep.mubr.f32.mxu0 %v3905_v1  ;;  %v3909_v18 = vmul.f32 %v12165_v7, %v16694_v25  ;;  %v8978_v38 = vclamps-f32 %v16695_v4, 1.0  ;;  %v12166_v41 = vld [vmem:[%s12296_s30 + $0x48] sm:$0xff]  ;;  %v16697_v7 = vld [vmem:[#allocation61_spill] sm:$0xff]  ;;  %v12168_v4 = vld [vmem:[%s12296_s30 + $0x60] sm:$0xff] }
 0x306   : > { %v6897_v6 = vrot.slane %v6896_v9, 4  ;;  %11187 = vmatpush3.bf16.msra.mxu1 %v14226_v8  ;;  %v15179_v46 = vsub.f32 %v8976_v35, %v9048_v39  ;;  %v16696_v14 = vld [vmem:[#allocation59_spill] sm:$0xff]  ;;  %v15191_v25 = vmul.f32 %v12167_v51, %v16697_v7  ;;  %v12169_v51 = vld [vmem:[%s12296_s30 + $0x70] sm:$0xff] }
 0x307   : > { %v11914_v62 = vpop.eup %11913  ;;  %v6909_v59 = vadd.f32 %v6908_v63, %v6907_v13  ;;  %11189 = vmatprep.subr.bf16.mxu1 %v14234_v45  ;;  %v3224_v17 = vpop.f32.mrb[44].mxu0  ;;  %v15187_v53 = vmul.f32 %v12166_v41, %v16696_v14  ;;  %v16699_v7 = vld [vmem:[#allocation60_spill] sm:$0xff] }
 0x308   : > { %v6898_v47 = vadd.f32 %v6897_v6, %v6896_v9  ;;  %v11916_v35 = vpop.eup %11915  ;;  %v7004_v39 = vmul.f32 1.442695, %v11914_v62  ;;  %v3308_v1 = vpop.f32.mrb[42].mxu1  ;;  %v9049_v16 = vclamps-f32 %v3224_v17, 1.0  ;;  %v16698_v9 = vld [vmem:[#allocation62_spill] sm:$0xff]  ;;  %5442 = vmatmul.mubr.f32.gmra.mrb[100].mxu0 %v3904_v5 }
 0x309   : > { %v10329_v49 = vpop.f32.mrb[45].mxu0  ;;  %v15195_v13 = vmul.f32 %v12168_v4, %v16698_v9  ;;  %v11918_v6 = vpop.eup %11917  ;;  %v7006_v63 = vmul.f32 1.442695, %v11916_v35  ;;  %v6910_v12 = vrot.slane %v6909_v59, 2  ;;  %v9051_v41 = vclamps-f32 %v3308_v1, 1.0  ;;  %10449 = vmatprep.mubr.msk.f32.mxu0 %vm12237_vm6, %v16570_v50 }
 0x30a   : > { %v6899_v21 = vrot.slane %v6898_v47, 2  ;;  %v10341_v14 = vpop.f32.mrb[43].mxu1  ;;  %v7008_v62 = vmul.f32 1.442695, %v11918_v6  ;;  %11191 = vmatpush3.bf16.msra.mxu1 %v14255_v30  ;;  %v6914_v49 = vsel %vm2343_vm3, %v15179_v46, 0.0  ;;  %v15200_v17 = vsub.f32 %v8977_v0, %v9049_v16 }
 0x30b   : > { %v3912_v4 = vmul.f32 %v12169_v51, %v16699_v7  ;;  %11925 = vpow2.f32 %v7004_v39  ;;  %v6911_v5 = vadd.f32 %v6910_v12, %v6909_v59  ;;  %v15206_v1 = vsub.f32 %v8979_v43, %v9051_v41  ;;  %11193 = vmatprep.subr.bf16.mxu1 %v14265_v22  ;;  %v3229_v6 = vpop.f32.mrb[46].mxu0 }
 0x30c   : > { %v11920_v35 = vpop.eup %11919  ;;  %v6900_v9 = vadd.f32 %v6899_v21, %v6898_v47  ;;  %11927 = vpow2.f32 %v7008_v62  ;;  %v6915_v16 = vsel %vm2343_vm3, %v15200_v17, 0.0  ;;  %v3313_v0 = vpop.f32.mrb[44].mxu1  ;;  %v9050_v58 = vclamps-f32 %v3229_v6, 1.0  ;;  %10450 = vmatmul.mubr.msk.f32.vlgmr.msra.gmra.mrb[102].mxu0 %vm380_vm0, %v3909_v18  ;;  %v12170_v62 = vld [vmem:[%s12296_s30 + $0x80] sm:$0xf] }
 0x30d   : > { %v11922_v14 = vpop.eup %11921  ;;  %v7010_v44 = vmul.f32 1.442695, %v11920_v35  ;;  %v10332_v26 = vpop.f32.mrb[47].mxu0  ;;  %11929 = vpow2.f32 %v7006_v63  ;;  %v6912_v21 = vrot.slane %v6911_v5, 1  ;;  %v6916_v47 = vadd.f32 %v6915_v16, %v6914_v49  ;;  %11199 = vmatpush3.bf16.msra.mxu0 %v14036_v36  ;;  %10452 = vmatprep.mubr.msk.f32.mxu0 %vm12237_vm6, %v16570_v50  ;;  %v16701_v49 = vld [vmem:[#allocation69_spill] sm:$0xff] }
 0x30e   : > { %v11924_v24 = vpop.eup %11923  ;;  %v7012_v51 = vmul.f32 1.442695, %v11922_v14  ;;  %v6901_v39 = vrot.slane %v6900_v9, 1  ;;  %v10344_v12 = vpop.f32.mrb[45].mxu1  ;;  %11195 = vmatpush3.bf16.msra.mxu1 %v14286_v11  ;;  %v9052_v43 = vclamps-f32 %v3313_v0, 1.0  ;;  %v15214_v63 = vsub.f32 %v8978_v38, %v9050_v58  ;;  %11201 = vmatprep.subr.bf16.mxu0 %v14041_v19  ;;  %v16702_v58 = vld [vmem:[#allocation70_spill] sm:$0xff] }
 0x30f   : > { %11931 = vpow2.f32 %v7010_v44  ;;  %v7014_v59 = vmul.f32 1.442695, %v11924_v24  ;;  %v6913_v41 = vadd.f32 %v6912_v21, %v6911_v5  ;;  %10458 = vmatprep.subr.mxu1 %v16570_v50  ;;  %v16700_v44 = vclamps-f32 %v14696_v60, 1.0  ;;  %v12171_v35 = vld [vmem:[%s12296_s30 + $0x88] sm:$0xf] }
 0x310   : > { %11933 = vpow2.f32 %v7012_v51  ;;  %v6902_v26 = vadd.f32 %v6901_v39, %v6900_v9  ;;  %v3318_v18 = vpop.f32.mrb[46].mxu1  ;;  %v3914_v7 = vmul.f32 %v12170_v62, %v16701_v49  ;;  %v3915_v38 = vmul.f32 %v12171_v35, %v16702_v58  ;;  %10453 = vmatmul.mubr.msk.f32.gmra.mrb[104].mxu0 %vm380_vm0, %v3912_v4  ;;  %v12172_v39 = vld [vmem:[%s12296_s30 + $0x98] sm:$0xff] }
 0x311   : > { %11935 = vpow2.f32 %v7014_v59  ;;  %v15220_v24 = vsub.f32 %v16700_v44, %v9052_v43  ;;  %v6941_v5 = vmul.f32 0.31622776, %v6913_v41  ;;  %5601 = vmatmul.mubr.f32.vlgmr.msra.gmra.mrb[102].mxu1 %v15187_v53  ;;  %v6917_v60 = vsel %vm2350_vm4, %v15214_v63, 0.0  ;;  %11203 = vmatpush3.bf16.msra.mxu0 %v14074_v32  ;;  %v10347_v51 = vpop.f32.mrb[47].mxu1  ;;  %v16703_v53 = vld [vmem:[#allocation67_spill] sm:$0xff]  ;;  %v16705_v58 = vld [vmem:[#allocation77_spill] sm:$0xff] }
 0x312   : > { %v6940_v9 = vmul.f32 0.31622776, %v6902_v26  ;;  %v9053_v6 = vclamps-f32 %v3318_v18, 1.0  ;;  %v6925_v14 = vsel %vm2343_vm3, %v15206_v1, 0.0  ;;  %v6918_v0 = vadd.f32 %v6917_v60, %v6916_v47  ;;  %5605 = vmatprep.mubr.f32.mxu1 %v15191_v25  ;;  %10459 = vmatpush3.msk.msra.mxu1 %vm390_vm1, %v15166_v20  ;;  %v12173_v35 = vld [vmem:[%s12296_s30 + $0x78] sm:$0xf] }
 0x313   : > { %v6926_v16 = vsel %vm2343_vm3, %v15220_v24, 0.0  ;;  %v3917_v21 = vmul.f32 %v12172_v39, %v16703_v53  ;;  %v6959_v43 = vmul.f32 %v6941_v5, %v15105_v23  ;;  %v6960_v25 = vmul.f32 %v6941_v5, %v15131_v48  ;;  %11205 = vmatprep.subr.bf16.mxu0 %v14096_v55  ;;  %10455 = vmatprep.mubr.msk.f32.mxu0 %vm12237_vm6, %v16570_v50  ;;  %v16706_v39 = vld [vmem:[#allocation15_spill] sm:$0xff] }
 0x314   : > { %v6956_v12 = vmul.f32 %v6940_v9, %v15109_v54  ;;  %v6957_v4 = vmul.f32 %v6940_v9, %v15129_v27  ;;  %v6958_v59 = vmul.f32 %v6940_v9, %v15149_v61  ;;  %v6961_v47 = vmul.f32 %v6941_v5, %v15151_v29  ;;  %v15249_v44 = vpop.f32.mrb[48].mxu1  ;;  %10456 = vmatmul.mubr.msk.f32.gmra.mrb[106].mxu0 %vm380_vm0, %v3915_v38 }
 0x315   : > { %v6927_v26 = vadd.f32 %v6926_v16, %v6925_v14  ;;  %v6919_v41 = vrot.slane %v6918_v0, 4  ;;  %v15253_v18 = vpop.eup %11925  ;;  %v16704_v62 = vclamps-f32 %v16693_v28, 1.0  ;;  %5606 = vmatmul.mubr.f32.gmra.mrb[104].mxu1 %v15195_v13  ;;  %v3913_v9 = vmul.f32 %v12173_v35, %v16705_v58  ;;  %v10352_v5 = vpop.f32.mrb[49].mxu1  ;;  %11207 = vmatpush3.bf16.msra.mxu0 %v14112_v10  ;;  %v16707_v58 = vld [vmem:[#allocation20_spill] sm:$0xff] }
 0x316   : > { %11937 = vtanh.f32 %v6956_v12  ;;  %v15263_v60 = vpop.eup %11927  ;;  %5610 = vmatprep.mubr.f32.mxu1 %v3914_v7  ;;  %11209 = vmatprep.subr.bf16.mxu0 %v14128_v42 }
 0x317   : > { %v15257_v49 = vsub.f32 %v16704_v62, %v9053_v6  ;;  %11939 = vtanh.f32 %v6957_v4  ;;  %v6920_v14 = vadd.f32 %v6919_v41, %v6918_v0  ;;  %v15266_v16 = vpop.eup %11929  ;;  %v15270_v28 = vmul.f32 %v15263_v60, %v15055_v56  ;;  %11229 = vmatprep.subr.bf16.mxu1 %v14012_v34  ;;  %5769 = vmatprep.mubr.f32.mxu0 %v3917_v21  ;;  %v12174_v56 = vld [vmem:[%s12296_s30 + $0xa0] sm:$0xff] }
 0x318   : > { %11941 = vtanh.f32 %v6958_v59  ;;  %v15278_v0 = vpop.f32.mrb[50].mxu1  ;;  %v3918_v53 = vmul.f32 %v12174_v56, %v16706_v39  ;;  %v15306_v35 = vmul.f32 %v15266_v16, %v15027_v52 }
 0x319   : > { %v6928_v13 = vsel %vm2350_vm4, %v15257_v49, 0.0  ;;  %v15276_v38 = vpop.eup %11931  ;;  %11943 = vtanh.f32 %v6959_v43  ;;  %v6921_v7 = vrot.slane %v6920_v14, 2  ;;  %5611 = vmatmul.mubr.f32.gmra.mrb[106].mxu1 %v3913_v9  ;;  %v10355_v12 = vpop.f32.mrb[51].mxu1  ;;  %11211 = vmatpush3.bf16.msra.mxu0 %v14165_v57  ;;  %v15296_v43 = vmul.f32 %v15253_v18, %v15011_v31  ;;  %v12175_v31 = vld [vmem:[%s12296_s30 + $0xb8] sm:$0xff] }
 0x31a   : > { %v6929_v6 = vadd.f32 %v6928_v13, %v6927_v26  ;;  %v15280_v51 = vpop.eup %11933  ;;  %11945 = vtanh.f32 %v6960_v25  ;;  %10460 = vmatprep.mubr.msk.f32.mxu1 %vm12237_vm6, %v16570_v50  ;;  %11213 = vmatprep.subr.bf16.mxu0 %v14171_v33  ;;  %v15300_v25 = vmul.f32 %v15276_v38, %v15029_v3  ;;  %v3921_v9 = vmul.f32 %v12175_v31, %v16707_v58  ;;  %v16708_v12 = vld [vmem:[#allocation73_spill] sm:$0xff] }
 0x31b   : > { %v15284_v4 = vpop.eup %11935  ;;  %11947 = vtanh.f32 %v6961_v47  ;;  %v6922_v59 = vadd.f32 %v6921_v7, %v6920_v14  ;;  %vm8542_vm4 = vcmask 15360  }
 0x31c   : > { %v6930_v41 = vrot.slane %v6929_v6, 4  ;;  %v15291_v21 = vmul.f32 %v15284_v4, %v15077_v2  ;;  %v15302_v62 = vpop.f32.mrb[52].mxu1  ;;  %v15310_v2 = vmul.f32 %v15280_v51, %v15057_v37 }
 0x31d   : > { %v6923_v47 = vrot.slane %v6922_v59, 1  ;;  %10461 = vmatmul.mubr.msk.f32.vlgmr.msra.gmra.mrb[108].mxu1 %vm380_vm0, %v3918_v53  ;;  %v10358_v5 = vpop.f32.mrb[53].mxu1  ;;  %11215 = vmatpush3.bf16.msra.mxu0 %v14196_v15  ;;  %v12176_v53 = vld [vmem:[%s12296_s30 + $0xd0] sm:$0xf] }
 0x31e   : > { %v6931_v26 = vadd.f32 %v6930_v41, %v6929_v6  ;;  %11231 = vmatpush3.bf16.msra.mxu1 %v14036_v36  ;;  %11217 = vmatprep.subr.bf16.mxu0 %v14205_v40 }
 0x31f   : > { %v6924_v3 = vadd.f32 %v6923_v47, %v6922_v59  ;;  %11233 = vmatprep.subr.bf16.mxu1 %v14041_v19  ;;  %10463 = vmatprep.mubr.msk.f32.mxu1 %vm12237_vm6, %v16570_v50  ;;  %v3924_v59 = vmul.f32 %v12176_v53, %v16708_v12  ;;  %v16709_v53 = vld [vmem:[#allocation71_spill] sm:$0xff] }
 0x320   : > { %v6932_v14 = vrot.slane %v6931_v26, 2  ;;  %v11938_v13 = vpop.eup %11937 }
 0x321   : > { %v11940_v52 = vpop.eup %11939  ;;  %v7016_v37 = vmul.f32 1.442695, %v11938_v13  ;;  %v6942_v7 = vmul.f32 0.31622776, %v6924_v3  ;;  %10464 = vmatmul.mubr.msk.f32.gmra.mrb[110].mxu1 %vm380_vm0, %v3921_v9  ;;  %11219 = vmatpush3.bf16.msra.mxu0 %v14226_v8 }
 0x322   : > { %v6933_v6 = vadd.f32 %v6932_v14, %v6931_v26  ;;  %v11942_v56 = vpop.eup %11941  ;;  %v7018_v39 = vmul.f32 1.442695, %v11940_v52  ;;  %11235 = vmatpush3.bf16.msra.mxu1 %v14074_v32  ;;  %11221 = vmatprep.subr.bf16.mxu0 %v14234_v45 }
 0x323   : > { %v11944_v41 = vpop.eup %11943  ;;  %11949 = vpow2.f32 %v7016_v37  ;;  %v7020_v47 = vmul.f32 1.442695, %v11942_v56  ;;  %v6962_v31 = vmul.f32 %v6942_v7, %v15179_v46  ;;  %v6963_v58 = vmul.f32 %v6942_v7, %v15200_v17  ;;  %11237 = vmatprep.subr.bf16.mxu1 %v14096_v55  ;;  %v9317_v14 = vpop.f32.mrb[48].mxu0  ;;  %10466 = vmatprep.mubr.msk.f32.mxu1 %vm12237_vm6, %v16570_v50  ;;  %v12177_v56 = vld [vmem:[%s12296_s30 + $0xe0] sm:$0xff] }
 0x324   : > { %v11946_v26 = vpop.eup %11945  ;;  %11951 = vpow2.f32 %v7018_v39  ;;  %v7022_v5 = vmul.f32 1.442695, %v11944_v41  ;;  %v6964_v9 = vmul.f32 %v6942_v7, %v15214_v63  ;;  %v6934_v3 = vrot.slane %v6933_v6, 1  ;;  %v9318_v37 = vpop.f32.mrb[49].mxu0 }
 0x325   : > { %v11948_v13 = vpop.eup %11947  ;;  %11953 = vpow2.f32 %v7020_v47  ;;  %v7024_v52 = vmul.f32 1.442695, %v11946_v26  ;;  %v3926_v12 = vmul.f32 %v12177_v56, %v16709_v53  ;;  %v9319_v41 = vadd.f32 %v9318_v37, %v9317_v14  ;;  %10467 = vmatmul.mubr.msk.f32.gmra.mrb[112].mxu1 %vm380_vm0, %v3924_v59  ;;  %11223 = vmatpush3.bf16.msra.mxu0 %v14255_v30  ;;  %v16711_v56 = vld [vmem:[#allocation28_spill] sm:$0xff] }
 0x326   : > { %11955 = vpow2.f32 %v7022_v5  ;;  %v7026_v39 = vmul.f32 1.442695, %v11948_v13  ;;  %v6935_v7 = vadd.f32 %v6934_v3, %v6933_v6  ;;  %11239 = vmatpush3.bf16.msra.mxu1 %v14112_v10  ;;  %11225 = vmatprep.subr.bf16.mxu0 %v14265_v22  ;;  %v12178_v6 = vld [vmem:[%s12296_s30 + $0x90] sm:$0xff]  ;;  %v16710_v3 = vld [vmem:[#allocation14_spill] sm:$0xff] }
 0x327   : > { %11957 = vpow2.f32 %v7024_v52  ;;  %11241 = vmatprep.subr.bf16.mxu1 %v14128_v42  ;;  %v15341_v26 = vadd.f32 %v9319_v41, %v15249_v44  ;;  %v9320_v5 = vpop.f32.mrb[50].mxu0  ;;  %v3916_v59 = vmul.f32 %v12178_v6, %v16710_v3  ;;  %5938 = vmatprep.mubr.f32.mxu1 %v3926_v12  ;;  %v12180_v41 = vld [vmem:[%s12296_s30 + $0xa8] sm:$0xff] }
 0x328   : > { %11959 = vpow2.f32 %v7026_v39  ;;  %v6943_v47 = vmul.f32 0.31622776, %v6935_v7  ;;  %v9321_v14 = vpop.f32.mrb[51].mxu0 }
 0x329   : > { %11961 = vtanh.f32 %v6962_v31  ;;  %11227 = vmatpush3.bf16.msra.mxu0 %v14286_v11  ;;  %v9322_v44 = vadd.f32 %v9321_v14, %v9320_v5  ;;  %v12179_v31 = vld [vmem:[%s12296_s30 + $0xb0] sm:$0xff] }
 0x32a   : > { %11963 = vtanh.f32 %v6963_v58  ;;  %v6965_v13 = vmul.f32 %v6943_v47, %v15206_v1  ;;  %v6966_v52 = vmul.f32 %v6943_v47, %v15220_v24  ;;  %v6967_v37 = vmul.f32 %v6943_v47, %v15257_v49  ;;  %11243 = vmatpush3.bf16.msra.mxu1 %v14165_v57  ;;  %10469 = vmatprep.subr.mxu0 %v16570_v50  ;;  %v16712_v47 = vld [vmem:[#allocation27_spill] sm:$0xff] }
 0x32b   : > { %11965 = vtanh.f32 %v6964_v9  ;;  %v3920_v53 = vmul.f32 %v12179_v31, %v16711_v56  ;;  %11245 = vmatprep.subr.bf16.mxu1 %v14171_v33  ;;  %v9323_v58 = vpop.f32.mrb[52].mxu0  ;;  %v15357_v9 = vadd.f32 %v9322_v44, %v15278_v0  ;;  %v3919_v5 = vmul.f32 %v12180_v41, %v16712_v47  ;;  %v12181_v0 = vld [vmem:[%s12296_s30 + $0xc8] sm:$0xf] }
 0x32c   : > { %11967 = vtanh.f32 %v6965_v13  ;;  %v9324_v39 = vpop.f32.mrb[53].mxu0  ;;  %5770 = vmatmul.mubr.f32.vlgmr.msra.gmra.mrb[108].mxu0 %v3916_v59  ;;  %v16714_v13 = vld [vmem:[#allocation31_spill] sm:$0xff] }
 0x32d   : > { %v15354_v12 = vpop.eup %11949  ;;  %11969 = vtanh.f32 %v6966_v52  ;;  %v9325_v6 = vadd.f32 %v9324_v39, %v9323_v58  ;;  %5774 = vmatprep.mubr.f32.mxu0 %v3920_v53  ;;  %v3923_v52 = vmul.f32 %v12181_v0, %v16714_v13  ;;  %10470 = vmatpush3.msk.msra.mxu0 %vm390_vm1, %v15166_v20  ;;  %v12182_v58 = vld [vmem:[%s12296_s30 + $0xc0] sm:$0xf] }
 0x32e   : > { %v15359_v7 = vpop.eup %11951  ;;  %11971 = vtanh.f32 %v6967_v37  ;;  %v15365_v3 = vmul.f32 %v15354_v12, %v15109_v54  ;;  %11247 = vmatpush3.bf16.msra.mxu1 %v14196_v15  ;;  %11261 = vmatprep.subr.bf16.mxu0 %v14012_v34  ;;  %v16718_v39 = vld [vmem:[#allocation78_spill] sm:$0xff] }
 0x32f   : > { %v15367_v14 = vpop.eup %11953  ;;  %v15374_v59 = vmul.f32 %v15359_v7, %v15129_v27  ;;  %11249 = vmatprep.subr.bf16.mxu1 %v14205_v40  ;;  %v15386_v54 = vadd.f32 %v9325_v6, %v15302_v62  ;;  %v4330_v31 = vpop.f32.mrb[54].mxu0  ;;  %v3922_v41 = vmul.f32 %v12182_v58, %v16718_v39 }
 0x330   : > { %16713 = vst [vmem:[#allocation16_spill] sm:$0xff] %v15365_v3  ;;  %v15376_v37 = vpop.eup %11955  ;;  %v15380_v44 = vmul.f32 %v15367_v14, %v15149_v61  ;;  %v10363_v53 = vpop.f32.mrb[55].mxu0  ;;  %5775 = vmatmul.mubr.f32.gmra.mrb[110].mxu0 %v3919_v5 }
 0x331   : > { %16715 = vst [vmem:[#allocation53_spill] sm:$0xff] %v15374_v59  ;;  %v15388_v56 = vpop.eup %11957  ;;  %v15393_v27 = vmul.f32 %v15376_v37, %v15105_v23  ;;  %5779 = vmatprep.mubr.f32.mxu0 %v3923_v52 }
 0x332   : > { %16716 = vst [vmem:[#allocation54_spill] sm:$0xff] %v15380_v44  ;;  %v15395_v61 = vpop.eup %11959  ;;  %v15401_v62 = vmul.f32 %v15388_v56, %v15131_v48  ;;  %11251 = vmatpush3.bf16.msra.mxu1 %v14226_v8 }
 0x333   : > { %16717 = vst [vmem:[#allocation17_spill] sm:$0xff] %v15393_v27  ;;  %v11962_v47 = vpop.eup %11961  ;;  %v15405_v6 = vmul.f32 %v15395_v61, %v15151_v29  ;;  %11253 = vmatprep.subr.bf16.mxu1 %v14234_v45  ;;  %v4335_v5 = vpop.f32.mrb[56].mxu0  ;;  %v12183_v29 = vld [vmem:[%s12296_s30 + $0xe8] sm:$0xff] }
 0x334   : > { %16719 = vst [vmem:[#allocation56_spill] sm:$0xff] %v15401_v62  ;;  %v11964_v23 = vpop.eup %11963  ;;  %v7028_v0 = vmul.f32 1.442695, %v11962_v47  ;;  %v9362_v58 = vpop.f32.mrb[54].mxu1  ;;  %5780 = vmatmul.mubr.f32.gmra.mrb[112].mxu0 %v3922_v41 }
 0x335   : > { %16720 = vst [vmem:[#allocation75_spill] sm:$0xff] %v15405_v6  ;;  %v11966_v13 = vpop.eup %11965  ;;  %v7030_v53 = vmul.f32 1.442695, %v11964_v23  ;;  %v10366_v39 = vpop.f32.mrb[57].mxu0  ;;  %v16721_v6 = vld [vmem:[#allocation34_spill] sm:$0xff]  ;;  %10471 = vmatprep.mubr.msk.f32.mxu0 %vm12237_vm6, %v16570_v50 }
 0x336   : > { %v11968_v48 = vpop.eup %11967  ;;  %11973 = vpow2.f32 %v7028_v0  ;;  %v7032_v44 = vmul.f32 1.442695, %v11966_v13  ;;  %v9363_v62 = vpop.f32.mrb[55].mxu1  ;;  %v3927_v59 = vmul.f32 %v12183_v29, %v16721_v6  ;;  %11255 = vmatpush3.bf16.msra.mxu1 %v14255_v30 }
 0x337   : > { %v11970_v27 = vpop.eup %11969  ;;  %11975 = vpow2.f32 %v7030_v53  ;;  %v7034_v52 = vmul.f32 1.442695, %v11968_v48  ;;  %v9364_v47 = vadd.f32 %v9363_v62, %v9362_v58  ;;  %11257 = vmatprep.subr.bf16.mxu1 %v14265_v22  ;;  %v4340_v41 = vpop.f32.mrb[58].mxu0  ;;  %v12184_v62 = vld [vmem:[%s12296_s30 + $0xd8] sm:$0xff]  ;;  %v16722_v58 = vld [vmem:[#allocation79_spill] sm:$0xff] }
 0x338   : > { %v11972_v23 = vpop.eup %11971  ;;  %11977 = vpow2.f32 %v7032_v44  ;;  %v7036_v0 = vmul.f32 1.442695, %v11970_v27  ;;  %v9365_v53 = vpop.f32.mrb[56].mxu1  ;;  %10472 = vmatmul.mubr.msk.f32.vlgmr.msra.gmra.mrb[114].mxu0 %vm380_vm0, %v3927_v59  ;;  %v3925_v48 = vmul.f32 %v12184_v62, %v16722_v58  ;;  %v12185_v44 = vld [vmem:[%s12296_s30 + $0x100] sm:$0xff]  ;;  %v16723_v27 = vld [vmem:[#allocation32_spill] sm:$0xff] }
 0x339   : > { %11979 = vpow2.f32 %v7034_v52  ;;  %v7038_v6 = vmul.f32 1.442695, %v11972_v23  ;;  %v15415_v13 = vadd.f32 %v9364_v47, %v4330_v31  ;;  %v10369_v39 = vpop.f32.mrb[59].mxu0  ;;  %v9366_v29 = vpop.f32.mrb[57].mxu1  ;;  %v3930_v3 = vmul.f32 %v12185_v44, %v16723_v27  ;;  %11263 = vmatpush3.bf16.msra.mxu0 %v14036_v36  ;;  %v12186_v52 = vld [vmem:[%s12296_s30 + $0xf8] sm:$0xff]  ;;  %10474 = vmatprep.mubr.msk.f32.mxu0 %vm12237_vm6, %v16570_v50 }
 0x33a   : > { %11981 = vpow2.f32 %v7036_v0  ;;  %11259 = vmatpush3.bf16.msra.mxu1 %v14286_v11  ;;  %v9367_v31 = vadd.f32 %v9366_v29, %v9365_v53  ;;  %v16724_v47 = vld [vmem:[#allocation37_spill] sm:$0xff]  ;;  %11265 = vmatprep.subr.bf16.mxu0 %v14041_v19  ;;  %v12189_v27 = vld [vmem:[%s12296_s30 + $0x110] sm:$0xf] }
 0x33b   : > { %11983 = vpow2.f32 %v7038_v6  ;;  %v3929_v23 = vmul.f32 %v12186_v52, %v16724_v47  ;;  %10480 = vmatprep.subr.mxu1 %v16570_v50  ;;  %v12187_v6 = vld [vmem:[%s12296_s30 + $0xf0] sm:$0xff]  ;;  %v16725_v39 = vld [vmem:[#allocation33_spill] sm:$0xff] }
 0x33c   : > { %v15428_v59 = vadd.f32 %v9367_v31, %v4335_v5  ;;  %v9368_v0 = vpop.f32.mrb[58].mxu1  ;;  %v3928_v62 = vmul.f32 %v12187_v6, %v16725_v39  ;;  %10475 = vmatmul.mubr.msk.f32.gmra.mrb[116].mxu0 %vm380_vm0, %v3930_v3  ;;  %v12188_v58 = vld [vmem:[%s12296_s30 + $0x118] sm:$0xf]  ;;  %v16728_v3 = vld [vmem:[#allocation43_spill] sm:$0xff]  ;;  %11985 = vrcp.f32 %v15341_v26 }
 0x33d   : > { %5939 = vmatmul.mubr.f32.vlgmr.msra.gmra.mrb[114].mxu1 %v3925_v48  ;;  %v9369_v53 = vpop.f32.mrb[59].mxu1  ;;  %v16726_v29 = vld [vmem:[#allocation41_spill] sm:$0xff]  ;;  %11267 = vmatpush3.bf16.msra.mxu0 %v14074_v32  ;;  %v12190_v48 = vld [vmem:[%s12296_s30 + $0x128] sm:$0xff]  ;;  %11987 = vrcp.f32 %v15357_v9 }
 0x33e   : > { %v3933_v44 = vmul.f32 %v12188_v58, %v16726_v29  ;;  %5943 = vmatprep.mubr.f32.mxu1 %v3929_v23  ;;  %v9370_v5 = vadd.f32 %v9369_v53, %v9368_v0  ;;  %v16727_v31 = vld [vmem:[#allocation29_spill] sm:$0xff]  ;;  %10481 = vmatpush3.msk.msra.mxu1 %vm390_vm1, %v15166_v20  ;;  %v3935_v6 = vmul.f32 %v12190_v48, %v16728_v3  ;;  %v12191_v29 = vld [vmem:[%s12296_s30 + $0x108] sm:$0xf]  ;;  %11989 = vrcp.f32 %v15386_v54 }
 0x33f   : > { %v3932_v52 = vmul.f32 %v12189_v27, %v16727_v31  ;;  %11269 = vmatprep.subr.bf16.mxu0 %v14096_v55  ;;  %10477 = vmatprep.mubr.msk.f32.mxu0 %vm12237_vm6, %v16570_v50  ;;  %v16731_v27 = vld [vmem:[#allocation39_spill] sm:$0xff]  ;;  %11991 = vrcp.f32 %v15415_v13 }
 0x340   : > { %v15440_v47 = vpop.eup %11973  ;;  %v15449_v23 = vadd.f32 %v9370_v5, %v4340_v41  ;;  %v4499_v58 = vpop.f32.mrb[60].mxu1  ;;  %11293 = vmatprep.subr.bf16.mxu1 %v14012_v34  ;;  %v3931_v31 = vmul.f32 %v12191_v29, %v16731_v27  ;;  %10478 = vmatmul.mubr.msk.f32.gmra.mrb[118].mxu0 %vm380_vm0, %v3933_v44  ;;  %v12192_v29 = vld [vmem:[%s12296_s30 + $0x130] sm:$0xff]  ;;  %v16737_v27 = vld [vmem:[#allocation45_spill] sm:$0xff]  ;;  %11993 = vrcp.f32 %v15428_v59 }
 0x341   : > { %v15447_v39 = vpop.eup %11975  ;;  %v15456_v0 = vmul.f32 %v15440_v47, %v15179_v46  ;;  %5944 = vmatmul.mubr.f32.gmra.mrb[116].mxu1 %v3928_v62  ;;  %v10374_v48 = vpop.f32.mrb[61].mxu1  ;;  %11271 = vmatpush3.bf16.msra.mxu0 %v14112_v10 }
 0x342   : > { %16729 = vst [vmem:[#allocation22_spill] sm:$0xff] %v15449_v23  ;;  %v15458_v53 = vpop.eup %11977  ;;  %v15465_v41 = vmul.f32 %v15447_v39, %v15200_v17  ;;  %5948 = vmatprep.mubr.f32.mxu1 %v3932_v52  ;;  %11273 = vmatprep.subr.bf16.mxu0 %v14128_v42  ;;  %v3936_v48 = vmul.f32 %v12192_v29, %v16737_v27  ;;  %v16739_v29 = vld [vmem:[#allocation6_spill] sm:$0xff] }
 0x343   : > { %16730 = vst [vmem:[#allocation55_spill] sm:$0xff] %v15456_v0  ;;  %v15467_v5 = vpop.eup %11979  ;;  %v15471_v46 = vmul.f32 %v15458_v53, %v15214_v63  ;;  %6107 = vmatprep.mubr.f32.mxu0 %v3935_v6  ;;  %v16746_v0 = vld [vmem:[#allocation12_spill] sm:$0xff] }
 0x344   : > { %16732 = vst [vmem:[#allocation30_spill] sm:$0xff] %v15465_v41  ;;  %v15474_v62 = vpop.eup %11981  ;;  %v15479_v44 = vmul.f32 %v15467_v5, %v15206_v1  ;;  %v4504_v3 = vpop.f32.mrb[62].mxu1  ;;  %v12196_v41 = vld [vmem:[%s12296_s30 + $0x120] sm:$0xff] }
 0x345   : > { %16733 = vst [vmem:[#allocation35_spill] sm:$0xff] %v15471_v46  ;;  %v15481_v17 = vpop.eup %11983  ;;  %v15485_v63 = vmul.f32 %v15474_v62, %v15220_v24  ;;  %5949 = vmatmul.mubr.f32.gmra.mrb[118].mxu1 %v3931_v31  ;;  %v10377_v6 = vpop.f32.mrb[63].mxu1  ;;  %11275 = vmatpush3.bf16.msra.mxu0 %v14165_v57  ;;  %v12193_v24 = vld [vmem:[%s12296_s30 + $0x148] sm:$0xff]  ;;  %v16738_v46 = vld [vmem:[#allocation49_spill] sm:$0xff]  ;;  %v12194_v31 = vld [vmem:[%s12296_s30 + $0x160] sm:$0xf] }
 0x346   : > { %16734 = vst [vmem:[#allocation38_spill] sm:$0xff] %v15479_v44  ;;  %v15489_v52 = vmul.f32 %v15481_v17, %v15257_v49  ;;  %10482 = vmatprep.mubr.msk.f32.mxu1 %vm12237_vm6, %v16570_v50  ;;  %11277 = vmatprep.subr.bf16.mxu0 %v14171_v33  ;;  %v3939_v49 = vmul.f32 %v12193_v24, %v16738_v46  ;;  %v16740_v6 = vld [vmem:[#allocation5_spill] sm:$0xff] }
 0x347   : > { %16735 = vst [vmem:[#allocation57_spill] sm:$0xff] %v15485_v63  ;;  %v3942_v27 = vmul.f32 %v12194_v31, %v16739_v29 }
 0x348   : > { %16736 = vst [vmem:[#allocation58_spill] sm:$0xff] %v15489_v52  ;;  %v4509_v1 = vpop.f32.mrb[64].mxu1 }
 0x349   : > { %10483 = vmatmul.mubr.msk.f32.vlgmr.msra.gmra.mrb[120].mxu1 %vm380_vm0, %v3936_v48  ;;  %v10380_v52 = vpop.f32.mrb[65].mxu1  ;;  %11279 = vmatpush3.bf16.msra.mxu0 %v14196_v15  ;;  %v12195_v48 = vld [vmem:[%s12296_s30 + $0x170] sm:$0xff]  ;;  %v16791_v59 = vld [vmem:[#allocation22_spill] sm:$0xff] }
 0x34a   : > { %11295 = vmatpush3.bf16.msra.mxu1 %v14036_v36  ;;  %11281 = vmatprep.subr.bf16.mxu0 %v14205_v40  ;;  %v3944_v24 = vmul.f32 %v12195_v48, %v16740_v6  ;;  %v16742_v48 = vld [vmem:[#allocation50_spill] sm:$0xff]  ;;  %11995 = vrcp.f32 %v16791_v59 }
 0x34b   : > { %11297 = vmatprep.subr.bf16.mxu1 %v14041_v19  ;;  %10485 = vmatprep.mubr.msk.f32.mxu1 %vm12237_vm6, %v16570_v50  ;;  %v3934_v6 = vmul.f32 %v12196_v41, %v16742_v48  ;;  %v12198_v41 = vld [vmem:[%s12296_s30 + $0x138] sm:$0xff] }
 0x34d   : > { %10486 = vmatmul.mubr.msk.f32.gmra.mrb[122].mxu1 %vm380_vm0, %v3939_v49  ;;  %11283 = vmatpush3.bf16.msra.mxu0 %v14226_v8 }
 0x34e   : > { %11299 = vmatpush3.bf16.msra.mxu1 %v14074_v32  ;;  %11285 = vmatprep.subr.bf16.mxu0 %v14234_v45 }
 0x34f   : > { %11301 = vmatprep.subr.bf16.mxu1 %v14096_v55  ;;  %v9407_v46 = vpop.f32.mrb[60].mxu0  ;;  %10488 = vmatprep.mubr.msk.f32.mxu1 %vm12237_vm6, %v16570_v50  ;;  %v16803_v59 = vld [vmem:[#allocation58_spill] sm:$0xff] }
 0x350   : > { %v9408_v52 = vpop.f32.mrb[61].mxu0 }
 0x351   : > { %v9409_v49 = vadd.f32 %v9408_v52, %v9407_v46  ;;  %10489 = vmatmul.mubr.msk.f32.gmra.mrb[124].mxu1 %vm380_vm0, %v3942_v27  ;;  %11287 = vmatpush3.bf16.msra.mxu0 %v14255_v30  ;;  %v12197_v27 = vld [vmem:[%s12296_s30 + $0x140] sm:$0xff] }
 0x352   : > { %11303 = vmatpush3.bf16.msra.mxu1 %v14112_v10  ;;  %11289 = vmatprep.subr.bf16.mxu0 %v14265_v22  ;;  %v16743_v52 = vld [vmem:[#allocation2_spill] sm:$0xff] }
 0x353   : > { %11305 = vmatprep.subr.bf16.mxu1 %v14128_v42  ;;  %v15522_v31 = vadd.f32 %v9409_v49, %v4499_v58  ;;  %v9410_v29 = vpop.f32.mrb[62].mxu0  ;;  %6276 = vmatprep.mubr.f32.mxu1 %v3944_v24  ;;  %v3938_v44 = vmul.f32 %v12197_v27, %v16743_v52  ;;  %v12200_v52 = vld [vmem:[%s12296_s30 + $0x150] sm:$0xf] }
 0x354   : > { %v9411_v63 = vpop.f32.mrb[63].mxu0 }
 0x355   : > { %16741 = vst [vmem:[#allocation64_spill] sm:$0xff] %v15522_v31  ;;  %v9412_v46 = vadd.f32 %v9411_v63, %v9410_v29  ;;  %11291 = vmatpush3.bf16.msra.mxu0 %v14286_v11  ;;  %v16745_v63 = vld [vmem:[#allocation7_spill] sm:$0xff]  ;;  %v12199_v31 = vld [vmem:[%s12296_s30 + $0x158] sm:$0xf] }
 0x356   : > { %11307 = vmatpush3.bf16.msra.mxu1 %v14165_v57  ;;  %10491 = vmatprep.subr.mxu0 %v16570_v50  ;;  %v3937_v29 = vmul.f32 %v12198_v41, %v16745_v63  ;;  %v3941_v27 = vmul.f32 %v12199_v31, %v16746_v0  ;;  %v12201_v41 = vld [vmem:[%s12296_s30 + $0x178] sm:$0xff] }
 0x357   : > { %11309 = vmatprep.subr.bf16.mxu1 %v14171_v33  ;;  %v15531_v58 = vadd.f32 %v9412_v46, %v4504_v3  ;;  %v9413_v49 = vpop.f32.mrb[64].mxu0  ;;  %v16749_v63 = vld [vmem:[#allocation9_spill] sm:$0xff] }
 0x358   : > { %v9414_v24 = vpop.f32.mrb[65].mxu0  ;;  %6108 = vmatmul.mubr.f32.vlgmr.msra.gmra.mrb[120].mxu0 %v3934_v6 }
 0x359   : > { %16744 = vst [vmem:[#allocation66_spill] sm:$0xff] %v15531_v58  ;;  %v9415_v48 = vadd.f32 %v9414_v24, %v9413_v49  ;;  %6112 = vmatprep.mubr.f32.mxu0 %v3938_v44  ;;  %10492 = vmatpush3.msk.msra.mxu0 %vm390_vm1, %v15166_v20  ;;  %v16748_v49 = vld [vmem:[#allocation4_spill] sm:$0xff] }
 0x35a   : > { %11311 = vmatpush3.bf16.msra.mxu1 %v14196_v15  ;;  %11325 = vmatprep.subr.bf16.mxu0 %v14012_v34  ;;  %v3940_v24 = vmul.f32 %v12200_v52, %v16748_v49 }
 0x35b   : > { %11313 = vmatprep.subr.bf16.mxu1 %v14205_v40  ;;  %v15542_v3 = vadd.f32 %v9415_v48, %v4509_v1  ;;  %v4668_v46 = vpop.f32.mrb[66].mxu0  ;;  %v3945_v48 = vmul.f32 %v12201_v41, %v16749_v63 }
 0x35c   : > { %v10385_v6 = vpop.f32.mrb[67].mxu0  ;;  %6113 = vmatmul.mubr.f32.gmra.mrb[122].mxu0 %v3937_v29 }
 0x35d   : > { %16747 = vst [vmem:[#allocation65_spill] sm:$0xff] %v15542_v3  ;;  %6117 = vmatprep.mubr.f32.mxu0 %v3941_v27  ;;  %v12203_v3 = vld [vmem:[%s12296_s30 + $0x190] sm:$0xff] }
 0x35e   : > { %11315 = vmatpush3.bf16.msra.mxu1 %v14226_v8 }
 0x35f   : > { %11317 = vmatprep.subr.bf16.mxu1 %v14234_v45  ;;  %v4673_v0 = vpop.f32.mrb[68].mxu0 }
 0x360   : > { %v9452_v44 = vpop.f32.mrb[66].mxu1  ;;  %v10388_v31 = vpop.f32.mrb[69].mxu0  ;;  %6118 = vmatmul.mubr.f32.gmra.mrb[124].mxu0 %v3940_v24  ;;  %v12202_v24 = vld [vmem:[%s12296_s30 + $0x168] sm:$0xff] }
 0x361   : > { %v9453_v1 = vpop.f32.mrb[67].mxu1  ;;  %10493 = vmatprep.mubr.msk.f32.mxu0 %vm12237_vm6, %v16570_v50  ;;  %v16751_v31 = vld [vmem:[#allocation13_spill] sm:$0xff] }
 0x362   : > { %11319 = vmatpush3.bf16.msra.mxu1 %v14255_v30  ;;  %v9454_v29 = vadd.f32 %v9453_v1, %v9452_v44  ;;  %v3943_v41 = vmul.f32 %v12202_v24, %v16751_v31  ;;  %v16752_v44 = vld [vmem:[#allocation8_spill] sm:$0xff]  ;;  %v16755_v24 = vld [vmem:[#allocation11_spill] sm:$0xff] }
 0x363   : > { %11321 = vmatprep.subr.bf16.mxu1 %v14265_v22  ;;  %v4678_v27 = vpop.f32.mrb[70].mxu0  ;;  %v3948_v1 = vmul.f32 %v12203_v3, %v16752_v44  ;;  %v12205_v3 = vld [vmem:[%s12296_s30 + $0x180] sm:$0xff]  ;;  %v16756_v44 = vld [vmem:[#allocation19_spill] sm:$0xff] }
 0x364   : > { %v15555_v6 = vadd.f32 %v9454_v29, %v4668_v46  ;;  %v9455_v52 = vpop.f32.mrb[68].mxu1  ;;  %v10391_v49 = vpop.f32.mrb[71].mxu0  ;;  %10494 = vmatmul.mubr.msk.f32.vlgmr.msra.gmra.mrb[126].mxu0 %vm380_vm0, %v3945_v48  ;;  %v12204_v46 = vld [vmem:[%s12296_s30 + $0x188] sm:$0xff]  ;;  %v16753_v29 = vld [vmem:[#allocation10_spill] sm:$0xff]  ;;  %v3946_v31 = vmul.f32 %v12205_v3, %v16755_v24 }
 0x365   : > { %v9456_v63 = vpop.f32.mrb[69].mxu1  ;;  %11327 = vmatpush3.bf16.msra.mxu0 %v14036_v36  ;;  %10496 = vmatprep.mubr.msk.f32.mxu0 %vm12237_vm6, %v16570_v50  ;;  %v16758_v3 = vld [vmem:[#allocation18_spill] sm:$0xff] }
 0x366   : > { %16750 = vst [vmem:[#allocation51_spill] sm:$0xff] %v15555_v6  ;;  %11323 = vmatpush3.bf16.msra.mxu1 %v14286_v11  ;;  %v9457_v58 = vadd.f32 %v9456_v63, %v9455_v52  ;;  %v3947_v6 = vmul.f32 %v12204_v46, %v16753_v29  ;;  %11329 = vmatprep.subr.bf16.mxu0 %v14041_v19  ;;  %v12206_v63 = vld [vmem:[%s12296_s30 + $0x1a8] sm:$0xf] }
 0x367   : > { %10502 = vmatprep.subr.mxu1 %v16570_v50  ;;  %v3951_v46 = vmul.f32 %v12206_v63, %v16756_v44  ;;  %v16757_v29 = vld [vmem:[#allocation23_spill] sm:$0xff]  ;;  %v12210_v44 = vld [vmem:[%s12296_s30 + $0x1c0] sm:$0xff] }
 0x368   : > { %v15568_v48 = vadd.f32 %v9457_v58, %v4673_v0  ;;  %v9458_v49 = vpop.f32.mrb[70].mxu1  ;;  %10497 = vmatmul.mubr.msk.f32.gmra.mrb[128].mxu0 %vm380_vm0, %v3948_v1  ;;  %v12207_v0 = vld [vmem:[%s12296_s30 + $0x1a0] sm:$0xf] }
 0x369   : > { %6277 = vmatmul.mubr.f32.vlgmr.msra.gmra.mrb[126].mxu1 %v3943_v41  ;;  %v9459_v52 = vpop.f32.mrb[71].mxu1  ;;  %11331 = vmatpush3.bf16.msra.mxu0 %v14074_v32  ;;  %v12208_v41 = vld [vmem:[%s12296_s30 + $0x1b8] sm:$0xff] }
 0x36a   : > { %16754 = vst [vmem:[#allocation63_spill] sm:$0xff] %v15568_v48  ;;  %6281 = vmatprep.mubr.f32.mxu1 %v3947_v6  ;;  %v9460_v58 = vadd.f32 %v9459_v52, %v9458_v49  ;;  %v3950_v48 = vmul.f32 %v12207_v0, %v16757_v29  ;;  %10503 = vmatpush3.msk.msra.mxu1 %vm390_vm1, %v15166_v20  ;;  %v12209_v6 = vld [vmem:[%s12296_s30 + $0x198] sm:$0xf] }
 0x36b   : > { %11333 = vmatprep.subr.bf16.mxu0 %v14096_v55  ;;  %v3953_v24 = vmul.f32 %v12208_v41, %v16758_v3  ;;  %10499 = vmatprep.mubr.msk.f32.mxu0 %vm12237_vm6, %v16570_v50  ;;  %v16759_v49 = vld [vmem:[#allocation25_spill] sm:$0xff]  ;;  %v12212_v3 = vld [vmem:[%s12296_s30 + $0x1f0] sm:$0xf] }
 0x36c   : > { %v15585_v1 = vadd.f32 %v9460_v58, %v4678_v27  ;;  %v4837_v23 = vpop.f32.mrb[72].mxu1  ;;  %11357 = vmatprep.subr.bf16.mxu1 %v14012_v34  ;;  %v3949_v52 = vmul.f32 %v12209_v6, %v16759_v49  ;;  %10500 = vmatmul.mubr.msk.f32.gmra.mrb[130].mxu0 %vm380_vm0, %v3951_v46  ;;  %v16760_v58 = vld [vmem:[#allocation24_spill] sm:$0xff]  ;;  %v16761_v46 = vld [vmem:[#allocation26_spill] sm:$0xff] }
 0x36d   : > { %6282 = vmatmul.mubr.f32.gmra.mrb[128].mxu1 %v3946_v31  ;;  %v10396_v63 = vpop.f32.mrb[73].mxu1  ;;  %11335 = vmatpush3.bf16.msra.mxu0 %v14112_v10  ;;  %v3954_v0 = vmul.f32 %v12210_v44, %v16760_v58  ;;  %v12211_v31 = vld [vmem:[%s12296_s30 + $0x1d8] sm:$0xff]  ;;  %v12213_v49 = vld [vmem:[%s12296_s30 + $0x200] sm:$0xff] }
 0x36e   : > { %6286 = vmatprep.mubr.f32.mxu1 %v3950_v48  ;;  %11337 = vmatprep.subr.bf16.mxu0 %v14128_v42  ;;  %v3957_v29 = vmul.f32 %v12211_v31, %v16761_v46 }
 0x36f   : > { %6445 = vmatprep.mubr.f32.mxu0 %v3953_v24  ;;  %v16762_v24 = vld [vmem:[#allocation40_spill] sm:$0xff] }
 0x370   : > { %v4842_v27 = vpop.f32.mrb[74].mxu1  ;;  %v3960_v6 = vmul.f32 %v12212_v3, %v16762_v24  ;;  %v12216_v24 = vld [vmem:[%s12296_s30 + $0x1c8] sm:$0xff] }
 0x371   : > { %6287 = vmatmul.mubr.f32.gmra.mrb[130].mxu1 %v3949_v52  ;;  %v10399_v34 = vpop.f32.mrb[75].mxu1  ;;  %11339 = vmatpush3.bf16.msra.mxu0 %v14165_v57  ;;  %v16763_v52 = vld [vmem:[#allocation47_spill] sm:$0xff] }
 0x372   : > { %10504 = vmatprep.mubr.msk.f32.mxu1 %vm12237_vm6, %v16570_v50  ;;  %11341 = vmatprep.subr.bf16.mxu0 %v14171_v33  ;;  %v3962_v63 = vmul.f32 %v12213_v49, %v16763_v52  ;;  %v16764_v34 = vld [vmem:[#allocation42_spill] sm:$0xff]  ;;  %v16767_v49 = vld [vmem:[#allocation44_spill] sm:$0xff] }
 0x374   : > { %v4847_v48 = vpop.f32.mrb[76].mxu1 }
 0x375   : > { %10505 = vmatmul.mubr.msk.f32.vlgmr.msra.gmra.mrb[132].mxu1 %vm380_vm0, %v3954_v0  ;;  %v10402_v41 = vpop.f32.mrb[77].mxu1  ;;  %11343 = vmatpush3.bf16.msra.mxu0 %v14196_v15  ;;  %v12214_v0 = vld [vmem:[%s12296_s30 + $0x1b0] sm:$0xff] }
 0x376   : > { %11359 = vmatpush3.bf16.msra.mxu1 %v14036_v36  ;;  %11345 = vmatprep.subr.bf16.mxu0 %v14205_v40  ;;  %v3952_v31 = vmul.f32 %v12214_v0, %v16764_v34 }
 0x377   : > { %11361 = vmatprep.subr.bf16.mxu1 %v14041_v19  ;;  %10507 = vmatprep.mubr.msk.f32.mxu1 %vm12237_vm6, %v16570_v50 }
 0x379   : > { %10508 = vmatmul.mubr.msk.f32.gmra.mrb[134].mxu1 %vm380_vm0, %v3957_v29  ;;  %11347 = vmatpush3.bf16.msra.mxu0 %v14226_v8  ;;  %v16765_v29 = vld [vmem:[#allocation48_spill] sm:$0xff] }
 0x37a   : > { %11363 = vmatpush3.bf16.msra.mxu1 %v14074_v32  ;;  %11349 = vmatprep.subr.bf16.mxu0 %v14234_v45 }
 0x37b   : > { %11365 = vmatprep.subr.bf16.mxu1 %v14096_v55  ;;  %v9497_v36 = vpop.f32.mrb[72].mxu0  ;;  %10510 = vmatprep.mubr.msk.f32.mxu1 %vm12237_vm6, %v16570_v50 }
 0x37c   : > { %v9498_v19 = vpop.f32.mrb[73].mxu0 }
 0x37d   : > { %v9499_v44 = vadd.f32 %v9498_v19, %v9497_v36  ;;  %10511 = vmatmul.mubr.msk.f32.gmra.mrb[136].mxu1 %vm380_vm0, %v3960_v6  ;;  %11351 = vmatpush3.bf16.msra.mxu0 %v14255_v30  ;;  %v16766_v6 = vld [vmem:[#allocation46_spill] sm:$0xff] }
 0x37e   : > { %11367 = vmatpush3.bf16.msra.mxu1 %v14112_v10  ;;  %11353 = vmatprep.subr.bf16.mxu0 %v14265_v22  ;;  %v12215_v10 = vld [vmem:[%s12296_s30 + $0x1d0] sm:$0xff]  ;;  %v3955_v36 = vmul.f32 %v12216_v24, %v16766_v6  ;;  %v12220_v6 = vld [vmem:[%s12296_s30 + $0x1f8] sm:$0xff] }
 0x37f   : > { %11369 = vmatprep.subr.bf16.mxu1 %v14128_v42  ;;  %v15626_v32 = vadd.f32 %v9499_v44, %v4837_v23  ;;  %v9500_v55 = vpop.f32.mrb[74].mxu0  ;;  %6614 = vmatprep.mubr.f32.mxu1 %v3962_v63  ;;  %v3956_v42 = vmul.f32 %v12215_v10, %v16765_v29  ;;  %v16768_v44 = vmov 0.0|0.0  }
 0x380   : > { %v9501_v58 = vpop.f32.mrb[75].mxu0 }
 0x381   : > { %v9502_v46 = vadd.f32 %v9501_v58, %v9500_v55  ;;  %11355 = vmatpush3.bf16.msra.mxu0 %v14286_v11  ;;  %v12218_v55 = vld [vmem:[%s12296_s30 + $0x1e0] sm:$0xf]  ;;  %v16769_v58 = vld [vmem:[#allocation80_spill] sm:$0xff] }
 0x382   : > { %11371 = vmatpush3.bf16.msra.mxu1 %v14165_v57  ;;  %10513 = vmatprep.subr.mxu0 %v16570_v50  ;;  %v12217_v57 = vld [vmem:[%s12296_s30 + $0x1e8] sm:$0xf] }
 0x383   : > { %11373 = vmatprep.subr.bf16.mxu1 %v14171_v33  ;;  %v15635_v23 = vadd.f32 %v9502_v46, %v4842_v27  ;;  %v9503_v41 = vpop.f32.mrb[76].mxu0  ;;  %v3959_v52 = vmul.f32 %v12217_v57, %v16767_v49  ;;  %v12219_v46 = vld [vmem:[%s12296_s30 + $0x208] sm:$0xff]  ;;  %v12221_v57 = vld [vmem:[%s12296_s30 + $0x220] sm:$0xff]  ;;  %v16772_v49 = vld [vmem:[#allocation93_spill] sm:$0xff] }
 0x384   : > { %v9504_v3 = vpop.f32.mrb[77].mxu0  ;;  %6446 = vmatmul.mubr.f32.vlgmr.msra.gmra.mrb[132].mxu0 %v3952_v31 }
 0x385   : > { %v9505_v19 = vadd.f32 %v9504_v3, %v9503_v41  ;;  %6450 = vmatprep.mubr.f32.mxu0 %v3956_v42  ;;  %10514 = vmatpush3.msk.msra.mxu0 %vm390_vm1, %v15166_v20  ;;  %v7064_v20 = vld [vmem:[%s16163_s3] sm:$0xff] }
 0x386   : > { %11375 = vmatpush3.bf16.msra.mxu1 %v14196_v15  ;;  %11388 = vmatprep.subr.bf16.mxu0 %v16768_v44  ;;  %v3958_v15 = vmul.f32 %v12218_v55, %v16769_v58 }
 0x387   : > { %11377 = vmatprep.subr.bf16.mxu1 %v14205_v40  ;;  %v15646_v33 = vadd.f32 %v9505_v19, %v4847_v48  ;;  %v5006_v27 = vpop.f32.mrb[78].mxu0  ;;  %v7065_v48 = vld [vmem:[%s16163_s3 + $0x8] sm:$0xff] }
 0x388   : > { %v10407_v63 = vpop.f32.mrb[79].mxu0  ;;  %6451 = vmatmul.mubr.f32.gmra.mrb[134].mxu0 %v3955_v36  ;;  %v15665_v29 = vpack.c.bf16 %v7065_v48, %v7064_v20  ;;  %v16771_v36 = vld [vmem:[#allocation92_spill] sm:$0xff]  ;;  %v16774_v20 = vld [vmem:[#allocation74_spill] sm:$0xff] }
 0x389   : > { %6455 = vmatprep.mubr.f32.mxu0 %v3959_v52  ;;  %v3961_v19 = vmul.f32 %v12220_v6, %v16771_v36  ;;  %v3966_v52 = vmul.f32 %v12221_v57, %v16772_v49  ;;  %v16773_v63 = vld [vmem:[#allocation72_spill] sm:$0xff]  ;;  %v12226_v36 = vld [vmem:[%s12296_s30 + $0x228] sm:$0xf]  ;;  %v16778_v49 = vld [vmem:[#allocation81_spill] sm:$0xff] }
 0x38a   : > { %11379 = vmatpush3.bf16.msra.mxu1 %v14226_v8  ;;  %v16770_v8 = vld [vmem:[#allocation36_spill] sm:$0xff] }
 0x38b   : > { %11381 = vmatprep.subr.bf16.mxu1 %v14234_v45  ;;  %v5011_v40 = vpop.f32.mrb[80].mxu0  ;;  %v3963_v10 = vmul.f32 %v12219_v46, %v16770_v8  ;;  %v16775_v46 = vld [vmem:[#allocation76_spill] sm:$0xff] }
 0x38c   : > { %v9542_v0 = vpop.f32.mrb[78].mxu1  ;;  %v10410_v34 = vpop.f32.mrb[81].mxu0  ;;  %6456 = vmatmul.mubr.f32.gmra.mrb[136].mxu0 %v3958_v15 }
 0x38d   : > { %v9543_v31 = vpop.f32.mrb[79].mxu1  ;;  %10515 = vmatprep.mubr.msk.f32.mxu0 %vm12237_vm6, %v16570_v50 }
 0x38e   : > { %11383 = vmatpush3.bf16.msra.mxu1 %v14255_v30  ;;  %v9544_v45 = vadd.f32 %v9543_v31, %v9542_v0  ;;  %v12223_v0 = vld [vmem:[%s12296_s30 + $0x210] sm:$0xff]  ;;  %v12224_v31 = vld [vmem:[%s12296_s30 + $0x238] sm:$0xf] }
 0x38f   : > { %11385 = vmatprep.subr.bf16.mxu1 %v14265_v22  ;;  %v5016_v42 = vpop.f32.mrb[82].mxu0  ;;  %v3964_v48 = vmul.f32 %v12223_v0, %v16774_v20  ;;  %v16782_v0 = vld [vmem:[#allocation84_spill] sm:$0xff] }
 0x390   : > { %v15667_v41 = vadd.f32 %v9544_v45, %v5006_v27  ;;  %v9545_v3 = vpop.f32.mrb[80].mxu1  ;;  %v10413_v24 = vpop.f32.mrb[83].mxu0  ;;  %10516 = vmatmul.mubr.msk.f32.vlgmr.msra.gmra.mrb[138].mxu0 %vm380_vm0, %v3963_v10  ;;  %v12222_v27 = vld [vmem:[%s12296_s30 + $0x218] sm:$0xff]  ;;  %v12225_v10 = vld [vmem:[%s12296_s30 + $0x230] sm:$0xf] }
 0x391   : > { %v9546_v30 = vpop.f32.mrb[81].mxu1  ;;  %10518 = vmatprep.mubr.msk.f32.mxu0 %vm12237_vm6, %v16570_v50  ;;  %v3965_v55 = vmul.f32 %v12222_v27, %v16773_v63  ;;  %11390 = vmatpush3.bf16.msra.mxu0 %v15665_v29  ;;  %v16776_v45 = vld [vmem:[#allocation21_spill] sm:$0xff]  ;;  %v16779_v27 = vld [vmem:[#allocation86_spill] sm:$0xff] }
 0x392   : > { %11387 = vmatpush3.bf16.msra.mxu1 %v14286_v11  ;;  %v9547_v22 = vadd.f32 %v9546_v30, %v9545_v3  ;;  %10528 = vmatprep.subr.mxu0 %v16570_v50  ;;  %v15687_v11 = vld [vmem:[%s16163_s3 + $0x10] sm:$0xf]  ;;  %v3968_v3 = vmul.f32 %v12225_v10, %v16776_v45  ;;  %v16780_v63 = vld [vmem:[#allocation82_spill] sm:$0xff] }
 0x393   : > { %11391 = vmatprep.subr.bf16.mxu1 %v16768_v44 }
 0x394   : > { %v15681_v58 = vadd.f32 %v9547_v22, %v5011_v40  ;;  %v9548_v15 = vpop.f32.mrb[82].mxu1  ;;  %10519 = vmatmul.mubr.msk.f32.gmra.mrb[140].mxu0 %vm380_vm0, %v3966_v52  ;;  %v3969_v40 = vmul.f32 %v12224_v31, %v16775_v46 }
 0x395   : > { %6615 = vmatmul.mubr.f32.vlgmr.msra.gmra.mrb[138].mxu1 %v3961_v19  ;;  %v9549_v34 = vpop.f32.mrb[83].mxu1  ;;  %10521 = vmatprep.mubr.msk.f32.mxu0 %vm12237_vm6, %v16570_v50  ;;  %v16777_v19 = vld [vmem:[#allocation52_spill] sm:$0xff] }
 0x396   : > { %6619 = vmatprep.mubr.f32.mxu1 %v3965_v55  ;;  %11393 = vmatpush3.bf16.msra.mxu1 %v15665_v29  ;;  %v9550_v8 = vadd.f32 %v9549_v34, %v9548_v15  ;;  %v3967_v30 = vmul.f32 %v12226_v36, %v16777_v19  ;;  %v16781_v15 = vld [vmem:[#allocation88_spill] sm:$0xff] }
 0x397   : > { %10529 = vmatpush3.msk.msra.mxu0 %vm390_vm1, %v15687_v11  ;;  %10543 = vmatprep.subr.mxu1 %v16570_v50 }
 0x398   : > { %v15701_v24 = vadd.f32 %v9550_v8, %v5016_v42  ;;  %v5175_v6 = vpop.f32.mrb[84].mxu1  ;;  %11394 = vmatprep.subr.bf16.mxu0 %v16768_v44  ;;  %10522 = vmatmul.mubr.msk.f32.gmra.mrb[142].mxu0 %vm380_vm0, %v3969_v40  ;;  %vm8651_vm0 = vcmask 1044484  }
 0x399   : > { %6620 = vmatmul.mubr.f32.gmra.mrb[140].mxu1 %v3964_v48  ;;  %v10418_v57 = vpop.f32.mrb[85].mxu1  ;;  %10530 = vmatprep.mubr.msk.f32.mxu0 %vm12237_vm6, %v16570_v50  ;;  %v16783_v48 = vld [vmem:[#allocation68_spill] sm:$0xff] }
 0x39a   : > { %6624 = vmatprep.mubr.f32.mxu1 %v3968_v3  ;;  %10544 = vmatpush3.msk.msra.mxu1 %vm390_vm1, %v15687_v11 }
 0x39b   : > { %11397 = vmatprep.subr.bf16.mxu1 %v16768_v44 }
 0x39c   : > { %v5180_v42 = vpop.f32.mrb[86].mxu1  ;;  %10531 = vmatmul.mubr.msk.f32.vlgmr.msra.gmra.mrb[144].mxu0 %vm2343_vm3, %v16778_v49 }
 0x39d   : > { %6625 = vmatmul.mubr.f32.gmra.mrb[142].mxu1 %v3967_v30  ;;  %v10421_v52 = vpop.f32.mrb[87].mxu1  ;;  %10533 = vmatprep.mubr.msk.f32.mxu0 %vm12237_vm6, %v16570_v50 }
 0x39e   : > { %10545 = vmatprep.mubr.msk.f32.mxu1 %vm12237_vm6, %v16570_v50  ;;  %11396 = vmatpush3.bf16.msra.mxu0 %v15665_v29 }
 0x39f   : > { %10558 = vmatprep.subr.mxu0 %v16570_v50 }
 0x3a0   : > { %v5185_v22 = vpop.f32.mrb[88].mxu1  ;;  %10534 = vmatmul.mubr.msk.f32.gmra.mrb[146].mxu0 %vm2343_vm3, %v16780_v63 }
 0x3a1   : > { %10546 = vmatmul.mubr.msk.f32.vlgmr.msra.gmra.mrb[144].mxu1 %vm2343_vm3, %v16779_v27  ;;  %v10424_v55 = vpop.f32.mrb[89].mxu1  ;;  %10536 = vmatprep.mubr.msk.f32.mxu0 %vm12237_vm6, %v16570_v50 }
 0x3a2   : > { %10548 = vmatprep.mubr.msk.f32.mxu1 %vm12237_vm6, %v16570_v50  ;;  %11399 = vmatpush3.bf16.msra.mxu1 %v15665_v29  ;;  %v16785_v55 = vld [vmem:[#allocation89_spill] sm:$0xff] }
 0x3a3   : > { %10559 = vmatpush3.msk.msra.mxu0 %vm390_vm1, %v15687_v11  ;;  %10573 = vmatprep.subr.mxu1 %v16570_v50 }
 0x3a4   : > { %11400 = vmatprep.subr.bf16.mxu0 %v16768_v44  ;;  %10537 = vmatmul.mubr.msk.f32.gmra.mrb[148].mxu0 %vm2343_vm3, %v16782_v0  ;;  %v16788_v0 = vld [vmem:[#allocation87_spill] sm:$0xff] }
 0x3a5   : > { %10549 = vmatmul.mubr.msk.f32.gmra.mrb[146].mxu1 %vm2343_vm3, %v16781_v15  ;;  %10560 = vmatprep.mubr.msk.f32.mxu0 %vm12237_vm6, %v16570_v50  ;;  %v16787_v15 = vld [vmem:[#allocation90_spill] sm:$0xff] }
 0x3a6   : > { %10551 = vmatprep.mubr.msk.f32.mxu1 %vm12237_vm6, %v16570_v50  ;;  %10574 = vmatpush3.msk.msra.mxu1 %vm390_vm1, %v15687_v11 }
 0x3a7   : > { %11403 = vmatprep.subr.bf16.mxu1 %v16768_v44  ;;  %v9587_v20 = vpop.f32.mrb[84].mxu0 }
 0x3a8   : > { %10561 = vmatmul.mubr.msk.f32.vlgmr.msra.gmra.mrb[150].mxu0 %vm2343_vm3, %v15253_v18  ;;  %v9588_v34 = vpop.f32.mrb[85].mxu0 }
 0x3a9   : > { %10552 = vmatmul.mubr.msk.f32.gmra.mrb[148].mxu1 %vm2343_vm3, %v16783_v48  ;;  %10563 = vmatprep.mubr.msk.f32.mxu0 %vm12237_vm6, %v16570_v50  ;;  %v9589_v31 = vadd.f32 %v9588_v34, %v9587_v20 }
 0x3aa   : > { %10575 = vmatprep.mubr.msk.f32.mxu1 %vm12237_vm6, %v16570_v50  ;;  %11402 = vmatpush3.bf16.msra.mxu0 %v15665_v29 }
 0x3ab   : > { %v15754_v46 = vadd.f32 %v9589_v31, %v5175_v6  ;;  %v9590_v40 = vpop.f32.mrb[86].mxu0  ;;  %10588 = vmatprep.subr.mxu0 %v16570_v50  ;;  %v11986_v31 = vpop.eup %11985 }
 0x3ac   : > { %10564 = vmatmul.mubr.msk.f32.gmra.mrb[152].mxu0 %vm2343_vm3, %v15266_v16  ;;  %v9591_v18 = vpop.f32.mrb[87].mxu0 }
 0x3ad   : > { %10576 = vmatmul.mubr.msk.f32.vlgmr.msra.gmra.mrb[150].mxu1 %vm2343_vm3, %v15276_v38  ;;  %v9592_v8 = vadd.f32 %v9591_v18, %v9590_v40  ;;  %10566 = vmatprep.mubr.msk.f32.mxu0 %vm12237_vm6, %v16570_v50  ;;  %v16789_v40 = vld [vmem:[#allocation91_spill] sm:$0xff] }
 0x3ae   : > { %10578 = vmatprep.mubr.msk.f32.mxu1 %vm12237_vm6, %v16570_v50  ;;  %11405 = vmatpush3.bf16.msra.mxu1 %v15665_v29 }
 0x3af   : > { %10589 = vmatpush3.msk.msra.mxu0 %vm390_vm1, %v15687_v11  ;;  %v15768_v10 = vadd.f32 %v9592_v8, %v5180_v42  ;;  %10603 = vmatprep.subr.mxu1 %v16570_v50  ;;  %v9593_v38 = vpop.f32.mrb[88].mxu0 }
 0x3b0   : > { %11406 = vmatprep.subr.bf16.mxu0 %v16768_v44  ;;  %10567 = vmatmul.mubr.msk.f32.gmra.mrb[154].mxu0 %vm2343_vm3, %v15263_v60  ;;  %v9594_v16 = vpop.f32.mrb[89].mxu0 }
 0x3b1   : > { %10579 = vmatmul.mubr.msk.f32.gmra.mrb[152].mxu1 %vm2343_vm3, %v15280_v51  ;;  %v9595_v45 = vadd.f32 %v9594_v16, %v9593_v38  ;;  %10590 = vmatprep.mubr.msk.f32.mxu0 %vm12237_vm6, %v16570_v50 }
 0x3b2   : > { %10581 = vmatprep.mubr.msk.f32.mxu1 %vm12237_vm6, %v16570_v50  ;;  %10604 = vmatpush3.msk.msra.mxu1 %vm390_vm1, %v15687_v11 }
 0x3b3   : > { %11409 = vmatprep.subr.bf16.mxu1 %v16768_v44  ;;  %v15783_v3 = vadd.f32 %v9595_v45, %v5185_v22  ;;  %v5344_v6 = vpop.f32.mrb[90].mxu0  ;;  %v11988_v45 = vpop.eup %11987 }
 0x3b4   : > { %10591 = vmatmul.mubr.msk.f32.vlgmr.msra.gmra.mrb[156].mxu0 %vm2343_vm3, %v15354_v12  ;;  %v10429_v60 = vpop.f32.mrb[91].mxu0 }
 0x3b5   : > { %10582 = vmatmul.mubr.msk.f32.gmra.mrb[154].mxu1 %vm2343_vm3, %v15284_v4  ;;  %10593 = vmatprep.mubr.msk.f32.mxu0 %vm12237_vm6, %v16570_v50 }
 0x3b6   : > { %10605 = vmatprep.mubr.msk.f32.mxu1 %vm12237_vm6, %v16570_v50  ;;  %11408 = vmatpush3.bf16.msra.mxu0 %v15665_v29 }
 0x3b7   : > { %10618 = vmatprep.subr.mxu0 %v16570_v50  ;;  %v5349_v36 = vpop.f32.mrb[92].mxu0 }
 0x3b8   : > { %v9632_v51 = vpop.f32.mrb[90].mxu1  ;;  %10594 = vmatmul.mubr.msk.f32.gmra.mrb[158].mxu0 %vm2343_vm3, %v15359_v7  ;;  %v10432_v12 = vpop.f32.mrb[93].mxu0 }
 0x3b9   : > { %10606 = vmatmul.mubr.msk.f32.vlgmr.msra.gmra.mrb[156].mxu1 %vm2343_vm3, %v15376_v37  ;;  %v9633_v4 = vpop.f32.mrb[91].mxu1  ;;  %10596 = vmatprep.mubr.msk.f32.mxu0 %vm12237_vm6, %v16570_v50 }
 0x3ba   : > { %10608 = vmatprep.mubr.msk.f32.mxu1 %vm12237_vm6, %v16570_v50  ;;  %11411 = vmatpush3.bf16.msra.mxu1 %v15665_v29  ;;  %v9634_v19 = vadd.f32 %v9633_v4, %v9632_v51  ;;  %v11990_v4 = vpop.eup %11989 }
 0x3bb   : > { %10619 = vmatpush3.msk.msra.mxu0 %vm390_vm1, %v15687_v11  ;;  %10633 = vmatprep.subr.mxu1 %v16570_v50  ;;  %v5354_v7 = vpop.f32.mrb[94].mxu0 }
 0x3bc   : > { %v15806_v30 = vadd.f32 %v9634_v19, %v5344_v6  ;;  %v9635_v37 = vpop.f32.mrb[92].mxu1  ;;  %11412 = vmatprep.subr.bf16.mxu0 %v16768_v44  ;;  %10597 = vmatmul.mubr.msk.f32.gmra.mrb[160].mxu0 %vm2343_vm3, %v15367_v14  ;;  %v10435_v42 = vpop.f32.mrb[95].mxu0 }
 0x3bd   : > { %10609 = vmatmul.mubr.msk.f32.gmra.mrb[158].mxu1 %vm2343_vm3, %v15388_v56  ;;  %v9636_v57 = vpop.f32.mrb[93].mxu1  ;;  %10620 = vmatprep.mubr.msk.f32.mxu0 %vm12237_vm6, %v16570_v50  ;;  %v16790_v42 = vld [vmem:[#allocation16_spill] sm:$0xff] }
 0x3be   : > { %10611 = vmatprep.mubr.msk.f32.mxu1 %vm12237_vm6, %v16570_v50  ;;  %v9637_v49 = vadd.f32 %v9636_v57, %v9635_v37  ;;  %10634 = vmatpush3.msk.msra.mxu1 %vm390_vm1, %v15687_v11 }
 0x3bf   : > { %11415 = vmatprep.subr.bf16.mxu1 %v16768_v44 }
 0x3c0   : > { %v15821_v52 = vadd.f32 %v9637_v49, %v5349_v36  ;;  %v9638_v56 = vpop.f32.mrb[94].mxu1  ;;  %10621 = vmatmul.mubr.msk.f32.vlgmr.msra.gmra.mrb[162].mxu0 %vm2343_vm3, %v15440_v47 }
 0x3c1   : > { %10612 = vmatmul.mubr.msk.f32.gmra.mrb[160].mxu1 %vm2343_vm3, %v15395_v61  ;;  %v9639_v14 = vpop.f32.mrb[95].mxu1  ;;  %10623 = vmatprep.mubr.msk.f32.mxu0 %vm12237_vm6, %v16570_v50 }
 0x3c2   : > { %10635 = vmatprep.mubr.msk.f32.mxu1 %vm12237_vm6, %v16570_v50  ;;  %v9640_v22 = vadd.f32 %v9639_v14, %v9638_v56  ;;  %11414 = vmatpush3.bf16.msra.mxu0 %v15665_v29 }
 0x3c3   : > { %10648 = vmatprep.subr.mxu0 %v16570_v50 }
 0x3c4   : > { %v15832_v27 = vadd.f32 %v9640_v22, %v5354_v7  ;;  %v5513_v63 = vpop.f32.mrb[96].mxu1  ;;  %10624 = vmatmul.mubr.msk.f32.gmra.mrb[164].mxu0 %vm2343_vm3, %v15447_v39 }
 0x3c5   : > { %10636 = vmatmul.mubr.msk.f32.vlgmr.msra.gmra.mrb[162].mxu1 %vm2343_vm3, %v15467_v5  ;;  %v10440_v61 = vpop.f32.mrb[97].mxu1  ;;  %10626 = vmatprep.mubr.msk.f32.mxu0 %vm12237_vm6, %v16570_v50 }
 0x3c6   : > { %10638 = vmatprep.mubr.msk.f32.mxu1 %vm12237_vm6, %v16570_v50  ;;  %11417 = vmatpush3.bf16.msra.mxu1 %v15665_v29  ;;  %v16792_v61 = vld [vmem:[#allocation17_spill] sm:$0xff] }
 0x3c7   : > { %10649 = vmatpush3.msk.msra.mxu0 %vm390_vm1, %v15687_v11  ;;  %10663 = vmatprep.subr.mxu1 %v16570_v50 }
 0x3c8   : > { %11418 = vmatprep.subr.bf16.mxu0 %v16768_v44  ;;  %v5518_v47 = vpop.f32.mrb[98].mxu1  ;;  %10627 = vmatmul.mubr.msk.f32.gmra.mrb[166].mxu0 %vm2343_vm3, %v15458_v53 }
 0x3c9   : > { %10639 = vmatmul.mubr.msk.f32.gmra.mrb[164].mxu1 %vm2343_vm3, %v15474_v62  ;;  %v10443_v39 = vpop.f32.mrb[99].mxu1  ;;  %10650 = vmatprep.mubr.msk.f32.mxu0 %vm12237_vm6, %v16570_v50  ;;  %v16784_v62 = vld [vmem:[#allocation83_spill] sm:$0xff] }
 0x3ca   : > { %10641 = vmatprep.mubr.msk.f32.mxu1 %vm12237_vm6, %v16570_v50  ;;  %10664 = vmatpush3.msk.msra.mxu1 %vm390_vm1, %v15687_v11  ;;  %v16793_v39 = vld [vmem:[#allocation53_spill] sm:$0xff] }
 0x3cb   : > { %11421 = vmatprep.subr.bf16.mxu1 %v16768_v44 }
 0x3cc   : > { %v5523_v5 = vpop.f32.mrb[100].mxu1  ;;  %10651 = vmatmul.mubr.msk.f32.vlgmr.msra.gmra.mrb[168].mxu0 %vm2343_vm3, %v16784_v62 }
 0x3cd   : > { %10642 = vmatmul.mubr.msk.f32.gmra.mrb[166].mxu1 %vm2343_vm3, %v15481_v17  ;;  %v10446_v53 = vpop.f32.mrb[101].mxu1  ;;  %10653 = vmatprep.mubr.msk.f32.mxu0 %vm12237_vm6, %v16570_v50  ;;  %v16786_v17 = vld [vmem:[#allocation85_spill] sm:$0xff] }
 0x3ce   : > { %10665 = vmatprep.mubr.msk.f32.mxu1 %vm12237_vm6, %v16570_v50  ;;  %11420 = vmatpush3.bf16.msra.mxu0 %v15665_v29 }
 0x3cf   : > { %10678 = vmatprep.subr.mxu0 %v16570_v50 }
 0x3d0   : > { %10654 = vmatmul.mubr.msk.f32.gmra.mrb[170].mxu0 %vm2343_vm3, %v16786_v17 }
 0x3d1   : > { %10666 = vmatmul.mubr.msk.f32.vlgmr.msra.gmra.mrb[168].mxu1 %vm2343_vm3, %v16785_v55  ;;  %10656 = vmatprep.mubr.msk.f32.mxu0 %vm12237_vm6, %v16570_v50 }
 0x3d2   : > { %10668 = vmatprep.mubr.msk.f32.mxu1 %vm12237_vm6, %v16570_v50  ;;  %11423 = vmatpush3.bf16.msra.mxu1 %v15665_v29 }
 0x3d3   : > { %10679 = vmatpush3.msk.msra.mxu0 %vm390_vm1, %v15687_v11  ;;  %10693 = vmatprep.subr.mxu1 %v16570_v50  ;;  %v9677_v26 = vpop.f32.mrb[96].mxu0 }
 0x3d4   : > { %11424 = vmatprep.subr.bf16.mxu0 %v16768_v44  ;;  %10657 = vmatmul.mubr.msk.f32.gmra.mrb[172].mxu0 %vm2343_vm3, %v16788_v0  ;;  %v9678_v20 = vpop.f32.mrb[97].mxu0  ;;  %v16794_v0 = vld [vmem:[#allocation56_spill] sm:$0xff] }
 0x3d5   : > { %10669 = vmatmul.mubr.msk.f32.gmra.mrb[170].mxu1 %vm2343_vm3, %v16787_v15  ;;  %v9679_v9 = vadd.f32 %v9678_v20, %v9677_v26  ;;  %10680 = vmatprep.mubr.msk.f32.mxu0 %vm12237_vm6, %v16570_v50 }
 0x3d6   : > { %10671 = vmatprep.mubr.msk.f32.mxu1 %vm12237_vm6, %v16570_v50  ;;  %10694 = vmatpush3.msk.msra.mxu1 %vm390_vm1, %v15687_v11 }
 0x3d7   : > { %11427 = vmatprep.subr.bf16.mxu1 %v16768_v44  ;;  %v5514_v48 = vadd.f32 %v9679_v9, %v5513_v63  ;;  %v9680_v34 = vpop.f32.mrb[98].mxu0  ;;  %v11992_v63 = vpop.eup %11991  ;;  %v16795_v9 = vld [vmem:[#allocation54_spill] sm:$0xff] }
 0x3d8   : > { %10681 = vmatmul.mubr.msk.f32.vlgmr.msra.gmra.mrb[174].mxu0 %vm2343_vm3, %v15296_v43  ;;  %v9681_v18 = vpop.f32.mrb[99].mxu0  ;;  %v11994_v26 = vpop.eup %11993 }
 0x3d9   : > { %10672 = vmatmul.mubr.msk.f32.gmra.mrb[172].mxu1 %vm2343_vm3, %v16789_v40  ;;  %v6734_v8 = vmul.f32 %v11986_v31, %v5514_v48  ;;  %v9682_v54 = vadd.f32 %v9681_v18, %v9680_v34  ;;  %10683 = vmatprep.mubr.msk.f32.mxu0 %vm12237_vm6, %v16570_v50 }
 0x3da   : > { %10695 = vmatprep.mubr.msk.f32.mxu1 %vm12237_vm6, %v16570_v50  ;;  %11426 = vmatpush3.bf16.msra.mxu0 %v15665_v29 }
 0x3db   : > { %v5519_v38 = vadd.f32 %v9682_v54, %v5518_v47  ;;  %v9683_v16 = vpop.f32.mrb[100].mxu0  ;;  %10708 = vmatprep.subr.mxu0 %v16570_v50 }
 0x3dc   : > { %10684 = vmatmul.mubr.msk.f32.gmra.mrb[176].mxu0 %vm2343_vm3, %v15306_v35  ;;  %v9684_v43 = vpop.f32.mrb[101].mxu0 }
 0x3dd   : > { %10696 = vmatmul.mubr.msk.f32.vlgmr.msra.gmra.mrb[174].mxu1 %vm2343_vm3, %v15300_v25  ;;  %v6735_v6 = vmul.f32 %v11988_v45, %v5519_v38  ;;  %v9685_v60 = vadd.f32 %v9684_v43, %v9683_v16  ;;  %10686 = vmatprep.mubr.msk.f32.mxu0 %vm12237_vm6, %v16570_v50  ;;  %v6759_v25 = vsel %vm6758_vm8, %v6734_v8, 0.0  ;;  %v11996_v8 = vpop.eup %11995  ;;  %v16796_v16 = vld [vmem:[#allocation75_spill] sm:$0xff] }
 0x3de   : > { %10698 = vmatprep.mubr.msk.f32.mxu1 %vm12237_vm6, %v16570_v50  ;;  %11429 = vmatpush3.bf16.msra.mxu1 %v15665_v29  ;;  %v16797_v45 = vld [vmem:[#allocation55_spill] sm:$0xff] }
 0x3df   : > { %10709 = vmatpush3.msk.msra.mxu0 %vm390_vm1, %v15687_v11  ;;  %v6760_v35 = vsel %vm6758_vm8, %v6735_v6, 0.0  ;;  %v5524_v51 = vadd.f32 %v9685_v60, %v5523_v5  ;;  %10723 = vmatprep.subr.mxu1 %v16570_v50  ;;  %v5682_v36 = vpop.f32.mrb[102].mxu0 }
 0x3e0   : > { %11430 = vmatprep.subr.bf16.mxu0 %v16768_v44  ;;  %v6761_v12 = vadd.f32 %v6760_v35, %v6759_v25  ;;  %10687 = vmatmul.mubr.msk.f32.gmra.mrb[178].mxu0 %vm2343_vm3, %v15270_v28  ;;  %v10451_v13 = vpop.f32.mrb[103].mxu0 }
 0x3e1   : > { %10699 = vmatmul.mubr.msk.f32.gmra.mrb[176].mxu1 %vm2343_vm3, %v15310_v2  ;;  %v6736_v19 = vmul.f32 %v11990_v4, %v5524_v51  ;;  %10710 = vmatprep.mubr.msk.f32.mxu0 %vm12237_vm6, %v16570_v50  ;;  %v16798_v51 = vld [vmem:[#allocation38_spill] sm:$0xff] }
 0x3e2   : > { %10701 = vmatprep.mubr.msk.f32.mxu1 %vm12237_vm6, %v16570_v50  ;;  %10724 = vmatpush3.msk.msra.mxu1 %vm390_vm1, %v15687_v11 }
 0x3e3   : > { %11433 = vmatprep.subr.bf16.mxu1 %v16768_v44  ;;  %v6763_v2 = vsel %vm6762_vm9, %v6736_v19, 0.0  ;;  %v5687_v7 = vpop.f32.mrb[104].mxu0 }
 0x3e4   : > { %v9722_v37 = vpop.f32.mrb[102].mxu1  ;;  %v6764_v28 = vadd.f32 %v6763_v2, %v6761_v12  ;;  %10711 = vmatmul.mubr.msk.f32.vlgmr.msra.gmra.mrb[180].mxu0 %vm2343_vm3, %v16790_v42  ;;  %v10454_v49 = vpop.f32.mrb[105].mxu0 }
 0x3e5   : > { %10702 = vmatmul.mubr.msk.f32.gmra.mrb[178].mxu1 %vm2343_vm3, %v15291_v21  ;;  %v9723_v57 = vpop.f32.mrb[103].mxu1  ;;  %10713 = vmatprep.mubr.msk.f32.mxu0 %vm12237_vm6, %v16570_v50 }
 0x3e6   : > { %v9724_v56 = vadd.f32 %v9723_v57, %v9722_v37  ;;  %10725 = vmatprep.mubr.msk.f32.mxu1 %vm12237_vm6, %v16570_v50  ;;  %11432 = vmatpush3.bf16.msra.mxu0 %v15665_v29  ;;  %v6765_v15 = vrot.slane %v6764_v28, 4  ;;  %v16800_v37 = vld [vmem:[#allocation57_spill] sm:$0xff]  ;;  %v16802_v57 = vld [vmem:[#allocation64_spill] sm:$0xff] }
 0x3e7   : > { %10738 = vmatprep.subr.mxu0 %v16570_v50  ;;  %v5692_v21 = vpop.f32.mrb[106].mxu0  ;;  %11997 = vrcp.f32 %v16802_v57 }
 0x3e8   : > { %v5683_v14 = vadd.f32 %v9724_v56, %v5682_v36  ;;  %v9725_v22 = vpop.f32.mrb[104].mxu1  ;;  %10714 = vmatmul.mubr.msk.f32.gmra.mrb[182].mxu0 %vm2343_vm3, %v16793_v39  ;;  %v10457_v5 = vpop.f32.mrb[107].mxu0  ;;  %v6766_v54 = vadd.f32 %v6765_v15, %v6764_v28  ;;  %v16799_v36 = vld [vmem:[#allocation30_spill] sm:$0xff]  ;;  %v8633_v15 = vld [vmem:[%s16164_s4 + $0x8] sm:$0xff] }
 0x3e9   : > { %10726 = vmatmul.mubr.msk.f32.vlgmr.msra.gmra.mrb[180].mxu1 %vm2343_vm3, %v16792_v61  ;;  %v9726_v47 = vpop.f32.mrb[105].mxu1  ;;  %10716 = vmatprep.mubr.msk.f32.mxu0 %vm12237_vm6, %v16570_v50  ;;  %v16805_v5 = vld [vmem:[#allocation65_spill] sm:$0xff] }
 0x3ea   : > { %v6737_v62 = vmul.f32 %v11992_v63, %v5683_v14  ;;  %v9727_v53 = vadd.f32 %v9726_v47, %v9725_v22  ;;  %10728 = vmatprep.mubr.msk.f32.mxu1 %vm12237_vm6, %v16570_v50  ;;  %11435 = vmatpush3.bf16.msra.mxu1 %v15665_v29  ;;  %v6767_v25 = vrot.slane %v6766_v54, 2  ;;  %v16804_v14 = vld [vmem:[#allocation66_spill] sm:$0xff] }
 0x3eb   : > { %10739 = vmatpush3.msk.msra.mxu0 %vm390_vm1, %v15687_v11  ;;  %10753 = vmatprep.subr.mxu1 %v16570_v50  ;;  %11999 = vrcp.f32 %v16804_v14 }
 0x3ec   : > { %v5688_v55 = vadd.f32 %v9727_v53, %v5687_v7  ;;  %v9728_v17 = vpop.f32.mrb[106].mxu1  ;;  %10764 = vmatprep.subr.mxu0 %v16570_v50  ;;  %10717 = vmatmul.mubr.msk.f32.gmra.mrb[184].mxu0 %vm2343_vm3, %v16795_v9  ;;  %v6771_v34 = vsel %vm6758_vm8, %v6737_v62, 0.0  ;;  %v6768_v19 = vadd.f32 %v6767_v25, %v6766_v54  ;;  %v16801_v7 = vld [vmem:[#allocation35_spill] sm:$0xff]  ;;  %12001 = vrcp.f32 %v16805_v5 }
 0x3ed   : > { %10729 = vmatmul.mubr.msk.f32.gmra.mrb[182].mxu1 %vm2343_vm3, %v16794_v0  ;;  %v9729_v20 = vpop.f32.mrb[107].mxu1  ;;  %10740 = vmatprep.mubr.msk.f32.mxu0 %vm12237_vm6, %v16570_v50  ;;  %v8634_v0 = vld [vmem:[%s16164_s4 + $0x10] sm:$0xff] }
 0x3ee   : > { %v6738_v29 = vmul.f32 %v11994_v26, %v5688_v55  ;;  %v9730_v48 = vadd.f32 %v9729_v20, %v9728_v17  ;;  %10731 = vmatprep.mubr.msk.f32.mxu1 %vm12237_vm6, %v16570_v50  ;;  %10754 = vmatpush3.msk.msra.mxu1 %vm390_vm1, %v15687_v11  ;;  %v6769_v49 = vrot.slane %v6768_v19, 1  ;;  %vm8653_vm1 = vcmask 1045509  }
 0x3ef   : > { %11436 = vmatprep.subr.bf16.mxu1 %v16768_v44 }
 0x3f0   : > { %v6772_v31 = vsel %vm6758_vm8, %v6738_v29, 0.0  ;;  %v5693_v40 = vadd.f32 %v9730_v48, %v5692_v21  ;;  %v5851_v18 = vpop.f32.mrb[108].mxu1  ;;  %10741 = vmatmul.mubr.msk.f32.vlgmr.msra.gmra.mrb[186].mxu0 %vm2343_vm3, %v16797_v45  ;;  %v6770_v63 = vadd.f32 %v6769_v49, %v6768_v19  ;;  %v8635_v48 = vld [vmem:[%s16164_s4 + $0x18] sm:$0x3] }
 0x3f1   : > { %v6773_v38 = vadd.f32 %v6772_v31, %v6771_v34  ;;  %10732 = vmatmul.mubr.msk.f32.gmra.mrb[184].mxu1 %vm2343_vm3, %v16796_v16  ;;  %v10462_v11 = vpop.f32.mrb[109].mxu1  ;;  %10743 = vmatprep.mubr.msk.f32.mxu0 %vm12237_vm6, %v16570_v50  ;;  %v11998_v17 = vpop.eup %11997  ;;  %v16806_v16 = vld [vmem:[#allocation51_spill] sm:$0xff] }
 0x3f2   : > { %v6739_v43 = vmul.f32 %v11996_v8, %v5693_v40  ;;  %10755 = vmatprep.mubr.msk.f32.mxu1 %vm12237_vm6, %v16570_v50  ;;  %v11440_v40 = vpack.c.bf16 %v8635_v48, %v8634_v0  ;;  %12003 = vrcp.f32 %v16806_v16 }
 0x3f4   : > { %v6774_v6 = vsel %vm6762_vm9, %v6739_v43, 0.0  ;;  %v5856_v60 = vpop.f32.mrb[110].mxu1  ;;  %10744 = vmatmul.mubr.msk.f32.gmra.mrb[188].mxu0 %vm2343_vm3, %v16799_v36  ;;  %v16807_v36 = vld [vmem:[#allocation63_spill] sm:$0xff] }
 0x3f5   : > { %v6775_v35 = vadd.f32 %v6774_v6, %v6773_v38  ;;  %10756 = vmatmul.mubr.msk.f32.vlgmr.msra.gmra.mrb[186].mxu1 %vm2343_vm3, %v16798_v51  ;;  %v10465_v4 = vpop.f32.mrb[111].mxu1  ;;  %10746 = vmatprep.mubr.msk.f32.mxu0 %vm12237_vm6, %v16570_v50  ;;  %12005 = vrcp.f32 %v16807_v36 }
 0x3f6   : > { %10758 = vmatprep.mubr.msk.f32.mxu1 %vm12237_vm6, %v16570_v50  ;;  %12007 = vrcp.f32 %v15585_v1 }
 0x3f7   : > { %v6776_v12 = vrot.slane %v6775_v35, 4  ;;  %12009 = vrcp.f32 %v15626_v32 }
 0x3f8   : > { %v5861_v13 = vpop.f32.mrb[112].mxu1  ;;  %10747 = vmatmul.mubr.msk.f32.gmra.mrb[190].mxu0 %vm2343_vm3, %v16801_v7  ;;  %12011 = vrcp.f32 %v15635_v23 }
 0x3f9   : > { %v6777_v2 = vadd.f32 %v6776_v12, %v6775_v35  ;;  %10759 = vmatmul.mubr.msk.f32.gmra.mrb[188].mxu1 %vm2343_vm3, %v16800_v37  ;;  %v10468_v28 = vpop.f32.mrb[113].mxu1  ;;  %10766 = vmatprep.mubr.msk.f32.mxu0 %vm12237_vm6, %v16570_v50  ;;  %12013 = vrcp.f32 %v15646_v33 }
 0x3fa   : > { %10761 = vmatprep.mubr.msk.f32.mxu1 %vm12237_vm6, %v16570_v50  ;;  %12015 = vrcp.f32 %v15667_v41 }
 0x3fb   : > { %v6778_v42 = vrot.slane %v6777_v2, 2  ;;  %12017 = vrcp.f32 %v15681_v58 }
 0x3fc   : > { %12019 = vrcp.f32 %v15701_v24 }
 0x3fd   : > { %v6779_v56 = vadd.f32 %v6778_v42, %v6777_v2  ;;  %10762 = vmatmul.mubr.msk.f32.gmra.mrb[190].mxu1 %vm2343_vm3, %v16803_v59  ;;  %12021 = vrcp.f32 %v15754_v46  ;;  %vm8657_vm3 = vcmask 1047559  }
 0x3fe   : > { %10777 = vmatprep.mubr.msk.f32.mxu1 %vm12237_vm6, %v16570_v50  ;;  %v8632_v50 = vld [vmem:[%s16164_s4] sm:$0xff]  ;;  %12023 = vrcp.f32 %v15768_v10  ;;  %vm8833_vm6 = vcmask 64512  }
 0x3ff   : > { %v6780_v22 = vrot.slane %v6779_v56, 1  ;;  %v9767_v21 = vpop.f32.mrb[108].mxu0  ;;  %v11437_v29 = vpack.c.bf16 %v8633_v15, %v8632_v50  ;;  %12025 = vrcp.f32 %v15783_v3  ;;  %v8636_v10 = vld [vmem:[%s16165_s5] sm:$0x3] }
 0x400   : > { %v9768_v47 = vpop.f32.mrb[109].mxu0  ;;  %10765 = vmatpush3.msk.msra.mxu0 %vm8661_vm11, %v8636_v10  ;;  %12027 = vrcp.f32 %v15806_v30 }
 0x401   : > { %v6781_v61 = vadd.f32 %v6780_v22, %v6779_v56  ;;  %v9769_v39 = vadd.f32 %v9768_v47, %v9767_v21  ;;  %11438 = vmatpush3.bf16.msra.mxu1 %v11437_v29  ;;  %12029 = vrcp.f32 %v15821_v52 }
 0x402   : > { %11439 = vmatprep.subr.bf16.mxu1 %v16768_v44 }
 0x403   : > { %v16005_v62 = vsel %vm8645_vm10, %v6781_v61, %v6770_v63  ;;  %v5852_v53 = vadd.f32 %v9769_v39, %v5851_v18  ;;  %v9770_v55 = vpop.f32.mrb[110].mxu0  ;;  %v12000_v18 = vpop.eup %11999  ;;  %12031 = vrcp.f32 %v15832_v27 }
 0x404   : > { %v9771_v26 = vpop.f32.mrb[111].mxu0 }
 0x405   : > { %v6740_v20 = vmul.f32 %v11998_v17, %v5852_v53  ;;  %v9772_v9 = vadd.f32 %v9771_v26, %v9770_v55  ;;  %11442 = vmatpush3.bf16.msk.msra.mxu1 %vm11441_vm13, %v11440_v40 }
 0x407   : > { %v5857_v34 = vadd.f32 %v9772_v9, %v5856_v60  ;;  %v9773_v31 = vpop.f32.mrb[112].mxu0  ;;  %v6782_v45 = vsel %vm6758_vm8, %v6740_v20, 0.0  ;;  %v12002_v60 = vpop.eup %12001 }
 0x408   : > { %v9774_v8 = vpop.f32.mrb[113].mxu0  ;;  %v12004_v49 = vpop.eup %12003 }
 0x409   : > { %v6741_v54 = vmul.f32 %v12000_v18, %v5857_v34  ;;  %v9775_v38 = vadd.f32 %v9774_v8, %v9773_v31  ;;  %v12006_v39 = vpop.eup %12005 }
 0x40a   : > { %v12008_v20 = vpop.eup %12007 }
 0x40b   : > { %v6783_v11 = vsel %vm6758_vm8, %v6741_v54, 0.0  ;;  %v5862_v43 = vadd.f32 %v9775_v38, %v5861_v13  ;;  %v6020_v6 = vpop.f32.mrb[114].mxu0 }
 0x40c   : > { %v6784_v25 = vadd.f32 %v6783_v11, %v6782_v45  ;;  %v10473_v35 = vpop.f32.mrb[115].mxu0 }
 0x40d   : > { %v6742_v51 = vmul.f32 %v12002_v60, %v5862_v43 }
 0x40f   : > { %v6785_v44 = vsel %vm6762_vm9, %v6742_v51, 0.0  ;;  %v6025_v12 = vpop.f32.mrb[116].mxu0 }
 0x410   : > { %v9812_v4 = vpop.f32.mrb[114].mxu1  ;;  %v6786_v19 = vadd.f32 %v6785_v44, %v6784_v25  ;;  %v10476_v37 = vpop.f32.mrb[117].mxu0 }
 0x411   : > { %v9813_v2 = vpop.f32.mrb[115].mxu1 }
 0x412   : > { %v9814_v7 = vadd.f32 %v9813_v2, %v9812_v4  ;;  %v6787_v28 = vrot.slane %v6786_v19, 4 }
 0x413   : > { %v6030_v42 = vpop.f32.mrb[118].mxu0 }
 0x414   : > { %v6021_v13 = vadd.f32 %v9814_v7, %v6020_v6  ;;  %v9815_v57 = vpop.f32.mrb[116].mxu1  ;;  %v6788_v56 = vadd.f32 %v6787_v28, %v6786_v19  ;;  %v10479_v14 = vpop.f32.mrb[119].mxu0 }
 0x415   : > { %v9816_v59 = vpop.f32.mrb[117].mxu1 }
 0x416   : > { %v6743_v22 = vmul.f32 %v12004_v49, %v6021_v13  ;;  %v9817_v21 = vadd.f32 %v9816_v59, %v9815_v57  ;;  %v6789_v63 = vrot.slane %v6788_v56, 2 }
 0x418   : > { %v6026_v61 = vadd.f32 %v9817_v21, %v6025_v12  ;;  %v9818_v47 = vpop.f32.mrb[118].mxu1  ;;  %v6790_v5 = vadd.f32 %v6789_v63, %v6788_v56  ;;  %v6793_v1 = vsel %vm6758_vm8, %v6743_v22, 0.0  ;;  %v12010_v12 = vpop.eup %12009 }
 0x419   : > { %v9819_v53 = vpop.f32.mrb[119].mxu1  ;;  %v12012_v28 = vpop.eup %12011 }
 0x41a   : > { %v6744_v55 = vmul.f32 %v12006_v39, %v6026_v61  ;;  %v9820_v17 = vadd.f32 %v9819_v53, %v9818_v47  ;;  %v6791_v26 = vrot.slane %v6790_v5, 1  ;;  %v12014_v59 = vpop.eup %12013 }
 0x41c   : > { %v6794_v50 = vsel %vm6758_vm8, %v6744_v55, 0.0  ;;  %v6031_v15 = vadd.f32 %v9820_v17, %v6030_v42  ;;  %v6189_v0 = vpop.f32.mrb[120].mxu1  ;;  %v6792_v9 = vadd.f32 %v6791_v26, %v6790_v5 }
 0x41d   : > { %v6795_v29 = vadd.f32 %v6794_v50, %v6793_v1  ;;  %v10484_v48 = vpop.f32.mrb[121].mxu1  ;;  %v12016_v50 = vpop.eup %12015 }
 0x41e   : > { %v6745_v34 = vmul.f32 %v12008_v20, %v6031_v15  ;;  %v8744_v31 = vsel %vm8647_vm14, %v6792_v9, %v16005_v62 }
 0x420   : > { %v6796_v40 = vsel %vm6762_vm9, %v6745_v34, 0.0  ;;  %v6194_v18 = vpop.f32.mrb[122].mxu1 }
 0x421   : > { %v6797_v8 = vadd.f32 %v6796_v40, %v6795_v29  ;;  %v10487_v54 = vpop.f32.mrb[123].mxu1 }
 0x423   : > { %v6798_v38 = vrot.slane %v6797_v8, 4 }
 0x424   : > { %v6199_v16 = vpop.f32.mrb[124].mxu1 }
 0x425   : > { %v6799_v45 = vadd.f32 %v6798_v38, %v6797_v8  ;;  %v10490_v11 = vpop.f32.mrb[125].mxu1 }
 0x427   : > { %v6800_v43 = vrot.slane %v6799_v45, 2 }
 0x429   : > { %v6801_v6 = vadd.f32 %v6800_v43, %v6799_v45 }
 0x42b   : > { %v6802_v60 = vrot.slane %v6801_v6, 1  ;;  %v9857_v25 = vpop.f32.mrb[120].mxu0 }
 0x42c   : > { %v9858_v62 = vpop.f32.mrb[121].mxu0 }
 0x42d   : > { %v6803_v35 = vadd.f32 %v6802_v60, %v6801_v6  ;;  %v9859_v51 = vadd.f32 %v9858_v62, %v9857_v25 }
 0x42f   : > { %v8745_v36 = vsel %vm8649_vm15, %v6803_v35, %v8744_v31  ;;  %v6190_v44 = vadd.f32 %v9859_v51, %v6189_v0  ;;  %v9860_v4 = vpop.f32.mrb[122].mxu0  ;;  %v12018_v31 = vpop.eup %12017 }
 0x430   : > { %v9861_v19 = vpop.f32.mrb[123].mxu0  ;;  %v12020_v43 = vpop.eup %12019 }
 0x431   : > { %v6746_v2 = vmul.f32 %v12010_v12, %v6190_v44  ;;  %v9862_v32 = vadd.f32 %v9861_v19, %v9860_v4 }
 0x433   : > { %v6195_v37 = vadd.f32 %v9862_v32, %v6194_v18  ;;  %v9863_v7 = vpop.f32.mrb[124].mxu0  ;;  %v6804_v42 = vsel %vm6758_vm8, %v6746_v2, 0.0 }
 0x434   : > { %v9864_v23 = vpop.f32.mrb[125].mxu0 }
 0x435   : > { %v6747_v13 = vmul.f32 %v12012_v28, %v6195_v37  ;;  %v9865_v57 = vadd.f32 %v9864_v23, %v9863_v7 }
 0x437   : > { %v6805_v33 = vsel %vm6758_vm8, %v6747_v13, 0.0  ;;  %v6200_v49 = vadd.f32 %v9865_v57, %v6199_v16  ;;  %v6358_v56 = vpop.f32.mrb[126].mxu0 }
 0x438   : > { %v6806_v14 = vadd.f32 %v6805_v33, %v6804_v42  ;;  %v10495_v22 = vpop.f32.mrb[127].mxu0 }
 0x439   : > { %v6748_v21 = vmul.f32 %v12014_v59, %v6200_v49  ;;  %v12022_v59 = vpop.eup %12021 }
 0x43b   : > { %v6807_v63 = vsel %vm6762_vm9, %v6748_v21, 0.0  ;;  %v6363_v47 = vpop.f32.mrb[128].mxu0 }
 0x43c   : > { %v9902_v61 = vpop.f32.mrb[126].mxu1  ;;  %v6808_v39 = vadd.f32 %v6807_v63, %v6806_v14  ;;  %v10498_v53 = vpop.f32.mrb[129].mxu0 }
 0x43d   : > { %v9903_v5 = vpop.f32.mrb[127].mxu1 }
 0x43e   : > { %v9904_v41 = vadd.f32 %v9903_v5, %v9902_v61  ;;  %v6809_v55 = vrot.slane %v6808_v39, 4  ;;  %v12024_v61 = vpop.eup %12023 }
 0x43f   : > { %v6368_v1 = vpop.f32.mrb[130].mxu0 }
 0x440   : > { %v6359_v17 = vadd.f32 %v9904_v41, %v6358_v56  ;;  %v9905_v26 = vpop.f32.mrb[128].mxu1  ;;  %v6810_v15 = vadd.f32 %v6809_v55, %v6808_v39  ;;  %v10501_v20 = vpop.f32.mrb[131].mxu0 }
 0x441   : > { %v9906_v0 = vpop.f32.mrb[129].mxu1 }
 0x442   : > { %v6749_v9 = vmul.f32 %v12016_v50, %v6359_v17  ;;  %v9907_v58 = vadd.f32 %v9906_v0, %v9905_v26  ;;  %v6811_v29 = vrot.slane %v6810_v15, 2  ;;  %v12026_v17 = vpop.eup %12025 }
 0x444   : > { %v6364_v48 = vadd.f32 %v9907_v58, %v6363_v47  ;;  %v9908_v34 = vpop.f32.mrb[130].mxu1  ;;  %v6812_v40 = vadd.f32 %v6811_v29, %v6810_v15  ;;  %v6815_v24 = vsel %vm6758_vm8, %v6749_v9, 0.0 }
 0x445   : > { %v9909_v18 = vpop.f32.mrb[131].mxu1 }
 0x446   : > { %v6750_v8 = vmul.f32 %v12018_v31, %v6364_v48  ;;  %v9910_v54 = vadd.f32 %v9909_v18, %v9908_v34  ;;  %v6813_v38 = vrot.slane %v6812_v40, 1  ;;  %v12028_v18 = vpop.eup %12027 }
 0x448   : > { %v6816_v16 = vsel %vm6758_vm8, %v6750_v8, 0.0  ;;  %v6369_v45 = vadd.f32 %v9910_v54, %v6368_v1  ;;  %v6527_v11 = vpop.f32.mrb[132].mxu1  ;;  %v6814_v6 = vadd.f32 %v6813_v38, %v6812_v40 }
 0x449   : > { %v6817_v60 = vadd.f32 %v6816_v16, %v6815_v24  ;;  %v10506_v25 = vpop.f32.mrb[133].mxu1 }
 0x44a   : > { %v6751_v35 = vmul.f32 %v12020_v43, %v6369_v45  ;;  %v8746_v62 = vsel %vm8651_vm0, %v6814_v6, %v8745_v36  ;;  %v12030_v6 = vpop.eup %12029 }
 0x44c   : > { %v6818_v51 = vsel %vm6762_vm9, %v6751_v35, 0.0  ;;  %v6532_v44 = vpop.f32.mrb[134].mxu1 }
 0x44d   : > { %v6819_v4 = vadd.f32 %v6818_v51, %v6817_v60  ;;  %v10509_v12 = vpop.f32.mrb[135].mxu1 }
 0x44f   : > { %v6820_v19 = vrot.slane %v6819_v4, 4 }
 0x450   : > { %v6537_v2 = vpop.f32.mrb[136].mxu1 }
 0x451   : > { %v6821_v32 = vadd.f32 %v6820_v19, %v6819_v4  ;;  %v10512_v37 = vpop.f32.mrb[137].mxu1 }
 0x453   : > { %v6822_v7 = vrot.slane %v6821_v32, 2 }
 0x455   : > { %v6823_v28 = vadd.f32 %v6822_v7, %v6821_v32  ;;  %v12032_v32 = vpop.eup %12031 }
 0x457   : > { %v6824_v23 = vrot.slane %v6823_v28, 1  ;;  %v9947_v13 = vpop.f32.mrb[132].mxu0 }
 0x458   : > { %v9948_v36 = vpop.f32.mrb[133].mxu0 }
 0x459   : > { %v6825_v57 = vadd.f32 %v6824_v23, %v6823_v28  ;;  %v9949_v42 = vadd.f32 %v9948_v36, %v9947_v13 }
 0x45b   : > { %v16050_v33 = vsel %vm8653_vm1, %v6825_v57, %v8746_v62  ;;  %v6528_v49 = vadd.f32 %v9949_v42, %v6527_v11  ;;  %v9950_v56 = vpop.f32.mrb[134].mxu0 }
 0x45c   : > { %v9951_v14 = vpop.f32.mrb[135].mxu0 }
 0x45d   : > { %v6752_v46 = vmul.f32 %v12022_v59, %v6528_v49  ;;  %v9952_v22 = vadd.f32 %v9951_v14, %v9950_v56 }
 0x45f   : > { %v6533_v21 = vadd.f32 %v9952_v22, %v6532_v44  ;;  %v9953_v63 = vpop.f32.mrb[136].mxu0  ;;  %v6826_v5 = vsel %vm6758_vm8, %v6752_v46, 0.0 }
 0x460   : > { %v9954_v47 = vpop.f32.mrb[137].mxu0 }
 0x461   : > { %v6753_v3 = vmul.f32 %v12024_v61, %v6533_v21  ;;  %v9955_v39 = vadd.f32 %v9954_v47, %v9953_v63 }
 0x463   : > { %v6827_v53 = vsel %vm6758_vm8, %v6753_v3, 0.0  ;;  %v6538_v41 = vadd.f32 %v9955_v39, %v6537_v2  ;;  %v6696_v55 = vpop.f32.mrb[138].mxu0 }
 0x464   : > { %v6828_v26 = vadd.f32 %v6827_v53, %v6826_v5  ;;  %v10517_v1 = vpop.f32.mrb[139].mxu0 }
 0x465   : > { %v6754_v50 = vmul.f32 %v12026_v17, %v6538_v41 }
 0x467   : > { %v6829_v15 = vsel %vm6762_vm9, %v6754_v50, 0.0  ;;  %v6701_v20 = vpop.f32.mrb[140].mxu0 }
 0x468   : > { %v9992_v0 = vpop.f32.mrb[138].mxu1  ;;  %v6830_v9 = vadd.f32 %v6829_v15, %v6828_v26  ;;  %v10520_v29 = vpop.f32.mrb[141].mxu0 }
 0x469   : > { %v9993_v58 = vpop.f32.mrb[139].mxu1 }
 0x46a   : > { %v9994_v30 = vadd.f32 %v9993_v58, %v9992_v0  ;;  %v6831_v48 = vrot.slane %v6830_v9, 4 }
 0x46b   : > { %v6706_v40 = vpop.f32.mrb[142].mxu0 }
 0x46c   : > { %v6697_v34 = vadd.f32 %v9994_v30, %v6696_v55  ;;  %v9995_v31 = vpop.f32.mrb[140].mxu1  ;;  %v6832_v8 = vadd.f32 %v6831_v48, %v6830_v9  ;;  %v10523_v38 = vpop.f32.mrb[143].mxu0 }
 0x46d   : > { %v9996_v54 = vpop.f32.mrb[141].mxu1 }
 0x46e   : > { %v6755_v24 = vmul.f32 %v12028_v18, %v6697_v34  ;;  %v9997_v52 = vadd.f32 %v9996_v54, %v9995_v31  ;;  %v6833_v16 = vrot.slane %v6832_v8, 2 }
 0x46f   : > { %v16062_v43 = vpop.f32.mrb[144].mxu0 }
 0x470   : > { %v6702_v45 = vadd.f32 %v9997_v52, %v6701_v20  ;;  %v9998_v11 = vpop.f32.mrb[142].mxu1  ;;  %v6834_v60 = vadd.f32 %v6833_v16, %v6832_v8  ;;  %v10532_v35 = vpop.f32.mrb[145].mxu0  ;;  %v6837_v44 = vsel %vm6758_vm8, %v6755_v24, 0.0  ;;  %12033 = vrcp.f32 %v16062_v43 }
 0x471   : > { %v9999_v25 = vpop.f32.mrb[143].mxu1 }
 0x472   : > { %v6756_v27 = vmul.f32 %v12030_v6, %v6702_v45  ;;  %v10000_v62 = vadd.f32 %v9999_v25, %v9998_v11  ;;  %v6835_v51 = vrot.slane %v6834_v60, 1 }
 0x473   : > { %v7150_v2 = vpop.f32.mrb[146].mxu0 }
 0x474   : > { %v6838_v4 = vsel %vm6758_vm8, %v6756_v27, 0.0  ;;  %v6707_v12 = vadd.f32 %v10000_v62, %v6706_v40  ;;  %v7234_v19 = vpop.f32.mrb[144].mxu1  ;;  %v6836_v37 = vadd.f32 %v6835_v51, %v6834_v60  ;;  %v10535_v23 = vpop.f32.mrb[147].mxu0 }
 0x475   : > { %v6839_v7 = vadd.f32 %v6838_v4, %v6837_v44  ;;  %v10547_v28 = vpop.f32.mrb[145].mxu1  ;;  %12035 = vrcp.f32 %v7234_v19 }
 0x476   : > { %v6757_v13 = vmul.f32 %v12032_v32, %v6707_v12  ;;  %v8748_v57 = vsel %vm8655_vm2, %v6836_v37, %v16050_v33  ;;  %12037 = vrcp.f32 %v7150_v2 }
 0x477   : > { %v7155_v49 = vpop.f32.mrb[148].mxu0 }
 0x478   : > { %v6840_v36 = vsel %vm6762_vm9, %v6757_v13, 0.0  ;;  %v7239_v42 = vpop.f32.mrb[146].mxu1  ;;  %v10538_v14 = vpop.f32.mrb[149].mxu0 }
 0x479   : > { %v6841_v56 = vadd.f32 %v6840_v36, %v6839_v7  ;;  %v10550_v59 = vpop.f32.mrb[147].mxu1  ;;  %12039 = vrcp.f32 %v7239_v42 }
 0x47a   : > { %12041 = vrcp.f32 %v7155_v49  ;;  %v12034_v62 = vpop.eup %12033 }
 0x47b   : > { %v6842_v46 = vrot.slane %v6841_v56, 4  ;;  %v7323_v21 = vpop.f32.mrb[150].mxu0 }
 0x47c   : > { %v7244_v22 = vpop.f32.mrb[148].mxu1  ;;  %v10562_v61 = vpop.f32.mrb[151].mxu0 }
 0x47d   : > { %v6843_v63 = vadd.f32 %v6842_v46, %v6841_v56  ;;  %v10553_v10 = vpop.f32.mrb[149].mxu1  ;;  %12043 = vrcp.f32 %v7244_v22 }
 0x47e   : > { %12045 = vrcp.f32 %v7323_v21 }
 0x47f   : > { %v6844_v47 = vrot.slane %v6843_v63, 2  ;;  %v7328_v39 = vpop.f32.mrb[152].mxu0  ;;  %v12036_v19 = vpop.eup %12035 }
 0x480   : > { %v7412_v3 = vpop.f32.mrb[150].mxu1  ;;  %v10565_v41 = vpop.f32.mrb[153].mxu0 }
 0x481   : > { %v6845_v5 = vadd.f32 %v6844_v47, %v6843_v63  ;;  %v10577_v53 = vpop.f32.mrb[151].mxu1  ;;  %v12038_v32 = vpop.eup %12037  ;;  %12047 = vrcp.f32 %v7412_v3 }
 0x482   : > { %12049 = vrcp.f32 %v7328_v39 }
 0x483   : > { %v6846_v33 = vrot.slane %v6845_v5, 1  ;;  %v16071_v17 = vpop.f32.mrb[154].mxu0 }
 0x484   : > { %v16069_v55 = vpop.f32.mrb[152].mxu1  ;;  %v10568_v50 = vpop.f32.mrb[155].mxu0 }
 0x485   : > { %v6847_v26 = vadd.f32 %v6846_v33, %v6845_v5  ;;  %v10580_v1 = vpop.f32.mrb[153].mxu1  ;;  %12051 = vrcp.f32 %v16069_v55 }
 0x486   : > { %12053 = vrcp.f32 %v16071_v17 }
 0x487   : > { %v8749_v15 = vsel %vm8657_vm3, %v6847_v26, %v8748_v57  ;;  %v16077_v20 = vpop.f32.mrb[156].mxu0  ;;  %v12040_v57 = vpop.eup %12039 }
 0x488   : > { %v16074_v0 = vpop.f32.mrb[154].mxu1  ;;  %10778 = vmatmul.mubr.msk.f32.vlgmr.msra.gmra.mrb[192].mxu1 %vm6758_vm8, %v8749_v15  ;;  %v10592_v58 = vpop.f32.mrb[157].mxu0 }
 0x489   : > { %v10583_v9 = vpop.f32.mrb[155].mxu1  ;;  %v12042_v49 = vpop.eup %12041  ;;  %12055 = vrcp.f32 %v16074_v0 }
 0x48a   : > { %v12044_v10 = vpop.eup %12043  ;;  %12057 = vrcp.f32 %v16077_v20 }
 0x48b   : > { %v16081_v30 = vpop.f32.mrb[158].mxu0  ;;  %v12046_v39 = vpop.eup %12045 }
 0x48c   : > { %v16079_v29 = vpop.f32.mrb[156].mxu1  ;;  %v10595_v34 = vpop.f32.mrb[159].mxu0 }
 0x48d   : > { %v10607_v48 = vpop.f32.mrb[157].mxu1  ;;  %v12048_v15 = vpop.eup %12047  ;;  %12059 = vrcp.f32 %v16079_v29 }
 0x48e   : > { %v12050_v58 = vpop.eup %12049  ;;  %12061 = vrcp.f32 %v16081_v30 }
 0x48f   : > { %v16085_v40 = vpop.f32.mrb[160].mxu0  ;;  %v12052_v20 = vpop.eup %12051 }
 0x490   : > { %v16083_v31 = vpop.f32.mrb[158].mxu1  ;;  %v10598_v8 = vpop.f32.mrb[161].mxu0 }
 0x491   : > { %v10610_v18 = vpop.f32.mrb[159].mxu1  ;;  %12063 = vrcp.f32 %v16083_v31 }
 0x492   : > { %12065 = vrcp.f32 %v16085_v40 }
 0x493   : > { %v16089_v38 = vpop.f32.mrb[162].mxu0 }
 0x494   : > { %v16087_v54 = vpop.f32.mrb[160].mxu1  ;;  %v10622_v52 = vpop.f32.mrb[163].mxu0 }
 0x495   : > { %v10613_v24 = vpop.f32.mrb[161].mxu1  ;;  %12067 = vrcp.f32 %v16087_v54 }
 0x496   : > { %12069 = vrcp.f32 %v16089_v38 }
 0x497   : > { %v16094_v45 = vpop.f32.mrb[164].mxu0 }
 0x498   : > { %v16092_v16 = vpop.f32.mrb[162].mxu1  ;;  %v10625_v6 = vpop.f32.mrb[165].mxu0 }
 0x499   : > { %v10637_v11 = vpop.f32.mrb[163].mxu1  ;;  %12071 = vrcp.f32 %v16092_v16 }
 0x49a   : > { %12073 = vrcp.f32 %v16094_v45 }
 0x49b   : > { %v16098_v25 = vpop.f32.mrb[166].mxu0 }
 0x49c   : > { %v16096_v60 = vpop.f32.mrb[164].mxu1  ;;  %v10628_v27 = vpop.f32.mrb[167].mxu0 }
 0x49d   : > { %v10640_v35 = vpop.f32.mrb[165].mxu1  ;;  %12075 = vrcp.f32 %v16096_v60 }
 0x49e   : > { %12077 = vrcp.f32 %v16098_v25 }
 0x49f   : > { %v7857_v43 = vpop.f32.mrb[168].mxu0 }
 0x4a0   : > { %v16100_v51 = vpop.f32.mrb[166].mxu1  ;;  %v8518_v4 = vmul.f32 %v12034_v62, %v7857_v43  ;;  %v10652_v12 = vpop.f32.mrb[169].mxu0 }
 0x4a1   : > { %v10643_v44 = vpop.f32.mrb[167].mxu1  ;;  %v12054_v43 = vpop.eup %12053  ;;  %12079 = vrcp.f32 %v16100_v51 }
 0x4a2   : > { %v8543_v36 = vsel %vm8542_vm4, %v8518_v4, 0.0 }
 0x4a3   : > { %v7862_v37 = vpop.f32.mrb[170].mxu0 }
 0x4a4   : > { %v7946_v2 = vpop.f32.mrb[168].mxu1  ;;  %v8519_v23 = vmul.f32 %v12038_v32, %v7862_v37  ;;  %v10655_v13 = vpop.f32.mrb[171].mxu0 }
 0x4a5   : > { %v8521_v7 = vmul.f32 %v12036_v19, %v7946_v2  ;;  %v10667_v28 = vpop.f32.mrb[169].mxu1 }
 0x4a6   : > { %v8544_v42 = vsel %vm8542_vm4, %v8519_v23, 0.0  ;;  %v12056_v23 = vpop.eup %12055 }
 0x4a7   : > { %v8545_v56 = vadd.f32 %v8544_v42, %v8543_v36  ;;  %v7867_v14 = vpop.f32.mrb[172].mxu0  ;;  %v8555_v61 = vsel %vm8542_vm4, %v8521_v7, 0.0  ;;  %v12058_v42 = vpop.eup %12057 }
 0x4a8   : > { %v7951_v59 = vpop.f32.mrb[170].mxu1  ;;  %v8520_v21 = vmul.f32 %v12042_v49, %v7867_v14  ;;  %v10658_v63 = vpop.f32.mrb[173].mxu0 }
 0x4a9   : > { %v8522_v46 = vmul.f32 %v12040_v57, %v7951_v59  ;;  %v10670_v22 = vpop.f32.mrb[171].mxu1 }
 0x4aa   : > { %v8547_v3 = vsel %vm8546_vm5, %v8520_v21, 0.0 }
 0x4ab   : > { %v8556_v47 = vsel %vm8542_vm4, %v8522_v46, 0.0  ;;  %v8548_v53 = vadd.f32 %v8547_v3, %v8545_v56  ;;  %v8035_v33 = vpop.f32.mrb[174].mxu0 }
 0x4ac   : > { %v8557_v5 = vadd.f32 %v8556_v47, %v8555_v61  ;;  %v7956_v41 = vpop.f32.mrb[172].mxu1  ;;  %v8524_v1 = vmul.f32 %v12046_v39, %v8035_v33  ;;  %v10682_v50 = vpop.f32.mrb[175].mxu0 }
 0x4ad   : > { %v8523_v55 = vmul.f32 %v12044_v10, %v7956_v41  ;;  %v10673_v26 = vpop.f32.mrb[173].mxu1  ;;  %v8549_v17 = vrot.slane %v8548_v53, 4  ;;  %v12060_v47 = vpop.eup %12059 }
 0x4ae   : > { %v8566_v27 = vsel %vm8542_vm4, %v8524_v1, 0.0  ;;  %v12062_v39 = vpop.eup %12061 }
 0x4af   : > { %v8558_v9 = vsel %vm8546_vm5, %v8523_v55, 0.0  ;;  %v8550_v48 = vadd.f32 %v8549_v17, %v8548_v53  ;;  %v8040_v8 = vpop.f32.mrb[176].mxu0 }
 0x4b0   : > { %v8559_v34 = vadd.f32 %v8558_v9, %v8557_v5  ;;  %v8124_v18 = vpop.f32.mrb[174].mxu1  ;;  %v8525_v0 = vmul.f32 %v12050_v58, %v8040_v8  ;;  %v10685_v11 = vpop.f32.mrb[177].mxu0 }
 0x4b1   : > { %v8527_v24 = vmul.f32 %v12048_v15, %v8124_v18  ;;  %v10697_v52 = vpop.f32.mrb[175].mxu1  ;;  %v8551_v6 = vrot.slane %v8550_v48, 2  ;;  %v12064_v9 = vpop.eup %12063 }
 0x4b2   : > { %v8560_v35 = vrot.slane %v8559_v34, 4  ;;  %v8567_v62 = vsel %vm8542_vm4, %v8525_v0, 0.0 }
 0x4b3   : > { %v8552_v44 = vadd.f32 %v8551_v6, %v8550_v48  ;;  %v8568_v12 = vadd.f32 %v8567_v62, %v8566_v27  ;;  %v8045_v32 = vpop.f32.mrb[178].mxu0  ;;  %v8577_v13 = vsel %vm8542_vm4, %v8527_v24, 0.0 }
 0x4b4   : > { %v8561_v4 = vadd.f32 %v8560_v35, %v8559_v34  ;;  %v8129_v19 = vpop.f32.mrb[176].mxu1  ;;  %v8526_v37 = vmul.f32 %v12054_v43, %v8045_v32  ;;  %v10688_v7 = vpop.f32.mrb[179].mxu0 }
 0x4b5   : > { %v8528_v29 = vmul.f32 %v12052_v20, %v8129_v19  ;;  %v10700_v2 = vpop.f32.mrb[177].mxu1  ;;  %v8553_v30 = vrot.slane %v8552_v44, 1  ;;  %v12066_v34 = vpop.eup %12065 }
 0x4b6   : > { %v8562_v28 = vrot.slane %v8561_v4, 2  ;;  %v8569_v36 = vsel %vm8546_vm5, %v8526_v37, 0.0  ;;  %v12068_v27 = vpop.eup %12067 }
 0x4b7   : > { %v8578_v57 = vsel %vm8542_vm4, %v8528_v29, 0.0  ;;  %v8570_v59 = vadd.f32 %v8569_v36, %v8568_v12  ;;  %v8213_v14 = vpop.f32.mrb[180].mxu0  ;;  %v8554_v63 = vadd.f32 %v8553_v30, %v8552_v44 }
 0x4b8   : > { %v8563_v49 = vadd.f32 %v8562_v28, %v8561_v4  ;;  %v8579_v56 = vadd.f32 %v8578_v57, %v8577_v13  ;;  %v8134_v31 = vpop.f32.mrb[178].mxu1  ;;  %v8530_v40 = vmul.f32 %v12058_v42, %v8213_v14  ;;  %v10712_v21 = vpop.f32.mrb[181].mxu0 }
 0x4b9   : > { %v8529_v46 = vmul.f32 %v12056_v23, %v8134_v31  ;;  %v10703_v22 = vpop.f32.mrb[179].mxu1  ;;  %v8571_v61 = vrot.slane %v8570_v59, 4  ;;  %v12070_v4 = vpop.eup %12069 }
 0x4ba   : > { %v8564_v10 = vrot.slane %v8563_v49, 1  ;;  %v8588_v58 = vsel %vm8542_vm4, %v8530_v40, 0.0  ;;  %v12072_v57 = vpop.eup %12071 }
 0x4bb   : > { %v8580_v3 = vsel %vm8546_vm5, %v8529_v46, 0.0  ;;  %v8572_v53 = vadd.f32 %v8571_v61, %v8570_v59  ;;  %v8218_v55 = vpop.f32.mrb[182].mxu0  ;;  %v12074_v42 = vpop.eup %12073 }
 0x4bc   : > { %v8565_v5 = vadd.f32 %v8564_v10, %v8563_v49  ;;  %v8581_v41 = vadd.f32 %v8580_v3, %v8579_v56  ;;  %v8302_v33 = vpop.f32.mrb[180].mxu1  ;;  %v8531_v1 = vmul.f32 %v12062_v39, %v8218_v55  ;;  %v10715_v50 = vpop.f32.mrb[183].mxu0 }
 0x4bd   : > { %v8533_v54 = vmul.f32 %v12060_v47, %v8302_v33  ;;  %v10727_v26 = vpop.f32.mrb[181].mxu1  ;;  %v8573_v17 = vrot.slane %v8572_v53, 2  ;;  %v12076_v61 = vpop.eup %12075 }
 0x4be   : > { %v8646_v38 = vsel %vm8645_vm10, %v8565_v5, %v8554_v63  ;;  %v8582_v15 = vrot.slane %v8581_v41, 4  ;;  %v8589_v48 = vsel %vm8542_vm4, %v8531_v1, 0.0  ;;  %v12078_v39 = vpop.eup %12077 }
 0x4bf   : > { %v8574_v18 = vadd.f32 %v8573_v17, %v8572_v53  ;;  %v8590_v24 = vadd.f32 %v8589_v48, %v8588_v58  ;;  %v8223_v52 = vpop.f32.mrb[184].mxu0  ;;  %v8599_v62 = vsel %vm8542_vm4, %v8533_v54, 0.0  ;;  %v12080_v48 = vpop.eup %12079 }
 0x4c0   : > { %v8583_v8 = vadd.f32 %v8582_v15, %v8581_v41  ;;  %v8307_v16 = vpop.f32.mrb[182].mxu1  ;;  %v8532_v45 = vmul.f32 %v12066_v34, %v8223_v52  ;;  %v10718_v6 = vpop.f32.mrb[185].mxu0 }
 0x4c1   : > { %v8534_v0 = vmul.f32 %v12064_v9, %v8307_v16  ;;  %v10730_v11 = vpop.f32.mrb[183].mxu1  ;;  %v8575_v35 = vrot.slane %v8574_v18, 1 }
 0x4c2   : > { %v8584_v20 = vrot.slane %v8583_v8, 2  ;;  %v8591_v44 = vsel %vm8546_vm5, %v8532_v45, 0.0 }
 0x4c3   : > { %v8600_v43 = vsel %vm8542_vm4, %v8534_v0, 0.0  ;;  %v8576_v12 = vadd.f32 %v8575_v35, %v8574_v18  ;;  %v8592_v60 = vadd.f32 %v8591_v44, %v8590_v24  ;;  %v8391_v2 = vpop.f32.mrb[186].mxu0 }
 0x4c4   : > { %v8585_v19 = vadd.f32 %v8584_v20, %v8583_v8  ;;  %v8601_v32 = vadd.f32 %v8600_v43, %v8599_v62  ;;  %v8312_v29 = vpop.f32.mrb[184].mxu1  ;;  %v8536_v30 = vmul.f32 %v12070_v4, %v8391_v2  ;;  %v10742_v25 = vpop.f32.mrb[187].mxu0 }
 0x4c5   : > { %v8535_v37 = vmul.f32 %v12068_v27, %v8312_v29  ;;  %v10733_v7 = vpop.f32.mrb[185].mxu1  ;;  %v8648_v28 = vsel %vm8647_vm14, %v8576_v12, %v8646_v38  ;;  %v8593_v13 = vrot.slane %v8592_v60, 4 }
 0x4c6   : > { %v8586_v23 = vrot.slane %v8585_v19, 1  ;;  %v8610_v47 = vsel %vm8542_vm4, %v8536_v30, 0.0 }
 0x4c7   : > { %v8602_v36 = vsel %vm8546_vm5, %v8535_v37, 0.0  ;;  %v8594_v56 = vadd.f32 %v8593_v13, %v8592_v60  ;;  %v8396_v14 = vpop.f32.mrb[188].mxu0 }
 0x4c8   : > { %v8587_v49 = vadd.f32 %v8586_v23, %v8585_v19  ;;  %v8603_v59 = vadd.f32 %v8602_v36, %v8601_v32  ;;  %v8480_v31 = vpop.f32.mrb[186].mxu1  ;;  %v8537_v40 = vmul.f32 %v12074_v42, %v8396_v14  ;;  %v10745_v21 = vpop.f32.mrb[189].mxu0 }
 0x4c9   : > { %v8539_v46 = vmul.f32 %v12072_v57, %v8480_v31  ;;  %v10757_v22 = vpop.f32.mrb[187].mxu1  ;;  %v8595_v51 = vrot.slane %v8594_v56, 2  ;;  %v9186_v57 = vld [vmem:[%s16166_s6] ss:$0 sm:$0xff] }
 0x4ca   : > { %v8650_v63 = vsel %vm8649_vm15, %v8587_v49, %v8648_v28  ;;  %v8604_v10 = vrot.slane %v8603_v59, 4  ;;  %v8611_v3 = vsel %vm8542_vm4, %v8537_v40, 0.0 }
 0x4cb   : > { %v8596_v5 = vadd.f32 %v8595_v51, %v8594_v56  ;;  %v8612_v41 = vadd.f32 %v8611_v3, %v8610_v47  ;;  %v8401_v55 = vpop.f32.mrb[190].mxu0  ;;  %v8621_v15 = vsel %vm8542_vm4, %v8539_v46, 0.0 }
 0x4cc   : > { %v8605_v53 = vadd.f32 %v8604_v10, %v8603_v59  ;;  %v8485_v33 = vpop.f32.mrb[188].mxu1  ;;  %v8538_v1 = vmul.f32 %v12078_v39, %v8401_v55  ;;  %v10748_v50 = vpop.f32.mrb[191].mxu0 }
 0x4cd   : > { %v8540_v54 = vmul.f32 %v12076_v61, %v8485_v33  ;;  %v10760_v26 = vpop.f32.mrb[189].mxu1  ;;  %v8597_v38 = vrot.slane %v8596_v5, 1 }
 0x4ce   : > { %v8606_v17 = vrot.slane %v8605_v53, 2  ;;  %v8613_v58 = vsel %vm8546_vm5, %v8538_v1, 0.0 }
 0x4cf   : > { %v8622_v9 = vsel %vm8542_vm4, %v8540_v54, 0.0  ;;  %v8598_v34 = vadd.f32 %v8597_v38, %v8596_v5  ;;  %v8614_v24 = vadd.f32 %v8613_v58, %v8612_v41 }
 0x4d0   : > { %v8607_v18 = vadd.f32 %v8606_v17, %v8605_v53  ;;  %v8623_v8 = vadd.f32 %v8622_v9, %v8621_v15  ;;  %v8490_v16 = vpop.f32.mrb[190].mxu1 }
 0x4d1   : > { %v8541_v52 = vmul.f32 %v12080_v48, %v8490_v16  ;;  %v10763_v0 = vpop.f32.mrb[191].mxu1  ;;  %v8652_v11 = vsel %vm8651_vm0, %v8598_v34, %v8650_v63  ;;  %v8615_v6 = vrot.slane %v8614_v24, 4 }
 0x4d2   : > { %v8608_v45 = vrot.slane %v8607_v18, 1 }
 0x4d3   : > { %v8624_v35 = vsel %vm8546_vm5, %v8541_v52, 0.0  ;;  %v8616_v27 = vadd.f32 %v8615_v6, %v8614_v24 }
 0x4d4   : > { %v8609_v20 = vadd.f32 %v8608_v45, %v8607_v18  ;;  %v8625_v62 = vadd.f32 %v8624_v35, %v8623_v8 }
 0x4d5   : > { %v8617_v43 = vrot.slane %v8616_v27, 2 }
 0x4d6   : > { %v8626_v44 = vrot.slane %v8625_v62, 4  ;;  %v8654_v4 = vsel %vm8653_vm1, %v8609_v20, %v8652_v11 }
 0x4d7   : > { %v8618_v12 = vadd.f32 %v8617_v43, %v8616_v27 }
 0x4d8   : > { %v8627_v19 = vadd.f32 %v8626_v44, %v8625_v62 }
 0x4d9   : > { %v8619_v32 = vrot.slane %v8618_v12, 1 }
 0x4da   : > { %v8628_v60 = vrot.slane %v8627_v19, 2 }
 0x4db   : > { %v8620_v29 = vadd.f32 %v8619_v32, %v8618_v12 }
 0x4dc   : > { %v8629_v2 = vadd.f32 %v8628_v60, %v8627_v19 }
 0x4dd   : > { %v8656_v7 = vsel %vm8655_vm2, %v8620_v29, %v8654_v4 }
 0x4de   : > { %v8630_v37 = vrot.slane %v8629_v2, 1 }
 0x4e0   : > { %v8631_v30 = vadd.f32 %v8630_v37, %v8629_v2 }
 0x4e2   : > { %v8658_v25 = vsel %vm8657_vm3, %v8631_v30, %v8656_v7 }
 0x4e3   : > { %10767 = vmatmul.mubr.msk.f32.vlgmr.msra.gmra.mrb[192].mxu0 %vm8542_vm4, %v8658_v25 }
 0x55b   : > { %v8821_v28 = vpop.f32.mrb[192].mxu1 }
 0x55c   : > { %v10779_v23 = vpop.f32.mrb[193].mxu1 }
 0x5b6   : > { %v8731_v13 = vpop.f32.mrb[192].mxu0 }
 0x5b7   : > { %v8822_v36 = vadd.f32 %v8821_v28, %v8731_v13  ;;  %v10768_v42 = vpop.f32.mrb[193].mxu0 }
 0x5b9   : > { %v8832_v49 = vadd.f32 %v9186_v57, %v8822_v36 }
 0x5bb   : > { %8834 = vst.msk [vmem:[%s306_s22] sm:$0xff] %vm8833_vm6, %v8832_v49 }
 0x5bc PF: > { %s17_s24 = sadd.s32 1, %s12233_s24  }
 0x5bd   : > { %p14_p5 = scmp.ge.s32.totalorder %s17_s24, 4  }
 0x5bf   :  { %16 = sbr.rel (!%p14_p5) target bundleno = 1 (0x1), region = 81 }

</bundles_post_ra>
